<compile_context>
chip_gen: v7x
topology: tpu7x:2x2x1
jax: 0.10.0
libtpu: 0.0.40
codegen_flags: <defaults>
</compile_context>

<pallas_src>
import functools

import jax
import jax.numpy as jnp
from jax import lax
from jax.experimental import pallas as pl
from jax.experimental.pallas import tpu as pltpu

L = 500            # hidden size of feature_extractor_part2
L_PAD = 512        # padded to a lane multiple
D = 128            # attention hidden size
K = 1              # number of attention heads
F_IN = 50 * 4 * 4  # 800 input features per instance
TILE_N = 1024      # instance-tile size (sweep 512-1024; overhead-amortizing)
NUM_SHARDS = 2     # leading "parallel" grid axis -> both TensorCores on v7x
NEG_INF = -1e30    # Python float (NOT a jnp array -> no captured-const error)


def _abmil_kernel(x_ref, w1_ref, b1_ref, wa_ref, ba_ref, wb_ref, bb_ref,
                  logits_ref, m_ref, l_ref, acc_ref,
                  *, n_instances, tiles_per_shard):
    s = pl.program_id(0)          # shard (parallel across TensorCores on v7x)
    i = pl.program_id(1)          # instance tile within the shard (arbitrary)
    g = s * tiles_per_shard + i   # global tile index

    @pl.when(i == 0)
    def _init():
        m_ref[0] = jnp.full((1, 1), NEG_INF, jnp.float32)
        l_ref[0] = jnp.zeros((1, 1), jnp.float32)
        acc_ref[0] = jnp.zeros((1, L_PAD), jnp.float32)

    # f32 -> bf16 cast in-kernel (raw bag streamed; no wrapper pad/cast pass)
    x = x_ref[...].astype(jnp.bfloat16)                                # (T, 800)

    # ---- feature_extractor_part2: Linear(800 -> 500) + ReLU (bf16 MXU, f32 acc)
    h = jnp.dot(x, w1_ref[...], preferred_element_type=jnp.float32) + b1_ref[...]
    h = jnp.maximum(h, 0.0)                                            # (T, 512)

    # zero instance rows beyond the real bag (ragged tail / padded tiles read
    # unspecified VMEM -> must not reach the p @ H matmul)
    row = g * TILE_N + lax.broadcasted_iota(jnp.int32, (TILE_N, 1), 0)
    h = jnp.where(row < n_instances, h, 0.0)
    h_b = h.astype(jnp.bfloat16)

    # ---- attention MLP: Linear(500 -> 128) + tanh
    ah = jnp.tanh(jnp.dot(h_b, wa_ref[...], preferred_element_type=jnp.float32)
                  + ba_ref[...])                                       # (T, 128)

    # ---- K=1 head: logits produced lane-dense as (1, T) via an NT contraction
    # on the MXU (no (T,128) transpose, no width-1 stores).
    logits = lax.dot_general(wb_ref[...], ah.astype(jnp.bfloat16),
                             (((1,), (1,)), ((), ())),
                             preferred_element_type=jnp.float32)       # (1, T)
    col = g * TILE_N + lax.broadcasted_iota(jnp.int32, (1, TILE_N), 1)
    logits = jnp.where(col < n_instances, logits + bb_ref[...], NEG_INF)

    # stash masked raw logits into this shard's resident lane-dense A slice
    logits_ref[:, pl.ds(pl.multiple_of(i * TILE_N, TILE_N), TILE_N)] = logits

    # ---- online softmax accumulation over this shard's instances
    m_prev = m_ref[0]                                                  # (1, 1)
    m_new = jnp.maximum(m_prev, jnp.max(logits, axis=-1, keepdims=True))
    alpha = jnp.exp(m_prev - m_new)
    p = jnp.exp(logits - m_new)                                        # (1, T)
    l_ref[0] = alpha * l_ref[0] + jnp.sum(p, axis=-1, keepdims=True)
    acc_ref[0] = alpha * acc_ref[0] + jnp.dot(
        p.astype(jnp.bfloat16), h_b, preferred_element_type=jnp.float32)
    m_ref[0] = m_new


def _uniform_init(key, shape, fan_in):
    bound = 1.0 / jnp.sqrt(jnp.float32(fan_in))
    return jax.random.uniform(key, shape, jnp.float32, -bound, bound)


def init_params(key):
    """PyTorch-default-like init; weights stored as (in_features, out_features)."""
    ks = jax.random.split(key, 8)
    return {
        "w1": _uniform_init(ks[0], (F_IN, L), F_IN),
        "b1": _uniform_init(ks[1], (1, L), F_IN),
        "wa": _uniform_init(ks[2], (L, D), L),
        "ba": _uniform_init(ks[3], (1, D), L),
        "wb": _uniform_init(ks[4], (D, K), D),
        "bb": _uniform_init(ks[5], (1, K), D),
        "wc": _uniform_init(ks[6], (L * K, 1), L * K),
        "bc": _uniform_init(ks[7], (1, 1), L * K),
    }


def prepare_params(params):
    """Pad L=500 -> 512, cast matmul weights to bf16, lane-dense K=1 vectors.
    Done once and reused across bags."""
    w1 = jnp.zeros((F_IN, L_PAD), jnp.bfloat16).at[:, :L].set(
        params["w1"].astype(jnp.bfloat16))
    b1 = jnp.zeros((1, L_PAD), jnp.float32).at[:, :L].set(params["b1"])
    wa = jnp.zeros((L_PAD, D), jnp.bfloat16).at[:L, :].set(
        params["wa"].astype(jnp.bfloat16))
    ba = params["ba"].astype(jnp.float32)                        # (1, D)
    wb = params["wb"].T.astype(jnp.bfloat16)                     # (1, D) row
    bb = params["bb"].reshape(1, 1).astype(jnp.float32)          # (1, 1)
    wc = jnp.zeros((1, L_PAD), jnp.float32).at[:, :L].set(params["wc"].T)
    bc = params["bc"].astype(jnp.float32)                        # (1, 1)
    return (w1, b1, wa, ba, wb, bb, wc, bc)


def abmil_forward(x, kparams):
    """x: (1, N, 800) f32 -> (Y_prob (1,1), Y_hat (1,1), A (1, N))."""
    w1, b1, wa, ba, wb, bb, wc, bc = kparams
    x2 = x[0]                                    # squeeze(0): (N, 800)
    n = x2.shape[0]
    n_tiles = -(-n // TILE_N)
    num_shards = NUM_SHARDS if n_tiles >= NUM_SHARDS else 1
    tiles_per_shard = -(-n_tiles // num_shards)
    shard_w = tiles_per_shard * TILE_N
    n_pad = num_shards * shard_w

    kernel = functools.partial(_abmil_kernel, n_instances=n,
                               tiles_per_shard=tiles_per_shard)

    # clamp so fully-padded tiles re-read the last real block (never OOB DMA);
    # those tiles are fully masked in-kernel anyway.
    def x_map(s, i):
        return (jnp.minimum(s * tiles_per_shard + i, n_tiles - 1), 0)

    const = lambda s, i: (0, 0)

    grid_spec = pltpu.PrefetchScalarGridSpec(
        num_scalar_prefetch=0,
        grid=(num_shards, tiles_per_shard),
        in_specs=[
            pl.BlockSpec((TILE_N, F_IN), x_map),         # x tile (f32, streamed)
            pl.BlockSpec((F_IN, L_PAD), const),          # w1 (bf16, resident)
            pl.BlockSpec((1, L_PAD), const),             # b1
            pl.BlockSpec((L_PAD, D), const),             # wa
            pl.BlockSpec((1, D), const),                 # ba
            pl.BlockSpec((1, D), const),                 # wb (lane-dense row)
            pl.BlockSpec((1, 1), const),                 # bb
        ],
        out_specs=(
            pl.BlockSpec((1, shard_w), lambda s, i: (0, s)),       # raw logits
            pl.BlockSpec((1, 1, 1), lambda s, i: (s, 0, 0)),       # m per shard
            pl.BlockSpec((1, 1, 1), lambda s, i: (s, 0, 0)),       # l per shard
            pl.BlockSpec((1, 1, L_PAD), lambda s, i: (s, 0, 0)),   # acc per shard
        ),
    )

    tiles = num_shards * tiles_per_shard
    cost = pl.CostEstimate(
        flops=2 * tiles * TILE_N * (F_IN * L_PAD + L_PAD * D + D + L_PAD),
        transcendentals=tiles * TILE_N * (D + 1),
        bytes_accessed=(n * F_IN * 4 + int(w1.size) * 2 + int(wa.size) * 2
                        + 4 * (int(b1.size) + int(ba.size) + int(wb.size) + 1)
                        + 4 * (n_pad + num_shards * (L_PAD + 2))))

    logits_row, m_p, l_p, acc_p = pl.pallas_call(
        kernel,
        out_shape=(
            jax.ShapeDtypeStruct((1, n_pad), jnp.float32),
            jax.ShapeDtypeStruct((num_shards, 1, 1), jnp.float32),
            jax.ShapeDtypeStruct((num_shards, 1, 1), jnp.float32),
            jax.ShapeDtypeStruct((num_shards, 1, L_PAD), jnp.float32),
        ),
        grid_spec=grid_spec,
        compiler_params=pltpu.CompilerParams(
            dimension_semantics=("parallel", "arbitrary"),
            vmem_limit_bytes=32 * 1024 * 1024),
        cost_estimate=cost,
    )(x2, w1, b1, wa, ba, wb, bb)

    # ---- merge per-shard online-softmax states (tiny O(S*L + N) epilogue,
    # wrapper-side so the shards can run on both v7x TensorCores)
    m_p = m_p.reshape(num_shards, 1)
    l_p = l_p.reshape(num_shards, 1)
    acc_p = acc_p.reshape(num_shards, L_PAD)
    m_g = jnp.max(m_p, axis=0, keepdims=True)                   # (1, 1)
    scale = jnp.exp(m_p - m_g)                                  # (S, 1)
    l_g = jnp.sum(scale * l_p)                                  # scalar
    inv_l = 1.0 / l_g
    A = jnp.exp(logits_row[:, :n] - m_g) * inv_l                # (1, N) softmax
    M = jnp.sum(scale * acc_p, axis=0, keepdims=True) * inv_l   # (1, 512)
    z = jnp.sum(M * wc, axis=-1, keepdims=True) + bc            # (1, 1)
    y_prob = jax.nn.sigmoid(z)
    y_hat = (y_prob >= 0.5).astype(jnp.float32)
    return y_prob, y_hat, A


def _reference_forward(x, params):
    """Pure-JAX f32 reference of the same forward (un-quantized weights)."""
    H = jnp.maximum(x[0] @ params["w1"] + params["b1"], 0.0)
    att = jnp.tanh(H @ params["wa"] + params["ba"]) @ params["wb"] + params["bb"]
    A = jax.nn.softmax(att.T, axis=1)
    M = A @ H
    y_prob = jax.nn.sigmoid(M @ params["wc"] + params["bc"])
    return y_prob, A


if __name__ == "__main__":
    key = jax.random.PRNGKey(0)
    k_param, k_x1, k_x2 = jax.random.split(key, 3)

    params = init_params(k_param)
    kparams = prepare_params(params)
    fwd = jax.jit(abmil_forward)

    # Bag 1: small single-tile bag (canonical ABMIL setting).
    # Bag 2: N > 2*TILE_N exercises the multi-tile online-softmax carry, the
    #        ragged-tail mask, a fully padded (clamped) tile and the 2-shard merge.
    for k_x, n_inst in ((k_x1, 8), (k_x2, 2 * TILE_N + 77)):
        x = jax.random.normal(k_x, (1, n_inst, F_IN), jnp.float32)
        y_prob, y_hat, A = fwd(x, kparams)
        jax.block_until_ready((y_prob, y_hat, A))

        y_prob_ref, A_ref = _reference_forward(x, params)
        assert y_prob.shape == (1, 1) and y_hat.shape == (1, 1)
        assert A.shape == (1, n_inst)
        assert jnp.allclose(jnp.sum(A), 1.0, atol=1e-3)
        assert jnp.allclose(A, A_ref, atol=1e-2), (n_inst, float(jnp.abs(A - A_ref).max()))
        assert jnp.allclose(y_prob, y_prob_ref, atol=1e-2), (y_prob, y_prob_ref)
        assert float(y_hat[0, 0]) == float(y_prob[0, 0] >= 0.5)

    print("KERNEL_OK")
</pallas_src>

<mosaic_0001>
module attributes {stable_mosaic.version = 11 : i64} {
  func.func @_abmil_kernel(%arg0: i32, %arg1: i32, %arg2: memref<1024x800xf32, #tpu.memory_space<vmem>>, %arg3: memref<800x512xbf16, #tpu.memory_space<vmem>>, %arg4: memref<1x512xf32, #tpu.memory_space<vmem>>, %arg5: memref<512x128xbf16, #tpu.memory_space<vmem>>, %arg6: memref<1x128xf32, #tpu.memory_space<vmem>>, %arg7: memref<1x128xbf16, #tpu.memory_space<vmem>>, %arg8: memref<1x1xf32, #tpu.memory_space<vmem>>, %arg9: memref<1x1024xf32, #tpu.memory_space<vmem>>, %arg10: memref<1x1x1xf32, #tpu.memory_space<vmem>>, %arg11: memref<1x1x1xf32, #tpu.memory_space<vmem>>, %arg12: memref<1x1x512xf32, #tpu.memory_space<vmem>>) attributes {dimension_semantics = [#tpu.dimension_semantics<parallel>, #tpu.dimension_semantics<arbitrary>], iteration_bounds = array<i64: 1, 1>, scalar_prefetch = 0 : i64, scratch_operands = 0 : i64, tpu.core_type = #tpu.core_type<tc>, window_params = [{transform_indices = @transform_0, window_bounds = array<i64: 1024, 800>}, {pipeline_mode = #tpu.pipeline_mode<synchronous>, transform_indices = @transform_1, window_bounds = array<i64: 800, 512>}, {pipeline_mode = #tpu.pipeline_mode<synchronous>, transform_indices = @transform_2, window_bounds = array<i64: 1, 512>}, {pipeline_mode = #tpu.pipeline_mode<synchronous>, transform_indices = @transform_3, window_bounds = array<i64: 512, 128>}, {pipeline_mode = #tpu.pipeline_mode<synchronous>, transform_indices = @transform_4, window_bounds = array<i64: 1, 128>}, {pipeline_mode = #tpu.pipeline_mode<synchronous>, transform_indices = @transform_5, window_bounds = array<i64: 1, 128>}, {pipeline_mode = #tpu.pipeline_mode<synchronous>, transform_indices = @transform_6, window_bounds = array<i64: 1, 1>}, {transform_indices = @transform_7, window_bounds = array<i64: 1, 1024>}, {transform_indices = @transform_8, window_bounds = array<i64: 1, 1, 1>}, {transform_indices = @transform_9, window_bounds = array<i64: 1, 1, 1>}, {transform_indices = @transform_10, window_bounds = array<i64: 1, 1, 512>}]} {
    %c1_i32 = arith.constant 1 : i32
    %0 = arith.muli %arg0, %c1_i32 : i32
    %1 = arith.addi %0, %arg1 : i32
    %c0_i32 = arith.constant 0 : i32
    %2 = arith.cmpi eq, %arg1, %c0_i32 : i32
    %3 = arith.extui %2 : i1 to i32
    %c0_i32_0 = arith.constant 0 : i32
    %4 = arith.cmpi ne, %3, %c0_i32_0 : i32
    scf.if %4 {
      %cst_44 = arith.constant -1.000000e+30 : f32
      %81 = vector.broadcast %cst_44 : f32 to vector<1x1xf32>
      %c0_45 = arith.constant 0 : index
      %c0_46 = arith.constant 0 : index
      %c0_47 = arith.constant 0 : index
      %82 = vector.load %arg10[%c0_45, %c0_46, %c0_47] : memref<1x1x1xf32, #tpu.memory_space<vmem>>, vector<1x1x1xf32>
      %83 = vector.shape_cast %82 : vector<1x1x1xf32> to vector<1x1xf32>
      %84 = vector.shape_cast %81 : vector<1x1xf32> to vector<1x1x1xf32>
      tpu.vector_store %arg10[%c0_45, %c0_46, %c0_47], %84 {strides = array<i32>} : memref<1x1x1xf32, #tpu.memory_space<vmem>>, vector<1x1x1xf32>,
      %cst_48 = arith.constant 0.000000e+00 : f32
      %85 = vector.broadcast %cst_48 : f32 to vector<1x1xf32>
      %c0_49 = arith.constant 0 : index
      %c0_50 = arith.constant 0 : index
      %c0_51 = arith.constant 0 : index
      %86 = vector.load %arg11[%c0_49, %c0_50, %c0_51] : memref<1x1x1xf32, #tpu.memory_space<vmem>>, vector<1x1x1xf32>
      %87 = vector.shape_cast %86 : vector<1x1x1xf32> to vector<1x1xf32>
      %88 = vector.shape_cast %85 : vector<1x1xf32> to vector<1x1x1xf32>
      tpu.vector_store %arg11[%c0_49, %c0_50, %c0_51], %88 {strides = array<i32>} : memref<1x1x1xf32, #tpu.memory_space<vmem>>, vector<1x1x1xf32>,
      %cst_52 = arith.constant 0.000000e+00 : f32
      %89 = vector.broadcast %cst_52 : f32 to vector<1x512xf32>
      %c0_53 = arith.constant 0 : index
      %c0_54 = arith.constant 0 : index
      %c0_55 = arith.constant 0 : index
      %90 = vector.load %arg12[%c0_53, %c0_54, %c0_55] : memref<1x1x512xf32, #tpu.memory_space<vmem>>, vector<1x1x512xf32>
      %91 = vector.shape_cast %90 : vector<1x1x512xf32> to vector<1x512xf32>
      %92 = vector.shape_cast %89 : vector<1x512xf32> to vector<1x1x512xf32>
      tpu.vector_store %arg12[%c0_53, %c0_54, %c0_55], %92 {strides = array<i32>} : memref<1x1x512xf32, #tpu.memory_space<vmem>>, vector<1x1x512xf32>,
    } else {
    }
    %c0 = arith.constant 0 : index
    %c0_1 = arith.constant 0 : index
    %5 = vector.load %arg2[%c0, %c0_1] : memref<1024x800xf32, #tpu.memory_space<vmem>>, vector<1024x800xf32>
    %6 = arith.truncf %5 : vector<1024x800xf32> to vector<1024x800xbf16>
    %c0_2 = arith.constant 0 : index
    %c0_3 = arith.constant 0 : index
    %7 = vector.load %arg3[%c0_2, %c0_3] : memref<800x512xbf16, #tpu.memory_space<vmem>>, vector<800x512xbf16>
    %cst = arith.constant dense<0.000000e+00> : vector<1024x512xf32>
    %8 = tpu.matmul %6, %7, %cst {dimension_numbers = #tpu.dot_dimension_numbers<[1], [0], [0], [1], [0, 0, 1, 1], [], []>} : vector<1024x800xbf16>, vector<800x512xbf16>, vector<1024x512xf32> -> vector<1024x512xf32>
    %c0_4 = arith.constant 0 : index
    %c0_5 = arith.constant 0 : index
    %9 = vector.load %arg4[%c0_4, %c0_5] : memref<1x512xf32, #tpu.memory_space<vmem>>, vector<1x512xf32>
    %10 = vector.broadcast %9 : vector<1x512xf32> to vector<1024x512xf32>
    %11 = arith.addf %8, %10 : vector<1024x512xf32>
    %cst_6 = arith.constant 0.000000e+00 : f32
    %12 = vector.broadcast %cst_6 : f32 to vector<1024x512xf32>
    %13 = arith.maximumf %11, %12 : vector<1024x512xf32>
    %c1024_i32 = arith.constant 1024 : i32
    %14 = arith.muli %1, %c1024_i32 : i32
    %15 = tpu.iota {dimensions = array<i32: 0>} : vector<1024x1xi32>
    %16 = vector.broadcast %14 : i32 to vector<1024x1xi32>
    %17 = arith.addi %16, %15 : vector<1024x1xi32>
    %c8_i32 = arith.constant 8 : i32
    %18 = vector.broadcast %c8_i32 : i32 to vector<1024x1xi32>
    %19 = arith.cmpi slt, %17, %18 : vector<1024x1xi32>
    %cst_7 = arith.constant 0.000000e+00 : f32
    %20 = vector.shape_cast %19 : vector<1024x1xi1> to vector<1024x1xi1>
    %21 = vector.broadcast %20 : vector<1024x1xi1> to vector<1024x512xi1>
    %22 = vector.broadcast %cst_7 : f32 to vector<1024x512xf32>
    %23 = arith.select %21, %13, %22 : vector<1024x512xi1>, vector<1024x512xf32>
    %24 = arith.truncf %23 : vector<1024x512xf32> to vector<1024x512xbf16>
    %c0_8 = arith.constant 0 : index
    %c0_9 = arith.constant 0 : index
    %25 = vector.load %arg5[%c0_8, %c0_9] : memref<512x128xbf16, #tpu.memory_space<vmem>>, vector<512x128xbf16>
    %cst_10 = arith.constant dense<0.000000e+00> : vector<1024x128xf32>
    %26 = tpu.matmul %24, %25, %cst_10 {dimension_numbers = #tpu.dot_dimension_numbers<[1], [0], [0], [1], [0, 0, 1, 1], [], []>} : vector<1024x512xbf16>, vector<512x128xbf16>, vector<1024x128xf32> -> vector<1024x128xf32>
    %c0_11 = arith.constant 0 : index
    %c0_12 = arith.constant 0 : index
    %27 = vector.load %arg6[%c0_11, %c0_12] : memref<1x128xf32, #tpu.memory_space<vmem>>, vector<1x128xf32>
    %28 = vector.broadcast %27 : vector<1x128xf32> to vector<1024x128xf32>
    %29 = arith.addf %26, %28 : vector<1024x128xf32>
    %30 = math.tanh %29 : vector<1024x128xf32>
    %c0_13 = arith.constant 0 : index
    %c0_14 = arith.constant 0 : index
    %31 = vector.load %arg7[%c0_13, %c0_14] : memref<1x128xbf16, #tpu.memory_space<vmem>>, vector<1x128xbf16>
    %32 = arith.truncf %30 : vector<1024x128xf32> to vector<1024x128xbf16>
    %cst_15 = arith.constant dense<0.000000e+00> : vector<1x1024xf32>
    %33 = tpu.matmul %31, %32, %cst_15 {dimension_numbers = #tpu.dot_dimension_numbers<[1], [1], [0], [0], [0, 0, 1, 0], [], []>} : vector<1x128xbf16>, vector<1024x128xbf16>, vector<1x1024xf32> -> vector<1x1024xf32>
    %c1024_i32_16 = arith.constant 1024 : i32
    %34 = arith.muli %1, %c1024_i32_16 : i32
    %35 = tpu.iota {dimensions = array<i32: 1>} : vector<1x1024xi32>
    %36 = vector.broadcast %34 : i32 to vector<1x1024xi32>
    %37 = arith.addi %36, %35 : vector<1x1024xi32>
    %c8_i32_17 = arith.constant 8 : i32
    %38 = vector.broadcast %c8_i32_17 : i32 to vector<1x1024xi32>
    %39 = arith.cmpi slt, %37, %38 : vector<1x1024xi32>
    %c0_18 = arith.constant 0 : index
    %c0_19 = arith.constant 0 : index
    %40 = vector.load %arg8[%c0_18, %c0_19] : memref<1x1xf32, #tpu.memory_space<vmem>>, vector<1x1xf32>
    %41 = vector.broadcast %40 : vector<1x1xf32> to vector<1x1024xf32>
    %42 = arith.addf %33, %41 : vector<1x1024xf32>
    %cst_20 = arith.constant -1.000000e+30 : f32
    %43 = vector.broadcast %cst_20 : f32 to vector<1x1024xf32>
    %44 = arith.select %39, %42, %43 : vector<1x1024xi1>, vector<1x1024xf32>
    %c1024_i32_21 = arith.constant 1024 : i32
    %45 = arith.muli %arg1, %c1024_i32_21 : i32
    %46 = tpu.assume_multiple %45, 1024 : i32
    %c0_22 = arith.constant 0 : index
    %47 = arith.index_cast %46 : i32 to index
    %48 = vector.load %arg9[%c0_22, %47] : memref<1x1024xf32, #tpu.memory_space<vmem>>, vector<1x1024xf32>
    tpu.vector_store %arg9[%c0_22, %47], %44 {strides = array<i32>} : memref<1x1024xf32, #tpu.memory_space<vmem>>, vector<1x1024xf32>,
    %c0_23 = arith.constant 0 : index
    %c0_24 = arith.constant 0 : index
    %c0_25 = arith.constant 0 : index
    %49 = vector.load %arg10[%c0_23, %c0_24, %c0_25] : memref<1x1x1xf32, #tpu.memory_space<vmem>>, vector<1x1x1xf32>
    %50 = vector.shape_cast %49 : vector<1x1x1xf32> to vector<1x1xf32>
    %cst_26 = arith.constant dense<0xFF800000> : vector<1xf32>
    %51 = vector.multi_reduction <maximumf>, %44, %cst_26 [1] : vector<1x1024xf32> to vector<1xf32>
    %52 = vector.shape_cast %51 : vector<1xf32> to vector<1x1xf32>
    %53 = arith.maximumf %50, %52 : vector<1x1xf32>
    %54 = arith.subf %50, %53 : vector<1x1xf32>
    %55 = math.exp %54 : vector<1x1xf32>
    %56 = vector.broadcast %53 : vector<1x1xf32> to vector<1x1024xf32>
    %57 = arith.subf %44, %56 : vector<1x1024xf32>
    %58 = math.exp %57 : vector<1x1024xf32>
    %c0_27 = arith.constant 0 : index
    %c0_28 = arith.constant 0 : index
    %c0_29 = arith.constant 0 : index
    %59 = vector.load %arg11[%c0_27, %c0_28, %c0_29] : memref<1x1x1xf32, #tpu.memory_space<vmem>>, vector<1x1x1xf32>
    %60 = vector.shape_cast %59 : vector<1x1x1xf32> to vector<1x1xf32>
    %61 = arith.mulf %55, %60 : vector<1x1xf32>
    %cst_30 = arith.constant dense<0.000000e+00> : vector<1xf32>
    %62 = vector.multi_reduction <add>, %58, %cst_30 [1] : vector<1x1024xf32> to vector<1xf32>
    %63 = vector.shape_cast %62 : vector<1xf32> to vector<1x1xf32>
    %64 = arith.addf %61, %63 : vector<1x1xf32>
    %c0_31 = arith.constant 0 : index
    %c0_32 = arith.constant 0 : index
    %c0_33 = arith.constant 0 : index
    %65 = vector.load %arg11[%c0_31, %c0_32, %c0_33] : memref<1x1x1xf32, #tpu.memory_space<vmem>>, vector<1x1x1xf32>
    %66 = vector.shape_cast %65 : vector<1x1x1xf32> to vector<1x1xf32>
    %67 = vector.shape_cast %64 : vector<1x1xf32> to vector<1x1x1xf32>
    tpu.vector_store %arg11[%c0_31, %c0_32, %c0_33], %67 {strides = array<i32>} : memref<1x1x1xf32, #tpu.memory_space<vmem>>, vector<1x1x1xf32>,
    %c0_34 = arith.constant 0 : index
    %c0_35 = arith.constant 0 : index
    %c0_36 = arith.constant 0 : index
    %68 = vector.load %arg12[%c0_34, %c0_35, %c0_36] : memref<1x1x512xf32, #tpu.memory_space<vmem>>, vector<1x1x512xf32>
    %69 = vector.shape_cast %68 : vector<1x1x512xf32> to vector<1x512xf32>
    %70 = vector.broadcast %55 : vector<1x1xf32> to vector<1x512xf32>
    %71 = arith.mulf %70, %69 : vector<1x512xf32>
    %72 = arith.truncf %58 : vector<1x1024xf32> to vector<1x1024xbf16>
    %cst_37 = arith.constant dense<0.000000e+00> : vector<1x512xf32>
    %73 = tpu.matmul %72, %24, %cst_37 {dimension_numbers = #tpu.dot_dimension_numbers<[1], [0], [0], [1], [0, 0, 1, 1], [], []>} : vector<1x1024xbf16>, vector<1024x512xbf16>, vector<1x512xf32> -> vector<1x512xf32>
    %74 = arith.addf %71, %73 : vector<1x512xf32>
    %c0_38 = arith.constant 0 : index
    %c0_39 = arith.constant 0 : index
    %c0_40 = arith.constant 0 : index
    %75 = vector.load %arg12[%c0_38, %c0_39, %c0_40] : memref<1x1x512xf32, #tpu.memory_space<vmem>>, vector<1x1x512xf32>
    %76 = vector.shape_cast %75 : vector<1x1x512xf32> to vector<1x512xf32>
    %77 = vector.shape_cast %74 : vector<1x512xf32> to vector<1x1x512xf32>
    tpu.vector_store %arg12[%c0_38, %c0_39, %c0_40], %77 {strides = array<i32>} : memref<1x1x512xf32, #tpu.memory_space<vmem>>, vector<1x1x512xf32>,
    %c0_41 = arith.constant 0 : index
    %c0_42 = arith.constant 0 : index
    %c0_43 = arith.constant 0 : index
    %78 = vector.load %arg10[%c0_41, %c0_42, %c0_43] : memref<1x1x1xf32, #tpu.memory_space<vmem>>, vector<1x1x1xf32>
    %79 = vector.shape_cast %78 : vector<1x1x1xf32> to vector<1x1xf32>
    %80 = vector.shape_cast %53 : vector<1x1xf32> to vector<1x1x1xf32>
    tpu.vector_store %arg10[%c0_41, %c0_42, %c0_43], %80 {strides = array<i32>} : memref<1x1x1xf32, #tpu.memory_space<vmem>>, vector<1x1x1xf32>,
    return
  }
  func.func @transform_0(%arg0: i32, %arg1: i32) -> (i32, i32) {
    %c1_i32 = arith.constant 1 : i32
    %0 = arith.muli %arg0, %c1_i32 : i32
    %1 = arith.addi %0, %arg1 : i32
    %c0_i32 = arith.constant 0 : i32
    %2 = arith.minsi %1, %c0_i32 : i32
    %c0_i32_0 = arith.constant 0 : i32
    %c0_i32_1 = arith.constant 0 : i32
    return %2, %c0_i32_0 : i32, i32
  }
  func.func @transform_1(%arg0: i32, %arg1: i32) -> (i32, i32) {
    %c0_i32 = arith.constant 0 : i32
    %c0_i32_0 = arith.constant 0 : i32
    %c0_i32_1 = arith.constant 0 : i32
    return %c0_i32, %c0_i32_0 : i32, i32
  }
  func.func @transform_2(%arg0: i32, %arg1: i32) -> (i32, i32) {
    %c0_i32 = arith.constant 0 : i32
    %c0_i32_0 = arith.constant 0 : i32
    %c0_i32_1 = arith.constant 0 : i32
    return %c0_i32, %c0_i32_0 : i32, i32
  }
  func.func @transform_3(%arg0: i32, %arg1: i32) -> (i32, i32) {
    %c0_i32 = arith.constant 0 : i32
    %c0_i32_0 = arith.constant 0 : i32
    %c0_i32_1 = arith.constant 0 : i32
    return %c0_i32, %c0_i32_0 : i32, i32
  }
  func.func @transform_4(%arg0: i32, %arg1: i32) -> (i32, i32) {
    %c0_i32 = arith.constant 0 : i32
    %c0_i32_0 = arith.constant 0 : i32
    %c0_i32_1 = arith.constant 0 : i32
    return %c0_i32, %c0_i32_0 : i32, i32
  }
  func.func @transform_5(%arg0: i32, %arg1: i32) -> (i32, i32) {
    %c0_i32 = arith.constant 0 : i32
    %c0_i32_0 = arith.constant 0 : i32
    %c0_i32_1 = arith.constant 0 : i32
    return %c0_i32, %c0_i32_0 : i32, i32
  }
  func.func @transform_6(%arg0: i32, %arg1: i32) -> (i32, i32) {
    %c0_i32 = arith.constant 0 : i32
    %c0_i32_0 = arith.constant 0 : i32
    %c0_i32_1 = arith.constant 0 : i32
    return %c0_i32, %c0_i32_0 : i32, i32
  }
  func.func @transform_7(%arg0: i32, %arg1: i32) -> (i32, i32) {
    %c0_i32 = arith.constant 0 : i32
    %c0_i32_0 = arith.constant 0 : i32
    return %c0_i32, %arg0 : i32, i32
  }
  func.func @transform_8(%arg0: i32, %arg1: i32) -> (i32, i32, i32) {
    %c0_i32 = arith.constant 0 : i32
    %c0_i32_0 = arith.constant 0 : i32
    %c0_i32_1 = arith.constant 0 : i32
    return %arg0, %c0_i32, %c0_i32_0 : i32, i32, i32
  }
  func.func @transform_9(%arg0: i32, %arg1: i32) -> (i32, i32, i32) {
    %c0_i32 = arith.constant 0 : i32
    %c0_i32_0 = arith.constant 0 : i32
    %c0_i32_1 = arith.constant 0 : i32
    return %arg0, %c0_i32, %c0_i32_0 : i32, i32, i32
  }
  func.func @transform_10(%arg0: i32, %arg1: i32) -> (i32, i32, i32) {
    %c0_i32 = arith.constant 0 : i32
    %c0_i32_0 = arith.constant 0 : i32
    %c0_i32_1 = arith.constant 0 : i32
    return %arg0, %c0_i32, %c0_i32_0 : i32, i32, i32
  }
}

</mosaic_0001>

<bundles_post_ra>
// kernel: abmil_forward.1
= control target key start
LH: loop header
LB: loop body
LE: loop exit
PB: predicated region body
PF: predicated region fallthrough
CT: control target
= control target key end

     0   :  { %s17128_s0 = inlined_call_operand.hbm [shape: f32[8,800], index: 0, kind: input, shape index: {}]   ;;  %s17129_s1 = inlined_call_operand.hbm [shape: bf16[800,512], index: 1, kind: input, shape index: {}]   ;;  %s17130_s2 = inlined_call_operand.vmem [shape: f32[1,512], index: 2, kind: input, shape index: {}]   ;;  %s17131_s3 = inlined_call_operand.hbm [shape: bf16[512,128], index: 3, kind: input, shape index: {}]   ;;  %s17132_s4 = inlined_call_operand.vmem [shape: f32[1,128], index: 4, kind: input, shape index: {}]   ;;  %s17133_s5 = inlined_call_operand.vmem [shape: bf16[1,128], index: 5, kind: input, shape index: {}]   ;;  %s17134_s6 = inlined_call_operand.<no memory space> [shape: f32[1,1], index: 6, kind: input, shape index: {}]   ;;  %s17135_s7 = inlined_call_operand.vmem [shape: f32[1,1024], index: 7, kind: output, shape index: {0}]   ;;  %s17136_s8 = inlined_call_operand.hbm [shape: f32[1,1,1], index: 8, kind: output, shape index: {1}]   ;;  %s17137_s9 = inlined_call_operand.hbm [shape: f32[1,1,1], index: 9, kind: output, shape index: {2}]   ;;  %s17138_s10 = inlined_call_operand.vmem [shape: f32[1,1,512], index: 10, kind: output, shape index: {3}]  }
   0x1   :  { %v16_v0 = vstv %s17134_s6 }
   0x2   :  { %17 = vst [vmem:[#allocation2] sm:$0x1] %v16_v0 }
   0x3   :  { %18 = vsyncpa [#allocation4], 0 }
   0x4   :  { %19 = vsyncpa [#allocation7], 0 }
   0x5   :  { %20 = vsyncpa [#allocation5], 0 }
   0x6   :  { %21 = vsyncpa [#allocation11], 0 }
   0x7   :  { %33 = vsyncadd [#allocation4], 113792  ;;  %s14103_s15 = smov [#allocation6]   ;;  %s13985_s19 = scalar_lea.hbm %s17129_s1, 25600 }
   0x8   :  { %s51_s16 = sshll.u32 %s14103_s15, 4  ;;  %p13986_p0 = scmp.ne.s32.totalorder %s17129_s1, %s13985_s19  ;;  %s52_s16 = int_to_ptr.vmem [resolvable:$true] %s51_s16 }
   0x9   :  { %p13989_p1 = scmp.lt.u32.totalorder %s13985_s19, %s17129_s1 }
   0xb   :  { %p13991_p2 = pnand %p13989_p1, %p13986_p0 }
   0xd   :  { %13994 = shalt.err (!%p13991_p2)
}
   0xe   :  { %s13995_s6 = scalar_lea.vmem %s52_s16, 25600  ;;  %p14000_p4 = scmp.lt.s32.totalorder %s52_s16, %s52_s16 }
   0xf   :  { %p13996_p3 = scmp.ne.s32.totalorder %s52_s16, %s13995_s6  ;;  %p14001_p5 = scmp.lt.s32.totalorder %s13995_s6, %s13995_s6 }
  0x11   :  { %p14002_p6 = por %p14001_p5, %p14000_p4 }
  0x13   :  { %p14003_p7 = pnand %p14002_p6, %p13996_p3 }
  0x15   :  { %14006 = shalt.err (!%p14003_p7)
}
  0x16   :  { %s14104_s24 = smov 256   ;;  %s14105_s25 = smov 16  }
  0x17   :  { %57 = dma.hbm_to_vmem [thread:$0]  %s17129_s1, 25600, %s52_s16, [#allocation7], %s14104_s24, %s14104_s24, %s14105_s25  }
  0x18   :  { %s14106_s28 = smov [#allocation3]   ;;  %s14007_s12 = scalar_lea.hbm %s17128_s0, 896 }
  0x19   :  { %s39_s29 = sshll.u32 %s14106_s28, 4  ;;  %p14008_p8 = scmp.ne.s32.totalorder %s17128_s0, %s14007_s12  ;;  %s40_s29 = int_to_ptr.vmem [resolvable:$true] %s39_s29 }
  0x1a   :  { %p14011_p9 = scmp.lt.u32.totalorder %s14007_s12, %s17128_s0 }
  0x1c   :  { %p14013_p10 = pnand %p14011_p9, %p14008_p8 }
  0x1e   :  { %14016 = shalt.err (!%p14013_p10)
}
  0x1f   :  { %s14017_s18 = scalar_lea.vmem %s40_s29, 896  ;;  %s14021_s1 = scalar_lea.vmem %s40_s29, 114688 }
  0x20   :  { %p14018_p11 = scmp.ne.s32.totalorder %s40_s29, %s14017_s18  ;;  %p14022_p12 = scmp.lt.s32.totalorder %s40_s29, %s40_s29 }
  0x21   :  { %p14023_p13 = scmp.lt.s32.totalorder %s14021_s1, %s14017_s18 }
  0x23   :  { %p14024_p0 = por %p14023_p13, %p14022_p12 }
  0x25   :  { %p14025_p1 = pnand %p14024_p0, %p14018_p11 }
  0x27   :  { %14028 = shalt.err (!%p14025_p1)
}
  0x28   :  { %s14107_s16 = smov 896   ;;  %s14108_s19 = smov 56  }
  0x29   :  { %45 = dma.hbm_to_vmem [thread:$0]  %s17128_s0, 896, %s40_s29, [#allocation4], %s14107_s16, %s14107_s16, %s14108_s19  }
  0x2a   :  { %s14109_s22 = smov [#allocation8]   ;;  %s14029_s25 = scalar_lea.hbm %s17131_s3, 4096 }
  0x2b   :  { %s65_s23 = sshll.u32 %s14109_s22, 4  ;;  %p14030_p2 = scmp.ne.s32.totalorder %s17131_s3, %s14029_s25  ;;  %s66_s23 = int_to_ptr.vmem [resolvable:$true] %s65_s23 }
  0x2c   :  { %p14033_p3 = scmp.lt.u32.totalorder %s14029_s25, %s17131_s3 }
  0x2e   :  { %p14035_p4 = pnand %p14033_p3, %p14030_p2 }
  0x30   :  { %14038 = shalt.err (!%p14035_p4)
}
  0x31   :  { %s14039_s11 = scalar_lea.vmem %s66_s23, 4096  ;;  %p14044_p6 = scmp.lt.s32.totalorder %s66_s23, %s66_s23 }
  0x32   :  { %p14040_p5 = scmp.ne.s32.totalorder %s66_s23, %s14039_s11  ;;  %p14045_p7 = scmp.lt.s32.totalorder %s14039_s11, %s14039_s11 }
  0x34   :  { %p14046_p8 = por %p14045_p7, %p14044_p6 }
  0x36   :  { %p14047_p9 = pnand %p14046_p8, %p14040_p5 }
  0x38   :  { %14050 = shalt.err (!%p14047_p9)
}
  0x39   :  { %s14110_s0 = smov 64   ;;  %s14111_s29 = smov 4  }
  0x3a   :  { %71 = dma.hbm_to_vmem [thread:$0]  %s17131_s3, 4096, %s66_s23, [#allocation7], %s14110_s0, %s14110_s0, %s14111_s29  }
  0x3b   :  { %14095 = dma.done.wait [#allocation4], 114688  }
  0x3c   :  { %14096 = vsyncadd [#allocation4], 4294852608 }
  0x3d   :  { %14097 = dma.done.wait [#allocation7], 29696  }
  0x3e   :  { %14098 = vsyncadd [#allocation7], 4294937600  ;;  %v17159_v1 = vmov 0   ;;  %v13384_v2 = vld [vmem:[#allocation6 + $0x4] ss:$16 sps:$4 sm:$0xff]   ;;  %v303_v12 = vld [vmem:[#allocation3 + $0x618] sm:$0xff] }
  0x3f   :  { %5048 = vmatprep.mubr.bf16.mxu1 %v17159_v1  ;;  %13382 = vset.pattern.permute.xlu0 %v17159_v1  ;;  %v13386_v3 = vld [vmem:[#allocation6 + $0x604] ss:$16 sps:$4 sm:$0xff]   ;;  %v13388_v4 = vld [vmem:[#allocation6] ss:$16 sps:$4 sm:$0xff]   ;;  %vm2674_vm0 = vcmask 261120   ;;  %v317_v18 = vld [vmem:[#allocation3 + $0x688] sm:$0xff] }
  0x40   :  { %13383 = vset.pattern.permute.xlu1 %v17159_v1  ;;  %2867 = vmatprep.subr.bf16.mxu0 %v13384_v2  ;;  %v13389_v5 = vld [vmem:[#allocation6 + $0x600] ss:$16 sps:$4 sm:$0xff]   ;;  %v13390_v6 = vld [vmem:[#allocation6 + $0x24] ss:$16 sps:$4 sm:$0xff]   ;;  %v331_v25 = vld [vmem:[#allocation3 + $0x6f8] sm:$0xff]  ;;  %vm100_vm2 = vcmask 0  }
  0x41   :  { %12925 = vmatprep.subr.bf16.mxu1 %v13386_v3  ;;  %2868 = vmatpush1.bf16.msra.mxu0 %v13388_v4  ;;  %v13392_v7 = vld [vmem:[#allocation6 + $0x624] ss:$16 sps:$4 sm:$0xff]   ;;  %v13394_v8 = vld [vmem:[#allocation6 + $0x20] ss:$16 sps:$4 sm:$0xff]   ;;  %v345_v32 = vld [vmem:[#allocation3 + $0x768] sm:$0xff]  ;;  %vm11991_vm3 = vcmask 1040384  }
  0x42   :  { %12927 = vmatpush1.bf16.msra.mxu1 %v13389_v5  ;;  %2869 = vmatprep.subr.bf16.mxu0 %v13390_v6  ;;  %v13395_v9 = vld [vmem:[#allocation6 + $0x620] ss:$16 sps:$4 sm:$0xff]   ;;  %v13396_v10 = vld [vmem:[#allocation6 + $0x44] ss:$16 sps:$4 sm:$0xff]   ;;  %v109_v33 = vld [vmem:[#allocation3 + $0x8] sm:$0xff]  ;;  %s14119_s25 = smov [#allocation10]  }
  0x43   :  { %12926 = vmatprep.subr.bf16.mxu1 %v13392_v7  ;;  %v296_v11 = vld [vmem:[#allocation3 + $0x5e0] sm:$0xff]  ;;  %v310_v17 = vld [vmem:[#allocation3 + $0x650] sm:$0xff]  ;;  %v359_v42 = vld [vmem:[#allocation3 + $0x7d8] sm:$0xff]  ;;  %s12469_s26 = sshll.u32 %s14119_s25, 4  ;;  %s12470_s26 = int_to_ptr.vmem [resolvable:$true] %s12469_s26 }
  0x44   :  { %v14217_v13 = vpack.c.bf16 %v303_v12, %v296_v11  ;;  %v13398_v14 = vld [vmem:[#allocation6 + $0x40] ss:$16 sps:$4 sm:$0xff]   ;;  %v13399_v15 = vld [vmem:[#allocation6 + $0x64] ss:$16 sps:$4 sm:$0xff]   ;;  %v14222_v20 = vpack.c.bf16 %v317_v18, %v310_v17  ;;  %v373_v49 = vld [vmem:[#allocation3 + $0x848] sm:$0xff] }
  0x45   :  { %2870 = vmatpush1.bf16.msra.mxu0 %v13394_v8  ;;  %v13401_v16 = vld [vmem:[#allocation6 + $0x60] ss:$16 sps:$4 sm:$0xff]   ;;  %v13402_v19 = vld [vmem:[#allocation6 + $0x84] ss:$16 sps:$4 sm:$0xff]   ;;  %v387_v56 = vld [vmem:[#allocation3 + $0x8b8] sm:$0xff] }
  0x46   :  { %17371 = vst [vmem:[#allocation16_spill] sm:$0xff] %v14217_v13  ;;  %12928 = vmatpush1.bf16.msra.mxu1 %v13395_v9  ;;  %2871 = vmatprep.subr.bf16.mxu0 %v13396_v10  ;;  %17372 = vst [vmem:[#allocation17_spill] sm:$0xff] %v14222_v20  ;;  %v13404_v21 = vld [vmem:[#allocation6 + $0x80] ss:$16 sps:$4 sm:$0xff]   ;;  %v13405_v22 = vld [vmem:[#allocation6 + $0xa4] ss:$16 sps:$4 sm:$0xff]  }
  0x47   :  { %v13407_v23 = vld [vmem:[#allocation6 + $0xa0] ss:$16 sps:$4 sm:$0xff]   ;;  %v13408_v26 = vld [vmem:[#allocation6 + $0xc4] ss:$16 sps:$4 sm:$0xff]   ;;  %v115_v63 = vld [vmem:[#allocation3 + $0x38] sm:$0xff] }
  0x48   :  { %v324_v24 = vld [vmem:[#allocation3 + $0x6c0] sm:$0xff]  ;;  %v338_v31 = vld [vmem:[#allocation3 + $0x730] sm:$0xff]  ;;  %v401_v2 = vld [vmem:[#allocation3 + $0x928] sm:$0xff] }
  0x49   :  { %12705 = vmatmul.mubr.msk.bf16.vlgmr.msra.gmra.mrb[0].mxu1 %vm2674_vm0, %v14217_v13  ;;  %2872 = vmatpush1.bf16.msra.mxu0 %v13398_v14  ;;  %v14227_v27 = vpack.c.bf16 %v331_v25, %v324_v24  ;;  %v13410_v28 = vld [vmem:[#allocation6 + $0xc0] ss:$16 sps:$4 sm:$0xff]   ;;  %v13411_v29 = vld [vmem:[#allocation6 + $0xe4] ss:$16 sps:$4 sm:$0xff]   ;;  %v14234_v37 = vpack.c.bf16 %v345_v32, %v338_v31  ;;  %v123_v3 = vld [vmem:[#allocation3 + $0x78] sm:$0xff] }
  0x4a   :  { %5058 = vmatprep.mubr.bf16.mxu1 %v17159_v1  ;;  %2873 = vmatprep.subr.bf16.mxu0 %v13399_v15  ;;  %v13413_v30 = vld [vmem:[#allocation6 + $0xe0] ss:$16 sps:$4 sm:$0xff]   ;;  %v13414_v34 = vld [vmem:[#allocation6 + $0x104] ss:$16 sps:$4 sm:$0xff]   ;;  %v129_v9 = vld [vmem:[#allocation3 + $0xa8] sm:$0xff] }
  0x4b   :  { %17373 = vst [vmem:[#allocation18_spill] sm:$0xff] %v14227_v27  ;;  %v116_v35 = vld [vmem:[#allocation3 + $0x40] sm:$0xff]  ;;  %17374 = vst [vmem:[#allocation19_spill] sm:$0xff] %v14234_v37  ;;  %v366_v48 = vld [vmem:[#allocation3 + $0x810] sm:$0xff] }
  0x4c   :  { %v14232_v36 = vpack.c.bf16 %v116_v35, %v109_v33  ;;  %v13416_v38 = vld [vmem:[#allocation6 + $0x100] ss:$16 sps:$4 sm:$0xff]   ;;  %v13417_v39 = vld [vmem:[#allocation6 + $0x124] ss:$16 sps:$4 sm:$0xff]   ;;  %v14245_v51 = vpack.c.bf16 %v373_v49, %v366_v48  ;;  %v415_v11 = vld [vmem:[#allocation3 + $0x998] sm:$0xff] }
  0x4d   :  { %2874 = vmatpush1.bf16.msra.mxu0 %v13401_v16  ;;  %v13419_v40 = vld [vmem:[#allocation6 + $0x120] ss:$16 sps:$4 sm:$0xff]   ;;  %v13420_v43 = vld [vmem:[#allocation6 + $0x144] ss:$16 sps:$4 sm:$0xff]   ;;  %v137_v12 = vld [vmem:[#allocation3 + $0xe8] sm:$0xff] }
  0x4e   :  { %2875 = vmatprep.subr.bf16.mxu0 %v13402_v19  ;;  %2899 = vmatprep.mubr.bf16.mxu0 %v14232_v36  ;;  %v352_v41 = vld [vmem:[#allocation3 + $0x7a0] sm:$0xff]  ;;  %17376 = vst [vmem:[#allocation21_spill] sm:$0xff] %v14245_v51  ;;  %v394_v0 = vld [vmem:[#allocation3 + $0x8f0] sm:$0xff]  ;;  %v143_v19 = vld [vmem:[#allocation3 + $0x118] sm:$0xff] }
  0x4f   :  { %v14240_v44 = vpack.c.bf16 %v359_v42, %v352_v41  ;;  %v13422_v45 = vld [vmem:[#allocation6 + $0x140] ss:$16 sps:$4 sm:$0xff]   ;;  %v13423_v46 = vld [vmem:[#allocation6 + $0x164] ss:$16 sps:$4 sm:$0xff]   ;;  %v14257_v6 = vpack.c.bf16 %v401_v2, %v394_v0  ;;  %v443_v32 = vld [vmem:[#allocation3 + $0xa78] sm:$0xff] }
  0x50   :  { %v13425_v47 = vld [vmem:[#allocation6 + $0x160] ss:$16 sps:$4 sm:$0xff]   ;;  %v13426_v50 = vld [vmem:[#allocation6 + $0x184] ss:$16 sps:$4 sm:$0xff]   ;;  %v165_v33 = vld [vmem:[#allocation3 + $0x1c8] sm:$0xff] }
  0x51   :  { %12706 = vmatmul.mubr.msk.bf16.gmra.mrb[4].mxu1 %vm2674_vm0, %v14222_v20  ;;  %2876 = vmatpush1.bf16.msra.mxu0 %v13404_v21  ;;  %17375 = vst [vmem:[#allocation20_spill] sm:$0xff] %v14240_v44  ;;  %v13428_v52 = vld [vmem:[#allocation6 + $0x180] ss:$16 sps:$4 sm:$0xff]   ;;  %v13429_v53 = vld [vmem:[#allocation6 + $0x1a4] ss:$16 sps:$4 sm:$0xff]   ;;  %17378 = vst [vmem:[#allocation23_spill] sm:$0xff] %v14257_v6 }
  0x52   :  { %5068 = vmatprep.mubr.bf16.mxu1 %v17159_v1  ;;  %2877 = vmatprep.subr.bf16.mxu0 %v13405_v22  ;;  %v13431_v54 = vld [vmem:[#allocation6 + $0x1a0] ss:$16 sps:$4 sm:$0xff]   ;;  %v13432_v57 = vld [vmem:[#allocation6 + $0x1c4] ss:$16 sps:$4 sm:$0xff]   ;;  %v429_v22 = vld [vmem:[#allocation3 + $0xa08] sm:$0xff] }
  0x53   :  { %v380_v55 = vld [vmem:[#allocation3 + $0x880] sm:$0xff]  ;;  %v130_v4 = vld [vmem:[#allocation3 + $0xb0] sm:$0xff]  ;;  %v171_v41 = vld [vmem:[#allocation3 + $0x1f8] sm:$0xff] }
  0x54   :  { %v14250_v58 = vpack.c.bf16 %v387_v56, %v380_v55  ;;  %v13434_v59 = vld [vmem:[#allocation6 + $0x1c0] ss:$16 sps:$4 sm:$0xff]   ;;  %v13435_v60 = vld [vmem:[#allocation6 + $0x1e4] ss:$16 sps:$4 sm:$0xff]   ;;  %v14259_v7 = vpack.c.bf16 %v130_v4, %v123_v3  ;;  %v193_v55 = vld [vmem:[#allocation3 + $0x2a8] sm:$0xff] }
  0x55   :  { %2878 = vmatpush1.bf16.msra.mxu0 %v13407_v23  ;;  %v13437_v61 = vld [vmem:[#allocation6 + $0x1e0] ss:$16 sps:$4 sm:$0xff]   ;;  %v151_v23 = vld [vmem:[#allocation3 + $0x158] sm:$0xff]  ;;  %v485_v0 = vld [vmem:[#allocation3 + $0xbc8] sm:$0xff] }
  0x56   :  { %2879 = vmatprep.subr.bf16.mxu0 %v13408_v26  ;;  %17377 = vst [vmem:[#allocation22_spill] sm:$0xff] %v14250_v58  ;;  %v108_v62 = vld [vmem:[#allocation3] sm:$0xff]  ;;  %v122_v8 = vld [vmem:[#allocation3 + $0x70] sm:$0xff]  ;;  %v207_v2 = vld [vmem:[#allocation3 + $0x318] sm:$0xff] }
  0x57   :  { %v14255_v5 = vpack.c.bf16 %v115_v63, %v108_v62  ;;  %v408_v10 = vld [vmem:[#allocation3 + $0x960] sm:$0xff]  ;;  %v14266_v15 = vpack.c.bf16 %v129_v9, %v122_v8  ;;  %v422_v21 = vld [vmem:[#allocation3 + $0x9d0] sm:$0xff]  ;;  %v199_v62 = vld [vmem:[#allocation3 + $0x2d8] sm:$0xff] }
  0x58   :  { %v144_v14 = vld [vmem:[#allocation3 + $0x120] sm:$0xff]  ;;  %v14268_v16 = vpack.c.bf16 %v415_v11, %v408_v10  ;;  %v158_v24 = vld [vmem:[#allocation3 + $0x190] sm:$0xff]  ;;  %v14279_v26 = vpack.c.bf16 %v429_v22, %v422_v21  ;;  %v213_v11 = vld [vmem:[#allocation3 + $0x348] sm:$0xff] }
  0x59   :  { %12707 = vmatmul.mubr.msk.bf16.gmra.mrb[8].mxu1 %vm2674_vm0, %v14227_v27  ;;  %2880 = vmatpush1.bf16.msra.mxu0 %v13410_v28  ;;  %v14270_v17 = vpack.c.bf16 %v144_v14, %v137_v12  ;;  %v136_v18 = vld [vmem:[#allocation3 + $0xe0] sm:$0xff]  ;;  %v14281_v28 = vpack.c.bf16 %v158_v24, %v151_v23  ;;  %v450_v42 = vld [vmem:[#allocation3 + $0xab0] sm:$0xff]  ;;  %v499_v14 = vld [vmem:[#allocation3 + $0xc38] sm:$0xff] }
  0x5a   :  { %5078 = vmatprep.mubr.bf16.mxu1 %v17159_v1  ;;  %2881 = vmatprep.subr.bf16.mxu0 %v13411_v29  ;;  %17379 = vst [vmem:[#allocation24_spill] sm:$0xff] %v14268_v16  ;;  %v14277_v25 = vpack.c.bf16 %v143_v19, %v136_v18  ;;  %17380 = vst [vmem:[#allocation25_spill] sm:$0xff] %v14279_v26  ;;  %v150_v29 = vld [vmem:[#allocation3 + $0x150] sm:$0xff]  ;;  %v436_v31 = vld [vmem:[#allocation3 + $0xa40] sm:$0xff] }
  0x5b   :  { %v200_v56 = vld [vmem:[#allocation3 + $0x2e0] sm:$0xff]  ;;  %v478_v63 = vld [vmem:[#allocation3 + $0xb90] sm:$0xff]  ;;  %v221_v18 = vld [vmem:[#allocation3 + $0x388] sm:$0xff] }
  0x5c   :  { %v214_v3 = vld [vmem:[#allocation3 + $0x350] sm:$0xff]  ;;  %v14323_v8 = vpack.c.bf16 %v485_v0, %v478_v63  ;;  %v492_v12 = vld [vmem:[#allocation3 + $0xc00] sm:$0xff]  ;;  %v541_v63 = vld [vmem:[#allocation3 + $0xd88] sm:$0xff] }
  0x5d   :  { %2882 = vmatpush1.bf16.msra.mxu0 %v13413_v30  ;;  %v157_v30 = vld [vmem:[#allocation3 + $0x188] sm:$0xff]  ;;  %v14325_v9 = vpack.c.bf16 %v214_v3, %v207_v2  ;;  %v206_v10 = vld [vmem:[#allocation3 + $0x310] sm:$0xff]  ;;  %v228_v19 = vld [vmem:[#allocation3 + $0x3c0] sm:$0xff]  ;;  %v14334_v22 = vpack.c.bf16 %v499_v14, %v492_v12 }
  0x5e   :  { %2883 = vmatprep.subr.bf16.mxu0 %v13414_v34  ;;  %v172_v34 = vld [vmem:[#allocation3 + $0x200] sm:$0xff]  ;;  %v14288_v35 = vpack.c.bf16 %v157_v30, %v150_v29  ;;  %17384 = vst [vmem:[#allocation29_spill] sm:$0xff] %v14323_v8  ;;  %v14332_v21 = vpack.c.bf16 %v213_v11, %v206_v10  ;;  %v14336_v23 = vpack.c.bf16 %v228_v19, %v221_v18  ;;  %v227_v29 = vld [vmem:[#allocation3 + $0x3b8] sm:$0xff]  ;;  %v506_v30 = vld [vmem:[#allocation3 + $0xc70] sm:$0xff] }
  0x5f   :  { %17385 = vst [vmem:[#allocation30_spill] sm:$0xff] %v14334_v22  ;;  %v220_v24 = vld [vmem:[#allocation3 + $0x380] sm:$0xff]  ;;  %v263_v0 = vld [vmem:[#allocation3 + $0x4d8] sm:$0xff]  ;;  %v270_v2 = vld [vmem:[#allocation3 + $0x510] sm:$0xff] }
  0x60   :  { %v14369_v11 = vpack.c.bf16 %v270_v2, %v263_v0  ;;  %v262_v12 = vld [vmem:[#allocation3 + $0x4d0] sm:$0xff]  ;;  %v269_v14 = vld [vmem:[#allocation3 + $0x508] sm:$0xff]  ;;  %v548_v18 = vld [vmem:[#allocation3 + $0xdc0] sm:$0xff] }
  0x61   :  { %12708 = vmatmul.mubr.msk.bf16.gmra.mrb[12].mxu1 %vm2674_vm0, %v14234_v37  ;;  %2884 = vmatpush1.bf16.msra.mxu0 %v13416_v38  ;;  %v14290_v38 = vpack.c.bf16 %v443_v32, %v436_v31  ;;  %v513_v31 = vld [vmem:[#allocation3 + $0xca8] sm:$0xff]  ;;  %v235_v32 = vld [vmem:[#allocation3 + $0x3f8] sm:$0xff]  ;;  %v576_v0 = vld [vmem:[#allocation3 + $0xea0] sm:$0xff] }
  0x62   :  { %5088 = vmatprep.mubr.bf16.mxu1 %v17159_v1  ;;  %2885 = vmatprep.subr.bf16.mxu0 %v13417_v39  ;;  %v14292_v39 = vpack.c.bf16 %v172_v34, %v165_v33  ;;  %v242_v33 = vld [vmem:[#allocation3 + $0x430] sm:$0xff]  ;;  %v14343_v34 = vpack.c.bf16 %v227_v29, %v220_v24  ;;  %v555_v19 = vld [vmem:[#allocation3 + $0xdf8] sm:$0xff]  ;;  %v277_v24 = vld [vmem:[#allocation3 + $0x548] sm:$0xff] }
  0x63   :  { %17381 = vst [vmem:[#allocation26_spill] sm:$0xff] %v14290_v38  ;;  %v284_v29 = vld [vmem:[#allocation3 + $0x580] sm:$0xff]  ;;  %v583_v2 = vld [vmem:[#allocation3 + $0xed8] sm:$0xff] }
  0x64   :  { %v13446_v37 = vld [vmem:[#allocation6 + $0x4c] ss:$16 sps:$4 sm:$0xff]   ;;  %v13444_v20 = vld [vmem:[#allocation6 + $0x48] ss:$16 sps:$4 sm:$0xff]  }
  0x65   :  { %2886 = vmatpush1.bf16.msra.mxu0 %v13419_v40  ;;  %v164_v40 = vld [vmem:[#allocation3 + $0x1c0] sm:$0xff] }
  0x66   :  { %2887 = vmatprep.subr.bf16.mxu0 %v13420_v43  ;;  %v457_v43 = vld [vmem:[#allocation3 + $0xae8] sm:$0xff] }
  0x67   :  { %v14301_v48 = vpack.c.bf16 %v457_v43, %v450_v42  ;;  %v234_v42 = vld [vmem:[#allocation3 + $0x3f0] sm:$0xff]  ;;  %v241_v43 = vld [vmem:[#allocation3 + $0x428] sm:$0xff] }
  0x69   :  { %12709 = vmatmul.mubr.msk.bf16.gmra.mrb[16].mxu1 %vm2674_vm0, %v14240_v44  ;;  %2888 = vmatpush1.bf16.msra.mxu0 %v13422_v45  ;;  %v179_v45 = vld [vmem:[#allocation3 + $0x238] sm:$0xff]  ;;  %17382 = vst [vmem:[#allocation27_spill] sm:$0xff] %v14301_v48 }
  0x6a   :  { %5098 = vmatprep.mubr.bf16.mxu1 %v17159_v1  ;;  %2889 = vmatprep.subr.bf16.mxu0 %v13423_v46  ;;  %v186_v46 = vld [vmem:[#allocation3 + $0x270] sm:$0xff] }
  0x6b   :  { %v14303_v49 = vpack.c.bf16 %v186_v46, %v179_v45  ;;  %v520_v45 = vld [vmem:[#allocation3 + $0xce0] sm:$0xff]  ;;  %v527_v46 = vld [vmem:[#allocation3 + $0xd18] sm:$0xff] }
  0x6d   :  { %2890 = vmatpush1.bf16.msra.mxu0 %v13425_v47  ;;  %v14299_v47 = vpack.c.bf16 %v171_v41, %v164_v40  ;;  %v14345_v40 = vpack.c.bf16 %v513_v31, %v506_v30  ;;  %v14347_v41 = vpack.c.bf16 %v242_v33, %v235_v32  ;;  %v14376_v30 = vpack.c.bf16 %v269_v14, %v262_v12  ;;  %v276_v33 = vld [vmem:[#allocation3 + $0x540] sm:$0xff]  ;;  %v305_v12 = vld [vmem:[#allocation3 + $0x628] sm:$0xff] }
  0x6e   :  { %2891 = vmatprep.subr.bf16.mxu0 %v13426_v50  ;;  %v178_v50 = vld [vmem:[#allocation3 + $0x230] sm:$0xff]  ;;  %v14378_v31 = vpack.c.bf16 %v555_v19, %v548_v18  ;;  %v14380_v32 = vpack.c.bf16 %v284_v29, %v277_v24  ;;  %v312_v14 = vld [vmem:[#allocation3 + $0x660] sm:$0xff]  ;;  %v14400_v19 = vpack.c.bf16 %v583_v2, %v576_v0  ;;  %v325_v2 = vld [vmem:[#allocation3 + $0x6c8] sm:$0xff] }
  0x6f   :  { %17386 = vst [vmem:[#allocation31_spill] sm:$0xff] %v14345_v40  ;;  %v14402_v24 = vpack.c.bf16 %v312_v14, %v305_v12  ;;  %v304_v29 = vld [vmem:[#allocation3 + $0x620] sm:$0xff]  ;;  %v318_v0 = vld [vmem:[#allocation3 + $0x690] sm:$0xff]  ;;  %v611_v14 = vld [vmem:[#allocation3 + $0xfb8] sm:$0xff] }
  0x70   :  { %17389 = vst [vmem:[#allocation34_spill] sm:$0xff] %v14378_v31  ;;  %17391 = vst [vmem:[#allocation36_spill] sm:$0xff] %v14400_v19  ;;  %v604_v12 = vld [vmem:[#allocation3 + $0xf80] sm:$0xff] }
  0x71   :  { %12710 = vmatmul.mubr.msk.bf16.gmra.mrb[20].mxu1 %vm2674_vm0, %v14245_v51  ;;  %2892 = vmatpush1.bf16.msra.mxu0 %v13428_v52  ;;  %v185_v52 = vld [vmem:[#allocation3 + $0x268] sm:$0xff] }
  0x72   :  { %5108 = vmatprep.mubr.bf16.mxu1 %v17159_v1  ;;  %2893 = vmatprep.subr.bf16.mxu0 %v13429_v53  ;;  %v464_v53 = vld [vmem:[#allocation3 + $0xb20] sm:$0xff] }
  0x75   :  { %2894 = vmatpush1.bf16.msra.mxu0 %v13431_v54  ;;  %v471_v54 = vld [vmem:[#allocation3 + $0xb58] sm:$0xff] }
  0x76   :  { %2895 = vmatprep.subr.bf16.mxu0 %v13432_v57  ;;  %v14310_v57 = vpack.c.bf16 %v185_v52, %v178_v50  ;;  %v249_v50 = vld [vmem:[#allocation3 + $0x468] sm:$0xff]  ;;  %v256_v52 = vld [vmem:[#allocation3 + $0x4a0] sm:$0xff] }
  0x79   :  { %12711 = vmatmul.mubr.msk.bf16.gmra.mrb[24].mxu1 %vm2674_vm0, %v14250_v58  ;;  %2896 = vmatpush1.bf16.msra.mxu0 %v13434_v59  ;;  %v14312_v59 = vpack.c.bf16 %v471_v54, %v464_v53  ;;  %v14354_v53 = vpack.c.bf16 %v241_v43, %v234_v42  ;;  %v14356_v54 = vpack.c.bf16 %v527_v46, %v520_v45  ;;  %v283_v42 = vld [vmem:[#allocation3 + $0x578] sm:$0xff]  ;;  %v562_v43 = vld [vmem:[#allocation3 + $0xe30] sm:$0xff]  ;;  %v569_v45 = vld [vmem:[#allocation3 + $0xe68] sm:$0xff] }
  0x7a   :  { %5118 = vmatprep.mubr.bf16.mxu1 %v17159_v1  ;;  %2897 = vmatprep.subr.bf16.mxu0 %v13435_v60  ;;  %v14314_v60 = vpack.c.bf16 %v200_v56, %v193_v55  ;;  %v14358_v55 = vpack.c.bf16 %v256_v52, %v249_v50  ;;  %v248_v56 = vld [vmem:[#allocation3 + $0x460] sm:$0xff]  ;;  %v291_v46 = vld [vmem:[#allocation3 + $0x5b8] sm:$0xff]  ;;  %v298_v50 = vld [vmem:[#allocation3 + $0x5f0] sm:$0xff]  ;;  %v14387_v52 = vpack.c.bf16 %v283_v42, %v276_v33 }
  0x7b   :  { %17383 = vst [vmem:[#allocation28_spill] sm:$0xff] %v14312_v59  ;;  %17387 = vst [vmem:[#allocation32_spill] sm:$0xff] %v14356_v54  ;;  %v311_v33 = vld [vmem:[#allocation3 + $0x658] sm:$0xff]  ;;  %v590_v42 = vld [vmem:[#allocation3 + $0xf10] sm:$0xff] }
  0x7d   :  { %2898 = vmatpush1.bf16.msra.mxu0 %v13437_v61  ;;  %v192_v61 = vld [vmem:[#allocation3 + $0x2a0] sm:$0xff] }
  0x7e   :  { %v14321_v4 = vpack.c.bf16 %v199_v62, %v192_v61  ;;  %v255_v61 = vld [vmem:[#allocation3 + $0x498] sm:$0xff]  ;;  %v534_v62 = vld [vmem:[#allocation3 + $0xd50] sm:$0xff] }
  0x7f   :  { %v14365_v3 = vpack.c.bf16 %v255_v61, %v248_v56  ;;  %v14367_v10 = vpack.c.bf16 %v541_v63, %v534_v62  ;;  %v14389_v56 = vpack.c.bf16 %v569_v45, %v562_v43  ;;  %v14391_v61 = vpack.c.bf16 %v298_v50, %v291_v46  ;;  %v290_v62 = vld [vmem:[#allocation3 + $0x5b0] sm:$0xff]  ;;  %v297_v63 = vld [vmem:[#allocation3 + $0x5e8] sm:$0xff]  ;;  %v319_v45 = vld [vmem:[#allocation3 + $0x698] sm:$0xff] }
  0x80   :  { %2900 = vmatmul.mubr.bf16.vlgmr.msra.gmra.mrb[0].mxu0 %v14255_v5  ;;  %v14398_v18 = vpack.c.bf16 %v297_v63, %v290_v62  ;;  %v597_v43 = vld [vmem:[#allocation3 + $0xf48] sm:$0xff]  ;;  %v326_v46 = vld [vmem:[#allocation3 + $0x6d0] sm:$0xff]  ;;  %v14409_v50 = vpack.c.bf16 %v311_v33, %v304_v29  ;;  %v340_v29 = vld [vmem:[#allocation3 + $0x740] sm:$0xff]  ;;  %v14420_v33 = vpack.c.bf16 %v325_v2, %v318_v0 }
  0x81   :  { %12712 = vmatmul.mubr.msk.bf16.gmra.mrb[28].mxu1 %vm2674_vm0, %v14257_v6  ;;  %2909 = vmatprep.mubr.bf16.mxu0 %v14259_v7  ;;  %17388 = vst [vmem:[#allocation33_spill] sm:$0xff] %v14367_v10  ;;  %17390 = vst [vmem:[#allocation35_spill] sm:$0xff] %v14389_v56  ;;  %v14411_v62 = vpack.c.bf16 %v597_v43, %v590_v42  ;;  %v14413_v63 = vpack.c.bf16 %v326_v46, %v319_v45  ;;  %v332_v45 = vld [vmem:[#allocation3 + $0x700] sm:$0xff]  ;;  %v339_v46 = vld [vmem:[#allocation3 + $0x738] sm:$0xff] }
  0x82   :  { %5128 = vmatprep.mubr.bf16.mxu1 %v17159_v1  ;;  %v14422_v42 = vpack.c.bf16 %v611_v14, %v604_v12  ;;  %v354_v0 = vld [vmem:[#allocation3 + $0x7b0] sm:$0xff]  ;;  %v14431_v2 = vpack.c.bf16 %v339_v46, %v332_v45  ;;  %v368_v45 = vld [vmem:[#allocation3 + $0x820] sm:$0xff]  ;;  %v13438_v6 = vld [vmem:[#allocation6 + $0x8] ss:$16 sps:$4 sm:$0xff]  }
  0x83   :  { %17392 = vst [vmem:[#allocation37_spill] sm:$0xff] %v14411_v62  ;;  %v346_v14 = vld [vmem:[#allocation3 + $0x770] sm:$0xff] }
  0x84   :  { %17393 = vst [vmem:[#allocation38_spill] sm:$0xff] %v14422_v42 }
  0x88   :  { %2910 = vmatmul.mubr.bf16.gmra.mrb[4].mxu0 %v14266_v15 }
  0x89   :  { %12713 = vmatmul.mubr.msk.bf16.gmra.mrb[32].mxu1 %vm2674_vm0, %v14268_v16  ;;  %2919 = vmatprep.mubr.bf16.mxu0 %v14270_v17 }
  0x8a   :  { %5138 = vmatprep.mubr.bf16.mxu1 %v17159_v1 }
  0x90   :  { %2920 = vmatmul.mubr.bf16.gmra.mrb[8].mxu0 %v14277_v25 }
  0x91   :  { %12714 = vmatmul.mubr.msk.bf16.gmra.mrb[36].mxu1 %vm2674_vm0, %v14279_v26  ;;  %2929 = vmatprep.mubr.bf16.mxu0 %v14281_v28 }
  0x92   :  { %5148 = vmatprep.mubr.bf16.mxu1 %v17159_v1 }
  0x98   :  { %2930 = vmatmul.mubr.bf16.gmra.mrb[12].mxu0 %v14288_v35 }
  0x99   :  { %12715 = vmatmul.mubr.msk.bf16.gmra.mrb[40].mxu1 %vm2674_vm0, %v14290_v38  ;;  %2939 = vmatprep.mubr.bf16.mxu0 %v14292_v39  ;;  %v403_v38 = vld [vmem:[#allocation3 + $0x938] sm:$0xff] }
  0x9a   :  { %5158 = vmatprep.mubr.bf16.mxu1 %v17159_v1 }
  0xa0   :  { %2940 = vmatmul.mubr.bf16.gmra.mrb[16].mxu0 %v14299_v47 }
  0xa1   :  { %12716 = vmatmul.mubr.msk.bf16.gmra.mrb[44].mxu1 %vm2674_vm0, %v14301_v48  ;;  %2949 = vmatprep.mubr.bf16.mxu0 %v14303_v49  ;;  %v681_v48 = vld [vmem:[#allocation3 + $0x11e8] sm:$0xff] }
  0xa2   :  { %5168 = vmatprep.mubr.bf16.mxu1 %v17159_v1 }
  0xa8   :  { %2950 = vmatmul.mubr.bf16.gmra.mrb[20].mxu0 %v14310_v57 }
  0xa9   :  { %12717 = vmatmul.mubr.msk.bf16.gmra.mrb[48].mxu1 %vm2674_vm0, %v14312_v59  ;;  %2959 = vmatprep.mubr.bf16.mxu0 %v14314_v60  ;;  %v389_v59 = vld [vmem:[#allocation3 + $0x8c8] sm:$0xff] }
  0xaa   :  { %5178 = vmatprep.mubr.bf16.mxu1 %v17159_v1 }
  0xb0   :  { %2960 = vmatmul.mubr.bf16.gmra.mrb[24].mxu0 %v14321_v4 }
  0xb1   :  { %12718 = vmatmul.mubr.msk.bf16.gmra.mrb[52].mxu1 %vm2674_vm0, %v14323_v8  ;;  %2969 = vmatprep.mubr.bf16.mxu0 %v14325_v9  ;;  %v667_v8 = vld [vmem:[#allocation3 + $0x1178] sm:$0xff] }
  0xb2   :  { %5188 = vmatprep.mubr.bf16.mxu1 %v17159_v1 }
  0xb8   :  { %2970 = vmatmul.mubr.bf16.gmra.mrb[28].mxu0 %v14332_v21 }
  0xb9   :  { %12719 = vmatmul.mubr.msk.bf16.gmra.mrb[56].mxu1 %vm2674_vm0, %v14334_v22  ;;  %2979 = vmatprep.mubr.bf16.mxu0 %v14336_v23  ;;  %v375_v22 = vld [vmem:[#allocation3 + $0x858] sm:$0xff] }
  0xba   :  { %5198 = vmatprep.mubr.bf16.mxu1 %v17159_v1 }
  0xc0   :  { %2980 = vmatmul.mubr.bf16.gmra.mrb[32].mxu0 %v14343_v34 }
  0xc1   :  { %12720 = vmatmul.mubr.msk.bf16.gmra.mrb[60].mxu1 %vm2674_vm0, %v14345_v40  ;;  %2989 = vmatprep.mubr.bf16.mxu0 %v14347_v41  ;;  %v653_v40 = vld [vmem:[#allocation3 + $0x1108] sm:$0xff] }
  0xc2   :  { %5208 = vmatprep.mubr.bf16.mxu1 %v17159_v1 }
  0xc8   :  { %2990 = vmatmul.mubr.bf16.gmra.mrb[36].mxu0 %v14354_v53 }
  0xc9   :  { %12721 = vmatmul.mubr.msk.bf16.gmra.mrb[64].mxu1 %vm2674_vm0, %v14356_v54  ;;  %2999 = vmatprep.mubr.bf16.mxu0 %v14358_v55  ;;  %v361_v54 = vld [vmem:[#allocation3 + $0x7e8] sm:$0xff] }
  0xca   :  { %5218 = vmatprep.mubr.bf16.mxu1 %v17159_v1 }
  0xd0   :  { %3000 = vmatmul.mubr.bf16.gmra.mrb[40].mxu0 %v14365_v3 }
  0xd1   :  { %12722 = vmatmul.mubr.msk.bf16.gmra.mrb[68].mxu1 %vm2674_vm0, %v14367_v10  ;;  %3009 = vmatprep.mubr.bf16.mxu0 %v14369_v11  ;;  %v639_v10 = vld [vmem:[#allocation3 + $0x1098] sm:$0xff] }
  0xd2   :  { %5228 = vmatprep.mubr.bf16.mxu1 %v17159_v1 }
  0xd8   :  { %3010 = vmatmul.mubr.bf16.gmra.mrb[44].mxu0 %v14376_v30 }
  0xd9   :  { %12723 = vmatmul.mubr.msk.bf16.gmra.mrb[72].mxu1 %vm2674_vm0, %v14378_v31  ;;  %3019 = vmatprep.mubr.bf16.mxu0 %v14380_v32  ;;  %v347_v31 = vld [vmem:[#allocation3 + $0x778] sm:$0xff] }
  0xda   :  { %5238 = vmatprep.mubr.bf16.mxu1 %v17159_v1 }
  0xe0   :  { %3020 = vmatmul.mubr.bf16.gmra.mrb[48].mxu0 %v14387_v52 }
  0xe1   :  { %12724 = vmatmul.mubr.msk.bf16.gmra.mrb[76].mxu1 %vm2674_vm0, %v14389_v56  ;;  %3029 = vmatprep.mubr.bf16.mxu0 %v14391_v61  ;;  %v625_v56 = vld [vmem:[#allocation3 + $0x1028] sm:$0xff] }
  0xe2   :  { %5248 = vmatprep.mubr.bf16.mxu1 %v17159_v1 }
  0xe8   :  { %3030 = vmatmul.mubr.bf16.gmra.mrb[52].mxu0 %v14398_v18 }
  0xe9   :  { %12725 = vmatmul.mubr.msk.bf16.gmra.mrb[80].mxu1 %vm2674_vm0, %v14400_v19  ;;  %3039 = vmatprep.mubr.bf16.mxu0 %v14402_v24  ;;  %v333_v19 = vld [vmem:[#allocation3 + $0x708] sm:$0xff] }
  0xea   :  { %5258 = vmatprep.mubr.bf16.mxu1 %v17159_v1  ;;  %v14424_v43 = vpack.c.bf16 %v340_v29, %v333_v19  ;;  %v14435_v19 = vpack.c.bf16 %v354_v0, %v347_v31  ;;  %v353_v29 = vld [vmem:[#allocation3 + $0x7a8] sm:$0xff]  ;;  %v14446_v31 = vpack.c.bf16 %v368_v45, %v361_v54  ;;  %v367_v0 = vld [vmem:[#allocation3 + $0x818] sm:$0xff] }
  0xeb   :  { %v14442_v46 = vpack.c.bf16 %v353_v29, %v346_v14  ;;  %v382_v14 = vld [vmem:[#allocation3 + $0x890] sm:$0xff]  ;;  %v381_v45 = vld [vmem:[#allocation3 + $0x888] sm:$0xff] }
  0xec   :  { %v14457_v54 = vpack.c.bf16 %v382_v14, %v375_v22  ;;  %v395_v14 = vld [vmem:[#allocation3 + $0x8f8] sm:$0xff] }
  0xf0   :  { %3040 = vmatmul.mubr.bf16.gmra.mrb[56].mxu0 %v14409_v50 }
  0xf1   :  { %12726 = vmatmul.mubr.msk.bf16.gmra.mrb[84].mxu1 %vm2674_vm0, %v14411_v62  ;;  %3049 = vmatprep.mubr.bf16.mxu0 %v14413_v63  ;;  %v618_v62 = vld [vmem:[#allocation3 + $0xff0] sm:$0xff] }
  0xf2   :  { %5268 = vmatprep.mubr.bf16.mxu1 %v17159_v1  ;;  %v14433_v12 = vpack.c.bf16 %v625_v56, %v618_v62  ;;  %v360_v62 = vld [vmem:[#allocation3 + $0x7e0] sm:$0xff] }
  0xf3   :  { %v14453_v29 = vpack.c.bf16 %v367_v0, %v360_v62  ;;  %v396_v62 = vld [vmem:[#allocation3 + $0x900] sm:$0xff] }
  0xf4   :  { %17394 = vst [vmem:[#allocation39_spill] sm:$0xff] %v14433_v12  ;;  %v14468_v22 = vpack.c.bf16 %v396_v62, %v389_v59 }
  0xf8   :  { %3050 = vmatmul.mubr.bf16.gmra.mrb[60].mxu0 %v14420_v33 }
  0xf9   :  { %12727 = vmatmul.mubr.msk.bf16.gmra.mrb[88].mxu1 %vm2674_vm0, %v14422_v42  ;;  %3059 = vmatprep.mubr.bf16.mxu0 %v14424_v43  ;;  %v632_v42 = vld [vmem:[#allocation3 + $0x1060] sm:$0xff] }
  0xfa   :  { %5278 = vmatprep.mubr.bf16.mxu1 %v17159_v1  ;;  %v14444_v56 = vpack.c.bf16 %v639_v10, %v632_v42  ;;  %v374_v42 = vld [vmem:[#allocation3 + $0x850] sm:$0xff] }
  0xfb   :  { %v14464_v0 = vpack.c.bf16 %v381_v45, %v374_v42  ;;  %v410_v42 = vld [vmem:[#allocation3 + $0x970] sm:$0xff] }
  0xfc   :  { %17395 = vst [vmem:[#allocation40_spill] sm:$0xff] %v14444_v56  ;;  %v14479_v62 = vpack.c.bf16 %v410_v42, %v403_v38  ;;  %v424_v38 = vld [vmem:[#allocation3 + $0x9e0] sm:$0xff] }
  0xfe   :  { %17400 = vst [vmem:[#allocation45_spill] sm:$0xff] %v14479_v62 }
 0x100   :  { %3060 = vmatmul.mubr.bf16.gmra.mrb[64].mxu0 %v14431_v2 }
 0x101   :  { %12728 = vmatmul.mubr.msk.bf16.gmra.mrb[92].mxu1 %vm2674_vm0, %v14433_v12  ;;  %3069 = vmatprep.mubr.bf16.mxu0 %v14435_v19  ;;  %v646_v12 = vld [vmem:[#allocation3 + $0x10d0] sm:$0xff] }
 0x102   :  { %5288 = vmatprep.mubr.bf16.mxu1 %v17159_v1  ;;  %v14455_v10 = vpack.c.bf16 %v653_v40, %v646_v12  ;;  %v388_v12 = vld [vmem:[#allocation3 + $0x8c0] sm:$0xff] }
 0x104   :  { %17396 = vst [vmem:[#allocation41_spill] sm:$0xff] %v14455_v10 }
 0x108   :  { %3070 = vmatmul.mubr.bf16.gmra.mrb[68].mxu0 %v14442_v46 }
 0x109   :  { %12729 = vmatmul.mubr.msk.bf16.gmra.mrb[96].mxu1 %vm2674_vm0, %v14444_v56  ;;  %3079 = vmatprep.mubr.bf16.mxu0 %v14446_v31  ;;  %v660_v56 = vld [vmem:[#allocation3 + $0x1140] sm:$0xff] }
 0x10a   :  { %5298 = vmatprep.mubr.bf16.mxu1 %v17159_v1  ;;  %v14466_v40 = vpack.c.bf16 %v667_v8, %v660_v56  ;;  %v14475_v8 = vpack.c.bf16 %v395_v14, %v388_v12  ;;  %v409_v12 = vld [vmem:[#allocation3 + $0x968] sm:$0xff] }
 0x10b   :  { %v417_v14 = vld [vmem:[#allocation3 + $0x9a8] sm:$0xff] }
 0x10c   :  { %17397 = vst [vmem:[#allocation42_spill] sm:$0xff] %v14466_v40  ;;  %17398 = vst [vmem:[#allocation43_spill] sm:$0xff] %v14475_v8  ;;  %v14490_v51 = vpack.c.bf16 %v424_v38, %v417_v14 }
 0x10e   :  { %17404 = vst [vmem:[#allocation48_spill] sm:$0xff] %v14490_v51 }
 0x110   :  { %3080 = vmatmul.mubr.bf16.gmra.mrb[72].mxu0 %v14453_v29 }
 0x111   :  { %12730 = vmatmul.mubr.msk.bf16.gmra.mrb[100].mxu1 %vm2674_vm0, %v14455_v10  ;;  %3089 = vmatprep.mubr.bf16.mxu0 %v14457_v54  ;;  %v674_v10 = vld [vmem:[#allocation3 + $0x11b0] sm:$0xff] }
 0x112   :  { %5308 = vmatprep.mubr.bf16.mxu1 %v17159_v1  ;;  %v14477_v59 = vpack.c.bf16 %v681_v48, %v674_v10  ;;  %v688_v48 = vld [vmem:[#allocation3 + $0x1220] sm:$0xff]  ;;  %v695_v10 = vld [vmem:[#allocation3 + $0x1258] sm:$0xff] }
 0x113   :  { %v14488_v58 = vpack.c.bf16 %v695_v10, %v688_v48  ;;  %v438_v48 = vld [vmem:[#allocation3 + $0xa50] sm:$0xff] }
 0x114   :  { %17399 = vst [vmem:[#allocation44_spill] sm:$0xff] %v14477_v59 }
 0x115   :  { %17403 = vst [vmem:[#allocation47_spill] sm:$0xff] %v14488_v58 }
 0x118   :  { %3090 = vmatmul.mubr.bf16.gmra.mrb[76].mxu0 %v14464_v0 }
 0x119   :  { %12731 = vmatmul.mubr.msk.bf16.gmra.mrb[104].mxu1 %vm2674_vm0, %v14466_v40  ;;  %3099 = vmatprep.mubr.bf16.mxu0 %v14468_v22  ;;  %v13440_v40 = vld [vmem:[#allocation6 + $0xc] ss:$16 sps:$4 sm:$0xff]  }
 0x11a   :  { %5318 = vmatprep.mubr.bf16.mxu1 %v17159_v1  ;;  %v402_v1 = vld [vmem:[#allocation3 + $0x930] sm:$0xff]  ;;  %5559 = vmatprep.subr.bf16.mxu1 %v13440_v40 }
 0x11b   :  { %5560 = vmatpush1.bf16.msra.mxu1 %v13438_v6  ;;  %v416_v6 = vld [vmem:[#allocation3 + $0x9a0] sm:$0xff]  ;;  %v702_v40 = vld [vmem:[#allocation3 + $0x1290] sm:$0xff] }
 0x11c   :  { %v5050_v45 = vpop.f32.mrb[0].mxu1 }
 0x11d   :  { %v5052_v56 = vpop.f32.mrb[1].mxu1  ;;  %v17401_v45 = vmov 0  }
 0x11e   :  { %v5054_v26 = vpop.f32.mrb[2].mxu1  ;;  %v14486_v56 = vpack.c.bf16 %v409_v12, %v402_v1  ;;  %v423_v1 = vld [vmem:[#allocation3 + $0x9d8] sm:$0xff] }
 0x11f   :  { %v5056_v16 = vpop.f32.mrb[3].mxu1  ;;  %v13443_v26 = vld [vmem:[#allocation6 + $0x2c] ss:$16 sps:$4 sm:$0xff]   ;;  %v14497_v14 = vpack.c.bf16 %v423_v1, %v416_v6  ;;  %v716_v6 = vld [vmem:[#allocation3 + $0x1300] sm:$0xff] }
 0x120   :  { %3100 = vmatmul.mubr.bf16.gmra.mrb[80].mxu0 %v14475_v8  ;;  %v13441_v16 = vld [vmem:[#allocation6 + $0x28] ss:$16 sps:$4 sm:$0xff]   ;;  %17402 = vst [vmem:[#allocation46_spill] sm:$0xff] %v14486_v56  ;;  %5561 = vmatprep.subr.bf16.mxu1 %v13443_v26 }
 0x121   :  { %12732 = vmatmul.mubr.msk.bf16.gmra.mrb[108].mxu1 %vm2674_vm0, %v14477_v59  ;;  %3109 = vmatprep.mubr.bf16.mxu0 %v14479_v62  ;;  %v431_v12 = vld [vmem:[#allocation3 + $0xa18] sm:$0xff]  ;;  %17405 = vst [vmem:[#allocation49_spill] sm:$0xff] %v14497_v14 }
 0x122   :  { %5328 = vmatprep.mubr.bf16.mxu1 %v17401_v45  ;;  %5562 = vmatpush1.bf16.msra.mxu1 %v13441_v16  ;;  %v14501_v16 = vpack.c.bf16 %v438_v48, %v431_v12  ;;  %v723_v1 = vld [vmem:[#allocation3 + $0x1338] sm:$0xff] }
 0x123   :  { %5563 = vmatprep.subr.bf16.mxu1 %v13446_v37  ;;  %v437_v37 = vld [vmem:[#allocation3 + $0xa48] sm:$0xff] }
 0x124   :  { %v5060_v42 = vpop.f32.mrb[4].mxu1  ;;  %17407 = vst [vmem:[#allocation51_spill] sm:$0xff] %v14501_v16  ;;  %v13455_v12 = vld [vmem:[#allocation6 + $0xac] ss:$16 sps:$4 sm:$0xff]  }
 0x125   :  { %v5062_v59 = vpop.f32.mrb[5].mxu1 }
 0x126   :  { %v5064_v44 = vpop.f32.mrb[6].mxu1  ;;  %v709_v59 = vld [vmem:[#allocation3 + $0x12c8] sm:$0xff]  ;;  %5564 = vmatpush1.bf16.msra.mxu1 %v13444_v20  ;;  %v430_v20 = vld [vmem:[#allocation3 + $0xa10] sm:$0xff] }
 0x127   :  { %v5066_v27 = vpop.f32.mrb[7].mxu1  ;;  %v13449_v44 = vld [vmem:[#allocation6 + $0x6c] ss:$16 sps:$4 sm:$0xff]   ;;  %v14499_v38 = vpack.c.bf16 %v709_v59, %v702_v40  ;;  %v452_v59 = vld [vmem:[#allocation3 + $0xac0] sm:$0xff] }
 0x128   :  { %3110 = vmatmul.mubr.bf16.gmra.mrb[84].mxu0 %v14486_v56  ;;  %v13447_v27 = vld [vmem:[#allocation6 + $0x68] ss:$16 sps:$4 sm:$0xff]   ;;  %5565 = vmatprep.subr.bf16.mxu1 %v13449_v44  ;;  %v14508_v44 = vpack.c.bf16 %v437_v37, %v430_v20  ;;  %v730_v20 = vld [vmem:[#allocation3 + $0x1370] sm:$0xff] }
 0x129   :  { %12733 = vmatmul.mubr.msk.bf16.gmra.mrb[112].mxu1 %vm2674_vm0, %v14488_v58  ;;  %3119 = vmatprep.mubr.bf16.mxu0 %v14490_v51  ;;  %17406 = vst [vmem:[#allocation50_spill] sm:$0xff] %v14499_v38  ;;  %v13452_v58 = vld [vmem:[#allocation6 + $0x8c] ss:$16 sps:$4 sm:$0xff]   ;;  %v13450_v51 = vld [vmem:[#allocation6 + $0x88] ss:$16 sps:$4 sm:$0xff]  }
 0x12a   :  { %5338 = vmatprep.mubr.bf16.mxu1 %v17401_v45  ;;  %5566 = vmatpush1.bf16.msra.mxu1 %v13447_v27  ;;  %v445_v40 = vld [vmem:[#allocation3 + $0xa88] sm:$0xff]  ;;  %17408 = vst [vmem:[#allocation52_spill] sm:$0xff] %v14508_v44  ;;  %v14510_v27 = vpack.c.bf16 %v723_v1, %v716_v6  ;;  %v459_v6 = vld [vmem:[#allocation3 + $0xaf8] sm:$0xff]  ;;  %v466_v1 = vld [vmem:[#allocation3 + $0xb30] sm:$0xff] }
 0x12b   :  { %5567 = vmatprep.subr.bf16.mxu1 %v13452_v58  ;;  %v451_v58 = vld [vmem:[#allocation3 + $0xab8] sm:$0xff]  ;;  %v737_v37 = vld [vmem:[#allocation3 + $0x13a8] sm:$0xff] }
 0x12c   :  { %v5070_v10 = vpop.f32.mrb[8].mxu1  ;;  %17409 = vst [vmem:[#allocation53_spill] sm:$0xff] %v14510_v27 }
 0x12d   :  { %v5072_v26 = vpop.f32.mrb[9].mxu1 }
 0x12e   :  { %v5074_v42 = vpop.f32.mrb[10].mxu1  ;;  %5568 = vmatpush1.bf16.msra.mxu1 %v13450_v51  ;;  %v14512_v26 = vpack.c.bf16 %v452_v59, %v445_v40  ;;  %v444_v51 = vld [vmem:[#allocation3 + $0xa80] sm:$0xff]  ;;  %v13461_v40 = vld [vmem:[#allocation6 + $0xec] ss:$16 sps:$4 sm:$0xff]  }
 0x12f   :  { %v5076_v13 = vpop.f32.mrb[11].mxu1  ;;  %5569 = vmatprep.subr.bf16.mxu1 %v13455_v12  ;;  %v14519_v12 = vpack.c.bf16 %v451_v58, %v444_v51  ;;  %v744_v51 = vld [vmem:[#allocation3 + $0x13e0] sm:$0xff]  ;;  %v751_v58 = vld [vmem:[#allocation3 + $0x1418] sm:$0xff] }
 0x130   :  { %3120 = vmatmul.mubr.bf16.gmra.mrb[88].mxu0 %v14497_v14  ;;  %v13453_v13 = vld [vmem:[#allocation6 + $0xa8] ss:$16 sps:$4 sm:$0xff]   ;;  %17410 = vst [vmem:[#allocation54_spill] sm:$0xff] %v14512_v26 }
 0x131   :  { %12734 = vmatmul.mubr.msk.bf16.gmra.mrb[116].mxu1 %vm2674_vm0, %v14499_v38  ;;  %3129 = vmatprep.mubr.bf16.mxu0 %v14501_v16  ;;  %v13458_v38 = vld [vmem:[#allocation6 + $0xcc] ss:$16 sps:$4 sm:$0xff]   ;;  %v13456_v14 = vld [vmem:[#allocation6 + $0xc8] ss:$16 sps:$4 sm:$0xff]   ;;  %17411 = vst [vmem:[#allocation55_spill] sm:$0xff] %v14519_v12 }
 0x132   :  { %5348 = vmatprep.mubr.bf16.mxu1 %v17401_v45  ;;  %5570 = vmatpush1.bf16.msra.mxu1 %v13453_v13  ;;  %v14521_v13 = vpack.c.bf16 %v737_v37, %v730_v20  ;;  %v473_v20 = vld [vmem:[#allocation3 + $0xb68] sm:$0xff]  ;;  %v480_v37 = vld [vmem:[#allocation3 + $0xba0] sm:$0xff] }
 0x133   :  { %5571 = vmatprep.subr.bf16.mxu1 %v13458_v38  ;;  %v465_v38 = vld [vmem:[#allocation3 + $0xb28] sm:$0xff] }
 0x134   :  { %v5080_v48 = vpop.f32.mrb[12].mxu1  ;;  %17412 = vst [vmem:[#allocation56_spill] sm:$0xff] %v14521_v13 }
 0x135   :  { %v5082_v10 = vpop.f32.mrb[13].mxu1 }
 0x136   :  { %v5084_v42 = vpop.f32.mrb[14].mxu1  ;;  %5572 = vmatpush1.bf16.msra.mxu1 %v13456_v14  ;;  %v14523_v10 = vpack.c.bf16 %v466_v1, %v459_v6  ;;  %v458_v14 = vld [vmem:[#allocation3 + $0xaf0] sm:$0xff]  ;;  %v13467_v6 = vld [vmem:[#allocation6 + $0x12c] ss:$16 sps:$4 sm:$0xff]  }
 0x137   :  { %v5086_v16 = vpop.f32.mrb[15].mxu1  ;;  %5573 = vmatprep.subr.bf16.mxu1 %v13461_v40  ;;  %v14530_v40 = vpack.c.bf16 %v465_v38, %v458_v14  ;;  %v758_v14 = vld [vmem:[#allocation3 + $0x1450] sm:$0xff]  ;;  %v765_v38 = vld [vmem:[#allocation3 + $0x1488] sm:$0xff] }
 0x138   :  { %3130 = vmatmul.mubr.bf16.gmra.mrb[92].mxu0 %v14508_v44  ;;  %v13459_v16 = vld [vmem:[#allocation6 + $0xe8] ss:$16 sps:$4 sm:$0xff]   ;;  %17413 = vst [vmem:[#allocation57_spill] sm:$0xff] %v14523_v10 }
 0x139   :  { %12735 = vmatmul.mubr.msk.bf16.gmra.mrb[120].mxu1 %vm2674_vm0, %v14510_v27  ;;  %3139 = vmatprep.mubr.bf16.mxu0 %v14512_v26  ;;  %v13464_v27 = vld [vmem:[#allocation6 + $0x10c] ss:$16 sps:$4 sm:$0xff]   ;;  %v13462_v44 = vld [vmem:[#allocation6 + $0x108] ss:$16 sps:$4 sm:$0xff]   ;;  %17414 = vst [vmem:[#allocation58_spill] sm:$0xff] %v14530_v40 }
 0x13a   :  { %5358 = vmatprep.mubr.bf16.mxu1 %v17401_v45  ;;  %5574 = vmatpush1.bf16.msra.mxu1 %v13459_v16  ;;  %v14532_v16 = vpack.c.bf16 %v751_v58, %v744_v51  ;;  %v487_v51 = vld [vmem:[#allocation3 + $0xbd8] sm:$0xff]  ;;  %v494_v58 = vld [vmem:[#allocation3 + $0xc10] sm:$0xff] }
 0x13b   :  { %5575 = vmatprep.subr.bf16.mxu1 %v13464_v27  ;;  %v479_v27 = vld [vmem:[#allocation3 + $0xb98] sm:$0xff] }
 0x13c   :  { %v5090_v59 = vpop.f32.mrb[16].mxu1  ;;  %17415 = vst [vmem:[#allocation59_spill] sm:$0xff] %v14532_v16 }
 0x13d   :  { %v5092_v48 = vpop.f32.mrb[17].mxu1 }
 0x13e   :  { %v5094_v42 = vpop.f32.mrb[18].mxu1  ;;  %5576 = vmatpush1.bf16.msra.mxu1 %v13462_v44  ;;  %v14534_v48 = vpack.c.bf16 %v480_v37, %v473_v20  ;;  %v472_v44 = vld [vmem:[#allocation3 + $0xb60] sm:$0xff]  ;;  %v13473_v20 = vld [vmem:[#allocation6 + $0x16c] ss:$16 sps:$4 sm:$0xff]  }
 0x13f   :  { %v5096_v26 = vpop.f32.mrb[19].mxu1  ;;  %5577 = vmatprep.subr.bf16.mxu1 %v13467_v6  ;;  %v14541_v6 = vpack.c.bf16 %v479_v27, %v472_v44  ;;  %v772_v44 = vld [vmem:[#allocation3 + $0x14c0] sm:$0xff]  ;;  %v779_v27 = vld [vmem:[#allocation3 + $0x14f8] sm:$0xff] }
 0x140   :  { %3140 = vmatmul.mubr.bf16.gmra.mrb[96].mxu0 %v14519_v12  ;;  %v13465_v26 = vld [vmem:[#allocation6 + $0x128] ss:$16 sps:$4 sm:$0xff]   ;;  %17416 = vst [vmem:[#allocation60_spill] sm:$0xff] %v14534_v48 }
 0x141   :  { %12736 = vmatmul.mubr.msk.bf16.gmra.mrb[124].mxu1 %vm2674_vm0, %v14521_v13  ;;  %3149 = vmatprep.mubr.bf16.mxu0 %v14523_v10  ;;  %v13470_v13 = vld [vmem:[#allocation6 + $0x14c] ss:$16 sps:$4 sm:$0xff]   ;;  %v13468_v12 = vld [vmem:[#allocation6 + $0x148] ss:$16 sps:$4 sm:$0xff]   ;;  %17417 = vst [vmem:[#allocation61_spill] sm:$0xff] %v14541_v6 }
 0x142   :  { %5368 = vmatprep.mubr.bf16.mxu1 %v17401_v45  ;;  %5578 = vmatpush1.bf16.msra.mxu1 %v13465_v26  ;;  %v14543_v26 = vpack.c.bf16 %v765_v38, %v758_v14  ;;  %v501_v14 = vld [vmem:[#allocation3 + $0xc48] sm:$0xff]  ;;  %v508_v38 = vld [vmem:[#allocation3 + $0xc80] sm:$0xff] }
 0x143   :  { %5579 = vmatprep.subr.bf16.mxu1 %v13470_v13  ;;  %v493_v13 = vld [vmem:[#allocation3 + $0xc08] sm:$0xff] }
 0x144   :  { %v5100_v1 = vpop.f32.mrb[20].mxu1  ;;  %17418 = vst [vmem:[#allocation62_spill] sm:$0xff] %v14543_v26 }
 0x145   :  { %v5102_v59 = vpop.f32.mrb[21].mxu1 }
 0x146   :  { %v5104_v42 = vpop.f32.mrb[22].mxu1  ;;  %5580 = vmatpush1.bf16.msra.mxu1 %v13468_v12  ;;  %v14545_v59 = vpack.c.bf16 %v494_v58, %v487_v51  ;;  %v486_v12 = vld [vmem:[#allocation3 + $0xbd0] sm:$0xff]  ;;  %v13479_v51 = vld [vmem:[#allocation6 + $0x1ac] ss:$16 sps:$4 sm:$0xff]  }
 0x147   :  { %v5106_v10 = vpop.f32.mrb[23].mxu1  ;;  %5581 = vmatprep.subr.bf16.mxu1 %v13473_v20  ;;  %v14552_v20 = vpack.c.bf16 %v493_v13, %v486_v12  ;;  %v786_v12 = vld [vmem:[#allocation3 + $0x1530] sm:$0xff]  ;;  %v793_v13 = vld [vmem:[#allocation3 + $0x1568] sm:$0xff] }
 0x148   :  { %3150 = vmatmul.mubr.bf16.gmra.mrb[100].mxu0 %v14530_v40  ;;  %v13471_v10 = vld [vmem:[#allocation6 + $0x168] ss:$16 sps:$4 sm:$0xff]   ;;  %17419 = vst [vmem:[#allocation63_spill] sm:$0xff] %v14545_v59 }
 0x149   :  { %12737 = vmatmul.mubr.msk.bf16.gmra.mrb[128].mxu1 %vm2674_vm0, %v14532_v16  ;;  %3159 = vmatprep.mubr.bf16.mxu0 %v14534_v48  ;;  %v13476_v16 = vld [vmem:[#allocation6 + $0x18c] ss:$16 sps:$4 sm:$0xff]   ;;  %v13474_v40 = vld [vmem:[#allocation6 + $0x188] ss:$16 sps:$4 sm:$0xff]   ;;  %17420 = vst [vmem:[#allocation64_spill] sm:$0xff] %v14552_v20 }
 0x14a   :  { %5378 = vmatprep.mubr.bf16.mxu1 %v17401_v45  ;;  %5582 = vmatpush1.bf16.msra.mxu1 %v13471_v10  ;;  %v14554_v10 = vpack.c.bf16 %v779_v27, %v772_v44  ;;  %v515_v44 = vld [vmem:[#allocation3 + $0xcb8] sm:$0xff]  ;;  %v522_v27 = vld [vmem:[#allocation3 + $0xcf0] sm:$0xff] }
 0x14b   :  { %5583 = vmatprep.subr.bf16.mxu1 %v13476_v16  ;;  %v507_v16 = vld [vmem:[#allocation3 + $0xc78] sm:$0xff] }
 0x14c   :  { %v5110_v37 = vpop.f32.mrb[24].mxu1  ;;  %17421 = vst [vmem:[#allocation65_spill] sm:$0xff] %v14554_v10 }
 0x14d   :  { %v5112_v1 = vpop.f32.mrb[25].mxu1 }
 0x14e   :  { %v5114_v42 = vpop.f32.mrb[26].mxu1  ;;  %5584 = vmatpush1.bf16.msra.mxu1 %v13474_v40  ;;  %v14556_v1 = vpack.c.bf16 %v508_v38, %v501_v14  ;;  %v500_v40 = vld [vmem:[#allocation3 + $0xc40] sm:$0xff]  ;;  %v13485_v14 = vld [vmem:[#allocation6 + $0x1ec] ss:$16 sps:$4 sm:$0xff]   ;;  %v13483_v38 = vld [vmem:[#allocation6 + $0x1e8] ss:$16 sps:$4 sm:$0xff]  }
 0x14f   :  { %v5116_v48 = vpop.f32.mrb[27].mxu1  ;;  %5585 = vmatprep.subr.bf16.mxu1 %v13479_v51 }
 0x150   :  { %3160 = vmatmul.mubr.bf16.gmra.mrb[104].mxu0 %v14541_v6  ;;  %v13477_v48 = vld [vmem:[#allocation6 + $0x1a8] ss:$16 sps:$4 sm:$0xff]   ;;  %17422 = vst [vmem:[#allocation66_spill] sm:$0xff] %v14556_v1 }
 0x151   :  { %12738 = vmatmul.mubr.msk.bf16.gmra.mrb[132].mxu1 %vm2674_vm0, %v14543_v26  ;;  %3169 = vmatprep.mubr.bf16.mxu0 %v14545_v59  ;;  %v13482_v26 = vld [vmem:[#allocation6 + $0x1cc] ss:$16 sps:$4 sm:$0xff]   ;;  %v13480_v6 = vld [vmem:[#allocation6 + $0x1c8] ss:$16 sps:$4 sm:$0xff]  }
 0x152   :  { %5388 = vmatprep.mubr.bf16.mxu1 %v17401_v45  ;;  %5586 = vmatpush1.bf16.msra.mxu1 %v13477_v48 }
 0x153   :  { %5587 = vmatprep.subr.bf16.mxu1 %v13482_v26  ;;  %v521_v26 = vld [vmem:[#allocation3 + $0xce8] sm:$0xff] }
 0x154   :  { %v5120_v58 = vpop.f32.mrb[28].mxu1 }
 0x155   :  { %v5122_v37 = vpop.f32.mrb[29].mxu1  ;;  %v14563_v58 = vpack.c.bf16 %v507_v16, %v500_v40  ;;  %v800_v40 = vld [vmem:[#allocation3 + $0x15a0] sm:$0xff]  ;;  %v807_v16 = vld [vmem:[#allocation3 + $0x15d8] sm:$0xff] }
 0x156   :  { %v5124_v42 = vpop.f32.mrb[30].mxu1  ;;  %5588 = vmatpush1.bf16.msra.mxu1 %v13480_v6  ;;  %v14565_v37 = vpack.c.bf16 %v793_v13, %v786_v12  ;;  %v514_v6 = vld [vmem:[#allocation3 + $0xcb0] sm:$0xff]  ;;  %v536_v12 = vld [vmem:[#allocation3 + $0xd60] sm:$0xff] }
 0x157   :  { %v5126_v59 = vpop.f32.mrb[31].mxu1  ;;  %17423 = vst [vmem:[#allocation67_spill] sm:$0xff] %v14563_v58  ;;  %5589 = vmatprep.subr.bf16.mxu1 %v13485_v14 }
 0x158   :  { %3170 = vmatmul.mubr.bf16.gmra.mrb[108].mxu0 %v14552_v20  ;;  %17424 = vst [vmem:[#allocation68_spill] sm:$0xff] %v14565_v37 }
 0x159   :  { %12739 = vmatmul.mubr.msk.bf16.gmra.mrb[136].mxu1 %vm2674_vm0, %v14554_v10  ;;  %3179 = vmatprep.mubr.bf16.mxu0 %v14556_v1  ;;  %v14567_v1 = vpack.c.bf16 %v522_v27, %v515_v44  ;;  %v14576_v44 = vpack.c.bf16 %v807_v16, %v800_v40  ;;  %v821_v40 = vld [vmem:[#allocation3 + $0x1648] sm:$0xff]  ;;  %v543_v16 = vld [vmem:[#allocation3 + $0xd98] sm:$0xff] }
 0x15a   :  { %5398 = vmatprep.mubr.bf16.mxu1 %v17401_v45  ;;  %5590 = vmatpush1.bf16.msra.mxu1 %v13483_v38 }
 0x15b   :  { %v2911_v59 = vpop.f32.mrb[4].mxu0  ;;  %17425 = vst [vmem:[#allocation69_spill] sm:$0xff] %v14567_v1  ;;  %17427 = vst [vmem:[#allocation71_spill] sm:$0xff] %v14576_v44 }
 0x15c   :  { %v5130_v51 = vpop.f32.mrb[32].mxu1  ;;  %v2913_v48 = vpop.f32.mrb[5].mxu0 }
 0x15d   :  { %v5132_v42 = vpop.f32.mrb[33].mxu1  ;;  %v2915_v10 = vpop.f32.mrb[6].mxu0 }
 0x15e   :  { %v5134_v20 = vpop.f32.mrb[34].mxu1  ;;  %v2917_v56 = vpop.f32.mrb[7].mxu0  ;;  %v529_v10 = vld [vmem:[#allocation3 + $0xd28] sm:$0xff]  ;;  %v528_v42 = vld [vmem:[#allocation3 + $0xd20] sm:$0xff] }
 0x15f   :  { %v5136_v62 = vpop.f32.mrb[35].mxu1  ;;  %v14578_v59 = vpack.c.bf16 %v536_v12, %v529_v10 }
 0x160   :  { %3180 = vmatmul.mubr.bf16.gmra.mrb[112].mxu0 %v14563_v58  ;;  %v14574_v62 = vpack.c.bf16 %v521_v26, %v514_v6  ;;  %v535_v6 = vld [vmem:[#allocation3 + $0xd58] sm:$0xff]  ;;  %v814_v26 = vld [vmem:[#allocation3 + $0x1610] sm:$0xff] }
 0x161   :  { %12740 = vmatmul.mubr.msk.bf16.gmra.mrb[140].mxu1 %vm2674_vm0, %v14565_v37  ;;  %3189 = vmatprep.mubr.bf16.mxu0 %v14567_v1  ;;  %17428 = vst [vmem:[#allocation72_spill] sm:$0xff] %v14578_v59  ;;  %v13494_v58 = vld [vmem:[#allocation6 + $0x244] ss:$16 sps:$4 sm:$0xff]  }
 0x162   :  { %5408 = vmatprep.mubr.bf16.mxu1 %v17401_v45  ;;  %17426 = vst [vmem:[#allocation70_spill] sm:$0xff] %v14574_v62 }
 0x163   :  { %v2921_v13 = vpop.f32.mrb[8].mxu0 }
 0x164   :  { %v5140_v20 = vpop.f32.mrb[36].mxu1  ;;  %v2923_v56 = vpop.f32.mrb[9].mxu0  ;;  %v550_v13 = vld [vmem:[#allocation3 + $0xdd0] sm:$0xff] }
 0x165   :  { %v5142_v27 = vpop.f32.mrb[37].mxu1  ;;  %v2925_v14 = vpop.f32.mrb[10].mxu0  ;;  %v14585_v56 = vpack.c.bf16 %v535_v6, %v528_v42  ;;  %v549_v42 = vld [vmem:[#allocation3 + $0xdc8] sm:$0xff]  ;;  %v828_v6 = vld [vmem:[#allocation3 + $0x1680] sm:$0xff] }
 0x166   :  { %v5144_v38 = vpop.f32.mrb[38].mxu1  ;;  %v2927_v51 = vpop.f32.mrb[11].mxu0  ;;  %v14587_v27 = vpack.c.bf16 %v821_v40, %v814_v26  ;;  %v835_v26 = vld [vmem:[#allocation3 + $0x16b8] sm:$0xff]  ;;  %v557_v40 = vld [vmem:[#allocation3 + $0xe08] sm:$0xff] }
 0x167   :  { %v5146_v48 = vpop.f32.mrb[39].mxu1  ;;  %17429 = vst [vmem:[#allocation73_spill] sm:$0xff] %v14585_v56  ;;  %v14589_v51 = vpack.c.bf16 %v550_v13, %v543_v16 }
 0x168   :  { %3190 = vmatmul.mubr.bf16.gmra.mrb[116].mxu0 %v14574_v62  ;;  %17430 = vst [vmem:[#allocation74_spill] sm:$0xff] %v14587_v27  ;;  %v13486_v62 = vld [vmem:[#allocation6 + $0x200] ss:$16 sps:$4 sm:$0xff]  }
 0x169   :  { %12741 = vmatmul.mubr.msk.bf16.gmra.mrb[144].mxu1 %vm2674_vm0, %v14576_v44  ;;  %3199 = vmatprep.mubr.bf16.mxu0 %v14578_v59  ;;  %17431 = vst [vmem:[#allocation75_spill] sm:$0xff] %v14589_v51  ;;  %v542_v59 = vld [vmem:[#allocation3 + $0xd90] sm:$0xff] }
 0x16a   :  { %5418 = vmatprep.mubr.bf16.mxu1 %v17401_v45 }
 0x16b   :  { %v2931_v10 = vpop.f32.mrb[12].mxu0 }
 0x16c   :  { %v5150_v12 = vpop.f32.mrb[40].mxu1  ;;  %v2933_v20 = vpop.f32.mrb[13].mxu0  ;;  %v564_v10 = vld [vmem:[#allocation3 + $0xe40] sm:$0xff] }
 0x16d   :  { %v5152_v14 = vpop.f32.mrb[41].mxu1  ;;  %v2935_v38 = vpop.f32.mrb[14].mxu0 }
 0x16e   :  { %v5154_v48 = vpop.f32.mrb[42].mxu1  ;;  %v2937_v44 = vpop.f32.mrb[15].mxu0  ;;  %v14600_v38 = vpack.c.bf16 %v564_v10, %v557_v40 }
 0x16f   :  { %v5156_v37 = vpop.f32.mrb[43].mxu1  ;;  %v14596_v44 = vpack.c.bf16 %v549_v42, %v542_v59  ;;  %v563_v59 = vld [vmem:[#allocation3 + $0xe38] sm:$0xff]  ;;  %v842_v42 = vld [vmem:[#allocation3 + $0x16f0] sm:$0xff] }
 0x170   :  { %3200 = vmatmul.mubr.bf16.gmra.mrb[120].mxu0 %v14585_v56  ;;  %v14598_v37 = vpack.c.bf16 %v835_v26, %v828_v6  ;;  %17434 = vst [vmem:[#allocation78_spill] sm:$0xff] %v14600_v38  ;;  %v556_v56 = vld [vmem:[#allocation3 + $0xe00] sm:$0xff]  ;;  %v849_v6 = vld [vmem:[#allocation3 + $0x1728] sm:$0xff]  ;;  %v571_v26 = vld [vmem:[#allocation3 + $0xe78] sm:$0xff] }
 0x171   :  { %12742 = vmatmul.mubr.msk.bf16.gmra.mrb[148].mxu1 %vm2674_vm0, %v14587_v27  ;;  %3209 = vmatprep.mubr.bf16.mxu0 %v14589_v51  ;;  %17432 = vst [vmem:[#allocation76_spill] sm:$0xff] %v14596_v44 }
 0x172   :  { %5428 = vmatprep.mubr.bf16.mxu1 %v17401_v45  ;;  %17433 = vst [vmem:[#allocation77_spill] sm:$0xff] %v14598_v37 }
 0x173   :  { %v2941_v16 = vpop.f32.mrb[16].mxu0 }
 0x174   :  { %v5160_v13 = vpop.f32.mrb[44].mxu1  ;;  %v2943_v12 = vpop.f32.mrb[17].mxu0  ;;  %v578_v16 = vld [vmem:[#allocation3 + $0xeb0] sm:$0xff] }
 0x175   :  { %v5162_v20 = vpop.f32.mrb[45].mxu1  ;;  %v2945_v14 = vpop.f32.mrb[18].mxu0 }
 0x176   :  { %v5164_v48 = vpop.f32.mrb[46].mxu1  ;;  %v2947_v27 = vpop.f32.mrb[19].mxu0  ;;  %v14611_v14 = vpack.c.bf16 %v578_v16, %v571_v26 }
 0x177   :  { %v5166_v51 = vpop.f32.mrb[47].mxu1  ;;  %v14607_v27 = vpack.c.bf16 %v563_v59, %v556_v56  ;;  %v577_v56 = vld [vmem:[#allocation3 + $0xea8] sm:$0xff]  ;;  %v856_v59 = vld [vmem:[#allocation3 + $0x1760] sm:$0xff] }
 0x178   :  { %3210 = vmatmul.mubr.bf16.gmra.mrb[124].mxu0 %v14596_v44  ;;  %v14609_v51 = vpack.c.bf16 %v849_v6, %v842_v42  ;;  %17437 = vst [vmem:[#allocation81_spill] sm:$0xff] %v14611_v14  ;;  %v570_v44 = vld [vmem:[#allocation3 + $0xe70] sm:$0xff]  ;;  %v863_v42 = vld [vmem:[#allocation3 + $0x1798] sm:$0xff]  ;;  %v585_v6 = vld [vmem:[#allocation3 + $0xee8] sm:$0xff] }
 0x179   :  { %12743 = vmatmul.mubr.msk.bf16.gmra.mrb[152].mxu1 %vm2674_vm0, %v14598_v37  ;;  %3219 = vmatprep.mubr.bf16.mxu0 %v14600_v38  ;;  %17435 = vst [vmem:[#allocation79_spill] sm:$0xff] %v14607_v27 }
 0x17a   :  { %5438 = vmatprep.mubr.bf16.mxu1 %v17401_v45  ;;  %17436 = vst [vmem:[#allocation80_spill] sm:$0xff] %v14609_v51 }
 0x17b   :  { %v2951_v40 = vpop.f32.mrb[20].mxu0 }
 0x17c   :  { %v5170_v10 = vpop.f32.mrb[48].mxu1  ;;  %v2953_v13 = vpop.f32.mrb[21].mxu0  ;;  %v592_v40 = vld [vmem:[#allocation3 + $0xf20] sm:$0xff] }
 0x17d   :  { %v5172_v12 = vpop.f32.mrb[49].mxu1  ;;  %v2955_v20 = vpop.f32.mrb[22].mxu0 }
 0x17e   :  { %v5174_v48 = vpop.f32.mrb[50].mxu1  ;;  %v2957_v37 = vpop.f32.mrb[23].mxu0  ;;  %v14622_v20 = vpack.c.bf16 %v592_v40, %v585_v6 }
 0x17f   :  { %v5176_v38 = vpop.f32.mrb[51].mxu1  ;;  %v14618_v37 = vpack.c.bf16 %v577_v56, %v570_v44  ;;  %v591_v44 = vld [vmem:[#allocation3 + $0xf18] sm:$0xff]  ;;  %v870_v56 = vld [vmem:[#allocation3 + $0x17d0] sm:$0xff] }
 0x180   :  { %3220 = vmatmul.mubr.bf16.gmra.mrb[128].mxu0 %v14607_v27  ;;  %v14620_v38 = vpack.c.bf16 %v863_v42, %v856_v59  ;;  %17440 = vst [vmem:[#allocation84_spill] sm:$0xff] %v14622_v20  ;;  %v584_v27 = vld [vmem:[#allocation3 + $0xee0] sm:$0xff]  ;;  %v877_v59 = vld [vmem:[#allocation3 + $0x1808] sm:$0xff]  ;;  %v599_v42 = vld [vmem:[#allocation3 + $0xf58] sm:$0xff] }
 0x181   :  { %12744 = vmatmul.mubr.msk.bf16.gmra.mrb[156].mxu1 %vm2674_vm0, %v14609_v51  ;;  %3229 = vmatprep.mubr.bf16.mxu0 %v14611_v14  ;;  %17438 = vst [vmem:[#allocation82_spill] sm:$0xff] %v14618_v37 }
 0x182   :  { %5448 = vmatprep.mubr.bf16.mxu1 %v17401_v45  ;;  %17439 = vst [vmem:[#allocation83_spill] sm:$0xff] %v14620_v38 }
 0x183   :  { %v2961_v26 = vpop.f32.mrb[24].mxu0 }
 0x184   :  { %v5180_v16 = vpop.f32.mrb[52].mxu1  ;;  %v2963_v10 = vpop.f32.mrb[25].mxu0  ;;  %v606_v26 = vld [vmem:[#allocation3 + $0xf90] sm:$0xff] }
 0x185   :  { %v5182_v13 = vpop.f32.mrb[53].mxu1  ;;  %v2965_v12 = vpop.f32.mrb[26].mxu0 }
 0x186   :  { %v5184_v48 = vpop.f32.mrb[54].mxu1  ;;  %v2967_v51 = vpop.f32.mrb[27].mxu0  ;;  %v14633_v12 = vpack.c.bf16 %v606_v26, %v599_v42 }
 0x187   :  { %v5186_v14 = vpop.f32.mrb[55].mxu1  ;;  %v14629_v51 = vpack.c.bf16 %v591_v44, %v584_v27  ;;  %v605_v27 = vld [vmem:[#allocation3 + $0xf88] sm:$0xff]  ;;  %v884_v44 = vld [vmem:[#allocation3 + $0x1840] sm:$0xff] }
 0x188   :  { %3230 = vmatmul.mubr.bf16.gmra.mrb[132].mxu0 %v14618_v37  ;;  %v14631_v14 = vpack.c.bf16 %v877_v59, %v870_v56  ;;  %17443 = vst [vmem:[#allocation87_spill] sm:$0xff] %v14633_v12  ;;  %v598_v37 = vld [vmem:[#allocation3 + $0xf50] sm:$0xff]  ;;  %v891_v56 = vld [vmem:[#allocation3 + $0x1878] sm:$0xff]  ;;  %v613_v59 = vld [vmem:[#allocation3 + $0xfc8] sm:$0xff] }
 0x189   :  { %12745 = vmatmul.mubr.msk.bf16.gmra.mrb[160].mxu1 %vm2674_vm0, %v14620_v38  ;;  %3239 = vmatprep.mubr.bf16.mxu0 %v14622_v20  ;;  %17441 = vst [vmem:[#allocation85_spill] sm:$0xff] %v14629_v51 }
 0x18a   :  { %5458 = vmatprep.mubr.bf16.mxu1 %v17401_v45  ;;  %17442 = vst [vmem:[#allocation86_spill] sm:$0xff] %v14631_v14 }
 0x18b   :  { %v2971_v6 = vpop.f32.mrb[28].mxu0 }
 0x18c   :  { %v5190_v40 = vpop.f32.mrb[56].mxu1  ;;  %v2973_v16 = vpop.f32.mrb[29].mxu0  ;;  %v620_v6 = vld [vmem:[#allocation3 + $0x1000] sm:$0xff] }
 0x18d   :  { %v5192_v10 = vpop.f32.mrb[57].mxu1  ;;  %v2975_v13 = vpop.f32.mrb[30].mxu0 }
 0x18e   :  { %v5194_v48 = vpop.f32.mrb[58].mxu1  ;;  %v2977_v38 = vpop.f32.mrb[31].mxu0  ;;  %v14644_v13 = vpack.c.bf16 %v620_v6, %v613_v59 }
 0x18f   :  { %v5196_v20 = vpop.f32.mrb[59].mxu1  ;;  %v14640_v38 = vpack.c.bf16 %v605_v27, %v598_v37  ;;  %v619_v37 = vld [vmem:[#allocation3 + $0xff8] sm:$0xff]  ;;  %v898_v27 = vld [vmem:[#allocation3 + $0x18b0] sm:$0xff] }
 0x190   :  { %3240 = vmatmul.mubr.bf16.gmra.mrb[136].mxu0 %v14629_v51  ;;  %v14642_v20 = vpack.c.bf16 %v891_v56, %v884_v44  ;;  %17446 = vst [vmem:[#allocation90_spill] sm:$0xff] %v14644_v13  ;;  %v612_v51 = vld [vmem:[#allocation3 + $0xfc0] sm:$0xff]  ;;  %v905_v44 = vld [vmem:[#allocation3 + $0x18e8] sm:$0xff]  ;;  %v627_v56 = vld [vmem:[#allocation3 + $0x1038] sm:$0xff] }
 0x191   :  { %12746 = vmatmul.mubr.msk.bf16.gmra.mrb[164].mxu1 %vm2674_vm0, %v14631_v14  ;;  %3249 = vmatprep.mubr.bf16.mxu0 %v14633_v12  ;;  %17444 = vst [vmem:[#allocation88_spill] sm:$0xff] %v14640_v38 }
 0x192   :  { %5468 = vmatprep.mubr.bf16.mxu1 %v17401_v45  ;;  %17445 = vst [vmem:[#allocation89_spill] sm:$0xff] %v14642_v20 }
 0x193   :  { %v2981_v42 = vpop.f32.mrb[32].mxu0 }
 0x194   :  { %v5200_v26 = vpop.f32.mrb[60].mxu1  ;;  %v2983_v40 = vpop.f32.mrb[33].mxu0  ;;  %v634_v42 = vld [vmem:[#allocation3 + $0x1070] sm:$0xff] }
 0x195   :  { %v5202_v16 = vpop.f32.mrb[61].mxu1  ;;  %v2985_v10 = vpop.f32.mrb[34].mxu0 }
 0x196   :  { %v5204_v48 = vpop.f32.mrb[62].mxu1  ;;  %v2987_v14 = vpop.f32.mrb[35].mxu0  ;;  %v14655_v10 = vpack.c.bf16 %v634_v42, %v627_v56 }
 0x197   :  { %v5206_v12 = vpop.f32.mrb[63].mxu1  ;;  %v14651_v14 = vpack.c.bf16 %v619_v37, %v612_v51  ;;  %v633_v51 = vld [vmem:[#allocation3 + $0x1068] sm:$0xff]  ;;  %v912_v37 = vld [vmem:[#allocation3 + $0x1920] sm:$0xff] }
 0x198   :  { %3250 = vmatmul.mubr.bf16.gmra.mrb[140].mxu0 %v14640_v38  ;;  %v14653_v12 = vpack.c.bf16 %v905_v44, %v898_v27  ;;  %17449 = vst [vmem:[#allocation93_spill] sm:$0xff] %v14655_v10  ;;  %v626_v38 = vld [vmem:[#allocation3 + $0x1030] sm:$0xff]  ;;  %v919_v27 = vld [vmem:[#allocation3 + $0x1958] sm:$0xff]  ;;  %v641_v44 = vld [vmem:[#allocation3 + $0x10a8] sm:$0xff] }
 0x199   :  { %12747 = vmatmul.mubr.msk.bf16.gmra.mrb[168].mxu1 %vm2674_vm0, %v14642_v20  ;;  %3259 = vmatprep.mubr.bf16.mxu0 %v14644_v13  ;;  %17447 = vst [vmem:[#allocation91_spill] sm:$0xff] %v14651_v14 }
 0x19a   :  { %5478 = vmatprep.mubr.bf16.mxu1 %v17401_v45  ;;  %17448 = vst [vmem:[#allocation92_spill] sm:$0xff] %v14653_v12 }
 0x19b   :  { %v2991_v59 = vpop.f32.mrb[36].mxu0 }
 0x19c   :  { %v5210_v6 = vpop.f32.mrb[64].mxu1  ;;  %v2993_v26 = vpop.f32.mrb[37].mxu0  ;;  %v648_v59 = vld [vmem:[#allocation3 + $0x10e0] sm:$0xff] }
 0x19d   :  { %v5212_v40 = vpop.f32.mrb[65].mxu1  ;;  %v2995_v16 = vpop.f32.mrb[38].mxu0 }
 0x19e   :  { %v5214_v48 = vpop.f32.mrb[66].mxu1  ;;  %v2997_v20 = vpop.f32.mrb[39].mxu0  ;;  %v14666_v16 = vpack.c.bf16 %v648_v59, %v641_v44 }
 0x19f   :  { %v5216_v13 = vpop.f32.mrb[67].mxu1  ;;  %v14662_v20 = vpack.c.bf16 %v633_v51, %v626_v38  ;;  %v647_v38 = vld [vmem:[#allocation3 + $0x10d8] sm:$0xff]  ;;  %v926_v51 = vld [vmem:[#allocation3 + $0x1990] sm:$0xff] }
 0x1a0   :  { %3260 = vmatmul.mubr.bf16.gmra.mrb[144].mxu0 %v14651_v14  ;;  %v14664_v13 = vpack.c.bf16 %v919_v27, %v912_v37  ;;  %17452 = vst [vmem:[#allocation96_spill] sm:$0xff] %v14666_v16  ;;  %v640_v14 = vld [vmem:[#allocation3 + $0x10a0] sm:$0xff]  ;;  %v933_v37 = vld [vmem:[#allocation3 + $0x19c8] sm:$0xff]  ;;  %v655_v27 = vld [vmem:[#allocation3 + $0x1118] sm:$0xff] }
 0x1a1   :  { %12748 = vmatmul.mubr.msk.bf16.gmra.mrb[172].mxu1 %vm2674_vm0, %v14653_v12  ;;  %3269 = vmatprep.mubr.bf16.mxu0 %v14655_v10  ;;  %17450 = vst [vmem:[#allocation94_spill] sm:$0xff] %v14662_v20 }
 0x1a2   :  { %5488 = vmatprep.mubr.bf16.mxu1 %v17401_v45  ;;  %17451 = vst [vmem:[#allocation95_spill] sm:$0xff] %v14664_v13 }
 0x1a3   :  { %v3001_v56 = vpop.f32.mrb[40].mxu0 }
 0x1a4   :  { %v5220_v42 = vpop.f32.mrb[68].mxu1  ;;  %v3003_v6 = vpop.f32.mrb[41].mxu0  ;;  %v662_v56 = vld [vmem:[#allocation3 + $0x1150] sm:$0xff] }
 0x1a5   :  { %v5222_v26 = vpop.f32.mrb[69].mxu1  ;;  %v3005_v40 = vpop.f32.mrb[42].mxu0 }
 0x1a6   :  { %v5224_v48 = vpop.f32.mrb[70].mxu1  ;;  %v3007_v12 = vpop.f32.mrb[43].mxu0  ;;  %v14677_v40 = vpack.c.bf16 %v662_v56, %v655_v27 }
 0x1a7   :  { %v5226_v10 = vpop.f32.mrb[71].mxu1  ;;  %v14673_v12 = vpack.c.bf16 %v647_v38, %v640_v14  ;;  %v661_v14 = vld [vmem:[#allocation3 + $0x1148] sm:$0xff]  ;;  %v940_v38 = vld [vmem:[#allocation3 + $0x1a00] sm:$0xff] }
 0x1a8   :  { %3270 = vmatmul.mubr.bf16.gmra.mrb[148].mxu0 %v14662_v20  ;;  %v14675_v10 = vpack.c.bf16 %v933_v37, %v926_v51  ;;  %17455 = vst [vmem:[#allocation99_spill] sm:$0xff] %v14677_v40  ;;  %v654_v20 = vld [vmem:[#allocation3 + $0x1110] sm:$0xff]  ;;  %v947_v51 = vld [vmem:[#allocation3 + $0x1a38] sm:$0xff]  ;;  %v669_v37 = vld [vmem:[#allocation3 + $0x1188] sm:$0xff] }
 0x1a9   :  { %12749 = vmatmul.mubr.msk.bf16.gmra.mrb[176].mxu1 %vm2674_vm0, %v14664_v13  ;;  %3279 = vmatprep.mubr.bf16.mxu0 %v14666_v16  ;;  %17453 = vst [vmem:[#allocation97_spill] sm:$0xff] %v14673_v12 }
 0x1aa   :  { %5498 = vmatprep.mubr.bf16.mxu1 %v17401_v45  ;;  %17454 = vst [vmem:[#allocation98_spill] sm:$0xff] %v14675_v10 }
 0x1ab   :  { %v3011_v44 = vpop.f32.mrb[44].mxu0 }
 0x1ac   :  { %v5230_v59 = vpop.f32.mrb[72].mxu1  ;;  %v3013_v42 = vpop.f32.mrb[45].mxu0  ;;  %v676_v44 = vld [vmem:[#allocation3 + $0x11c0] sm:$0xff] }
 0x1ad   :  { %v5232_v6 = vpop.f32.mrb[73].mxu1  ;;  %v3015_v26 = vpop.f32.mrb[46].mxu0 }
 0x1ae   :  { %v5234_v48 = vpop.f32.mrb[74].mxu1  ;;  %v3017_v13 = vpop.f32.mrb[47].mxu0  ;;  %v14688_v26 = vpack.c.bf16 %v676_v44, %v669_v37 }
 0x1af   :  { %v5236_v16 = vpop.f32.mrb[75].mxu1  ;;  %v14684_v13 = vpack.c.bf16 %v661_v14, %v654_v20  ;;  %v675_v20 = vld [vmem:[#allocation3 + $0x11b8] sm:$0xff]  ;;  %v954_v14 = vld [vmem:[#allocation3 + $0x1a70] sm:$0xff] }
 0x1b0   :  { %3280 = vmatmul.mubr.bf16.gmra.mrb[152].mxu0 %v14673_v12  ;;  %v14686_v16 = vpack.c.bf16 %v947_v51, %v940_v38  ;;  %17458 = vst [vmem:[#allocation102_spill] sm:$0xff] %v14688_v26  ;;  %v668_v12 = vld [vmem:[#allocation3 + $0x1180] sm:$0xff]  ;;  %v961_v38 = vld [vmem:[#allocation3 + $0x1aa8] sm:$0xff]  ;;  %v683_v51 = vld [vmem:[#allocation3 + $0x11f8] sm:$0xff] }
 0x1b1   :  { %12750 = vmatmul.mubr.msk.bf16.gmra.mrb[180].mxu1 %vm2674_vm0, %v14675_v10  ;;  %3289 = vmatprep.mubr.bf16.mxu0 %v14677_v40  ;;  %17456 = vst [vmem:[#allocation100_spill] sm:$0xff] %v14684_v13 }
 0x1b2   :  { %5508 = vmatprep.mubr.bf16.mxu1 %v17401_v45  ;;  %17457 = vst [vmem:[#allocation101_spill] sm:$0xff] %v14686_v16 }
 0x1b3   :  { %v3021_v27 = vpop.f32.mrb[48].mxu0 }
 0x1b4   :  { %v5240_v56 = vpop.f32.mrb[76].mxu1  ;;  %v3023_v59 = vpop.f32.mrb[49].mxu0  ;;  %v690_v27 = vld [vmem:[#allocation3 + $0x1230] sm:$0xff] }
 0x1b5   :  { %v5242_v42 = vpop.f32.mrb[77].mxu1  ;;  %v3025_v6 = vpop.f32.mrb[50].mxu0 }
 0x1b6   :  { %v5244_v48 = vpop.f32.mrb[78].mxu1  ;;  %v3027_v10 = vpop.f32.mrb[51].mxu0  ;;  %v14699_v6 = vpack.c.bf16 %v690_v27, %v683_v51  ;;  %v704_v51 = vld [vmem:[#allocation3 + $0x12a0] sm:$0xff] }
 0x1b7   :  { %v5246_v40 = vpop.f32.mrb[79].mxu1  ;;  %v14695_v10 = vpack.c.bf16 %v675_v20, %v668_v12  ;;  %v689_v12 = vld [vmem:[#allocation3 + $0x1228] sm:$0xff]  ;;  %v968_v20 = vld [vmem:[#allocation3 + $0x1ae0] sm:$0xff] }
 0x1b8   :  { %3290 = vmatmul.mubr.bf16.gmra.mrb[156].mxu0 %v14684_v13  ;;  %v14697_v40 = vpack.c.bf16 %v961_v38, %v954_v14  ;;  %17461 = vst [vmem:[#allocation105_spill] sm:$0xff] %v14699_v6  ;;  %v975_v14 = vld [vmem:[#allocation3 + $0x1b18] sm:$0xff]  ;;  %v697_v38 = vld [vmem:[#allocation3 + $0x1268] sm:$0xff] }
 0x1b9   :  { %12751 = vmatmul.mubr.msk.bf16.gmra.mrb[184].mxu1 %vm2674_vm0, %v14686_v16  ;;  %3299 = vmatprep.mubr.bf16.mxu0 %v14688_v26  ;;  %17459 = vst [vmem:[#allocation103_spill] sm:$0xff] %v14695_v10  ;;  %v13488_v26 = vld [vmem:[#allocation6 + $0x204] ss:$16 sps:$4 sm:$0xff]  }
 0x1ba   :  { %5518 = vmatprep.mubr.bf16.mxu1 %v17401_v45  ;;  %17460 = vst [vmem:[#allocation104_spill] sm:$0xff] %v14697_v40  ;;  %3540 = vmatprep.subr.bf16.mxu0 %v13488_v26  ;;  %v13492_v26 = vld [vmem:[#allocation6 + $0x240] ss:$16 sps:$4 sm:$0xff]  }
 0x1bb   :  { %v3031_v37 = vpop.f32.mrb[52].mxu0  ;;  %3541 = vmatpush1.bf16.msra.mxu0 %v13486_v62  ;;  %v696_v62 = vld [vmem:[#allocation3 + $0x1260] sm:$0xff] }
 0x1bc   :  { %v5250_v44 = vpop.f32.mrb[80].mxu1  ;;  %v3033_v56 = vpop.f32.mrb[53].mxu0  ;;  %v682_v37 = vld [vmem:[#allocation3 + $0x11f0] sm:$0xff] }
 0x1bd   :  { %v5252_v59 = vpop.f32.mrb[81].mxu1  ;;  %v3035_v42 = vpop.f32.mrb[54].mxu0 }
 0x1be   :  { %v5254_v48 = vpop.f32.mrb[82].mxu1  ;;  %v3037_v16 = vpop.f32.mrb[55].mxu0  ;;  %v14706_v59 = vpack.c.bf16 %v689_v12, %v682_v37  ;;  %v14708_v42 = vpack.c.bf16 %v975_v14, %v968_v20  ;;  %v703_v37 = vld [vmem:[#allocation3 + $0x1298] sm:$0xff]  ;;  %v989_v12 = vld [vmem:[#allocation3 + $0x1b88] sm:$0xff]  ;;  %v13495_v14 = vld [vmem:[#allocation6 + $0x260] ss:$16 sps:$4 sm:$0xff]  }
 0x1bf   :  { %v5256_v13 = vpop.f32.mrb[83].mxu1  ;;  %v13491_v16 = vld [vmem:[#allocation6 + $0x224] ss:$16 sps:$4 sm:$0xff]   ;;  %v711_v20 = vld [vmem:[#allocation3 + $0x12d8] sm:$0xff] }
 0x1c0   :  { %3300 = vmatmul.mubr.bf16.gmra.mrb[160].mxu0 %v14695_v10  ;;  %v13489_v13 = vld [vmem:[#allocation6 + $0x220] ss:$16 sps:$4 sm:$0xff]   ;;  %17462 = vst [vmem:[#allocation106_spill] sm:$0xff] %v14706_v59  ;;  %17463 = vst [vmem:[#allocation107_spill] sm:$0xff] %v14708_v42  ;;  %3542 = vmatprep.subr.bf16.mxu0 %v13491_v16  ;;  %v14717_v16 = vpack.c.bf16 %v703_v37, %v696_v62  ;;  %v717_v62 = vld [vmem:[#allocation3 + $0x1308] sm:$0xff] }
 0x1c1   :  { %12752 = vmatmul.mubr.msk.bf16.gmra.mrb[188].mxu1 %vm2674_vm0, %v14697_v40  ;;  %3309 = vmatprep.mubr.bf16.mxu0 %v14699_v6  ;;  %v14710_v6 = vpack.c.bf16 %v704_v51, %v697_v38  ;;  %v996_v37 = vld [vmem:[#allocation3 + $0x1bc0] sm:$0xff] }
 0x1c2   :  { %5528 = vmatprep.mubr.bf16.mxu1 %v17401_v45  ;;  %3543 = vmatpush1.bf16.msra.mxu0 %v13489_v13 }
 0x1c3   :  { %v3041_v27 = vpop.f32.mrb[56].mxu0  ;;  %17464 = vst [vmem:[#allocation108_spill] sm:$0xff] %v14710_v6  ;;  %3544 = vmatprep.subr.bf16.mxu0 %v13494_v58  ;;  %v13498_v58 = vld [vmem:[#allocation6 + $0x280] ss:$16 sps:$4 sm:$0xff]  }
 0x1c4   :  { %v5260_v44 = vpop.f32.mrb[84].mxu1  ;;  %v3043_v56 = vpop.f32.mrb[57].mxu0 }
 0x1c5   :  { %v5262_v48 = vpop.f32.mrb[85].mxu1  ;;  %v3045_v40 = vpop.f32.mrb[58].mxu0 }
 0x1c6   :  { %v5264_v10 = vpop.f32.mrb[86].mxu1  ;;  %v3047_v1 = vpop.f32.mrb[59].mxu0  ;;  %v982_v40 = vld [vmem:[#allocation3 + $0x1b50] sm:$0xff]  ;;  %3545 = vmatpush1.bf16.msra.mxu0 %v13492_v26 }
 0x1c7   :  { %v5266_v8 = vpop.f32.mrb[87].mxu1  ;;  %v718_v10 = vld [vmem:[#allocation3 + $0x1310] sm:$0xff]  ;;  %v14719_v27 = vpack.c.bf16 %v989_v12, %v982_v40  ;;  %v1003_v40 = vld [vmem:[#allocation3 + $0x1bf8] sm:$0xff]  ;;  %v725_v12 = vld [vmem:[#allocation3 + $0x1348] sm:$0xff] }
 0x1c8   :  { %3310 = vmatmul.mubr.bf16.gmra.mrb[164].mxu0 %v14706_v59  ;;  %v13497_v1 = vld [vmem:[#allocation6 + $0x264] ss:$16 sps:$4 sm:$0xff]   ;;  %v14721_v56 = vpack.c.bf16 %v718_v10, %v711_v20  ;;  %v13501_v10 = vld [vmem:[#allocation6 + $0x2a0] ss:$16 sps:$4 sm:$0xff]  }
 0x1c9   :  { %12753 = vmatmul.mubr.msk.bf16.gmra.mrb[192].mxu1 %vm2674_vm0, %v14708_v42  ;;  %3319 = vmatprep.mubr.bf16.mxu0 %v14710_v6  ;;  %17465 = vst [vmem:[#allocation109_spill] sm:$0xff] %v14719_v27  ;;  %v13500_v6 = vld [vmem:[#allocation6 + $0x284] ss:$16 sps:$4 sm:$0xff]  }
 0x1ca   :  { %5538 = vmatprep.mubr.bf16.mxu1 %v17401_v45  ;;  %3546 = vmatprep.subr.bf16.mxu0 %v13497_v1  ;;  %17466 = vst [vmem:[#allocation110_spill] sm:$0xff] %v14721_v56  ;;  %v710_v26 = vld [vmem:[#allocation3 + $0x12d0] sm:$0xff]  ;;  %v732_v20 = vld [vmem:[#allocation3 + $0x1380] sm:$0xff] }
 0x1cb   :  { %v3051_v8 = vpop.f32.mrb[60].mxu0  ;;  %3547 = vmatpush1.bf16.msra.mxu0 %v13495_v14  ;;  %v14728_v14 = vpack.c.bf16 %v717_v62, %v710_v26  ;;  %v731_v26 = vld [vmem:[#allocation3 + $0x1378] sm:$0xff] }
 0x1cc   :  { %v5270_v38 = vpop.f32.mrb[88].mxu1  ;;  %v3053_v51 = vpop.f32.mrb[61].mxu0  ;;  %3548 = vmatprep.subr.bf16.mxu0 %v13500_v6  ;;  %v13504_v6 = vld [vmem:[#allocation6 + $0x2c0] ss:$16 sps:$4 sm:$0xff]   ;;  %v739_v62 = vld [vmem:[#allocation3 + $0x13b8] sm:$0xff] }
 0x1cd   :  { %v5272_v13 = vpop.f32.mrb[89].mxu1  ;;  %v3055_v44 = vpop.f32.mrb[62].mxu0  ;;  %v14730_v38 = vpack.c.bf16 %v1003_v40, %v996_v37  ;;  %v746_v37 = vld [vmem:[#allocation3 + $0x13f0] sm:$0xff] }
 0x1ce   :  { %v5274_v48 = vpop.f32.mrb[90].mxu1  ;;  %v3057_v42 = vpop.f32.mrb[63].mxu0  ;;  %v14732_v44 = vpack.c.bf16 %v732_v20, %v725_v12  ;;  %v13509_v40 = vld [vmem:[#allocation6 + $0x2e4] ss:$16 sps:$4 sm:$0xff]  }
 0x1cf   :  { %v5276_v59 = vpop.f32.mrb[91].mxu1  ;;  %v13503_v42 = vld [vmem:[#allocation6 + $0x2a4] ss:$16 sps:$4 sm:$0xff]   ;;  %3549 = vmatpush1.bf16.msra.mxu0 %v13498_v58  ;;  %17467 = vst [vmem:[#allocation111_spill] sm:$0xff] %v14730_v38 }
 0x1d0   :  { %3320 = vmatmul.mubr.bf16.gmra.mrb[168].mxu0 %v14717_v16  ;;  %3550 = vmatprep.subr.bf16.mxu0 %v13503_v42  ;;  %v724_v58 = vld [vmem:[#allocation3 + $0x1340] sm:$0xff] }
 0x1d1   :  { %12754 = vmatmul.mubr.msk.bf16.gmra.mrb[196].mxu1 %vm2674_vm0, %v14719_v27  ;;  %3329 = vmatprep.mubr.bf16.mxu0 %v14721_v56  ;;  %v14739_v42 = vpack.c.bf16 %v731_v26, %v724_v58  ;;  %v753_v58 = vld [vmem:[#allocation3 + $0x1428] sm:$0xff]  ;;  %v760_v26 = vld [vmem:[#allocation3 + $0x1460] sm:$0xff] }
 0x1d2   :  { %5548 = vmatprep.mubr.bf16.mxu1 %v17401_v45  ;;  %v13506_v45 = vld [vmem:[#allocation6 + $0x2c4] ss:$16 sps:$4 sm:$0xff]  }
 0x1d3   :  { %v3061_v59 = vpop.f32.mrb[64].mxu0  ;;  %3551 = vmatpush1.bf16.msra.mxu0 %v13501_v10 }
 0x1d4   :  { %v5280_v1 = vpop.f32.mrb[92].mxu1  ;;  %v3063_v8 = vpop.f32.mrb[65].mxu0  ;;  %3552 = vmatprep.subr.bf16.mxu0 %v13506_v45  ;;  %v738_v45 = vld [vmem:[#allocation3 + $0x13b0] sm:$0xff] }
 0x1d5   :  { %v5282_v51 = vpop.f32.mrb[93].mxu1  ;;  %v3065_v13 = vpop.f32.mrb[66].mxu0  ;;  %v14741_v1 = vpack.c.bf16 %v746_v37, %v739_v62  ;;  %v13515_v62 = vld [vmem:[#allocation6 + $0x324] ss:$16 sps:$4 sm:$0xff]  }
 0x1d6   :  { %v5284_v48 = vpop.f32.mrb[94].mxu1  ;;  %v3067_v27 = vpop.f32.mrb[67].mxu0  ;;  %v13512_v51 = vld [vmem:[#allocation6 + $0x304] ss:$16 sps:$4 sm:$0xff]  }
 0x1d7   :  { %v5286_v56 = vpop.f32.mrb[95].mxu1  ;;  %3553 = vmatpush1.bf16.msra.mxu0 %v13504_v6  ;;  %v13510_v48 = vld [vmem:[#allocation6 + $0x300] ss:$16 sps:$4 sm:$0xff]   ;;  %v745_v6 = vld [vmem:[#allocation3 + $0x13e8] sm:$0xff] }
 0x1d8   :  { %3330 = vmatmul.mubr.bf16.gmra.mrb[172].mxu0 %v14728_v14  ;;  %v13507_v56 = vld [vmem:[#allocation6 + $0x2e0] ss:$16 sps:$4 sm:$0xff]   ;;  %3554 = vmatprep.subr.bf16.mxu0 %v13509_v40 }
 0x1d9   :  { %12755 = vmatmul.mubr.msk.bf16.gmra.mrb[200].mxu1 %vm2674_vm0, %v14730_v38  ;;  %3339 = vmatprep.mubr.bf16.mxu0 %v14732_v44  ;;  %v13513_v40 = vld [vmem:[#allocation6 + $0x320] ss:$16 sps:$4 sm:$0xff]  }
 0x1da   :  { %5591 = vmatprep.mubr.bf16.mxu1 %v14232_v36 }
 0x1db   :  { %v3071_v27 = vpop.f32.mrb[68].mxu0  ;;  %3555 = vmatpush1.bf16.msra.mxu0 %v13507_v56 }
 0x1dc   :  { %v5290_v12 = vpop.f32.mrb[96].mxu1  ;;  %v3073_v20 = vpop.f32.mrb[69].mxu0  ;;  %3556 = vmatprep.subr.bf16.mxu0 %v13512_v51  ;;  %v752_v51 = vld [vmem:[#allocation3 + $0x1420] sm:$0xff] }
 0x1dd   :  { %v5292_v59 = vpop.f32.mrb[97].mxu1  ;;  %v3075_v10 = vpop.f32.mrb[70].mxu0  ;;  %v14747_v12 = vpack.c.bf16 %v745_v6, %v738_v45  ;;  %v767_v45 = vld [vmem:[#allocation3 + $0x1498] sm:$0xff]  ;;  %v774_v6 = vld [vmem:[#allocation3 + $0x14d0] sm:$0xff] }
 0x1de   :  { %v5294_v8 = vpop.f32.mrb[98].mxu1  ;;  %v3077_v36 = vpop.f32.mrb[71].mxu0  ;;  %v14749_v59 = vpack.c.bf16 %v760_v26, %v753_v58  ;;  %v13521_v58 = vld [vmem:[#allocation6 + $0x364] ss:$16 sps:$4 sm:$0xff]  }
 0x1df   :  { %v5296_v13 = vpop.f32.mrb[99].mxu1  ;;  %3557 = vmatpush1.bf16.msra.mxu0 %v13510_v48  ;;  %v13518_v8 = vld [vmem:[#allocation6 + $0x344] ss:$16 sps:$4 sm:$0xff]   ;;  %v759_v48 = vld [vmem:[#allocation3 + $0x1458] sm:$0xff] }
 0x1e0   :  { %3340 = vmatmul.mubr.bf16.gmra.mrb[176].mxu0 %v14739_v42  ;;  %3558 = vmatprep.subr.bf16.mxu0 %v13515_v62  ;;  %v13516_v13 = vld [vmem:[#allocation6 + $0x340] ss:$16 sps:$4 sm:$0xff]  }
 0x1e1   :  { %5592 = vmatmul.mubr.bf16.vlgmr.msra.gmra.mrb[204].mxu1 %v14255_v5  ;;  %3349 = vmatprep.mubr.bf16.mxu0 %v14741_v1  ;;  %v13519_v62 = vld [vmem:[#allocation6 + $0x360] ss:$16 sps:$4 sm:$0xff]  }
 0x1e2   :  { %5601 = vmatprep.mubr.bf16.mxu1 %v14259_v7 }
 0x1e3   :  { %v3081_v37 = vpop.f32.mrb[72].mxu0  ;;  %3559 = vmatpush1.bf16.msra.mxu0 %v13513_v40 }
 0x1e4   :  { %v5300_v27 = vpop.f32.mrb[100].mxu1  ;;  %v3083_v56 = vpop.f32.mrb[73].mxu0  ;;  %3560 = vmatprep.subr.bf16.mxu0 %v13518_v8  ;;  %v766_v8 = vld [vmem:[#allocation3 + $0x1490] sm:$0xff] }
 0x1e5   :  { %v5302_v20 = vpop.f32.mrb[101].mxu1  ;;  %v3085_v5 = vpop.f32.mrb[74].mxu0  ;;  %v14755_v27 = vpack.c.bf16 %v759_v48, %v752_v51  ;;  %v781_v51 = vld [vmem:[#allocation3 + $0x1508] sm:$0xff]  ;;  %v788_v48 = vld [vmem:[#allocation3 + $0x1540] sm:$0xff] }
 0x1e6   :  { %v5304_v10 = vpop.f32.mrb[102].mxu1  ;;  %v3087_v7 = vpop.f32.mrb[75].mxu0  ;;  %v14757_v20 = vpack.c.bf16 %v774_v6, %v767_v45  ;;  %v13527_v45 = vld [vmem:[#allocation6 + $0x3a4] ss:$16 sps:$4 sm:$0xff]  }
 0x1e7   :  { %v5306_v36 = vpop.f32.mrb[103].mxu1  ;;  %3561 = vmatpush1.bf16.msra.mxu0 %v13516_v13  ;;  %v13524_v10 = vld [vmem:[#allocation6 + $0x384] ss:$16 sps:$4 sm:$0xff]   ;;  %v773_v13 = vld [vmem:[#allocation3 + $0x14c8] sm:$0xff] }
 0x1e8   :  { %3350 = vmatmul.mubr.bf16.gmra.mrb[180].mxu0 %v14747_v12  ;;  %3562 = vmatprep.subr.bf16.mxu0 %v13521_v58  ;;  %v13522_v36 = vld [vmem:[#allocation6 + $0x380] ss:$16 sps:$4 sm:$0xff]  }
 0x1e9   :  { %5602 = vmatmul.mubr.bf16.gmra.mrb[208].mxu1 %v14266_v15  ;;  %3359 = vmatprep.mubr.bf16.mxu0 %v14749_v59  ;;  %v13525_v58 = vld [vmem:[#allocation6 + $0x3a0] ss:$16 sps:$4 sm:$0xff]  }
 0x1ea   :  { %5611 = vmatprep.mubr.bf16.mxu1 %v14270_v17 }
 0x1eb   :  { %v3091_v26 = vpop.f32.mrb[76].mxu0  ;;  %3563 = vmatpush1.bf16.msra.mxu0 %v13519_v62 }
 0x1ec   :  { %v5310_v37 = vpop.f32.mrb[104].mxu1  ;;  %v3093_v40 = vpop.f32.mrb[77].mxu0  ;;  %3564 = vmatprep.subr.bf16.mxu0 %v13524_v10  ;;  %v780_v10 = vld [vmem:[#allocation3 + $0x1500] sm:$0xff] }
 0x1ed   :  { %v5312_v56 = vpop.f32.mrb[105].mxu1  ;;  %v3095_v15 = vpop.f32.mrb[78].mxu0  ;;  %v14763_v37 = vpack.c.bf16 %v773_v13, %v766_v8  ;;  %v795_v8 = vld [vmem:[#allocation3 + $0x1578] sm:$0xff]  ;;  %v802_v13 = vld [vmem:[#allocation3 + $0x15b0] sm:$0xff] }
 0x1ee   :  { %v5314_v5 = vpop.f32.mrb[106].mxu1  ;;  %v3097_v17 = vpop.f32.mrb[79].mxu0  ;;  %v14765_v56 = vpack.c.bf16 %v788_v48, %v781_v51  ;;  %v13533_v51 = vld [vmem:[#allocation6 + $0x3e4] ss:$16 sps:$4 sm:$0xff]  }
 0x1ef   :  { %v5316_v7 = vpop.f32.mrb[107].mxu1  ;;  %3565 = vmatpush1.bf16.msra.mxu0 %v13522_v36  ;;  %v13530_v5 = vld [vmem:[#allocation6 + $0x3c4] ss:$16 sps:$4 sm:$0xff]   ;;  %v787_v36 = vld [vmem:[#allocation3 + $0x1538] sm:$0xff] }
 0x1f0   :  { %3360 = vmatmul.mubr.bf16.gmra.mrb[184].mxu0 %v14755_v27  ;;  %3566 = vmatprep.subr.bf16.mxu0 %v13527_v45  ;;  %v13528_v7 = vld [vmem:[#allocation6 + $0x3c0] ss:$16 sps:$4 sm:$0xff]  }
 0x1f1   :  { %5612 = vmatmul.mubr.bf16.gmra.mrb[212].mxu1 %v14277_v25  ;;  %3369 = vmatprep.mubr.bf16.mxu0 %v14757_v20  ;;  %v13531_v45 = vld [vmem:[#allocation6 + $0x3e0] ss:$16 sps:$4 sm:$0xff]  }
 0x1f2   :  { %5621 = vmatprep.mubr.bf16.mxu1 %v14281_v28 }
 0x1f3   :  { %v3101_v6 = vpop.f32.mrb[80].mxu0  ;;  %3567 = vmatpush1.bf16.msra.mxu0 %v13525_v58 }
 0x1f4   :  { %v5320_v26 = vpop.f32.mrb[108].mxu1  ;;  %v3103_v62 = vpop.f32.mrb[81].mxu0  ;;  %3568 = vmatprep.subr.bf16.mxu0 %v13530_v5  ;;  %v801_v5 = vld [vmem:[#allocation3 + $0x15a8] sm:$0xff] }
 0x1f5   :  { %v5322_v40 = vpop.f32.mrb[109].mxu1  ;;  %v3105_v25 = vpop.f32.mrb[82].mxu0  ;;  %v14771_v26 = vpack.c.bf16 %v787_v36, %v780_v10 }
 0x1f6   :  { %v5324_v15 = vpop.f32.mrb[110].mxu1  ;;  %v3107_v28 = vpop.f32.mrb[83].mxu0  ;;  %v14773_v40 = vpack.c.bf16 %v802_v13, %v795_v8 }
 0x1f7   :  { %v5326_v17 = vpop.f32.mrb[111].mxu1  ;;  %3569 = vmatpush1.bf16.msra.mxu0 %v13528_v7  ;;  %v794_v28 = vld [vmem:[#allocation3 + $0x1570] sm:$0xff]  ;;  %v816_v7 = vld [vmem:[#allocation3 + $0x1620] sm:$0xff] }
 0x1f8   :  { %3370 = vmatmul.mubr.bf16.gmra.mrb[188].mxu0 %v14763_v37  ;;  %3570 = vmatprep.subr.bf16.mxu0 %v13533_v51  ;;  %v809_v17 = vld [vmem:[#allocation3 + $0x15e8] sm:$0xff]  ;;  %v14779_v13 = vpack.c.bf16 %v801_v5, %v794_v28 }
 0x1f9   :  { %5622 = vmatmul.mubr.bf16.gmra.mrb[216].mxu1 %v14288_v35  ;;  %3379 = vmatprep.mubr.bf16.mxu0 %v14765_v56 }
 0x1fa   :  { %5631 = vmatprep.mubr.bf16.mxu1 %v14292_v39 }
 0x1fb   :  { %v3111_v48 = vpop.f32.mrb[84].mxu0  ;;  %3571 = vmatpush1.bf16.msra.mxu0 %v13531_v45  ;;  %v14781_v45 = vpack.c.bf16 %v816_v7, %v809_v17 }
 0x1fc   :  { %v5330_v6 = vpop.f32.mrb[112].mxu1  ;;  %v3113_v58 = vpop.f32.mrb[85].mxu0 }
 0x1fd   :  { %v5332_v62 = vpop.f32.mrb[113].mxu1  ;;  %v3115_v35 = vpop.f32.mrb[86].mxu0 }
 0x1fe   :  { %v5334_v25 = vpop.f32.mrb[114].mxu1  ;;  %v3117_v39 = vpop.f32.mrb[87].mxu0  ;;  %v815_v62 = vld [vmem:[#allocation3 + $0x1618] sm:$0xff] }
 0x1ff   :  { %v5336_v15 = vpop.f32.mrb[115].mxu1  ;;  %v823_v35 = vld [vmem:[#allocation3 + $0x1658] sm:$0xff]  ;;  %v830_v25 = vld [vmem:[#allocation3 + $0x1690] sm:$0xff] }
 0x200   :  { %3380 = vmatmul.mubr.bf16.gmra.mrb[192].mxu0 %v14771_v26 }
 0x201   :  { %5632 = vmatmul.mubr.bf16.gmra.mrb[220].mxu1 %v14299_v47  ;;  %3389 = vmatprep.mubr.bf16.mxu0 %v14773_v40 }
 0x202   :  { %5641 = vmatprep.mubr.bf16.mxu1 %v14303_v49  ;;  %v808_v49 = vld [vmem:[#allocation3 + $0x15e0] sm:$0xff] }
 0x203   :  { %v3121_v10 = vpop.f32.mrb[88].mxu0  ;;  %v14787_v5 = vpack.c.bf16 %v815_v62, %v808_v49 }
 0x204   :  { %v5340_v36 = vpop.f32.mrb[116].mxu1  ;;  %v3123_v8 = vpop.f32.mrb[89].mxu0  ;;  %v14789_v10 = vpack.c.bf16 %v830_v25, %v823_v35 }
 0x205   :  { %v5342_v51 = vpop.f32.mrb[117].mxu1  ;;  %v3125_v48 = vpop.f32.mrb[90].mxu0 }
 0x206   :  { %v5344_v6 = vpop.f32.mrb[118].mxu1  ;;  %v3127_v58 = vpop.f32.mrb[91].mxu0  ;;  %v829_v51 = vld [vmem:[#allocation3 + $0x1688] sm:$0xff] }
 0x207   :  { %v5346_v47 = vpop.f32.mrb[119].mxu1  ;;  %v837_v48 = vld [vmem:[#allocation3 + $0x16c8] sm:$0xff]  ;;  %v844_v6 = vld [vmem:[#allocation3 + $0x1700] sm:$0xff] }
 0x208   :  { %3390 = vmatmul.mubr.bf16.gmra.mrb[196].mxu0 %v14779_v13 }
 0x209   :  { %5642 = vmatmul.mubr.bf16.gmra.mrb[224].mxu1 %v14310_v57  ;;  %3399 = vmatprep.mubr.bf16.mxu0 %v14781_v45 }
 0x20a   :  { %5651 = vmatprep.mubr.bf16.mxu1 %v14314_v60  ;;  %v822_v60 = vld [vmem:[#allocation3 + $0x1650] sm:$0xff] }
 0x20b   :  { %v3131_v39 = vpop.f32.mrb[92].mxu0  ;;  %v14795_v62 = vpack.c.bf16 %v829_v51, %v822_v60 }
 0x20c   :  { %v5350_v15 = vpop.f32.mrb[120].mxu1  ;;  %v3133_v28 = vpop.f32.mrb[93].mxu0  ;;  %v14797_v39 = vpack.c.bf16 %v844_v6, %v837_v48 }
 0x20d   :  { %v5352_v17 = vpop.f32.mrb[121].mxu1  ;;  %v3135_v7 = vpop.f32.mrb[94].mxu0 }
 0x20e   :  { %v5354_v36 = vpop.f32.mrb[122].mxu1  ;;  %v3137_v8 = vpop.f32.mrb[95].mxu0  ;;  %v843_v17 = vld [vmem:[#allocation3 + $0x16f8] sm:$0xff] }
 0x20f   :  { %v5356_v57 = vpop.f32.mrb[123].mxu1  ;;  %v851_v7 = vld [vmem:[#allocation3 + $0x1738] sm:$0xff]  ;;  %v858_v36 = vld [vmem:[#allocation3 + $0x1770] sm:$0xff] }
 0x210   :  { %3400 = vmatmul.mubr.bf16.gmra.mrb[200].mxu0 %v14787_v5 }
 0x211   :  { %5652 = vmatmul.mubr.bf16.gmra.mrb[228].mxu1 %v14321_v4  ;;  %3409 = vmatprep.mubr.bf16.mxu0 %v14789_v10 }
 0x212   :  { %5661 = vmatprep.mubr.bf16.mxu1 %v14325_v9  ;;  %v836_v9 = vld [vmem:[#allocation3 + $0x16c0] sm:$0xff] }
 0x213   :  { %v3141_v58 = vpop.f32.mrb[96].mxu0  ;;  %v14803_v51 = vpack.c.bf16 %v843_v17, %v836_v9 }
 0x214   :  { %v5360_v47 = vpop.f32.mrb[124].mxu1  ;;  %v3143_v49 = vpop.f32.mrb[97].mxu0  ;;  %v14805_v58 = vpack.c.bf16 %v858_v36, %v851_v7 }
 0x215   :  { %v5362_v35 = vpop.f32.mrb[125].mxu1  ;;  %v3145_v25 = vpop.f32.mrb[98].mxu0 }
 0x216   :  { %v5364_v15 = vpop.f32.mrb[126].mxu1  ;;  %v3147_v28 = vpop.f32.mrb[99].mxu0  ;;  %v857_v35 = vld [vmem:[#allocation3 + $0x1768] sm:$0xff] }
 0x217   :  { %v5366_v4 = vpop.f32.mrb[127].mxu1  ;;  %v865_v25 = vld [vmem:[#allocation3 + $0x17a8] sm:$0xff]  ;;  %v872_v15 = vld [vmem:[#allocation3 + $0x17e0] sm:$0xff] }
 0x218   :  { %3410 = vmatmul.mubr.bf16.gmra.mrb[204].mxu0 %v14795_v62 }
 0x219   :  { %5662 = vmatmul.mubr.bf16.gmra.mrb[232].mxu1 %v14332_v21  ;;  %3419 = vmatprep.mubr.bf16.mxu0 %v14797_v39 }
 0x21a   :  { %5671 = vmatprep.mubr.bf16.mxu1 %v14336_v23  ;;  %v850_v23 = vld [vmem:[#allocation3 + $0x1730] sm:$0xff] }
 0x21b   :  { %v3151_v8 = vpop.f32.mrb[100].mxu0  ;;  %v14811_v17 = vpack.c.bf16 %v857_v35, %v850_v23 }
 0x21c   :  { %v5370_v57 = vpop.f32.mrb[128].mxu1  ;;  %v3153_v60 = vpop.f32.mrb[101].mxu0  ;;  %v14813_v8 = vpack.c.bf16 %v872_v15, %v865_v25 }
 0x21d   :  { %v5372_v48 = vpop.f32.mrb[129].mxu1  ;;  %v3155_v6 = vpop.f32.mrb[102].mxu0 }
 0x21e   :  { %v5374_v47 = vpop.f32.mrb[130].mxu1  ;;  %v3157_v49 = vpop.f32.mrb[103].mxu0  ;;  %v871_v48 = vld [vmem:[#allocation3 + $0x17d8] sm:$0xff] }
 0x21f   :  { %v5376_v21 = vpop.f32.mrb[131].mxu1  ;;  %v879_v6 = vld [vmem:[#allocation3 + $0x1818] sm:$0xff]  ;;  %v886_v47 = vld [vmem:[#allocation3 + $0x1850] sm:$0xff] }
 0x220   :  { %3420 = vmatmul.mubr.bf16.gmra.mrb[208].mxu0 %v14803_v51 }
 0x221   :  { %5672 = vmatmul.mubr.bf16.gmra.mrb[236].mxu1 %v14343_v34  ;;  %3429 = vmatprep.mubr.bf16.mxu0 %v14805_v58 }
 0x222   :  { %5681 = vmatprep.mubr.bf16.mxu1 %v14347_v41  ;;  %v864_v41 = vld [vmem:[#allocation3 + $0x17a0] sm:$0xff] }
 0x223   :  { %v3161_v28 = vpop.f32.mrb[104].mxu0  ;;  %v14819_v35 = vpack.c.bf16 %v871_v48, %v864_v41 }
 0x224   :  { %v5380_v4 = vpop.f32.mrb[132].mxu1  ;;  %v3163_v9 = vpop.f32.mrb[105].mxu0  ;;  %v14821_v28 = vpack.c.bf16 %v886_v47, %v879_v6 }
 0x225   :  { %v5382_v7 = vpop.f32.mrb[133].mxu1  ;;  %v3165_v36 = vpop.f32.mrb[106].mxu0 }
 0x226   :  { %v5384_v57 = vpop.f32.mrb[134].mxu1  ;;  %v3167_v60 = vpop.f32.mrb[107].mxu0  ;;  %v885_v7 = vld [vmem:[#allocation3 + $0x1848] sm:$0xff] }
 0x227   :  { %v5386_v34 = vpop.f32.mrb[135].mxu1  ;;  %v893_v36 = vld [vmem:[#allocation3 + $0x1888] sm:$0xff]  ;;  %v900_v57 = vld [vmem:[#allocation3 + $0x18c0] sm:$0xff] }
 0x228   :  { %3430 = vmatmul.mubr.bf16.gmra.mrb[212].mxu0 %v14811_v17 }
 0x229   :  { %5682 = vmatmul.mubr.bf16.gmra.mrb[240].mxu1 %v14354_v53  ;;  %3439 = vmatprep.mubr.bf16.mxu0 %v14813_v8 }
 0x22a   :  { %5691 = vmatprep.mubr.bf16.mxu1 %v14358_v55  ;;  %v878_v55 = vld [vmem:[#allocation3 + $0x1810] sm:$0xff] }
 0x22b   :  { %v3171_v49 = vpop.f32.mrb[108].mxu0  ;;  %v14827_v48 = vpack.c.bf16 %v885_v7, %v878_v55 }
 0x22c   :  { %v5390_v21 = vpop.f32.mrb[136].mxu1  ;;  %v3173_v23 = vpop.f32.mrb[109].mxu0  ;;  %v14829_v49 = vpack.c.bf16 %v900_v57, %v893_v36 }
 0x22d   :  { %v5392_v25 = vpop.f32.mrb[137].mxu1  ;;  %v3175_v15 = vpop.f32.mrb[110].mxu0 }
 0x22e   :  { %v5394_v4 = vpop.f32.mrb[138].mxu1  ;;  %v3177_v9 = vpop.f32.mrb[111].mxu0  ;;  %v899_v25 = vld [vmem:[#allocation3 + $0x18b8] sm:$0xff] }
 0x22f   :  { %v5396_v53 = vpop.f32.mrb[139].mxu1  ;;  %v907_v15 = vld [vmem:[#allocation3 + $0x18f8] sm:$0xff]  ;;  %v914_v4 = vld [vmem:[#allocation3 + $0x1930] sm:$0xff] }
 0x230   :  { %3440 = vmatmul.mubr.bf16.gmra.mrb[216].mxu0 %v14819_v35 }
 0x231   :  { %5692 = vmatmul.mubr.bf16.gmra.mrb[244].mxu1 %v14365_v3  ;;  %3449 = vmatprep.mubr.bf16.mxu0 %v14821_v28 }
 0x232   :  { %5701 = vmatprep.mubr.bf16.mxu1 %v14369_v11  ;;  %v892_v11 = vld [vmem:[#allocation3 + $0x1880] sm:$0xff] }
 0x233   :  { %v3181_v60 = vpop.f32.mrb[112].mxu0  ;;  %v14835_v7 = vpack.c.bf16 %v899_v25, %v892_v11 }
 0x234   :  { %v5400_v34 = vpop.f32.mrb[140].mxu1  ;;  %v3183_v41 = vpop.f32.mrb[113].mxu0  ;;  %v14837_v60 = vpack.c.bf16 %v914_v4, %v907_v15 }
 0x235   :  { %v5402_v6 = vpop.f32.mrb[141].mxu1  ;;  %v3185_v47 = vpop.f32.mrb[114].mxu0 }
 0x236   :  { %v5404_v21 = vpop.f32.mrb[142].mxu1  ;;  %v3187_v23 = vpop.f32.mrb[115].mxu0  ;;  %v913_v6 = vld [vmem:[#allocation3 + $0x1928] sm:$0xff] }
 0x237   :  { %v5406_v3 = vpop.f32.mrb[143].mxu1  ;;  %v921_v47 = vld [vmem:[#allocation3 + $0x1968] sm:$0xff]  ;;  %v928_v21 = vld [vmem:[#allocation3 + $0x19a0] sm:$0xff] }
 0x238   :  { %3450 = vmatmul.mubr.bf16.gmra.mrb[220].mxu0 %v14827_v48 }
 0x239   :  { %5702 = vmatmul.mubr.bf16.gmra.mrb[248].mxu1 %v14376_v30  ;;  %3459 = vmatprep.mubr.bf16.mxu0 %v14829_v49 }
 0x23a   :  { %5711 = vmatprep.mubr.bf16.mxu1 %v14380_v32  ;;  %v906_v32 = vld [vmem:[#allocation3 + $0x18f0] sm:$0xff] }
 0x23b   :  { %v3191_v9 = vpop.f32.mrb[116].mxu0  ;;  %v14843_v25 = vpack.c.bf16 %v913_v6, %v906_v32 }
 0x23c   :  { %v5410_v53 = vpop.f32.mrb[144].mxu1  ;;  %v3193_v55 = vpop.f32.mrb[117].mxu0  ;;  %v14845_v9 = vpack.c.bf16 %v928_v21, %v921_v47 }
 0x23d   :  { %v5412_v36 = vpop.f32.mrb[145].mxu1  ;;  %v3195_v57 = vpop.f32.mrb[118].mxu0 }
 0x23e   :  { %v5414_v34 = vpop.f32.mrb[146].mxu1  ;;  %v3197_v41 = vpop.f32.mrb[119].mxu0  ;;  %v927_v36 = vld [vmem:[#allocation3 + $0x1998] sm:$0xff] }
 0x23f   :  { %v5416_v30 = vpop.f32.mrb[147].mxu1  ;;  %v935_v57 = vld [vmem:[#allocation3 + $0x19d8] sm:$0xff]  ;;  %v942_v34 = vld [vmem:[#allocation3 + $0x1a10] sm:$0xff] }
 0x240   :  { %3460 = vmatmul.mubr.bf16.gmra.mrb[224].mxu0 %v14835_v7 }
 0x241   :  { %5712 = vmatmul.mubr.bf16.gmra.mrb[252].mxu1 %v14387_v52  ;;  %3469 = vmatprep.mubr.bf16.mxu0 %v14837_v60 }
 0x242   :  { %5721 = vmatprep.mubr.bf16.mxu1 %v14391_v61  ;;  %v920_v61 = vld [vmem:[#allocation3 + $0x1960] sm:$0xff] }
 0x243   :  { %v3201_v23 = vpop.f32.mrb[120].mxu0  ;;  %v14851_v6 = vpack.c.bf16 %v927_v36, %v920_v61 }
 0x244   :  { %v5420_v3 = vpop.f32.mrb[148].mxu1  ;;  %v3203_v11 = vpop.f32.mrb[121].mxu0  ;;  %v14853_v23 = vpack.c.bf16 %v942_v34, %v935_v57 }
 0x245   :  { %v5422_v15 = vpop.f32.mrb[149].mxu1  ;;  %v3205_v4 = vpop.f32.mrb[122].mxu0 }
 0x246   :  { %v5424_v53 = vpop.f32.mrb[150].mxu1  ;;  %v3207_v55 = vpop.f32.mrb[123].mxu0  ;;  %v941_v15 = vld [vmem:[#allocation3 + $0x1a08] sm:$0xff] }
 0x247   :  { %v5426_v52 = vpop.f32.mrb[151].mxu1  ;;  %v949_v4 = vld [vmem:[#allocation3 + $0x1a48] sm:$0xff]  ;;  %v956_v53 = vld [vmem:[#allocation3 + $0x1a80] sm:$0xff] }
 0x248   :  { %3470 = vmatmul.mubr.bf16.gmra.mrb[228].mxu0 %v14843_v25 }
 0x249   :  { %5722 = vmatmul.mubr.bf16.gmra.mrb[0].mxu1 %v14398_v18  ;;  %3479 = vmatprep.mubr.bf16.mxu0 %v14845_v9 }
 0x24a   :  { %5731 = vmatprep.mubr.bf16.mxu1 %v14402_v24  ;;  %v934_v24 = vld [vmem:[#allocation3 + $0x19d0] sm:$0xff] }
 0x24b   :  { %v3211_v41 = vpop.f32.mrb[124].mxu0  ;;  %v14859_v36 = vpack.c.bf16 %v941_v15, %v934_v24 }
 0x24c   :  { %v5430_v30 = vpop.f32.mrb[152].mxu1  ;;  %v3213_v32 = vpop.f32.mrb[125].mxu0  ;;  %v14861_v41 = vpack.c.bf16 %v956_v53, %v949_v4 }
 0x24d   :  { %v5432_v47 = vpop.f32.mrb[153].mxu1  ;;  %v3215_v21 = vpop.f32.mrb[126].mxu0 }
 0x24e   :  { %v5434_v3 = vpop.f32.mrb[154].mxu1  ;;  %v3217_v11 = vpop.f32.mrb[127].mxu0  ;;  %v955_v47 = vld [vmem:[#allocation3 + $0x1a78] sm:$0xff] }
 0x24f   :  { %v5436_v18 = vpop.f32.mrb[155].mxu1  ;;  %v963_v21 = vld [vmem:[#allocation3 + $0x1ab8] sm:$0xff]  ;;  %v970_v3 = vld [vmem:[#allocation3 + $0x1af0] sm:$0xff] }
 0x250   :  { %3480 = vmatmul.mubr.bf16.gmra.mrb[232].mxu0 %v14851_v6 }
 0x251   :  { %5732 = vmatmul.mubr.bf16.gmra.mrb[4].mxu1 %v14409_v50  ;;  %3489 = vmatprep.mubr.bf16.mxu0 %v14853_v23 }
 0x252   :  { %5741 = vmatprep.mubr.bf16.mxu1 %v14413_v63  ;;  %v948_v63 = vld [vmem:[#allocation3 + $0x1a40] sm:$0xff] }
 0x253   :  { %v3221_v55 = vpop.f32.mrb[128].mxu0  ;;  %v14867_v15 = vpack.c.bf16 %v955_v47, %v948_v63 }
 0x254   :  { %v5440_v52 = vpop.f32.mrb[156].mxu1  ;;  %v3223_v61 = vpop.f32.mrb[129].mxu0  ;;  %v14869_v55 = vpack.c.bf16 %v970_v3, %v963_v21 }
 0x255   :  { %v5442_v57 = vpop.f32.mrb[157].mxu1  ;;  %v3225_v34 = vpop.f32.mrb[130].mxu0 }
 0x256   :  { %v5444_v30 = vpop.f32.mrb[158].mxu1  ;;  %v3227_v32 = vpop.f32.mrb[131].mxu0  ;;  %v969_v57 = vld [vmem:[#allocation3 + $0x1ae8] sm:$0xff] }
 0x257   :  { %v5446_v50 = vpop.f32.mrb[159].mxu1  ;;  %v977_v34 = vld [vmem:[#allocation3 + $0x1b28] sm:$0xff]  ;;  %v984_v30 = vld [vmem:[#allocation3 + $0x1b60] sm:$0xff] }
 0x258   :  { %3490 = vmatmul.mubr.bf16.gmra.mrb[236].mxu0 %v14859_v36 }
 0x259   :  { %5742 = vmatmul.mubr.bf16.gmra.mrb[8].mxu1 %v14420_v33  ;;  %3499 = vmatprep.mubr.bf16.mxu0 %v14861_v41 }
 0x25a   :  { %5751 = vmatprep.mubr.bf16.mxu1 %v14424_v43  ;;  %v962_v43 = vld [vmem:[#allocation3 + $0x1ab0] sm:$0xff] }
 0x25b   :  { %v3231_v11 = vpop.f32.mrb[132].mxu0  ;;  %v14875_v47 = vpack.c.bf16 %v969_v57, %v962_v43 }
 0x25c   :  { %v5450_v18 = vpop.f32.mrb[160].mxu1  ;;  %v3233_v24 = vpop.f32.mrb[133].mxu0  ;;  %v14877_v11 = vpack.c.bf16 %v984_v30, %v977_v34 }
 0x25d   :  { %v5452_v4 = vpop.f32.mrb[161].mxu1  ;;  %v3235_v53 = vpop.f32.mrb[134].mxu0 }
 0x25e   :  { %v5454_v52 = vpop.f32.mrb[162].mxu1  ;;  %v3237_v61 = vpop.f32.mrb[135].mxu0  ;;  %v983_v4 = vld [vmem:[#allocation3 + $0x1b58] sm:$0xff] }
 0x25f   :  { %v5456_v33 = vpop.f32.mrb[163].mxu1  ;;  %v991_v53 = vld [vmem:[#allocation3 + $0x1b98] sm:$0xff]  ;;  %v998_v52 = vld [vmem:[#allocation3 + $0x1bd0] sm:$0xff] }
 0x260   :  { %3500 = vmatmul.mubr.bf16.gmra.mrb[240].mxu0 %v14867_v15 }
 0x261   :  { %5752 = vmatmul.mubr.bf16.gmra.mrb[12].mxu1 %v14431_v2  ;;  %3509 = vmatprep.mubr.bf16.mxu0 %v14869_v55 }
 0x262   :  { %5761 = vmatprep.mubr.bf16.mxu1 %v14435_v19  ;;  %v976_v19 = vld [vmem:[#allocation3 + $0x1b20] sm:$0xff] }
 0x263   :  { %v3241_v32 = vpop.f32.mrb[136].mxu0  ;;  %v14883_v57 = vpack.c.bf16 %v983_v4, %v976_v19 }
 0x264   :  { %v5460_v50 = vpop.f32.mrb[164].mxu1  ;;  %v3243_v63 = vpop.f32.mrb[137].mxu0  ;;  %v14885_v32 = vpack.c.bf16 %v998_v52, %v991_v53 }
 0x265   :  { %v5462_v21 = vpop.f32.mrb[165].mxu1  ;;  %v3245_v3 = vpop.f32.mrb[138].mxu0 }
 0x266   :  { %v5464_v18 = vpop.f32.mrb[166].mxu1  ;;  %v3247_v24 = vpop.f32.mrb[139].mxu0  ;;  %v997_v21 = vld [vmem:[#allocation3 + $0x1bc8] sm:$0xff]  ;;  %v111_v3 = vld [vmem:[#allocation3 + $0x18] sm:$0xff] }
 0x267   :  { %v5466_v2 = vpop.f32.mrb[167].mxu1  ;;  %v118_v18 = vld [vmem:[#allocation3 + $0x50] sm:$0xff] }
 0x268   :  { %3510 = vmatmul.mubr.bf16.gmra.mrb[244].mxu0 %v14875_v47 }
 0x269   :  { %5762 = vmatmul.mubr.bf16.gmra.mrb[16].mxu1 %v14442_v46  ;;  %3519 = vmatprep.mubr.bf16.mxu0 %v14877_v11 }
 0x26a   :  { %5771 = vmatprep.mubr.bf16.mxu1 %v14446_v31  ;;  %v990_v31 = vld [vmem:[#allocation3 + $0x1b90] sm:$0xff] }
 0x26b   :  { %v3251_v61 = vpop.f32.mrb[140].mxu0  ;;  %v14891_v4 = vpack.c.bf16 %v997_v21, %v990_v31 }
 0x26c   :  { %v5470_v33 = vpop.f32.mrb[168].mxu1  ;;  %v3253_v43 = vpop.f32.mrb[141].mxu0  ;;  %v14893_v61 = vpack.c.bf16 %v118_v18, %v111_v3 }
 0x26d   :  { %v5472_v34 = vpop.f32.mrb[169].mxu1  ;;  %v3255_v30 = vpop.f32.mrb[142].mxu0 }
 0x26e   :  { %v5474_v50 = vpop.f32.mrb[170].mxu1  ;;  %v3257_v63 = vpop.f32.mrb[143].mxu0  ;;  %v117_v34 = vld [vmem:[#allocation3 + $0x48] sm:$0xff] }
 0x26f   :  { %v5476_v46 = vpop.f32.mrb[171].mxu1  ;;  %v125_v30 = vld [vmem:[#allocation3 + $0x88] sm:$0xff]  ;;  %v132_v50 = vld [vmem:[#allocation3 + $0xc0] sm:$0xff] }
 0x270   :  { %3520 = vmatmul.mubr.bf16.gmra.mrb[248].mxu0 %v14883_v57 }
 0x271   :  { %5772 = vmatmul.mubr.bf16.gmra.mrb[20].mxu1 %v14453_v29  ;;  %3529 = vmatprep.mubr.bf16.mxu0 %v14885_v32 }
 0x272   :  { %5781 = vmatprep.mubr.bf16.mxu1 %v14457_v54  ;;  %v110_v54 = vld [vmem:[#allocation3 + $0x10] sm:$0xff] }
 0x273   :  { %v3261_v24 = vpop.f32.mrb[144].mxu0  ;;  %v14899_v21 = vpack.c.bf16 %v117_v34, %v110_v54 }
 0x274   :  { %v5480_v2 = vpop.f32.mrb[172].mxu1  ;;  %v3263_v19 = vpop.f32.mrb[145].mxu0  ;;  %v14901_v24 = vpack.c.bf16 %v132_v50, %v125_v30 }
 0x275   :  { %v5482_v53 = vpop.f32.mrb[173].mxu1  ;;  %v3265_v52 = vpop.f32.mrb[146].mxu0 }
 0x276   :  { %v5484_v33 = vpop.f32.mrb[174].mxu1  ;;  %v3267_v43 = vpop.f32.mrb[147].mxu0  ;;  %17468 = vst [vmem:[#allocation112_spill] sm:$0xff] %v14901_v24  ;;  %v17469_v53 = vld [vmem:[#allocation43_spill] sm:$0xff] }
 0x277   :  { %v5486_v29 = vpop.f32.mrb[175].mxu1  ;;  %v124_v52 = vld [vmem:[#allocation3 + $0x80] sm:$0xff]  ;;  %v131_v33 = vld [vmem:[#allocation3 + $0xb8] sm:$0xff] }
 0x278   :  { %3530 = vmatmul.mubr.bf16.gmra.mrb[252].mxu0 %v14891_v4  ;;  %v139_v43 = vld [vmem:[#allocation3 + $0xf8] sm:$0xff]  ;;  %v146_v29 = vld [vmem:[#allocation3 + $0x130] sm:$0xff]  ;;  %v14907_v30 = vpack.c.bf16 %v131_v33, %v124_v52  ;;  %v160_v52 = vld [vmem:[#allocation3 + $0x1a0] sm:$0xff] }
 0x279   :  { %5782 = vmatmul.mubr.bf16.gmra.mrb[24].mxu1 %v14464_v0  ;;  %3572 = vmatprep.mubr.bf16.mxu0 %v14893_v61 }
 0x27a   :  { %5791 = vmatprep.mubr.bf16.mxu1 %v14468_v22  ;;  %v17470_v22 = vld [vmem:[#allocation45_spill] sm:$0xff]  ;;  %17471 = vst [vmem:[#allocation43_spill] sm:$0xff] %v14907_v30 }
 0x27b   :  { %v3271_v63 = vpop.f32.mrb[148].mxu0 }
 0x27c   :  { %v5490_v46 = vpop.f32.mrb[176].mxu1  ;;  %v3273_v31 = vpop.f32.mrb[149].mxu0 }
 0x27d   :  { %v5492_v3 = vpop.f32.mrb[177].mxu1  ;;  %v3275_v18 = vpop.f32.mrb[150].mxu0  ;;  %v14909_v31 = vpack.c.bf16 %v146_v29, %v139_v43 }
 0x27e   :  { %v5494_v2 = vpop.f32.mrb[178].mxu1  ;;  %v3277_v19 = vpop.f32.mrb[151].mxu0 }
 0x27f   :  { %v5496_v0 = vpop.f32.mrb[179].mxu1  ;;  %17472 = vst [vmem:[#allocation45_spill] sm:$0xff] %v14909_v31  ;;  %v17473_v19 = vld [vmem:[#allocation46_spill] sm:$0xff] }
 0x280   :  { %3573 = vmatmul.mubr.bf16.vlgmr.msra.gmra.mrb[0].mxu0 %v14899_v21  ;;  %v17474_v0 = vld [vmem:[#allocation48_spill] sm:$0xff] }
 0x281   :  { %5792 = vmatmul.mubr.bf16.gmra.mrb[28].mxu1 %v17469_v53  ;;  %3582 = vmatprep.mubr.bf16.mxu0 %v14901_v24  ;;  %v138_v53 = vld [vmem:[#allocation3 + $0xf0] sm:$0xff]  ;;  %v13540_v24 = vld [vmem:[#allocation6 + $0x248] ss:$16 sps:$4 sm:$0xff]  }
 0x282   :  { %5801 = vmatprep.mubr.bf16.mxu1 %v17470_v22  ;;  %v145_v22 = vld [vmem:[#allocation3 + $0x128] sm:$0xff] }
 0x283   :  { %v3281_v54 = vpop.f32.mrb[152].mxu0  ;;  %v14915_v43 = vpack.c.bf16 %v145_v22, %v138_v53  ;;  %v174_v53 = vld [vmem:[#allocation3 + $0x210] sm:$0xff] }
 0x284   :  { %v5500_v34 = vpop.f32.mrb[180].mxu1  ;;  %v3283_v63 = vpop.f32.mrb[153].mxu0  ;;  %v153_v54 = vld [vmem:[#allocation3 + $0x168] sm:$0xff] }
 0x285   :  { %v5502_v50 = vpop.f32.mrb[181].mxu1  ;;  %v3285_v46 = vpop.f32.mrb[154].mxu0  ;;  %17475 = vst [vmem:[#allocation46_spill] sm:$0xff] %v14915_v43 }
 0x286   :  { %v5504_v3 = vpop.f32.mrb[182].mxu1  ;;  %v3287_v18 = vpop.f32.mrb[155].mxu0  ;;  %v14917_v46 = vpack.c.bf16 %v160_v52, %v153_v54 }
 0x287   :  { %v5506_v2 = vpop.f32.mrb[183].mxu1 }
 0x288   :  { %3583 = vmatmul.mubr.bf16.gmra.mrb[4].mxu0 %v14907_v30  ;;  %17476 = vst [vmem:[#allocation48_spill] sm:$0xff] %v14917_v46 }
 0x289   :  { %5802 = vmatmul.mubr.bf16.gmra.mrb[32].mxu1 %v17473_v19  ;;  %3592 = vmatprep.mubr.bf16.mxu0 %v14909_v31  ;;  %v17477_v19 = vld [vmem:[#allocation49_spill] sm:$0xff] }
 0x28a   :  { %5811 = vmatprep.mubr.bf16.mxu1 %v17474_v0  ;;  %v17478_v0 = vld [vmem:[#allocation51_spill] sm:$0xff] }
 0x28b   :  { %v3291_v33 = vpop.f32.mrb[156].mxu0  ;;  %v13542_v31 = vld [vmem:[#allocation6 + $0x24c] ss:$16 sps:$4 sm:$0xff]  }
 0x28c   :  { %v5510_v34 = vpop.f32.mrb[184].mxu1  ;;  %v3293_v63 = vpop.f32.mrb[157].mxu0  ;;  %v152_v33 = vld [vmem:[#allocation3 + $0x160] sm:$0xff] }
 0x28d   :  { %v5512_v29 = vpop.f32.mrb[185].mxu1  ;;  %v3295_v50 = vpop.f32.mrb[158].mxu0  ;;  %v159_v34 = vld [vmem:[#allocation3 + $0x198] sm:$0xff] }
 0x28e   :  { %v5514_v3 = vpop.f32.mrb[186].mxu1  ;;  %v3297_v18 = vpop.f32.mrb[159].mxu0  ;;  %v167_v63 = vld [vmem:[#allocation3 + $0x1d8] sm:$0xff]  ;;  %v14923_v54 = vpack.c.bf16 %v159_v34, %v152_v33  ;;  %v188_v33 = vld [vmem:[#allocation3 + $0x280] sm:$0xff] }
 0x28f   :  { %v5516_v2 = vpop.f32.mrb[187].mxu1  ;;  %v14925_v18 = vpack.c.bf16 %v174_v53, %v167_v63 }
 0x290   :  { %3593 = vmatmul.mubr.bf16.gmra.mrb[8].mxu0 %v14915_v43  ;;  %17479 = vst [vmem:[#allocation49_spill] sm:$0xff] %v14923_v54 }
 0x291   :  { %5812 = vmatmul.mubr.bf16.gmra.mrb[36].mxu1 %v17477_v19  ;;  %3602 = vmatprep.mubr.bf16.mxu0 %v14917_v46  ;;  %17480 = vst [vmem:[#allocation51_spill] sm:$0xff] %v14925_v18  ;;  %v17481_v46 = vld [vmem:[#allocation52_spill] sm:$0xff] }
 0x292   :  { %5821 = vmatprep.mubr.bf16.mxu1 %v17478_v0  ;;  %v17482_v0 = vld [vmem:[#allocation54_spill] sm:$0xff] }
 0x293   :  { %v3301_v22 = vpop.f32.mrb[160].mxu0 }
 0x294   :  { %v5520_v29 = vpop.f32.mrb[188].mxu1  ;;  %v3303_v50 = vpop.f32.mrb[161].mxu0  ;;  %v166_v22 = vld [vmem:[#allocation3 + $0x1d0] sm:$0xff] }
 0x295   :  { %v5522_v52 = vpop.f32.mrb[189].mxu1  ;;  %v3305_v3 = vpop.f32.mrb[162].mxu0  ;;  %v173_v29 = vld [vmem:[#allocation3 + $0x208] sm:$0xff] }
 0x296   :  { %v5524_v2 = vpop.f32.mrb[190].mxu1  ;;  %v3307_v38 = vpop.f32.mrb[163].mxu0  ;;  %v181_v50 = vld [vmem:[#allocation3 + $0x248] sm:$0xff]  ;;  %v14931_v63 = vpack.c.bf16 %v173_v29, %v166_v22  ;;  %v202_v22 = vld [vmem:[#allocation3 + $0x2f0] sm:$0xff] }
 0x297   :  { %v5526_v19 = vpop.f32.mrb[191].mxu1  ;;  %v14933_v2 = vpack.c.bf16 %v188_v33, %v181_v50 }
 0x298   :  { %3603 = vmatmul.mubr.bf16.gmra.mrb[12].mxu0 %v14923_v54  ;;  %17483 = vst [vmem:[#allocation52_spill] sm:$0xff] %v14931_v63 }
 0x299   :  { %5822 = vmatmul.mubr.bf16.gmra.mrb[40].mxu1 %v17481_v46  ;;  %3612 = vmatprep.mubr.bf16.mxu0 %v14925_v18  ;;  %17484 = vst [vmem:[#allocation54_spill] sm:$0xff] %v14933_v2  ;;  %v17485_v18 = vld [vmem:[#allocation55_spill] sm:$0xff] }
 0x29a   :  { %5831 = vmatprep.mubr.bf16.mxu1 %v17482_v0  ;;  %v17486_v0 = vld [vmem:[#allocation57_spill] sm:$0xff] }
 0x29b   :  { %v3311_v34 = vpop.f32.mrb[164].mxu0 }
 0x29c   :  { %v5530_v52 = vpop.f32.mrb[192].mxu1  ;;  %v3313_v3 = vpop.f32.mrb[165].mxu0  ;;  %v180_v34 = vld [vmem:[#allocation3 + $0x240] sm:$0xff] }
 0x29d   :  { %v5532_v53 = vpop.f32.mrb[193].mxu1  ;;  %v3315_v38 = vpop.f32.mrb[166].mxu0  ;;  %v187_v52 = vld [vmem:[#allocation3 + $0x278] sm:$0xff] }
 0x29e   :  { %v5534_v19 = vpop.f32.mrb[194].mxu1  ;;  %v3317_v54 = vpop.f32.mrb[167].mxu0  ;;  %v195_v3 = vld [vmem:[#allocation3 + $0x2b8] sm:$0xff]  ;;  %v14939_v50 = vpack.c.bf16 %v187_v52, %v180_v34  ;;  %v216_v34 = vld [vmem:[#allocation3 + $0x360] sm:$0xff] }
 0x29f   :  { %v5536_v46 = vpop.f32.mrb[195].mxu1  ;;  %v14941_v19 = vpack.c.bf16 %v202_v22, %v195_v3 }
 0x2a0   :  { %3613 = vmatmul.mubr.bf16.gmra.mrb[16].mxu0 %v14931_v63  ;;  %17487 = vst [vmem:[#allocation55_spill] sm:$0xff] %v14939_v50 }
 0x2a1   :  { %5832 = vmatmul.mubr.bf16.gmra.mrb[44].mxu1 %v17485_v18  ;;  %3622 = vmatprep.mubr.bf16.mxu0 %v14933_v2  ;;  %17488 = vst [vmem:[#allocation57_spill] sm:$0xff] %v14941_v19  ;;  %v17489_v2 = vld [vmem:[#allocation58_spill] sm:$0xff] }
 0x2a2   :  { %5841 = vmatprep.mubr.bf16.mxu1 %v17486_v0  ;;  %v17490_v0 = vld [vmem:[#allocation60_spill] sm:$0xff] }
 0x2a3   :  { %v3321_v29 = vpop.f32.mrb[168].mxu0 }
 0x2a4   :  { %v5540_v53 = vpop.f32.mrb[196].mxu1  ;;  %v3323_v38 = vpop.f32.mrb[169].mxu0  ;;  %v194_v29 = vld [vmem:[#allocation3 + $0x2b0] sm:$0xff] }
 0x2a5   :  { %v5542_v33 = vpop.f32.mrb[197].mxu1  ;;  %v3325_v54 = vpop.f32.mrb[170].mxu0  ;;  %v201_v53 = vld [vmem:[#allocation3 + $0x2e8] sm:$0xff] }
 0x2a6   :  { %v5544_v46 = vpop.f32.mrb[198].mxu1  ;;  %v3327_v63 = vpop.f32.mrb[171].mxu0  ;;  %v209_v38 = vld [vmem:[#allocation3 + $0x328] sm:$0xff]  ;;  %v14947_v3 = vpack.c.bf16 %v201_v53, %v194_v29  ;;  %v230_v29 = vld [vmem:[#allocation3 + $0x3d0] sm:$0xff] }
 0x2a7   :  { %v5546_v18 = vpop.f32.mrb[199].mxu1  ;;  %v14949_v46 = vpack.c.bf16 %v216_v34, %v209_v38 }
 0x2a8   :  { %3623 = vmatmul.mubr.bf16.gmra.mrb[20].mxu0 %v14939_v50  ;;  %17491 = vst [vmem:[#allocation58_spill] sm:$0xff] %v14947_v3 }
 0x2a9   :  { %5842 = vmatmul.mubr.bf16.gmra.mrb[48].mxu1 %v17489_v2  ;;  %3632 = vmatprep.mubr.bf16.mxu0 %v14941_v19  ;;  %17492 = vst [vmem:[#allocation60_spill] sm:$0xff] %v14949_v46  ;;  %v17493_v19 = vld [vmem:[#allocation61_spill] sm:$0xff] }
 0x2aa   :  { %5851 = vmatprep.mubr.bf16.mxu1 %v17490_v0  ;;  %v17494_v0 = vld [vmem:[#allocation63_spill] sm:$0xff] }
 0x2ab   :  { %v3331_v52 = vpop.f32.mrb[172].mxu0 }
 0x2ac   :  { %v5550_v33 = vpop.f32.mrb[200].mxu1  ;;  %v3333_v54 = vpop.f32.mrb[173].mxu0  ;;  %v208_v52 = vld [vmem:[#allocation3 + $0x320] sm:$0xff] }
 0x2ad   :  { %v5552_v22 = vpop.f32.mrb[201].mxu1  ;;  %v3335_v63 = vpop.f32.mrb[174].mxu0  ;;  %v215_v33 = vld [vmem:[#allocation3 + $0x358] sm:$0xff] }
 0x2ae   :  { %v5554_v18 = vpop.f32.mrb[202].mxu1  ;;  %v3337_v50 = vpop.f32.mrb[175].mxu0  ;;  %v223_v54 = vld [vmem:[#allocation3 + $0x398] sm:$0xff]  ;;  %v14955_v63 = vpack.c.bf16 %v215_v33, %v208_v52 }
 0x2af   :  { %v5556_v2 = vpop.f32.mrb[203].mxu1  ;;  %v14957_v34 = vpack.c.bf16 %v230_v29, %v223_v54  ;;  %v17497_v18 = vld [vmem:[#allocation64_spill] sm:$0xff] }
 0x2b0   :  { %3633 = vmatmul.mubr.bf16.gmra.mrb[24].mxu0 %v14947_v3  ;;  %17495 = vst [vmem:[#allocation61_spill] sm:$0xff] %v14955_v63  ;;  %v222_v2 = vld [vmem:[#allocation3 + $0x390] sm:$0xff]  ;;  %v244_v3 = vld [vmem:[#allocation3 + $0x440] sm:$0xff] }
 0x2b1   :  { %5852 = vmatmul.mubr.bf16.gmra.mrb[52].mxu1 %v17493_v19  ;;  %3642 = vmatprep.mubr.bf16.mxu0 %v14949_v46  ;;  %17496 = vst [vmem:[#allocation63_spill] sm:$0xff] %v14957_v34  ;;  %v17498_v19 = vld [vmem:[#allocation66_spill] sm:$0xff]  ;;  %v237_v46 = vld [vmem:[#allocation3 + $0x408] sm:$0xff] }
 0x2b2   :  { %5861 = vmatprep.mubr.bf16.mxu1 %v17494_v0  ;;  %v229_v0 = vld [vmem:[#allocation3 + $0x3c8] sm:$0xff] }
 0x2b3   :  { %v3341_v53 = vpop.f32.mrb[176].mxu0  ;;  %v14963_v33 = vpack.c.bf16 %v229_v0, %v222_v2  ;;  %v258_v2 = vld [vmem:[#allocation3 + $0x4b0] sm:$0xff] }
 0x2b4   :  { %v3343_v22 = vpop.f32.mrb[177].mxu0 }
 0x2b5   :  { %v3345_v38 = vpop.f32.mrb[178].mxu0  ;;  %17499 = vst [vmem:[#allocation64_spill] sm:$0xff] %v14963_v33 }
 0x2b6   :  { %v3347_v50 = vpop.f32.mrb[179].mxu0  ;;  %v14965_v38 = vpack.c.bf16 %v244_v3, %v237_v46 }
 0x2b8   :  { %3643 = vmatmul.mubr.bf16.gmra.mrb[28].mxu0 %v14955_v63  ;;  %17500 = vst [vmem:[#allocation66_spill] sm:$0xff] %v14965_v38 }
 0x2b9   :  { %5862 = vmatmul.mubr.bf16.gmra.mrb[56].mxu1 %v17497_v18  ;;  %3652 = vmatprep.mubr.bf16.mxu0 %v14957_v34  ;;  %v17501_v34 = vld [vmem:[#allocation67_spill] sm:$0xff] }
 0x2ba   :  { %5871 = vmatprep.mubr.bf16.mxu1 %v17498_v19  ;;  %v17502_v19 = vld [vmem:[#allocation69_spill] sm:$0xff] }
 0x2bb   :  { %v3351_v53 = vpop.f32.mrb[180].mxu0 }
 0x2bc   :  { %v5603_v22 = vpop.f32.mrb[208].mxu1  ;;  %v3353_v52 = vpop.f32.mrb[181].mxu0  ;;  %v236_v53 = vld [vmem:[#allocation3 + $0x400] sm:$0xff] }
 0x2bd   :  { %v5605_v54 = vpop.f32.mrb[209].mxu1  ;;  %v3355_v29 = vpop.f32.mrb[182].mxu0  ;;  %v243_v22 = vld [vmem:[#allocation3 + $0x438] sm:$0xff] }
 0x2be   :  { %v5607_v50 = vpop.f32.mrb[210].mxu1  ;;  %v3357_v63 = vpop.f32.mrb[183].mxu0  ;;  %v251_v52 = vld [vmem:[#allocation3 + $0x478] sm:$0xff]  ;;  %v14971_v3 = vpack.c.bf16 %v243_v22, %v236_v53  ;;  %v272_v53 = vld [vmem:[#allocation3 + $0x520] sm:$0xff] }
 0x2bf   :  { %v5609_v18 = vpop.f32.mrb[211].mxu1  ;;  %v14973_v50 = vpack.c.bf16 %v258_v2, %v251_v52 }
 0x2c0   :  { %3653 = vmatmul.mubr.bf16.gmra.mrb[32].mxu0 %v14963_v33  ;;  %17503 = vst [vmem:[#allocation67_spill] sm:$0xff] %v14971_v3 }
 0x2c1   :  { %5872 = vmatmul.mubr.bf16.gmra.mrb[60].mxu1 %v17501_v34  ;;  %3662 = vmatprep.mubr.bf16.mxu0 %v14965_v38  ;;  %17504 = vst [vmem:[#allocation69_spill] sm:$0xff] %v14973_v50  ;;  %v17505_v38 = vld [vmem:[#allocation70_spill] sm:$0xff] }
 0x2c2   :  { %5881 = vmatprep.mubr.bf16.mxu1 %v17502_v19  ;;  %v17506_v19 = vld [vmem:[#allocation72_spill] sm:$0xff] }
 0x2c3   :  { %v3361_v0 = vpop.f32.mrb[184].mxu0 }
 0x2c4   :  { %v5613_v54 = vpop.f32.mrb[212].mxu1  ;;  %v3363_v29 = vpop.f32.mrb[185].mxu0  ;;  %v250_v0 = vld [vmem:[#allocation3 + $0x470] sm:$0xff] }
 0x2c5   :  { %v5615_v46 = vpop.f32.mrb[213].mxu1  ;;  %v3365_v63 = vpop.f32.mrb[186].mxu0  ;;  %v257_v54 = vld [vmem:[#allocation3 + $0x4a8] sm:$0xff] }
 0x2c6   :  { %v5617_v18 = vpop.f32.mrb[214].mxu1  ;;  %v3367_v33 = vpop.f32.mrb[187].mxu0  ;;  %v265_v29 = vld [vmem:[#allocation3 + $0x4e8] sm:$0xff]  ;;  %v14979_v52 = vpack.c.bf16 %v257_v54, %v250_v0  ;;  %v286_v0 = vld [vmem:[#allocation3 + $0x590] sm:$0xff] }
 0x2c7   :  { %v5619_v34 = vpop.f32.mrb[215].mxu1  ;;  %v14981_v18 = vpack.c.bf16 %v272_v53, %v265_v29 }
 0x2c8   :  { %3663 = vmatmul.mubr.bf16.gmra.mrb[36].mxu0 %v14971_v3  ;;  %17507 = vst [vmem:[#allocation70_spill] sm:$0xff] %v14979_v52 }
 0x2c9   :  { %5882 = vmatmul.mubr.bf16.gmra.mrb[64].mxu1 %v17505_v38  ;;  %3672 = vmatprep.mubr.bf16.mxu0 %v14973_v50  ;;  %17508 = vst [vmem:[#allocation72_spill] sm:$0xff] %v14981_v18  ;;  %v17509_v50 = vld [vmem:[#allocation73_spill] sm:$0xff] }
 0x2ca   :  { %5891 = vmatprep.mubr.bf16.mxu1 %v17506_v19  ;;  %v17510_v19 = vld [vmem:[#allocation75_spill] sm:$0xff] }
 0x2cb   :  { %v3371_v22 = vpop.f32.mrb[188].mxu0 }
 0x2cc   :  { %v5623_v46 = vpop.f32.mrb[216].mxu1  ;;  %v3373_v63 = vpop.f32.mrb[189].mxu0  ;;  %v264_v22 = vld [vmem:[#allocation3 + $0x4e0] sm:$0xff] }
 0x2cd   :  { %v5625_v2 = vpop.f32.mrb[217].mxu1  ;;  %v3375_v33 = vpop.f32.mrb[190].mxu0  ;;  %v271_v46 = vld [vmem:[#allocation3 + $0x518] sm:$0xff] }
 0x2ce   :  { %v5627_v34 = vpop.f32.mrb[218].mxu1  ;;  %v3377_v3 = vpop.f32.mrb[191].mxu0  ;;  %v279_v63 = vld [vmem:[#allocation3 + $0x558] sm:$0xff]  ;;  %v14987_v29 = vpack.c.bf16 %v271_v46, %v264_v22  ;;  %v300_v22 = vld [vmem:[#allocation3 + $0x600] sm:$0xff] }
 0x2cf   :  { %v5629_v38 = vpop.f32.mrb[219].mxu1  ;;  %v14989_v34 = vpack.c.bf16 %v286_v0, %v279_v63 }
 0x2d0   :  { %3673 = vmatmul.mubr.bf16.gmra.mrb[40].mxu0 %v14979_v52  ;;  %17511 = vst [vmem:[#allocation73_spill] sm:$0xff] %v14987_v29 }
 0x2d1   :  { %5892 = vmatmul.mubr.bf16.gmra.mrb[68].mxu1 %v17509_v50  ;;  %3682 = vmatprep.mubr.bf16.mxu0 %v14981_v18  ;;  %17512 = vst [vmem:[#allocation75_spill] sm:$0xff] %v14989_v34  ;;  %v17513_v18 = vld [vmem:[#allocation76_spill] sm:$0xff] }
 0x2d2   :  { %5901 = vmatprep.mubr.bf16.mxu1 %v17510_v19  ;;  %v17514_v19 = vld [vmem:[#allocation78_spill] sm:$0xff] }
 0x2d3   :  { %v3381_v54 = vpop.f32.mrb[192].mxu0 }
 0x2d4   :  { %v5633_v2 = vpop.f32.mrb[220].mxu1  ;;  %v3383_v33 = vpop.f32.mrb[193].mxu0  ;;  %v278_v54 = vld [vmem:[#allocation3 + $0x550] sm:$0xff] }
 0x2d5   :  { %v5635_v53 = vpop.f32.mrb[221].mxu1  ;;  %v3385_v3 = vpop.f32.mrb[194].mxu0  ;;  %v285_v2 = vld [vmem:[#allocation3 + $0x588] sm:$0xff] }
 0x2d6   :  { %v5637_v38 = vpop.f32.mrb[222].mxu1  ;;  %v3387_v52 = vpop.f32.mrb[195].mxu0  ;;  %v293_v33 = vld [vmem:[#allocation3 + $0x5c8] sm:$0xff]  ;;  %v14995_v63 = vpack.c.bf16 %v285_v2, %v278_v54  ;;  %v314_v54 = vld [vmem:[#allocation3 + $0x670] sm:$0xff] }
 0x2d7   :  { %v5639_v50 = vpop.f32.mrb[223].mxu1  ;;  %v14997_v38 = vpack.c.bf16 %v300_v22, %v293_v33 }
 0x2d8   :  { %3683 = vmatmul.mubr.bf16.gmra.mrb[44].mxu0 %v14987_v29  ;;  %17515 = vst [vmem:[#allocation76_spill] sm:$0xff] %v14995_v63 }
 0x2d9   :  { %5902 = vmatmul.mubr.bf16.gmra.mrb[72].mxu1 %v17513_v18  ;;  %3692 = vmatprep.mubr.bf16.mxu0 %v14989_v34  ;;  %17516 = vst [vmem:[#allocation78_spill] sm:$0xff] %v14997_v38  ;;  %v17517_v34 = vld [vmem:[#allocation79_spill] sm:$0xff] }
 0x2da   :  { %5911 = vmatprep.mubr.bf16.mxu1 %v17514_v19  ;;  %v17518_v19 = vld [vmem:[#allocation81_spill] sm:$0xff] }
 0x2db   :  { %v3391_v46 = vpop.f32.mrb[196].mxu0 }
 0x2dc   :  { %v5643_v53 = vpop.f32.mrb[224].mxu1  ;;  %v3393_v3 = vpop.f32.mrb[197].mxu0  ;;  %v292_v46 = vld [vmem:[#allocation3 + $0x5c0] sm:$0xff] }
 0x2dd   :  { %v5645_v0 = vpop.f32.mrb[225].mxu1  ;;  %v3395_v52 = vpop.f32.mrb[198].mxu0  ;;  %v299_v53 = vld [vmem:[#allocation3 + $0x5f8] sm:$0xff] }
 0x2de   :  { %v5647_v50 = vpop.f32.mrb[226].mxu1  ;;  %v3397_v29 = vpop.f32.mrb[199].mxu0  ;;  %v307_v3 = vld [vmem:[#allocation3 + $0x638] sm:$0xff]  ;;  %v15003_v33 = vpack.c.bf16 %v299_v53, %v292_v46  ;;  %v328_v46 = vld [vmem:[#allocation3 + $0x6e0] sm:$0xff] }
 0x2df   :  { %v5649_v18 = vpop.f32.mrb[227].mxu1  ;;  %v15005_v50 = vpack.c.bf16 %v314_v54, %v307_v3 }
 0x2e0   :  { %3693 = vmatmul.mubr.bf16.gmra.mrb[48].mxu0 %v14995_v63  ;;  %17519 = vst [vmem:[#allocation79_spill] sm:$0xff] %v15003_v33 }
 0x2e1   :  { %5912 = vmatmul.mubr.bf16.gmra.mrb[76].mxu1 %v17517_v34  ;;  %3702 = vmatprep.mubr.bf16.mxu0 %v14997_v38  ;;  %17520 = vst [vmem:[#allocation81_spill] sm:$0xff] %v15005_v50  ;;  %v17521_v38 = vld [vmem:[#allocation82_spill] sm:$0xff] }
 0x2e2   :  { %5921 = vmatprep.mubr.bf16.mxu1 %v17518_v19  ;;  %v17522_v19 = vld [vmem:[#allocation84_spill] sm:$0xff] }
 0x2e3   :  { %v3401_v2 = vpop.f32.mrb[200].mxu0 }
 0x2e4   :  { %v5653_v0 = vpop.f32.mrb[228].mxu1  ;;  %v3403_v52 = vpop.f32.mrb[201].mxu0  ;;  %v306_v2 = vld [vmem:[#allocation3 + $0x630] sm:$0xff] }
 0x2e5   :  { %v5655_v22 = vpop.f32.mrb[229].mxu1  ;;  %v3405_v29 = vpop.f32.mrb[202].mxu0  ;;  %v313_v0 = vld [vmem:[#allocation3 + $0x668] sm:$0xff] }
 0x2e6   :  { %v5657_v18 = vpop.f32.mrb[230].mxu1  ;;  %v3407_v63 = vpop.f32.mrb[203].mxu0  ;;  %v321_v52 = vld [vmem:[#allocation3 + $0x6a8] sm:$0xff]  ;;  %v15011_v3 = vpack.c.bf16 %v313_v0, %v306_v2  ;;  %v342_v2 = vld [vmem:[#allocation3 + $0x750] sm:$0xff] }
 0x2e7   :  { %v5659_v34 = vpop.f32.mrb[231].mxu1  ;;  %v15013_v18 = vpack.c.bf16 %v328_v46, %v321_v52 }
 0x2e8   :  { %3703 = vmatmul.mubr.bf16.gmra.mrb[52].mxu0 %v15003_v33  ;;  %17523 = vst [vmem:[#allocation82_spill] sm:$0xff] %v15011_v3 }
 0x2e9   :  { %5922 = vmatmul.mubr.bf16.gmra.mrb[80].mxu1 %v17521_v38  ;;  %3712 = vmatprep.mubr.bf16.mxu0 %v15005_v50  ;;  %17524 = vst [vmem:[#allocation84_spill] sm:$0xff] %v15013_v18  ;;  %v17525_v50 = vld [vmem:[#allocation85_spill] sm:$0xff] }
 0x2ea   :  { %5931 = vmatprep.mubr.bf16.mxu1 %v17522_v19  ;;  %v17526_v19 = vld [vmem:[#allocation87_spill] sm:$0xff] }
 0x2eb   :  { %v3411_v53 = vpop.f32.mrb[204].mxu0 }
 0x2ec   :  { %v5663_v22 = vpop.f32.mrb[232].mxu1  ;;  %v3413_v29 = vpop.f32.mrb[205].mxu0  ;;  %v320_v53 = vld [vmem:[#allocation3 + $0x6a0] sm:$0xff] }
 0x2ed   :  { %v5665_v54 = vpop.f32.mrb[233].mxu1  ;;  %v3415_v63 = vpop.f32.mrb[206].mxu0  ;;  %v327_v22 = vld [vmem:[#allocation3 + $0x6d8] sm:$0xff] }
 0x2ee   :  { %v5667_v34 = vpop.f32.mrb[234].mxu1  ;;  %v3417_v33 = vpop.f32.mrb[207].mxu0  ;;  %v335_v29 = vld [vmem:[#allocation3 + $0x718] sm:$0xff]  ;;  %v15019_v52 = vpack.c.bf16 %v327_v22, %v320_v53  ;;  %v356_v53 = vld [vmem:[#allocation3 + $0x7c0] sm:$0xff] }
 0x2ef   :  { %v5669_v38 = vpop.f32.mrb[235].mxu1  ;;  %v15021_v34 = vpack.c.bf16 %v342_v2, %v335_v29 }
 0x2f0   :  { %3713 = vmatmul.mubr.bf16.gmra.mrb[56].mxu0 %v15011_v3  ;;  %17527 = vst [vmem:[#allocation85_spill] sm:$0xff] %v15019_v52 }
 0x2f1   :  { %5932 = vmatmul.mubr.bf16.gmra.mrb[84].mxu1 %v17525_v50  ;;  %3722 = vmatprep.mubr.bf16.mxu0 %v15013_v18  ;;  %17528 = vst [vmem:[#allocation87_spill] sm:$0xff] %v15021_v34  ;;  %v17529_v18 = vld [vmem:[#allocation88_spill] sm:$0xff] }
 0x2f2   :  { %5941 = vmatprep.mubr.bf16.mxu1 %v17526_v19  ;;  %v17530_v19 = vld [vmem:[#allocation90_spill] sm:$0xff] }
 0x2f3   :  { %v3421_v0 = vpop.f32.mrb[208].mxu0 }
 0x2f4   :  { %v5673_v54 = vpop.f32.mrb[236].mxu1  ;;  %v3423_v63 = vpop.f32.mrb[209].mxu0  ;;  %v334_v0 = vld [vmem:[#allocation3 + $0x710] sm:$0xff] }
 0x2f5   :  { %v5675_v46 = vpop.f32.mrb[237].mxu1  ;;  %v3425_v33 = vpop.f32.mrb[210].mxu0  ;;  %v341_v54 = vld [vmem:[#allocation3 + $0x748] sm:$0xff] }
 0x2f6   :  { %v5677_v38 = vpop.f32.mrb[238].mxu1  ;;  %v3427_v3 = vpop.f32.mrb[211].mxu0  ;;  %v349_v63 = vld [vmem:[#allocation3 + $0x788] sm:$0xff]  ;;  %v15027_v29 = vpack.c.bf16 %v341_v54, %v334_v0  ;;  %v370_v0 = vld [vmem:[#allocation3 + $0x830] sm:$0xff] }
 0x2f7   :  { %v5679_v50 = vpop.f32.mrb[239].mxu1  ;;  %v15029_v38 = vpack.c.bf16 %v356_v53, %v349_v63 }
 0x2f8   :  { %3723 = vmatmul.mubr.bf16.gmra.mrb[60].mxu0 %v15019_v52  ;;  %17531 = vst [vmem:[#allocation88_spill] sm:$0xff] %v15027_v29 }
 0x2f9   :  { %5942 = vmatmul.mubr.bf16.gmra.mrb[88].mxu1 %v17529_v18  ;;  %3732 = vmatprep.mubr.bf16.mxu0 %v15021_v34  ;;  %17532 = vst [vmem:[#allocation90_spill] sm:$0xff] %v15029_v38  ;;  %v17533_v34 = vld [vmem:[#allocation91_spill] sm:$0xff] }
 0x2fa   :  { %5951 = vmatprep.mubr.bf16.mxu1 %v17530_v19  ;;  %v17534_v19 = vld [vmem:[#allocation93_spill] sm:$0xff] }
 0x2fb   :  { %v3431_v22 = vpop.f32.mrb[212].mxu0 }
 0x2fc   :  { %v5683_v46 = vpop.f32.mrb[240].mxu1  ;;  %v3433_v33 = vpop.f32.mrb[213].mxu0  ;;  %v348_v22 = vld [vmem:[#allocation3 + $0x780] sm:$0xff] }
 0x2fd   :  { %v5685_v2 = vpop.f32.mrb[241].mxu1  ;;  %v3435_v3 = vpop.f32.mrb[214].mxu0  ;;  %v355_v46 = vld [vmem:[#allocation3 + $0x7b8] sm:$0xff] }
 0x2fe   :  { %v5687_v50 = vpop.f32.mrb[242].mxu1  ;;  %v3437_v52 = vpop.f32.mrb[215].mxu0  ;;  %v363_v33 = vld [vmem:[#allocation3 + $0x7f8] sm:$0xff]  ;;  %v15035_v63 = vpack.c.bf16 %v355_v46, %v348_v22  ;;  %v384_v22 = vld [vmem:[#allocation3 + $0x8a0] sm:$0xff] }
 0x2ff   :  { %v5689_v18 = vpop.f32.mrb[243].mxu1  ;;  %v15037_v50 = vpack.c.bf16 %v370_v0, %v363_v33 }
 0x300   :  { %3733 = vmatmul.mubr.bf16.gmra.mrb[64].mxu0 %v15027_v29  ;;  %17535 = vst [vmem:[#allocation91_spill] sm:$0xff] %v15035_v63 }
 0x301   :  { %5952 = vmatmul.mubr.bf16.gmra.mrb[92].mxu1 %v17533_v34  ;;  %3742 = vmatprep.mubr.bf16.mxu0 %v15029_v38  ;;  %17536 = vst [vmem:[#allocation93_spill] sm:$0xff] %v15037_v50  ;;  %v17537_v38 = vld [vmem:[#allocation94_spill] sm:$0xff] }
 0x302   :  { %5961 = vmatprep.mubr.bf16.mxu1 %v17534_v19  ;;  %v17538_v19 = vld [vmem:[#allocation96_spill] sm:$0xff] }
 0x303   :  { %v3441_v54 = vpop.f32.mrb[216].mxu0 }
 0x304   :  { %v5693_v2 = vpop.f32.mrb[244].mxu1  ;;  %v3443_v3 = vpop.f32.mrb[217].mxu0  ;;  %v362_v54 = vld [vmem:[#allocation3 + $0x7f0] sm:$0xff] }
 0x305   :  { %v5695_v53 = vpop.f32.mrb[245].mxu1  ;;  %v3445_v52 = vpop.f32.mrb[218].mxu0  ;;  %v369_v2 = vld [vmem:[#allocation3 + $0x828] sm:$0xff] }
 0x306   :  { %v5697_v18 = vpop.f32.mrb[246].mxu1  ;;  %v3447_v29 = vpop.f32.mrb[219].mxu0  ;;  %v377_v3 = vld [vmem:[#allocation3 + $0x868] sm:$0xff]  ;;  %v15043_v33 = vpack.c.bf16 %v369_v2, %v362_v54  ;;  %v398_v54 = vld [vmem:[#allocation3 + $0x910] sm:$0xff] }
 0x307   :  { %v5699_v34 = vpop.f32.mrb[247].mxu1  ;;  %v15045_v18 = vpack.c.bf16 %v384_v22, %v377_v3 }
 0x308   :  { %3743 = vmatmul.mubr.bf16.gmra.mrb[68].mxu0 %v15035_v63  ;;  %17539 = vst [vmem:[#allocation94_spill] sm:$0xff] %v15043_v33 }
 0x309   :  { %5962 = vmatmul.mubr.bf16.gmra.mrb[96].mxu1 %v17537_v38  ;;  %3752 = vmatprep.mubr.bf16.mxu0 %v15037_v50  ;;  %17540 = vst [vmem:[#allocation96_spill] sm:$0xff] %v15045_v18  ;;  %v17541_v50 = vld [vmem:[#allocation97_spill] sm:$0xff] }
 0x30a   :  { %5971 = vmatprep.mubr.bf16.mxu1 %v17538_v19  ;;  %v17542_v19 = vld [vmem:[#allocation99_spill] sm:$0xff] }
 0x30b   :  { %v3451_v46 = vpop.f32.mrb[220].mxu0 }
 0x30c   :  { %v5703_v53 = vpop.f32.mrb[248].mxu1  ;;  %v3453_v52 = vpop.f32.mrb[221].mxu0  ;;  %v376_v46 = vld [vmem:[#allocation3 + $0x860] sm:$0xff] }
 0x30d   :  { %v5705_v0 = vpop.f32.mrb[249].mxu1  ;;  %v3455_v29 = vpop.f32.mrb[222].mxu0  ;;  %v383_v53 = vld [vmem:[#allocation3 + $0x898] sm:$0xff] }
 0x30e   :  { %v5707_v34 = vpop.f32.mrb[250].mxu1  ;;  %v3457_v63 = vpop.f32.mrb[223].mxu0  ;;  %v391_v52 = vld [vmem:[#allocation3 + $0x8d8] sm:$0xff]  ;;  %v15051_v3 = vpack.c.bf16 %v383_v53, %v376_v46  ;;  %v412_v46 = vld [vmem:[#allocation3 + $0x980] sm:$0xff] }
 0x30f   :  { %v5709_v38 = vpop.f32.mrb[251].mxu1  ;;  %v15053_v34 = vpack.c.bf16 %v398_v54, %v391_v52 }
 0x310   :  { %3753 = vmatmul.mubr.bf16.gmra.mrb[72].mxu0 %v15043_v33  ;;  %17543 = vst [vmem:[#allocation97_spill] sm:$0xff] %v15051_v3 }
 0x311   :  { %5972 = vmatmul.mubr.bf16.gmra.mrb[100].mxu1 %v17541_v50  ;;  %3762 = vmatprep.mubr.bf16.mxu0 %v15045_v18  ;;  %17544 = vst [vmem:[#allocation99_spill] sm:$0xff] %v15053_v34  ;;  %v17545_v18 = vld [vmem:[#allocation100_spill] sm:$0xff] }
 0x312   :  { %5981 = vmatprep.mubr.bf16.mxu1 %v17542_v19  ;;  %v17546_v19 = vld [vmem:[#allocation102_spill] sm:$0xff] }
 0x313   :  { %v3461_v2 = vpop.f32.mrb[224].mxu0 }
 0x314   :  { %v5713_v0 = vpop.f32.mrb[252].mxu1  ;;  %v3463_v29 = vpop.f32.mrb[225].mxu0  ;;  %v390_v2 = vld [vmem:[#allocation3 + $0x8d0] sm:$0xff] }
 0x315   :  { %v5715_v22 = vpop.f32.mrb[253].mxu1  ;;  %v3465_v63 = vpop.f32.mrb[226].mxu0  ;;  %v397_v0 = vld [vmem:[#allocation3 + $0x908] sm:$0xff] }
 0x316   :  { %v5717_v38 = vpop.f32.mrb[254].mxu1  ;;  %v3467_v33 = vpop.f32.mrb[227].mxu0  ;;  %v405_v29 = vld [vmem:[#allocation3 + $0x948] sm:$0xff]  ;;  %v15059_v52 = vpack.c.bf16 %v397_v0, %v390_v2  ;;  %v411_v2 = vld [vmem:[#allocation3 + $0x978] sm:$0xff] }
 0x317   :  { %v5719_v50 = vpop.f32.mrb[255].mxu1  ;;  %v15061_v38 = vpack.c.bf16 %v412_v46, %v405_v29  ;;  %v419_v0 = vld [vmem:[#allocation3 + $0x9b8] sm:$0xff] }
 0x318   :  { %3763 = vmatmul.mubr.bf16.gmra.mrb[76].mxu0 %v15051_v3  ;;  %17547 = vst [vmem:[#allocation100_spill] sm:$0xff] %v15059_v52  ;;  %v13539_v29 = vld [vmem:[#allocation6 + $0x22c] ss:$16 sps:$4 sm:$0xff]  }
 0x319   :  { %5982 = vmatmul.mubr.bf16.gmra.mrb[104].mxu1 %v17545_v18  ;;  %3772 = vmatprep.mubr.bf16.mxu0 %v15053_v34  ;;  %17548 = vst [vmem:[#allocation102_spill] sm:$0xff] %v15061_v38  ;;  %v13536_v18 = vld [vmem:[#allocation6 + $0x20c] ss:$16 sps:$4 sm:$0xff]   ;;  %v13534_v34 = vld [vmem:[#allocation6 + $0x208] ss:$16 sps:$4 sm:$0xff]  }
 0x31a   :  { %5991 = vmatprep.mubr.bf16.mxu1 %v17546_v19  ;;  %v17549_v19 = vld [vmem:[#allocation103_spill] sm:$0xff]  ;;  %6232 = vmatprep.subr.bf16.mxu1 %v13536_v18  ;;  %v17553_v18 = vld [vmem:[#allocation106_spill] sm:$0xff] }
 0x31b   :  { %v3471_v53 = vpop.f32.mrb[228].mxu0  ;;  %6233 = vmatpush1.bf16.msra.mxu1 %v13534_v34  ;;  %v17554_v34 = vld [vmem:[#allocation108_spill] sm:$0xff] }
 0x31c   :  { %v5723_v22 = vpop.f32.mrb[0].mxu1  ;;  %v3473_v63 = vpop.f32.mrb[229].mxu0  ;;  %v17550_v53 = vld [vmem:[#allocation105_spill] sm:$0xff]  ;;  %6234 = vmatprep.subr.bf16.mxu1 %v13539_v29 }
 0x31d   :  { %v5725_v54 = vpop.f32.mrb[1].mxu1  ;;  %v3475_v33 = vpop.f32.mrb[230].mxu0  ;;  %v404_v22 = vld [vmem:[#allocation3 + $0x940] sm:$0xff]  ;;  %v426_v63 = vld [vmem:[#allocation3 + $0x9f0] sm:$0xff]  ;;  %v433_v29 = vld [vmem:[#allocation3 + $0xa28] sm:$0xff] }
 0x31e   :  { %v5727_v50 = vpop.f32.mrb[2].mxu1  ;;  %v3477_v3 = vpop.f32.mrb[231].mxu0  ;;  %v15067_v33 = vpack.c.bf16 %v411_v2, %v404_v22  ;;  %v418_v22 = vld [vmem:[#allocation3 + $0x9b0] sm:$0xff]  ;;  %v425_v2 = vld [vmem:[#allocation3 + $0x9e8] sm:$0xff] }
 0x31f   :  { %v5729_v43 = vpop.f32.mrb[3].mxu1  ;;  %v13537_v3 = vld [vmem:[#allocation6 + $0x228] ss:$16 sps:$4 sm:$0xff]  }
 0x320   :  { %3773 = vmatmul.mubr.bf16.gmra.mrb[80].mxu0 %v15059_v52  ;;  %17551 = vst [vmem:[#allocation103_spill] sm:$0xff] %v15067_v33  ;;  %v15069_v52 = vpack.c.bf16 %v426_v63, %v419_v0  ;;  %6235 = vmatpush1.bf16.msra.mxu1 %v13537_v3  ;;  %v13545_v0 = vld [vmem:[#allocation6 + $0x26c] ss:$16 sps:$4 sm:$0xff]   ;;  %v13543_v63 = vld [vmem:[#allocation6 + $0x268] ss:$16 sps:$4 sm:$0xff]  }
 0x321   :  { %5992 = vmatmul.mubr.bf16.gmra.mrb[108].mxu1 %v17549_v19  ;;  %3782 = vmatprep.mubr.bf16.mxu0 %v15061_v38 }
 0x322   :  { %6001 = vmatprep.mubr.bf16.mxu1 %v17550_v53  ;;  %17552 = vst [vmem:[#allocation105_spill] sm:$0xff] %v15069_v52  ;;  %6236 = vmatprep.subr.bf16.mxu1 %v13542_v31  ;;  %v432_v31 = vld [vmem:[#allocation3 + $0xa20] sm:$0xff] }
 0x323   :  { %v3481_v46 = vpop.f32.mrb[232].mxu0 }
 0x324   :  { %v5733_v54 = vpop.f32.mrb[4].mxu1  ;;  %v3483_v43 = vpop.f32.mrb[233].mxu0  ;;  %v440_v46 = vld [vmem:[#allocation3 + $0xa60] sm:$0xff]  ;;  %6237 = vmatpush1.bf16.msra.mxu1 %v13540_v24  ;;  %v17556_v24 = vld [vmem:[#allocation110_spill] sm:$0xff] }
 0x325   :  { %v5735_v50 = vpop.f32.mrb[5].mxu1  ;;  %v3485_v19 = vpop.f32.mrb[234].mxu0  ;;  %v15075_v54 = vpack.c.bf16 %v425_v2, %v418_v22  ;;  %6238 = vmatprep.subr.bf16.mxu1 %v13545_v0  ;;  %v439_v22 = vld [vmem:[#allocation3 + $0xa58] sm:$0xff]  ;;  %v454_v0 = vld [vmem:[#allocation3 + $0xad0] sm:$0xff] }
 0x326   :  { %v5737_v38 = vpop.f32.mrb[6].mxu1  ;;  %v3487_v53 = vpop.f32.mrb[235].mxu0  ;;  %v15077_v19 = vpack.c.bf16 %v440_v46, %v433_v29  ;;  %v447_v2 = vld [vmem:[#allocation3 + $0xa98] sm:$0xff] }
 0x327   :  { %v5739_v30 = vpop.f32.mrb[7].mxu1  ;;  %v13551_v29 = vld [vmem:[#allocation6 + $0x2ac] ss:$16 sps:$4 sm:$0xff]  }
 0x328   :  { %3783 = vmatmul.mubr.bf16.gmra.mrb[84].mxu0 %v15067_v33  ;;  %17555 = vst [vmem:[#allocation106_spill] sm:$0xff] %v15077_v19  ;;  %6239 = vmatpush1.bf16.msra.mxu1 %v13543_v63  ;;  %v13546_v33 = vld [vmem:[#allocation6 + $0x288] ss:$16 sps:$4 sm:$0xff]  }
 0x329   :  { %6002 = vmatmul.mubr.bf16.gmra.mrb[112].mxu1 %v17553_v18  ;;  %3792 = vmatprep.mubr.bf16.mxu0 %v15069_v52 }
 0x32a   :  { %6011 = vmatprep.mubr.bf16.mxu1 %v17554_v34  ;;  %v13548_v34 = vld [vmem:[#allocation6 + $0x28c] ss:$16 sps:$4 sm:$0xff]  }
 0x32b   :  { %v3491_v38 = vpop.f32.mrb[236].mxu0  ;;  %6240 = vmatprep.subr.bf16.mxu1 %v13548_v34  ;;  %v453_v34 = vld [vmem:[#allocation3 + $0xac8] sm:$0xff] }
 0x32c   :  { %v5743_v30 = vpop.f32.mrb[8].mxu1  ;;  %v3493_v3 = vpop.f32.mrb[237].mxu0  ;;  %6241 = vmatpush1.bf16.msra.mxu1 %v13546_v33  ;;  %v13549_v38 = vld [vmem:[#allocation6 + $0x2a8] ss:$16 sps:$4 sm:$0xff]   ;;  %v446_v33 = vld [vmem:[#allocation3 + $0xa90] sm:$0xff] }
 0x32d   :  { %v5745_v43 = vpop.f32.mrb[9].mxu1  ;;  %v3495_v50 = vpop.f32.mrb[238].mxu0  ;;  %v15083_v30 = vpack.c.bf16 %v439_v22, %v432_v31  ;;  %6242 = vmatprep.subr.bf16.mxu1 %v13551_v29  ;;  %v461_v31 = vld [vmem:[#allocation3 + $0xb08] sm:$0xff]  ;;  %v468_v22 = vld [vmem:[#allocation3 + $0xb40] sm:$0xff] }
 0x32e   :  { %v5747_v53 = vpop.f32.mrb[10].mxu1  ;;  %v3497_v18 = vpop.f32.mrb[239].mxu0  ;;  %v15085_v43 = vpack.c.bf16 %v454_v0, %v447_v2  ;;  %v13557_v2 = vld [vmem:[#allocation6 + $0x2ec] ss:$16 sps:$4 sm:$0xff]   ;;  %v13555_v29 = vld [vmem:[#allocation6 + $0x2e8] ss:$16 sps:$4 sm:$0xff]  }
 0x32f   :  { %v5749_v52 = vpop.f32.mrb[11].mxu1  ;;  %v13554_v18 = vld [vmem:[#allocation6 + $0x2cc] ss:$16 sps:$4 sm:$0xff]  }
 0x330   :  { %3793 = vmatmul.mubr.bf16.gmra.mrb[88].mxu0 %v15075_v54  ;;  %6243 = vmatpush1.bf16.msra.mxu1 %v13549_v38 }
 0x331   :  { %6012 = vmatmul.mubr.bf16.gmra.mrb[116].mxu1 %v14717_v16  ;;  %3802 = vmatprep.mubr.bf16.mxu0 %v15077_v19  ;;  %v13552_v19 = vld [vmem:[#allocation6 + $0x2c8] ss:$16 sps:$4 sm:$0xff]  }
 0x332   :  { %6021 = vmatprep.mubr.bf16.mxu1 %v17556_v24  ;;  %6244 = vmatprep.subr.bf16.mxu1 %v13554_v18  ;;  %v467_v18 = vld [vmem:[#allocation3 + $0xb38] sm:$0xff] }
 0x333   :  { %v3501_v46 = vpop.f32.mrb[240].mxu0 }
 0x334   :  { %v5753_v52 = vpop.f32.mrb[12].mxu1  ;;  %v3503_v63 = vpop.f32.mrb[241].mxu0  ;;  %6245 = vmatpush1.bf16.msra.mxu1 %v13552_v19  ;;  %v460_v19 = vld [vmem:[#allocation3 + $0xb00] sm:$0xff] }
 0x335   :  { %v5755_v3 = vpop.f32.mrb[13].mxu1  ;;  %v3505_v16 = vpop.f32.mrb[242].mxu0  ;;  %v15091_v52 = vpack.c.bf16 %v453_v34, %v446_v33  ;;  %6246 = vmatprep.subr.bf16.mxu1 %v13557_v2  ;;  %v475_v33 = vld [vmem:[#allocation3 + $0xb78] sm:$0xff]  ;;  %v482_v34 = vld [vmem:[#allocation3 + $0xbb0] sm:$0xff] }
 0x336   :  { %v5757_v50 = vpop.f32.mrb[14].mxu1  ;;  %v3507_v53 = vpop.f32.mrb[243].mxu0  ;;  %v15093_v3 = vpack.c.bf16 %v468_v22, %v461_v31  ;;  %v13563_v31 = vld [vmem:[#allocation6 + $0x32c] ss:$16 sps:$4 sm:$0xff]   ;;  %v13561_v2 = vld [vmem:[#allocation6 + $0x328] ss:$16 sps:$4 sm:$0xff]  }
 0x337   :  { %v5759_v24 = vpop.f32.mrb[15].mxu1  ;;  %v13560_v50 = vld [vmem:[#allocation6 + $0x30c] ss:$16 sps:$4 sm:$0xff]  }
 0x338   :  { %3803 = vmatmul.mubr.bf16.gmra.mrb[92].mxu0 %v15083_v30  ;;  %6247 = vmatpush1.bf16.msra.mxu1 %v13555_v29  ;;  %v13558_v24 = vld [vmem:[#allocation6 + $0x308] ss:$16 sps:$4 sm:$0xff]  }
 0x339   :  { %6022 = vmatmul.mubr.bf16.gmra.mrb[120].mxu1 %v14728_v14  ;;  %3812 = vmatprep.mubr.bf16.mxu0 %v15085_v43 }
 0x33a   :  { %6031 = vmatprep.mubr.bf16.mxu1 %v14732_v44  ;;  %6248 = vmatprep.subr.bf16.mxu1 %v13560_v50  ;;  %v474_v50 = vld [vmem:[#allocation3 + $0xb70] sm:$0xff] }
 0x33b   :  { %v3511_v0 = vpop.f32.mrb[244].mxu0 }
 0x33c   :  { %v5763_v46 = vpop.f32.mrb[16].mxu1  ;;  %v3513_v38 = vpop.f32.mrb[245].mxu0  ;;  %6249 = vmatpush1.bf16.msra.mxu1 %v13558_v24  ;;  %v481_v24 = vld [vmem:[#allocation3 + $0xba8] sm:$0xff] }
 0x33d   :  { %v5765_v63 = vpop.f32.mrb[17].mxu1  ;;  %v3515_v14 = vpop.f32.mrb[246].mxu0  ;;  %v15099_v46 = vpack.c.bf16 %v467_v18, %v460_v19  ;;  %6250 = vmatprep.subr.bf16.mxu1 %v13563_v31  ;;  %v489_v19 = vld [vmem:[#allocation3 + $0xbe8] sm:$0xff]  ;;  %v496_v18 = vld [vmem:[#allocation3 + $0xc20] sm:$0xff] }
 0x33e   :  { %v5767_v16 = vpop.f32.mrb[18].mxu1  ;;  %v3517_v44 = vpop.f32.mrb[247].mxu0  ;;  %v15101_v63 = vpack.c.bf16 %v482_v34, %v475_v33  ;;  %v13569_v33 = vld [vmem:[#allocation6 + $0x36c] ss:$16 sps:$4 sm:$0xff]   ;;  %v13567_v31 = vld [vmem:[#allocation6 + $0x368] ss:$16 sps:$4 sm:$0xff]  }
 0x33f   :  { %v5769_v53 = vpop.f32.mrb[19].mxu1  ;;  %v13566_v16 = vld [vmem:[#allocation6 + $0x34c] ss:$16 sps:$4 sm:$0xff]  }
 0x340   :  { %3813 = vmatmul.mubr.bf16.gmra.mrb[96].mxu0 %v15091_v52  ;;  %6251 = vmatpush1.bf16.msra.mxu1 %v13561_v2  ;;  %v13564_v53 = vld [vmem:[#allocation6 + $0x348] ss:$16 sps:$4 sm:$0xff]  }
 0x341   :  { %6032 = vmatmul.mubr.bf16.gmra.mrb[124].mxu1 %v14739_v42  ;;  %3822 = vmatprep.mubr.bf16.mxu0 %v15093_v3 }
 0x342   :  { %6041 = vmatprep.mubr.bf16.mxu1 %v14741_v1  ;;  %6252 = vmatprep.subr.bf16.mxu1 %v13566_v16  ;;  %v488_v16 = vld [vmem:[#allocation3 + $0xbe0] sm:$0xff] }
 0x343   :  { %v3521_v22 = vpop.f32.mrb[248].mxu0 }
 0x344   :  { %v5773_v0 = vpop.f32.mrb[20].mxu1  ;;  %v3523_v29 = vpop.f32.mrb[249].mxu0  ;;  %6253 = vmatpush1.bf16.msra.mxu1 %v13564_v53  ;;  %v495_v53 = vld [vmem:[#allocation3 + $0xc18] sm:$0xff] }
 0x345   :  { %v5775_v38 = vpop.f32.mrb[21].mxu1  ;;  %v3525_v42 = vpop.f32.mrb[250].mxu0  ;;  %v15107_v0 = vpack.c.bf16 %v481_v24, %v474_v50  ;;  %6254 = vmatprep.subr.bf16.mxu1 %v13569_v33  ;;  %v503_v50 = vld [vmem:[#allocation3 + $0xc58] sm:$0xff]  ;;  %v510_v24 = vld [vmem:[#allocation3 + $0xc90] sm:$0xff] }
 0x346   :  { %v5777_v14 = vpop.f32.mrb[22].mxu1  ;;  %v3527_v1 = vpop.f32.mrb[251].mxu0  ;;  %v15109_v38 = vpack.c.bf16 %v496_v18, %v489_v19  ;;  %v13575_v19 = vld [vmem:[#allocation6 + $0x3ac] ss:$16 sps:$4 sm:$0xff]   ;;  %v13573_v18 = vld [vmem:[#allocation6 + $0x3a8] ss:$16 sps:$4 sm:$0xff]  }
 0x347   :  { %v5779_v44 = vpop.f32.mrb[23].mxu1  ;;  %v13572_v14 = vld [vmem:[#allocation6 + $0x38c] ss:$16 sps:$4 sm:$0xff]  }
 0x348   :  { %3823 = vmatmul.mubr.bf16.gmra.mrb[100].mxu0 %v15099_v46  ;;  %6255 = vmatpush1.bf16.msra.mxu1 %v13567_v31  ;;  %v13570_v44 = vld [vmem:[#allocation6 + $0x388] ss:$16 sps:$4 sm:$0xff]  }
 0x349   :  { %6042 = vmatmul.mubr.bf16.gmra.mrb[128].mxu1 %v14747_v12  ;;  %3832 = vmatprep.mubr.bf16.mxu0 %v15101_v63 }
 0x34a   :  { %6051 = vmatprep.mubr.bf16.mxu1 %v14749_v59  ;;  %6256 = vmatprep.subr.bf16.mxu1 %v13572_v14  ;;  %v524_v14 = vld [vmem:[#allocation3 + $0xd00] sm:$0xff] }
 0x34b   :  { %v3531_v34 = vpop.f32.mrb[252].mxu0 }
 0x34c   :  { %v5783_v22 = vpop.f32.mrb[24].mxu1  ;;  %v3533_v2 = vpop.f32.mrb[253].mxu0  ;;  %6257 = vmatpush1.bf16.msra.mxu1 %v13570_v44  ;;  %v15115_v34 = vpack.c.bf16 %v495_v53, %v488_v16  ;;  %v13579_v16 = vld [vmem:[#allocation6 + $0x3e8] ss:$16 sps:$4 sm:$0xff]  }
 0x34d   :  { %v5785_v29 = vpop.f32.mrb[25].mxu1  ;;  %v3535_v12 = vpop.f32.mrb[254].mxu0  ;;  %6258 = vmatprep.subr.bf16.mxu1 %v13575_v19  ;;  %v15117_v22 = vpack.c.bf16 %v510_v24, %v503_v50  ;;  %v13578_v2 = vld [vmem:[#allocation6 + $0x3cc] ss:$16 sps:$4 sm:$0xff]  }
 0x34e   :  { %v5787_v42 = vpop.f32.mrb[26].mxu1  ;;  %v3537_v59 = vpop.f32.mrb[255].mxu0  ;;  %v502_v12 = vld [vmem:[#allocation3 + $0xc50] sm:$0xff] }
 0x34f   :  { %v5789_v1 = vpop.f32.mrb[27].mxu1  ;;  %v509_v42 = vld [vmem:[#allocation3 + $0xc88] sm:$0xff] }
 0x350   :  { %3833 = vmatmul.mubr.bf16.gmra.mrb[104].mxu0 %v15107_v0  ;;  %6259 = vmatpush1.bf16.msra.mxu1 %v13573_v18  ;;  %v517_v59 = vld [vmem:[#allocation3 + $0xcc8] sm:$0xff]  ;;  %v15123_v24 = vpack.c.bf16 %v509_v42, %v502_v12 }
 0x351   :  { %6052 = vmatmul.mubr.bf16.gmra.mrb[132].mxu1 %v14755_v27  ;;  %3842 = vmatprep.mubr.bf16.mxu0 %v15109_v38  ;;  %v13581_v1 = vld [vmem:[#allocation6 + $0x3ec] ss:$16 sps:$4 sm:$0xff]   ;;  %v15125_v18 = vpack.c.bf16 %v524_v14, %v517_v59 }
 0x352   :  { %6061 = vmatprep.mubr.bf16.mxu1 %v14757_v20  ;;  %v13576_v20 = vld [vmem:[#allocation6 + $0x3c8] ss:$16 sps:$4 sm:$0xff]   ;;  %6260 = vmatprep.subr.bf16.mxu1 %v13578_v2 }
 0x353   :  { %v523_v2 = vld [vmem:[#allocation3 + $0xcf8] sm:$0xff] }
 0x354   :  { %v5793_v33 = vpop.f32.mrb[28].mxu1  ;;  %6261 = vmatpush1.bf16.msra.mxu1 %v13576_v20  ;;  %v538_v20 = vld [vmem:[#allocation3 + $0xd70] sm:$0xff] }
 0x355   :  { %v5795_v31 = vpop.f32.mrb[29].mxu1  ;;  %6262 = vmatprep.subr.bf16.mxu1 %v13581_v1 }
 0x356   :  { %v5797_v27 = vpop.f32.mrb[30].mxu1 }
 0x357   :  { %v5799_v29 = vpop.f32.mrb[31].mxu1  ;;  %v516_v27 = vld [vmem:[#allocation3 + $0xcc0] sm:$0xff] }
 0x358   :  { %3843 = vmatmul.mubr.bf16.gmra.mrb[108].mxu0 %v15115_v34  ;;  %6263 = vmatpush1.bf16.msra.mxu1 %v13579_v16  ;;  %v531_v29 = vld [vmem:[#allocation3 + $0xd38] sm:$0xff]  ;;  %v15131_v14 = vpack.c.bf16 %v523_v2, %v516_v27 }
 0x359   :  { %6062 = vmatmul.mubr.bf16.gmra.mrb[136].mxu1 %v14763_v37  ;;  %3852 = vmatprep.mubr.bf16.mxu0 %v15117_v22  ;;  %v15133_v16 = vpack.c.bf16 %v538_v20, %v531_v29 }
 0x35a   :  { %6071 = vmatprep.mubr.bf16.mxu1 %v14765_v56 }
 0x35b   :  { %v3584_v44 = vpop.f32.mrb[4].mxu0 }
 0x35c   :  { %v5803_v53 = vpop.f32.mrb[32].mxu1  ;;  %v3586_v50 = vpop.f32.mrb[5].mxu0 }
 0x35d   :  { %v5805_v19 = vpop.f32.mrb[33].mxu1  ;;  %v3588_v37 = vpop.f32.mrb[6].mxu0 }
 0x35e   :  { %v5807_v33 = vpop.f32.mrb[34].mxu1  ;;  %v3590_v56 = vpop.f32.mrb[7].mxu0  ;;  %v537_v19 = vld [vmem:[#allocation3 + $0xd68] sm:$0xff] }
 0x35f   :  { %v5809_v31 = vpop.f32.mrb[35].mxu1  ;;  %v545_v37 = vld [vmem:[#allocation3 + $0xda8] sm:$0xff]  ;;  %v552_v33 = vld [vmem:[#allocation3 + $0xde0] sm:$0xff] }
 0x360   :  { %3853 = vmatmul.mubr.bf16.gmra.mrb[112].mxu0 %v15123_v24 }
 0x361   :  { %6072 = vmatmul.mubr.bf16.gmra.mrb[140].mxu1 %v14771_v26  ;;  %3862 = vmatprep.mubr.bf16.mxu0 %v15125_v18 }
 0x362   :  { %6081 = vmatprep.mubr.bf16.mxu1 %v14773_v40  ;;  %v530_v40 = vld [vmem:[#allocation3 + $0xd30] sm:$0xff] }
 0x363   :  { %v3594_v12 = vpop.f32.mrb[8].mxu0  ;;  %v15139_v2 = vpack.c.bf16 %v537_v19, %v530_v40 }
 0x364   :  { %v5813_v42 = vpop.f32.mrb[36].mxu1  ;;  %v3596_v59 = vpop.f32.mrb[9].mxu0  ;;  %v15141_v12 = vpack.c.bf16 %v552_v33, %v545_v37 }
 0x365   :  { %v5815_v1 = vpop.f32.mrb[37].mxu1  ;;  %v3598_v44 = vpop.f32.mrb[10].mxu0 }
 0x366   :  { %v5817_v53 = vpop.f32.mrb[38].mxu1  ;;  %v3600_v50 = vpop.f32.mrb[11].mxu0  ;;  %v551_v1 = vld [vmem:[#allocation3 + $0xdd8] sm:$0xff] }
 0x367   :  { %v5819_v26 = vpop.f32.mrb[39].mxu1  ;;  %v559_v44 = vld [vmem:[#allocation3 + $0xe18] sm:$0xff]  ;;  %v566_v53 = vld [vmem:[#allocation3 + $0xe50] sm:$0xff] }
 0x368   :  { %3863 = vmatmul.mubr.bf16.gmra.mrb[116].mxu0 %v15131_v14 }
 0x369   :  { %6082 = vmatmul.mubr.bf16.gmra.mrb[144].mxu1 %v14779_v13  ;;  %3872 = vmatprep.mubr.bf16.mxu0 %v15133_v16 }
 0x36a   :  { %6091 = vmatprep.mubr.bf16.mxu1 %v14781_v45  ;;  %v544_v45 = vld [vmem:[#allocation3 + $0xda0] sm:$0xff] }
 0x36b   :  { %v3604_v56 = vpop.f32.mrb[12].mxu0  ;;  %v15147_v19 = vpack.c.bf16 %v551_v1, %v544_v45 }
 0x36c   :  { %v5823_v31 = vpop.f32.mrb[40].mxu1  ;;  %v3606_v27 = vpop.f32.mrb[13].mxu0  ;;  %v15149_v56 = vpack.c.bf16 %v566_v53, %v559_v44 }
 0x36d   :  { %v5825_v29 = vpop.f32.mrb[41].mxu1  ;;  %v3608_v20 = vpop.f32.mrb[14].mxu0 }
 0x36e   :  { %v5827_v42 = vpop.f32.mrb[42].mxu1  ;;  %v3610_v59 = vpop.f32.mrb[15].mxu0  ;;  %v565_v29 = vld [vmem:[#allocation3 + $0xe48] sm:$0xff] }
 0x36f   :  { %v5829_v13 = vpop.f32.mrb[43].mxu1  ;;  %v573_v20 = vld [vmem:[#allocation3 + $0xe88] sm:$0xff]  ;;  %v580_v42 = vld [vmem:[#allocation3 + $0xec0] sm:$0xff] }
 0x370   :  { %3873 = vmatmul.mubr.bf16.gmra.mrb[120].mxu0 %v15139_v2 }
 0x371   :  { %6092 = vmatmul.mubr.bf16.gmra.mrb[148].mxu1 %v14787_v5  ;;  %3882 = vmatprep.mubr.bf16.mxu0 %v15141_v12 }
 0x372   :  { %6101 = vmatprep.mubr.bf16.mxu1 %v14789_v10  ;;  %v558_v10 = vld [vmem:[#allocation3 + $0xe10] sm:$0xff] }
 0x373   :  { %v3614_v50 = vpop.f32.mrb[16].mxu0  ;;  %v15155_v1 = vpack.c.bf16 %v565_v29, %v558_v10 }
 0x374   :  { %v5833_v26 = vpop.f32.mrb[44].mxu1  ;;  %v3616_v40 = vpop.f32.mrb[17].mxu0  ;;  %v15157_v50 = vpack.c.bf16 %v580_v42, %v573_v20 }
 0x375   :  { %v5835_v37 = vpop.f32.mrb[45].mxu1  ;;  %v3618_v33 = vpop.f32.mrb[18].mxu0 }
 0x376   :  { %v5837_v31 = vpop.f32.mrb[46].mxu1  ;;  %v3620_v27 = vpop.f32.mrb[19].mxu0  ;;  %v579_v37 = vld [vmem:[#allocation3 + $0xeb8] sm:$0xff] }
 0x377   :  { %v5839_v5 = vpop.f32.mrb[47].mxu1  ;;  %v587_v33 = vld [vmem:[#allocation3 + $0xef8] sm:$0xff]  ;;  %v594_v31 = vld [vmem:[#allocation3 + $0xf30] sm:$0xff] }
 0x378   :  { %3883 = vmatmul.mubr.bf16.gmra.mrb[124].mxu0 %v15147_v19 }
 0x379   :  { %6102 = vmatmul.mubr.bf16.gmra.mrb[152].mxu1 %v14795_v62  ;;  %3892 = vmatprep.mubr.bf16.mxu0 %v15149_v56 }
 0x37a   :  { %6111 = vmatprep.mubr.bf16.mxu1 %v14797_v39  ;;  %v572_v39 = vld [vmem:[#allocation3 + $0xe80] sm:$0xff] }
 0x37b   :  { %v3624_v59 = vpop.f32.mrb[20].mxu0  ;;  %v15163_v29 = vpack.c.bf16 %v579_v37, %v572_v39 }
 0x37c   :  { %v5843_v13 = vpop.f32.mrb[48].mxu1  ;;  %v3626_v45 = vpop.f32.mrb[21].mxu0  ;;  %v15165_v59 = vpack.c.bf16 %v594_v31, %v587_v33 }
 0x37d   :  { %v5845_v44 = vpop.f32.mrb[49].mxu1  ;;  %v3628_v53 = vpop.f32.mrb[22].mxu0 }
 0x37e   :  { %v5847_v26 = vpop.f32.mrb[50].mxu1  ;;  %v3630_v40 = vpop.f32.mrb[23].mxu0  ;;  %v593_v44 = vld [vmem:[#allocation3 + $0xf28] sm:$0xff] }
 0x37f   :  { %v5849_v62 = vpop.f32.mrb[51].mxu1  ;;  %v601_v53 = vld [vmem:[#allocation3 + $0xf68] sm:$0xff]  ;;  %v608_v26 = vld [vmem:[#allocation3 + $0xfa0] sm:$0xff] }
 0x380   :  { %3893 = vmatmul.mubr.bf16.gmra.mrb[128].mxu0 %v15155_v1 }
 0x381   :  { %6112 = vmatmul.mubr.bf16.gmra.mrb[156].mxu1 %v14803_v51  ;;  %3902 = vmatprep.mubr.bf16.mxu0 %v15157_v50 }
 0x382   :  { %6121 = vmatprep.mubr.bf16.mxu1 %v14805_v58  ;;  %v586_v58 = vld [vmem:[#allocation3 + $0xef0] sm:$0xff] }
 0x383   :  { %v3634_v27 = vpop.f32.mrb[24].mxu0  ;;  %v15171_v37 = vpack.c.bf16 %v593_v44, %v586_v58 }
 0x384   :  { %v5853_v5 = vpop.f32.mrb[52].mxu1  ;;  %v3636_v10 = vpop.f32.mrb[25].mxu0  ;;  %v15173_v27 = vpack.c.bf16 %v608_v26, %v601_v53 }
 0x385   :  { %v5855_v20 = vpop.f32.mrb[53].mxu1  ;;  %v3638_v42 = vpop.f32.mrb[26].mxu0 }
 0x386   :  { %v5857_v13 = vpop.f32.mrb[54].mxu1  ;;  %v3640_v45 = vpop.f32.mrb[27].mxu0  ;;  %v607_v20 = vld [vmem:[#allocation3 + $0xf98] sm:$0xff] }
 0x387   :  { %v5859_v51 = vpop.f32.mrb[55].mxu1  ;;  %v615_v42 = vld [vmem:[#allocation3 + $0xfd8] sm:$0xff]  ;;  %v622_v13 = vld [vmem:[#allocation3 + $0x1010] sm:$0xff] }
 0x388   :  { %3903 = vmatmul.mubr.bf16.gmra.mrb[132].mxu0 %v15163_v29 }
 0x389   :  { %6122 = vmatmul.mubr.bf16.gmra.mrb[160].mxu1 %v14811_v17  ;;  %3912 = vmatprep.mubr.bf16.mxu0 %v15165_v59 }
 0x38a   :  { %6131 = vmatprep.mubr.bf16.mxu1 %v14813_v8  ;;  %v600_v8 = vld [vmem:[#allocation3 + $0xf60] sm:$0xff] }
 0x38b   :  { %v3644_v40 = vpop.f32.mrb[28].mxu0  ;;  %v15179_v44 = vpack.c.bf16 %v607_v20, %v600_v8 }
 0x38c   :  { %v5863_v62 = vpop.f32.mrb[56].mxu1  ;;  %v3646_v39 = vpop.f32.mrb[29].mxu0  ;;  %v15181_v40 = vpack.c.bf16 %v622_v13, %v615_v42 }
 0x38d   :  { %v5865_v33 = vpop.f32.mrb[57].mxu1  ;;  %v3648_v31 = vpop.f32.mrb[30].mxu0 }
 0x38e   :  { %v5867_v5 = vpop.f32.mrb[58].mxu1  ;;  %v3650_v10 = vpop.f32.mrb[31].mxu0  ;;  %v621_v33 = vld [vmem:[#allocation3 + $0x1008] sm:$0xff] }
 0x38f   :  { %v5869_v17 = vpop.f32.mrb[59].mxu1  ;;  %v629_v31 = vld [vmem:[#allocation3 + $0x1048] sm:$0xff]  ;;  %v636_v5 = vld [vmem:[#allocation3 + $0x1080] sm:$0xff] }
 0x390   :  { %3913 = vmatmul.mubr.bf16.gmra.mrb[136].mxu0 %v15171_v37 }
 0x391   :  { %6132 = vmatmul.mubr.bf16.gmra.mrb[164].mxu1 %v14819_v35  ;;  %3922 = vmatprep.mubr.bf16.mxu0 %v15173_v27 }
 0x392   :  { %6141 = vmatprep.mubr.bf16.mxu1 %v14821_v28  ;;  %v614_v28 = vld [vmem:[#allocation3 + $0xfd0] sm:$0xff] }
 0x393   :  { %v3654_v45 = vpop.f32.mrb[32].mxu0  ;;  %v15187_v20 = vpack.c.bf16 %v621_v33, %v614_v28 }
 0x394   :  { %v5873_v51 = vpop.f32.mrb[60].mxu1  ;;  %v3656_v58 = vpop.f32.mrb[33].mxu0  ;;  %v15189_v45 = vpack.c.bf16 %v636_v5, %v629_v31 }
 0x395   :  { %v5875_v53 = vpop.f32.mrb[61].mxu1  ;;  %v3658_v26 = vpop.f32.mrb[34].mxu0 }
 0x396   :  { %v5877_v62 = vpop.f32.mrb[62].mxu1  ;;  %v3660_v39 = vpop.f32.mrb[35].mxu0  ;;  %v635_v53 = vld [vmem:[#allocation3 + $0x1078] sm:$0xff] }
 0x397   :  { %v5879_v35 = vpop.f32.mrb[63].mxu1  ;;  %v643_v26 = vld [vmem:[#allocation3 + $0x10b8] sm:$0xff]  ;;  %v650_v62 = vld [vmem:[#allocation3 + $0x10f0] sm:$0xff] }
 0x398   :  { %3923 = vmatmul.mubr.bf16.gmra.mrb[140].mxu0 %v15179_v44 }
 0x399   :  { %6142 = vmatmul.mubr.bf16.gmra.mrb[168].mxu1 %v14827_v48  ;;  %3932 = vmatprep.mubr.bf16.mxu0 %v15181_v40 }
 0x39a   :  { %6151 = vmatprep.mubr.bf16.mxu1 %v14829_v49  ;;  %v628_v49 = vld [vmem:[#allocation3 + $0x1040] sm:$0xff] }
 0x39b   :  { %v3664_v10 = vpop.f32.mrb[36].mxu0  ;;  %v15195_v33 = vpack.c.bf16 %v635_v53, %v628_v49 }
 0x39c   :  { %v5883_v17 = vpop.f32.mrb[64].mxu1  ;;  %v3666_v8 = vpop.f32.mrb[37].mxu0  ;;  %v15197_v10 = vpack.c.bf16 %v650_v62, %v643_v26 }
 0x39d   :  { %v5885_v42 = vpop.f32.mrb[65].mxu1  ;;  %v3668_v13 = vpop.f32.mrb[38].mxu0 }
 0x39e   :  { %v5887_v51 = vpop.f32.mrb[66].mxu1  ;;  %v3670_v58 = vpop.f32.mrb[39].mxu0  ;;  %v649_v42 = vld [vmem:[#allocation3 + $0x10e8] sm:$0xff] }
 0x39f   :  { %v5889_v48 = vpop.f32.mrb[67].mxu1  ;;  %v657_v13 = vld [vmem:[#allocation3 + $0x1128] sm:$0xff]  ;;  %v664_v51 = vld [vmem:[#allocation3 + $0x1160] sm:$0xff] }
 0x3a0   :  { %3933 = vmatmul.mubr.bf16.gmra.mrb[144].mxu0 %v15187_v20 }
 0x3a1   :  { %6152 = vmatmul.mubr.bf16.gmra.mrb[172].mxu1 %v14835_v7  ;;  %3942 = vmatprep.mubr.bf16.mxu0 %v15189_v45 }
 0x3a2   :  { %6161 = vmatprep.mubr.bf16.mxu1 %v14837_v60  ;;  %v642_v60 = vld [vmem:[#allocation3 + $0x10b0] sm:$0xff] }
 0x3a3   :  { %v3674_v39 = vpop.f32.mrb[40].mxu0  ;;  %v15203_v53 = vpack.c.bf16 %v649_v42, %v642_v60 }
 0x3a4   :  { %v5893_v35 = vpop.f32.mrb[68].mxu1  ;;  %v3676_v28 = vpop.f32.mrb[41].mxu0  ;;  %v15205_v39 = vpack.c.bf16 %v664_v51, %v657_v13 }
 0x3a5   :  { %v5895_v31 = vpop.f32.mrb[69].mxu1  ;;  %v3678_v5 = vpop.f32.mrb[42].mxu0 }
 0x3a6   :  { %v5897_v17 = vpop.f32.mrb[70].mxu1  ;;  %v3680_v8 = vpop.f32.mrb[43].mxu0  ;;  %v663_v31 = vld [vmem:[#allocation3 + $0x1158] sm:$0xff] }
 0x3a7   :  { %v5899_v7 = vpop.f32.mrb[71].mxu1  ;;  %v671_v5 = vld [vmem:[#allocation3 + $0x1198] sm:$0xff]  ;;  %v678_v17 = vld [vmem:[#allocation3 + $0x11d0] sm:$0xff] }
 0x3a8   :  { %3943 = vmatmul.mubr.bf16.gmra.mrb[148].mxu0 %v15195_v33 }
 0x3a9   :  { %6162 = vmatmul.mubr.bf16.gmra.mrb[176].mxu1 %v14843_v25  ;;  %3952 = vmatprep.mubr.bf16.mxu0 %v15197_v10 }
 0x3aa   :  { %6171 = vmatprep.mubr.bf16.mxu1 %v14845_v9  ;;  %v656_v9 = vld [vmem:[#allocation3 + $0x1120] sm:$0xff] }
 0x3ab   :  { %v3684_v58 = vpop.f32.mrb[44].mxu0  ;;  %v15211_v42 = vpack.c.bf16 %v663_v31, %v656_v9 }
 0x3ac   :  { %v5903_v48 = vpop.f32.mrb[72].mxu1  ;;  %v3686_v49 = vpop.f32.mrb[45].mxu0  ;;  %v15213_v58 = vpack.c.bf16 %v678_v17, %v671_v5 }
 0x3ad   :  { %v5905_v26 = vpop.f32.mrb[73].mxu1  ;;  %v3688_v62 = vpop.f32.mrb[46].mxu0 }
 0x3ae   :  { %v5907_v35 = vpop.f32.mrb[74].mxu1  ;;  %v3690_v28 = vpop.f32.mrb[47].mxu0  ;;  %v677_v26 = vld [vmem:[#allocation3 + $0x11c8] sm:$0xff] }
 0x3af   :  { %v5909_v25 = vpop.f32.mrb[75].mxu1  ;;  %v685_v62 = vld [vmem:[#allocation3 + $0x1208] sm:$0xff]  ;;  %v692_v35 = vld [vmem:[#allocation3 + $0x1240] sm:$0xff] }
 0x3b0   :  { %3953 = vmatmul.mubr.bf16.gmra.mrb[152].mxu0 %v15203_v53 }
 0x3b1   :  { %6172 = vmatmul.mubr.bf16.gmra.mrb[180].mxu1 %v14851_v6  ;;  %3962 = vmatprep.mubr.bf16.mxu0 %v15205_v39 }
 0x3b2   :  { %6181 = vmatprep.mubr.bf16.mxu1 %v14853_v23  ;;  %v670_v23 = vld [vmem:[#allocation3 + $0x1190] sm:$0xff] }
 0x3b3   :  { %v3694_v8 = vpop.f32.mrb[48].mxu0  ;;  %v15219_v31 = vpack.c.bf16 %v677_v26, %v670_v23  ;;  %v13587_v23 = vld [vmem:[#allocation6 + $0x424] ss:$16 sps:$4 sm:$0xff]  }
 0x3b4   :  { %v5913_v7 = vpop.f32.mrb[76].mxu1  ;;  %v3696_v60 = vpop.f32.mrb[49].mxu0  ;;  %v15221_v8 = vpack.c.bf16 %v692_v35, %v685_v62  ;;  %v13585_v62 = vld [vmem:[#allocation6 + $0x420] ss:$16 sps:$4 sm:$0xff]  }
 0x3b5   :  { %v5915_v13 = vpop.f32.mrb[77].mxu1  ;;  %v3698_v51 = vpop.f32.mrb[50].mxu0 }
 0x3b6   :  { %v5917_v48 = vpop.f32.mrb[78].mxu1  ;;  %v3700_v49 = vpop.f32.mrb[51].mxu0  ;;  %v13582_v51 = vld [vmem:[#allocation6 + $0x400] ss:$16 sps:$4 sm:$0xff]  }
 0x3b7   :  { %v5919_v6 = vpop.f32.mrb[79].mxu1  ;;  %v691_v48 = vld [vmem:[#allocation3 + $0x1238] sm:$0xff] }
 0x3b8   :  { %3963 = vmatmul.mubr.bf16.gmra.mrb[156].mxu0 %v15211_v42  ;;  %v699_v49 = vld [vmem:[#allocation3 + $0x1278] sm:$0xff]  ;;  %v706_v6 = vld [vmem:[#allocation3 + $0x12b0] sm:$0xff] }
 0x3b9   :  { %6182 = vmatmul.mubr.bf16.gmra.mrb[184].mxu1 %v14859_v36  ;;  %3972 = vmatprep.mubr.bf16.mxu0 %v15213_v58  ;;  %v13584_v36 = vld [vmem:[#allocation6 + $0x404] ss:$16 sps:$4 sm:$0xff]  }
 0x3ba   :  { %6191 = vmatprep.mubr.bf16.mxu1 %v14861_v41  ;;  %v684_v41 = vld [vmem:[#allocation3 + $0x1200] sm:$0xff]  ;;  %4213 = vmatprep.subr.bf16.mxu0 %v13584_v36  ;;  %v698_v36 = vld [vmem:[#allocation3 + $0x1270] sm:$0xff] }
 0x3bb   :  { %v3704_v28 = vpop.f32.mrb[52].mxu0  ;;  %4214 = vmatpush1.bf16.msra.mxu0 %v13582_v51  ;;  %v705_v51 = vld [vmem:[#allocation3 + $0x12a8] sm:$0xff] }
 0x3bc   :  { %v5923_v25 = vpop.f32.mrb[80].mxu1  ;;  %v3706_v9 = vpop.f32.mrb[53].mxu0  ;;  %4215 = vmatprep.subr.bf16.mxu0 %v13587_v23  ;;  %v13591_v23 = vld [vmem:[#allocation6 + $0x460] ss:$16 sps:$4 sm:$0xff]  }
 0x3bd   :  { %v5925_v5 = vpop.f32.mrb[81].mxu1  ;;  %v3708_v17 = vpop.f32.mrb[54].mxu0  ;;  %v15227_v25 = vpack.c.bf16 %v691_v48, %v684_v41  ;;  %v713_v41 = vld [vmem:[#allocation3 + $0x12e8] sm:$0xff]  ;;  %v720_v48 = vld [vmem:[#allocation3 + $0x1320] sm:$0xff] }
 0x3be   :  { %v5927_v7 = vpop.f32.mrb[82].mxu1  ;;  %v3710_v60 = vpop.f32.mrb[55].mxu0  ;;  %v15229_v5 = vpack.c.bf16 %v706_v6, %v699_v49  ;;  %v13593_v49 = vld [vmem:[#allocation6 + $0x464] ss:$16 sps:$4 sm:$0xff]  }
 0x3bf   :  { %v5929_v13 = vpop.f32.mrb[83].mxu1  ;;  %v13590_v7 = vld [vmem:[#allocation6 + $0x444] ss:$16 sps:$4 sm:$0xff]   ;;  %4216 = vmatpush1.bf16.msra.mxu0 %v13585_v62 }
 0x3c0   :  { %3973 = vmatmul.mubr.bf16.gmra.mrb[160].mxu0 %v15219_v31  ;;  %v13588_v13 = vld [vmem:[#allocation6 + $0x440] ss:$16 sps:$4 sm:$0xff]   ;;  %4217 = vmatprep.subr.bf16.mxu0 %v13590_v7 }
 0x3c1   :  { %6192 = vmatmul.mubr.bf16.gmra.mrb[188].mxu1 %v14867_v15  ;;  %3982 = vmatprep.mubr.bf16.mxu0 %v15221_v8  ;;  %v712_v7 = vld [vmem:[#allocation3 + $0x12e0] sm:$0xff] }
 0x3c2   :  { %6201 = vmatprep.mubr.bf16.mxu1 %v14869_v55 }
 0x3c3   :  { %v3714_v26 = vpop.f32.mrb[56].mxu0  ;;  %4218 = vmatpush1.bf16.msra.mxu0 %v13588_v13  ;;  %v719_v13 = vld [vmem:[#allocation3 + $0x1318] sm:$0xff] }
 0x3c4   :  { %v5933_v35 = vpop.f32.mrb[84].mxu1  ;;  %v3716_v28 = vpop.f32.mrb[57].mxu0  ;;  %4219 = vmatprep.subr.bf16.mxu0 %v13593_v49  ;;  %v13597_v49 = vld [vmem:[#allocation6 + $0x4a0] ss:$16 sps:$4 sm:$0xff]  }
 0x3c5   :  { %v5935_v9 = vpop.f32.mrb[85].mxu1  ;;  %v3718_v15 = vpop.f32.mrb[58].mxu0  ;;  %v15235_v35 = vpack.c.bf16 %v705_v51, %v698_v36  ;;  %v727_v36 = vld [vmem:[#allocation3 + $0x1358] sm:$0xff]  ;;  %v734_v51 = vld [vmem:[#allocation3 + $0x1390] sm:$0xff] }
 0x3c6   :  { %v5937_v17 = vpop.f32.mrb[86].mxu1  ;;  %v3720_v55 = vpop.f32.mrb[59].mxu0  ;;  %v15237_v9 = vpack.c.bf16 %v720_v48, %v713_v41  ;;  %v13599_v41 = vld [vmem:[#allocation6 + $0x4a4] ss:$16 sps:$4 sm:$0xff]  }
 0x3c7   :  { %v5939_v60 = vpop.f32.mrb[87].mxu1  ;;  %v13596_v17 = vld [vmem:[#allocation6 + $0x484] ss:$16 sps:$4 sm:$0xff]   ;;  %4220 = vmatpush1.bf16.msra.mxu0 %v13591_v23 }
 0x3c8   :  { %3983 = vmatmul.mubr.bf16.gmra.mrb[164].mxu0 %v15227_v25  ;;  %v13594_v60 = vld [vmem:[#allocation6 + $0x480] ss:$16 sps:$4 sm:$0xff]   ;;  %4221 = vmatprep.subr.bf16.mxu0 %v13596_v17 }
 0x3c9   :  { %6202 = vmatmul.mubr.bf16.gmra.mrb[192].mxu1 %v14875_v47  ;;  %3992 = vmatprep.mubr.bf16.mxu0 %v15229_v5  ;;  %v726_v17 = vld [vmem:[#allocation3 + $0x1350] sm:$0xff] }
 0x3ca   :  { %6211 = vmatprep.mubr.bf16.mxu1 %v14877_v11 }
 0x3cb   :  { %v3724_v6 = vpop.f32.mrb[60].mxu0  ;;  %4222 = vmatpush1.bf16.msra.mxu0 %v13594_v60  ;;  %v733_v60 = vld [vmem:[#allocation3 + $0x1388] sm:$0xff] }
 0x3cc   :  { %v5943_v26 = vpop.f32.mrb[88].mxu1  ;;  %v3726_v62 = vpop.f32.mrb[61].mxu0  ;;  %4223 = vmatprep.subr.bf16.mxu0 %v13599_v41  ;;  %v13603_v41 = vld [vmem:[#allocation6 + $0x4e0] ss:$16 sps:$4 sm:$0xff]  }
 0x3cd   :  { %v5945_v28 = vpop.f32.mrb[89].mxu1  ;;  %v3728_v47 = vpop.f32.mrb[62].mxu0  ;;  %v15243_v26 = vpack.c.bf16 %v719_v13, %v712_v7  ;;  %v741_v7 = vld [vmem:[#allocation3 + $0x13c8] sm:$0xff]  ;;  %v748_v13 = vld [vmem:[#allocation3 + $0x1400] sm:$0xff] }
 0x3ce   :  { %v5947_v15 = vpop.f32.mrb[90].mxu1  ;;  %v3730_v11 = vpop.f32.mrb[63].mxu0  ;;  %v15245_v28 = vpack.c.bf16 %v734_v51, %v727_v36  ;;  %v13605_v36 = vld [vmem:[#allocation6 + $0x4e4] ss:$16 sps:$4 sm:$0xff]  }
 0x3cf   :  { %v5949_v55 = vpop.f32.mrb[91].mxu1  ;;  %v13602_v15 = vld [vmem:[#allocation6 + $0x4c4] ss:$16 sps:$4 sm:$0xff]   ;;  %4224 = vmatpush1.bf16.msra.mxu0 %v13597_v49 }
 0x3d0   :  { %3993 = vmatmul.mubr.bf16.gmra.mrb[168].mxu0 %v15235_v35  ;;  %v13600_v55 = vld [vmem:[#allocation6 + $0x4c0] ss:$16 sps:$4 sm:$0xff]   ;;  %4225 = vmatprep.subr.bf16.mxu0 %v13602_v15  ;;  %v17558_v15 = vld [vmem:[#allocation112_spill] sm:$0xff] }
 0x3d1   :  { %6212 = vmatmul.mubr.bf16.gmra.mrb[196].mxu1 %v14883_v57  ;;  %4002 = vmatprep.mubr.bf16.mxu0 %v15237_v9 }
 0x3d2   :  { %6221 = vmatprep.mubr.bf16.mxu1 %v14885_v32 }
 0x3d3   :  { %v3734_v48 = vpop.f32.mrb[64].mxu0  ;;  %4226 = vmatpush1.bf16.msra.mxu0 %v13600_v55  ;;  %v740_v55 = vld [vmem:[#allocation3 + $0x13c0] sm:$0xff] }
 0x3d4   :  { %v5953_v6 = vpop.f32.mrb[92].mxu1  ;;  %v3736_v23 = vpop.f32.mrb[65].mxu0  ;;  %4227 = vmatprep.subr.bf16.mxu0 %v13605_v36  ;;  %v762_v36 = vld [vmem:[#allocation3 + $0x1470] sm:$0xff] }
 0x3d5   :  { %v5955_v62 = vpop.f32.mrb[93].mxu1  ;;  %v3738_v57 = vpop.f32.mrb[66].mxu0  ;;  %v15251_v6 = vpack.c.bf16 %v733_v60, %v726_v17  ;;  %v747_v17 = vld [vmem:[#allocation3 + $0x13f8] sm:$0xff] }
 0x3d6   :  { %v5957_v47 = vpop.f32.mrb[94].mxu1  ;;  %v3740_v32 = vpop.f32.mrb[67].mxu0  ;;  %v15253_v62 = vpack.c.bf16 %v748_v13, %v741_v7  ;;  %v755_v60 = vld [vmem:[#allocation3 + $0x1438] sm:$0xff]  ;;  %v13611_v7 = vld [vmem:[#allocation6 + $0x524] ss:$16 sps:$4 sm:$0xff]  }
 0x3d7   :  { %v5959_v11 = vpop.f32.mrb[95].mxu1  ;;  %v13608_v47 = vld [vmem:[#allocation6 + $0x504] ss:$16 sps:$4 sm:$0xff]   ;;  %4228 = vmatpush1.bf16.msra.mxu0 %v13603_v41 }
 0x3d8   :  { %4003 = vmatmul.mubr.bf16.gmra.mrb[172].mxu0 %v15243_v26  ;;  %17557 = vst [vmem:[#allocation108_spill] sm:$0xff] %v15253_v62  ;;  %v13606_v11 = vld [vmem:[#allocation6 + $0x500] ss:$16 sps:$4 sm:$0xff]   ;;  %4229 = vmatprep.subr.bf16.mxu0 %v13608_v47 }
 0x3d9   :  { %6222 = vmatmul.mubr.bf16.gmra.mrb[200].mxu1 %v14891_v4  ;;  %4012 = vmatprep.mubr.bf16.mxu0 %v15245_v28  ;;  %v17561_v47 = vld [vmem:[#allocation43_spill] sm:$0xff] }
 0x3da   :  { %6264 = vmatprep.mubr.bf16.mxu1 %v14893_v61 }
 0x3db   :  { %v3744_v51 = vpop.f32.mrb[68].mxu0  ;;  %4230 = vmatpush1.bf16.msra.mxu0 %v13606_v11  ;;  %v17562_v11 = vld [vmem:[#allocation45_spill] sm:$0xff] }
 0x3dc   :  { %v5963_v48 = vpop.f32.mrb[96].mxu1  ;;  %v3746_v49 = vpop.f32.mrb[69].mxu0  ;;  %v13609_v51 = vld [vmem:[#allocation6 + $0x520] ss:$16 sps:$4 sm:$0xff]   ;;  %4231 = vmatprep.subr.bf16.mxu0 %v13611_v7  ;;  %v769_v7 = vld [vmem:[#allocation3 + $0x14a8] sm:$0xff] }
 0x3dd   :  { %v5965_v23 = vpop.f32.mrb[97].mxu1  ;;  %v3748_v4 = vpop.f32.mrb[70].mxu0  ;;  %v15259_v49 = vpack.c.bf16 %v747_v17, %v740_v55  ;;  %v754_v55 = vld [vmem:[#allocation3 + $0x1430] sm:$0xff]  ;;  %v761_v17 = vld [vmem:[#allocation3 + $0x1468] sm:$0xff] }
 0x3de   :  { %v5967_v57 = vpop.f32.mrb[98].mxu1  ;;  %v3750_v61 = vpop.f32.mrb[71].mxu0  ;;  %v15261_v4 = vpack.c.bf16 %v762_v36, %v755_v60  ;;  %v13617_v60 = vld [vmem:[#allocation6 + $0x564] ss:$16 sps:$4 sm:$0xff]  }
 0x3df   :  { %v5969_v32 = vpop.f32.mrb[99].mxu1  ;;  %17559 = vst [vmem:[#allocation110_spill] sm:$0xff] %v15259_v49  ;;  %4232 = vmatpush1.bf16.msra.mxu0 %v13609_v51 }
 0x3e0   :  { %4013 = vmatmul.mubr.bf16.gmra.mrb[176].mxu0 %v15251_v6  ;;  %17560 = vst [vmem:[#allocation112_spill] sm:$0xff] %v15261_v4  ;;  %v13614_v32 = vld [vmem:[#allocation6 + $0x544] ss:$16 sps:$4 sm:$0xff]  }
 0x3e1   :  { %6265 = vmatmul.mubr.bf16.vlgmr.msra.gmra.mrb[204].mxu1 %v14899_v21  ;;  %4022 = vmatprep.mubr.bf16.mxu0 %v15253_v62  ;;  %v13612_v62 = vld [vmem:[#allocation6 + $0x540] ss:$16 sps:$4 sm:$0xff]  }
 0x3e2   :  { %6274 = vmatprep.mubr.bf16.mxu1 %v17558_v15  ;;  %4233 = vmatprep.subr.bf16.mxu0 %v13614_v32  ;;  %v17565_v32 = vld [vmem:[#allocation46_spill] sm:$0xff] }
 0x3e3   :  { %v3754_v13 = vpop.f32.mrb[72].mxu0  ;;  %4234 = vmatpush1.bf16.msra.mxu0 %v13612_v62  ;;  %v17566_v62 = vld [vmem:[#allocation48_spill] sm:$0xff] }
 0x3e4   :  { %v5973_v48 = vpop.f32.mrb[100].mxu1  ;;  %v3756_v41 = vpop.f32.mrb[73].mxu0  ;;  %v776_v13 = vld [vmem:[#allocation3 + $0x14e0] sm:$0xff]  ;;  %4235 = vmatprep.subr.bf16.mxu0 %v13617_v60  ;;  %v783_v60 = vld [vmem:[#allocation3 + $0x1518] sm:$0xff] }
 0x3e5   :  { %v5975_v23 = vpop.f32.mrb[101].mxu1  ;;  %v3758_v21 = vpop.f32.mrb[74].mxu0  ;;  %v13615_v48 = vld [vmem:[#allocation6 + $0x560] ss:$16 sps:$4 sm:$0xff]  }
 0x3e6   :  { %v5977_v57 = vpop.f32.mrb[102].mxu1  ;;  %v3760_v61 = vpop.f32.mrb[75].mxu0  ;;  %v15267_v23 = vpack.c.bf16 %v761_v17, %v754_v55  ;;  %v768_v55 = vld [vmem:[#allocation3 + $0x14a0] sm:$0xff]  ;;  %v775_v17 = vld [vmem:[#allocation3 + $0x14d8] sm:$0xff] }
 0x3e7   :  { %v5979_v15 = vpop.f32.mrb[103].mxu1  ;;  %v15269_v61 = vpack.c.bf16 %v776_v13, %v769_v7  ;;  %4236 = vmatpush1.bf16.msra.mxu0 %v13615_v48  ;;  %v13623_v7 = vld [vmem:[#allocation6 + $0x5a4] ss:$16 sps:$4 sm:$0xff]  }
 0x3e8   :  { %4023 = vmatmul.mubr.bf16.gmra.mrb[180].mxu0 %v15259_v49  ;;  %17563 = vst [vmem:[#allocation43_spill] sm:$0xff] %v15267_v23  ;;  %v13618_v49 = vld [vmem:[#allocation6 + $0x580] ss:$16 sps:$4 sm:$0xff]  }
 0x3e9   :  { %6275 = vmatmul.mubr.bf16.gmra.mrb[208].mxu1 %v17561_v47  ;;  %4032 = vmatprep.mubr.bf16.mxu0 %v15261_v4  ;;  %17564 = vst [vmem:[#allocation45_spill] sm:$0xff] %v15269_v61 }
 0x3ea   :  { %6284 = vmatprep.mubr.bf16.mxu1 %v17562_v11  ;;  %v13620_v11 = vld [vmem:[#allocation6 + $0x584] ss:$16 sps:$4 sm:$0xff]  }
 0x3eb   :  { %v3764_v36 = vpop.f32.mrb[76].mxu0  ;;  %4237 = vmatprep.subr.bf16.mxu0 %v13620_v11  ;;  %v17567_v11 = vld [vmem:[#allocation49_spill] sm:$0xff] }
 0x3ec   :  { %v5983_v41 = vpop.f32.mrb[104].mxu1  ;;  %v3766_v51 = vpop.f32.mrb[77].mxu0  ;;  %v790_v36 = vld [vmem:[#allocation3 + $0x1550] sm:$0xff]  ;;  %4238 = vmatpush1.bf16.msra.mxu0 %v13618_v49  ;;  %v17568_v49 = vld [vmem:[#allocation51_spill] sm:$0xff] }
 0x3ed   :  { %v5985_v21 = vpop.f32.mrb[105].mxu1  ;;  %v3768_v57 = vpop.f32.mrb[78].mxu0  ;;  %v13621_v41 = vld [vmem:[#allocation6 + $0x5a0] ss:$16 sps:$4 sm:$0xff]   ;;  %v15275_v51 = vpack.c.bf16 %v775_v17, %v768_v55  ;;  %4239 = vmatprep.subr.bf16.mxu0 %v13623_v7  ;;  %v789_v17 = vld [vmem:[#allocation3 + $0x1548] sm:$0xff] }
 0x3ee   :  { %v5987_v15 = vpop.f32.mrb[106].mxu1  ;;  %v3770_v47 = vpop.f32.mrb[79].mxu0  ;;  %v782_v55 = vld [vmem:[#allocation3 + $0x1510] sm:$0xff]  ;;  %v797_v7 = vld [vmem:[#allocation3 + $0x1588] sm:$0xff] }
 0x3ef   :  { %v5989_v4 = vpop.f32.mrb[107].mxu1  ;;  %v15277_v15 = vpack.c.bf16 %v790_v36, %v783_v60  ;;  %v13629_v60 = vld [vmem:[#allocation6 + $0x5e4] ss:$16 sps:$4 sm:$0xff]  }
 0x3f0   :  { %4033 = vmatmul.mubr.bf16.gmra.mrb[184].mxu0 %v15267_v23  ;;  %v13624_v23 = vld [vmem:[#allocation6 + $0x5c0] ss:$16 sps:$4 sm:$0xff]  }
 0x3f1   :  { %6285 = vmatmul.mubr.bf16.gmra.mrb[212].mxu1 %v17565_v32  ;;  %4042 = vmatprep.mubr.bf16.mxu0 %v15269_v61 }
 0x3f2   :  { %6294 = vmatprep.mubr.bf16.mxu1 %v17566_v62  ;;  %v13626_v62 = vld [vmem:[#allocation6 + $0x5c4] ss:$16 sps:$4 sm:$0xff]   ;;  %4240 = vmatpush1.bf16.msra.mxu0 %v13621_v41 }
 0x3f3   :  { %v3774_v13 = vpop.f32.mrb[80].mxu0  ;;  %4241 = vmatprep.subr.bf16.mxu0 %v13626_v62  ;;  %v17571_v62 = vld [vmem:[#allocation52_spill] sm:$0xff] }
 0x3f4   :  { %v5993_v4 = vpop.f32.mrb[108].mxu1  ;;  %v3776_v48 = vpop.f32.mrb[81].mxu0  ;;  %v804_v13 = vld [vmem:[#allocation3 + $0x15c0] sm:$0xff] }
 0x3f5   :  { %v5995_v21 = vpop.f32.mrb[109].mxu1  ;;  %v3778_v57 = vpop.f32.mrb[82].mxu0  ;;  %v13627_v4 = vld [vmem:[#allocation6 + $0x5e0] ss:$16 sps:$4 sm:$0xff]   ;;  %v15283_v48 = vpack.c.bf16 %v789_v17, %v782_v55  ;;  %v803_v55 = vld [vmem:[#allocation3 + $0x15b8] sm:$0xff] }
 0x3f6   :  { %v5997_v47 = vpop.f32.mrb[110].mxu1  ;;  %v3780_v32 = vpop.f32.mrb[83].mxu0  ;;  %4242 = vmatpush1.bf16.msra.mxu0 %v13624_v23  ;;  %v17572_v23 = vld [vmem:[#allocation54_spill] sm:$0xff] }
 0x3f7   :  { %v5999_v61 = vpop.f32.mrb[111].mxu1  ;;  %17569 = vst [vmem:[#allocation46_spill] sm:$0xff] %v15283_v48  ;;  %4243 = vmatprep.subr.bf16.mxu0 %v13629_v60  ;;  %v15285_v47 = vpack.c.bf16 %v804_v13, %v797_v7  ;;  %v811_v17 = vld [vmem:[#allocation3 + $0x15f8] sm:$0xff]  ;;  %v818_v60 = vld [vmem:[#allocation3 + $0x1630] sm:$0xff] }
 0x3f8   :  { %4043 = vmatmul.mubr.bf16.gmra.mrb[188].mxu0 %v15275_v51 }
 0x3f9   :  { %6295 = vmatmul.mubr.bf16.gmra.mrb[216].mxu1 %v17567_v11  ;;  %4052 = vmatprep.mubr.bf16.mxu0 %v15277_v15  ;;  %17570 = vst [vmem:[#allocation48_spill] sm:$0xff] %v15285_v47 }
 0x3fa   :  { %6304 = vmatprep.mubr.bf16.mxu1 %v17568_v49  ;;  %4244 = vmatpush1.bf16.msra.mxu0 %v13627_v4 }
 0x3fb   :  { %v3784_v36 = vpop.f32.mrb[84].mxu0 }
 0x3fc   :  { %v6003_v61 = vpop.f32.mrb[112].mxu1  ;;  %v3786_v41 = vpop.f32.mrb[85].mxu0  ;;  %v796_v36 = vld [vmem:[#allocation3 + $0x1580] sm:$0xff] }
 0x3fd   :  { %v6005_v21 = vpop.f32.mrb[113].mxu1  ;;  %v3788_v57 = vpop.f32.mrb[86].mxu0  ;;  %v13978_v61 = vld [vmem:[#allocation6 + $0x604] ss:$16 sps:$4 sm:$0xff]  }
 0x3fe   :  { %v6007_v32 = vpop.f32.mrb[114].mxu1  ;;  %v3790_v11 = vpop.f32.mrb[87].mxu0  ;;  %4886 = vmatprep.subr.bf16.mxu0 %v13978_v61  ;;  %v15291_v21 = vpack.c.bf16 %v803_v55, %v796_v36  ;;  %v810_v61 = vld [vmem:[#allocation3 + $0x15f0] sm:$0xff]  ;;  %v832_v36 = vld [vmem:[#allocation3 + $0x16a0] sm:$0xff] }
 0x3ff   :  { %v6009_v49 = vpop.f32.mrb[115].mxu1  ;;  %v15293_v32 = vpack.c.bf16 %v818_v60, %v811_v17 }
 0x400   :  { %4053 = vmatmul.mubr.bf16.gmra.mrb[192].mxu0 %v15283_v48  ;;  %17573 = vst [vmem:[#allocation49_spill] sm:$0xff] %v15291_v21  ;;  %v17637_v48 = vmov 0  }
 0x401   :  { %6305 = vmatmul.mubr.bf16.gmra.mrb[220].mxu1 %v17571_v62  ;;  %4062 = vmatprep.mubr.bf16.mxu0 %v15285_v47  ;;  %17574 = vst [vmem:[#allocation51_spill] sm:$0xff] %v15293_v32  ;;  %v17576_v47 = vld [vmem:[#allocation57_spill] sm:$0xff] }
 0x402   :  { %6314 = vmatprep.mubr.bf16.mxu1 %v17572_v23  ;;  %v17575_v23 = vld [vmem:[#allocation55_spill] sm:$0xff] }
 0x403   :  { %v3794_v7 = vpop.f32.mrb[88].mxu0 }
 0x404   :  { %v6013_v13 = vpop.f32.mrb[116].mxu1  ;;  %v3796_v41 = vpop.f32.mrb[89].mxu0  ;;  %v817_v7 = vld [vmem:[#allocation3 + $0x1628] sm:$0xff] }
 0x405   :  { %v6015_v4 = vpop.f32.mrb[117].mxu1  ;;  %v3798_v57 = vpop.f32.mrb[90].mxu0  ;;  %v825_v13 = vld [vmem:[#allocation3 + $0x1668] sm:$0xff]  ;;  %v15299_v17 = vpack.c.bf16 %v817_v7, %v810_v61  ;;  %v846_v61 = vld [vmem:[#allocation3 + $0x1710] sm:$0xff] }
 0x406   :  { %v6017_v11 = vpop.f32.mrb[118].mxu1  ;;  %v3800_v49 = vpop.f32.mrb[91].mxu0 }
 0x407   :  { %v6019_v62 = vpop.f32.mrb[119].mxu1  ;;  %17577 = vst [vmem:[#allocation52_spill] sm:$0xff] %v15299_v17  ;;  %v15301_v11 = vpack.c.bf16 %v832_v36, %v825_v13 }
 0x408   :  { %4063 = vmatmul.mubr.bf16.gmra.mrb[196].mxu0 %v15291_v21  ;;  %v13981_v21 = vld [vmem:[#allocation6 + $0x620] ss:$16 sps:$4 sm:$0xff]  }
 0x409   :  { %6315 = vmatmul.mubr.bf16.gmra.mrb[224].mxu1 %v17575_v23  ;;  %4072 = vmatprep.mubr.bf16.mxu0 %v15293_v32  ;;  %17578 = vst [vmem:[#allocation54_spill] sm:$0xff] %v15301_v11  ;;  %v17579_v32 = vld [vmem:[#allocation58_spill] sm:$0xff] }
 0x40a   :  { %6324 = vmatprep.mubr.bf16.mxu1 %v17576_v47  ;;  %v17580_v47 = vld [vmem:[#allocation60_spill] sm:$0xff] }
 0x40b   :  { %v3804_v55 = vpop.f32.mrb[92].mxu0 }
 0x40c   :  { %v6023_v41 = vpop.f32.mrb[120].mxu1  ;;  %v3806_v4 = vpop.f32.mrb[93].mxu0  ;;  %v824_v55 = vld [vmem:[#allocation3 + $0x1660] sm:$0xff] }
 0x40d   :  { %v6025_v60 = vpop.f32.mrb[121].mxu1  ;;  %v3808_v57 = vpop.f32.mrb[94].mxu0  ;;  %v831_v41 = vld [vmem:[#allocation3 + $0x1698] sm:$0xff] }
 0x40e   :  { %v6027_v49 = vpop.f32.mrb[122].mxu1  ;;  %v3810_v62 = vpop.f32.mrb[95].mxu0  ;;  %v839_v4 = vld [vmem:[#allocation3 + $0x16d8] sm:$0xff]  ;;  %v15307_v13 = vpack.c.bf16 %v831_v41, %v824_v55  ;;  %v860_v55 = vld [vmem:[#allocation3 + $0x1780] sm:$0xff] }
 0x40f   :  { %v6029_v23 = vpop.f32.mrb[123].mxu1  ;;  %v15309_v62 = vpack.c.bf16 %v846_v61, %v839_v4 }
 0x410   :  { %4073 = vmatmul.mubr.bf16.gmra.mrb[200].mxu0 %v15299_v17  ;;  %17581 = vst [vmem:[#allocation55_spill] sm:$0xff] %v15307_v13 }
 0x411   :  { %6325 = vmatmul.mubr.bf16.gmra.mrb[228].mxu1 %v17579_v32  ;;  %4082 = vmatprep.mubr.bf16.mxu0 %v15301_v11  ;;  %17582 = vst [vmem:[#allocation57_spill] sm:$0xff] %v15309_v62  ;;  %v17583_v11 = vld [vmem:[#allocation61_spill] sm:$0xff] }
 0x412   :  { %6334 = vmatprep.mubr.bf16.mxu1 %v17580_v47  ;;  %v17584_v47 = vld [vmem:[#allocation63_spill] sm:$0xff] }
 0x413   :  { %v3814_v7 = vpop.f32.mrb[96].mxu0 }
 0x414   :  { %v6033_v60 = vpop.f32.mrb[124].mxu1  ;;  %v3816_v57 = vpop.f32.mrb[97].mxu0  ;;  %v838_v7 = vld [vmem:[#allocation3 + $0x16d0] sm:$0xff] }
 0x415   :  { %v6035_v36 = vpop.f32.mrb[125].mxu1  ;;  %v3818_v49 = vpop.f32.mrb[98].mxu0  ;;  %v845_v60 = vld [vmem:[#allocation3 + $0x1708] sm:$0xff] }
 0x416   :  { %v6037_v23 = vpop.f32.mrb[126].mxu1  ;;  %v3820_v17 = vpop.f32.mrb[99].mxu0  ;;  %v853_v57 = vld [vmem:[#allocation3 + $0x1748] sm:$0xff]  ;;  %v15315_v4 = vpack.c.bf16 %v845_v60, %v838_v7  ;;  %v874_v7 = vld [vmem:[#allocation3 + $0x17f0] sm:$0xff] }
 0x417   :  { %v6039_v32 = vpop.f32.mrb[127].mxu1  ;;  %v15317_v23 = vpack.c.bf16 %v860_v55, %v853_v57 }
 0x418   :  { %4083 = vmatmul.mubr.bf16.gmra.mrb[204].mxu0 %v15307_v13  ;;  %17585 = vst [vmem:[#allocation58_spill] sm:$0xff] %v15315_v4 }
 0x419   :  { %6335 = vmatmul.mubr.bf16.gmra.mrb[232].mxu1 %v17583_v11  ;;  %4092 = vmatprep.mubr.bf16.mxu0 %v15309_v62  ;;  %17586 = vst [vmem:[#allocation60_spill] sm:$0xff] %v15317_v23  ;;  %v17587_v62 = vld [vmem:[#allocation64_spill] sm:$0xff] }
 0x41a   :  { %6344 = vmatprep.mubr.bf16.mxu1 %v17584_v47  ;;  %v17588_v47 = vld [vmem:[#allocation66_spill] sm:$0xff] }
 0x41b   :  { %v3824_v41 = vpop.f32.mrb[100].mxu0 }
 0x41c   :  { %v6043_v36 = vpop.f32.mrb[128].mxu1  ;;  %v3826_v49 = vpop.f32.mrb[101].mxu0  ;;  %v852_v41 = vld [vmem:[#allocation3 + $0x1740] sm:$0xff] }
 0x41d   :  { %v6045_v61 = vpop.f32.mrb[129].mxu1  ;;  %v3828_v17 = vpop.f32.mrb[102].mxu0  ;;  %v859_v36 = vld [vmem:[#allocation3 + $0x1778] sm:$0xff] }
 0x41e   :  { %v6047_v32 = vpop.f32.mrb[130].mxu1  ;;  %v3830_v13 = vpop.f32.mrb[103].mxu0  ;;  %v867_v49 = vld [vmem:[#allocation3 + $0x17b8] sm:$0xff]  ;;  %v15323_v57 = vpack.c.bf16 %v859_v36, %v852_v41  ;;  %v888_v41 = vld [vmem:[#allocation3 + $0x1860] sm:$0xff] }
 0x41f   :  { %v6049_v11 = vpop.f32.mrb[131].mxu1  ;;  %v15325_v32 = vpack.c.bf16 %v874_v7, %v867_v49 }
 0x420   :  { %4093 = vmatmul.mubr.bf16.gmra.mrb[208].mxu0 %v15315_v4  ;;  %17589 = vst [vmem:[#allocation61_spill] sm:$0xff] %v15323_v57 }
 0x421   :  { %6345 = vmatmul.mubr.bf16.gmra.mrb[236].mxu1 %v17587_v62  ;;  %4102 = vmatprep.mubr.bf16.mxu0 %v15317_v23  ;;  %17590 = vst [vmem:[#allocation63_spill] sm:$0xff] %v15325_v32  ;;  %v17591_v23 = vld [vmem:[#allocation67_spill] sm:$0xff] }
 0x422   :  { %6354 = vmatprep.mubr.bf16.mxu1 %v17588_v47  ;;  %v17592_v47 = vld [vmem:[#allocation69_spill] sm:$0xff] }
 0x423   :  { %v3834_v60 = vpop.f32.mrb[104].mxu0 }
 0x424   :  { %v6053_v61 = vpop.f32.mrb[132].mxu1  ;;  %v3836_v17 = vpop.f32.mrb[105].mxu0  ;;  %v866_v60 = vld [vmem:[#allocation3 + $0x17b0] sm:$0xff] }
 0x425   :  { %v6055_v55 = vpop.f32.mrb[133].mxu1  ;;  %v3838_v13 = vpop.f32.mrb[106].mxu0  ;;  %v873_v61 = vld [vmem:[#allocation3 + $0x17e8] sm:$0xff] }
 0x426   :  { %v6057_v11 = vpop.f32.mrb[134].mxu1  ;;  %v3840_v4 = vpop.f32.mrb[107].mxu0  ;;  %v881_v17 = vld [vmem:[#allocation3 + $0x1828] sm:$0xff]  ;;  %v15331_v49 = vpack.c.bf16 %v873_v61, %v866_v60  ;;  %v902_v60 = vld [vmem:[#allocation3 + $0x18d0] sm:$0xff] }
 0x427   :  { %v6059_v62 = vpop.f32.mrb[135].mxu1  ;;  %v15333_v11 = vpack.c.bf16 %v888_v41, %v881_v17 }
 0x428   :  { %4103 = vmatmul.mubr.bf16.gmra.mrb[212].mxu0 %v15323_v57  ;;  %17593 = vst [vmem:[#allocation64_spill] sm:$0xff] %v15331_v49 }
 0x429   :  { %6355 = vmatmul.mubr.bf16.gmra.mrb[240].mxu1 %v17591_v23  ;;  %4112 = vmatprep.mubr.bf16.mxu0 %v15325_v32  ;;  %17594 = vst [vmem:[#allocation66_spill] sm:$0xff] %v15333_v11  ;;  %v17595_v32 = vld [vmem:[#allocation70_spill] sm:$0xff] }
 0x42a   :  { %6364 = vmatprep.mubr.bf16.mxu1 %v17592_v47  ;;  %v17596_v47 = vld [vmem:[#allocation72_spill] sm:$0xff] }
 0x42b   :  { %v3844_v36 = vpop.f32.mrb[108].mxu0 }
 0x42c   :  { %v6063_v55 = vpop.f32.mrb[136].mxu1  ;;  %v3846_v13 = vpop.f32.mrb[109].mxu0  ;;  %v880_v36 = vld [vmem:[#allocation3 + $0x1820] sm:$0xff] }
 0x42d   :  { %v6065_v7 = vpop.f32.mrb[137].mxu1  ;;  %v3848_v4 = vpop.f32.mrb[110].mxu0  ;;  %v887_v55 = vld [vmem:[#allocation3 + $0x1858] sm:$0xff] }
 0x42e   :  { %v6067_v62 = vpop.f32.mrb[138].mxu1  ;;  %v3850_v57 = vpop.f32.mrb[111].mxu0  ;;  %v895_v13 = vld [vmem:[#allocation3 + $0x1898] sm:$0xff]  ;;  %v15339_v17 = vpack.c.bf16 %v887_v55, %v880_v36  ;;  %v916_v36 = vld [vmem:[#allocation3 + $0x1940] sm:$0xff] }
 0x42f   :  { %v6069_v23 = vpop.f32.mrb[139].mxu1  ;;  %v15341_v62 = vpack.c.bf16 %v902_v60, %v895_v13 }
 0x430   :  { %4113 = vmatmul.mubr.bf16.gmra.mrb[216].mxu0 %v15331_v49  ;;  %17597 = vst [vmem:[#allocation67_spill] sm:$0xff] %v15339_v17 }
 0x431   :  { %6365 = vmatmul.mubr.bf16.gmra.mrb[244].mxu1 %v17595_v32  ;;  %4122 = vmatprep.mubr.bf16.mxu0 %v15333_v11  ;;  %17598 = vst [vmem:[#allocation69_spill] sm:$0xff] %v15341_v62  ;;  %v17599_v11 = vld [vmem:[#allocation73_spill] sm:$0xff] }
 0x432   :  { %6374 = vmatprep.mubr.bf16.mxu1 %v17596_v47  ;;  %v17600_v47 = vld [vmem:[#allocation75_spill] sm:$0xff] }
 0x433   :  { %v3854_v61 = vpop.f32.mrb[112].mxu0 }
 0x434   :  { %v6073_v7 = vpop.f32.mrb[140].mxu1  ;;  %v3856_v4 = vpop.f32.mrb[113].mxu0  ;;  %v894_v61 = vld [vmem:[#allocation3 + $0x1890] sm:$0xff] }
 0x435   :  { %v6075_v41 = vpop.f32.mrb[141].mxu1  ;;  %v3858_v57 = vpop.f32.mrb[114].mxu0  ;;  %v901_v7 = vld [vmem:[#allocation3 + $0x18c8] sm:$0xff] }
 0x436   :  { %v6077_v23 = vpop.f32.mrb[142].mxu1  ;;  %v3860_v49 = vpop.f32.mrb[115].mxu0  ;;  %v909_v4 = vld [vmem:[#allocation3 + $0x1908] sm:$0xff]  ;;  %v15347_v13 = vpack.c.bf16 %v901_v7, %v894_v61  ;;  %v930_v61 = vld [vmem:[#allocation3 + $0x19b0] sm:$0xff] }
 0x437   :  { %v6079_v32 = vpop.f32.mrb[143].mxu1  ;;  %v15349_v23 = vpack.c.bf16 %v916_v36, %v909_v4 }
 0x438   :  { %4123 = vmatmul.mubr.bf16.gmra.mrb[220].mxu0 %v15339_v17  ;;  %17601 = vst [vmem:[#allocation70_spill] sm:$0xff] %v15347_v13 }
 0x439   :  { %6375 = vmatmul.mubr.bf16.gmra.mrb[248].mxu1 %v17599_v11  ;;  %4132 = vmatprep.mubr.bf16.mxu0 %v15341_v62  ;;  %17602 = vst [vmem:[#allocation72_spill] sm:$0xff] %v15349_v23  ;;  %v17603_v62 = vld [vmem:[#allocation76_spill] sm:$0xff] }
 0x43a   :  { %6384 = vmatprep.mubr.bf16.mxu1 %v17600_v47  ;;  %v17604_v47 = vld [vmem:[#allocation78_spill] sm:$0xff] }
 0x43b   :  { %v3864_v55 = vpop.f32.mrb[116].mxu0 }
 0x43c   :  { %v6083_v41 = vpop.f32.mrb[144].mxu1  ;;  %v3866_v57 = vpop.f32.mrb[117].mxu0  ;;  %v908_v55 = vld [vmem:[#allocation3 + $0x1900] sm:$0xff] }
 0x43d   :  { %v6085_v60 = vpop.f32.mrb[145].mxu1  ;;  %v3868_v49 = vpop.f32.mrb[118].mxu0  ;;  %v915_v41 = vld [vmem:[#allocation3 + $0x1938] sm:$0xff] }
 0x43e   :  { %v6087_v32 = vpop.f32.mrb[146].mxu1  ;;  %v3870_v17 = vpop.f32.mrb[119].mxu0  ;;  %v923_v57 = vld [vmem:[#allocation3 + $0x1978] sm:$0xff]  ;;  %v15355_v4 = vpack.c.bf16 %v915_v41, %v908_v55  ;;  %v944_v55 = vld [vmem:[#allocation3 + $0x1a20] sm:$0xff] }
 0x43f   :  { %v6089_v11 = vpop.f32.mrb[147].mxu1  ;;  %v15357_v32 = vpack.c.bf16 %v930_v61, %v923_v57 }
 0x440   :  { %4133 = vmatmul.mubr.bf16.gmra.mrb[224].mxu0 %v15347_v13  ;;  %17605 = vst [vmem:[#allocation73_spill] sm:$0xff] %v15355_v4 }
 0x441   :  { %6385 = vmatmul.mubr.bf16.gmra.mrb[252].mxu1 %v17603_v62  ;;  %4142 = vmatprep.mubr.bf16.mxu0 %v15349_v23  ;;  %17606 = vst [vmem:[#allocation75_spill] sm:$0xff] %v15357_v32  ;;  %v17607_v23 = vld [vmem:[#allocation79_spill] sm:$0xff] }
 0x442   :  { %6394 = vmatprep.mubr.bf16.mxu1 %v17604_v47  ;;  %v17608_v47 = vld [vmem:[#allocation81_spill] sm:$0xff] }
 0x443   :  { %v3874_v7 = vpop.f32.mrb[120].mxu0 }
 0x444   :  { %v6093_v60 = vpop.f32.mrb[148].mxu1  ;;  %v3876_v49 = vpop.f32.mrb[121].mxu0  ;;  %v922_v7 = vld [vmem:[#allocation3 + $0x1970] sm:$0xff] }
 0x445   :  { %v6095_v36 = vpop.f32.mrb[149].mxu1  ;;  %v3878_v17 = vpop.f32.mrb[122].mxu0  ;;  %v929_v60 = vld [vmem:[#allocation3 + $0x19a8] sm:$0xff] }
 0x446   :  { %v6097_v11 = vpop.f32.mrb[150].mxu1  ;;  %v3880_v13 = vpop.f32.mrb[123].mxu0  ;;  %v937_v49 = vld [vmem:[#allocation3 + $0x19e8] sm:$0xff]  ;;  %v15363_v57 = vpack.c.bf16 %v929_v60, %v922_v7  ;;  %v958_v7 = vld [vmem:[#allocation3 + $0x1a90] sm:$0xff] }
 0x447   :  { %v6099_v62 = vpop.f32.mrb[151].mxu1  ;;  %v15365_v11 = vpack.c.bf16 %v944_v55, %v937_v49 }
 0x448   :  { %4143 = vmatmul.mubr.bf16.gmra.mrb[228].mxu0 %v15355_v4  ;;  %17609 = vst [vmem:[#allocation76_spill] sm:$0xff] %v15363_v57 }
 0x449   :  { %6395 = vmatmul.mubr.bf16.gmra.mrb[0].mxu1 %v17607_v23  ;;  %4152 = vmatprep.mubr.bf16.mxu0 %v15357_v32  ;;  %17610 = vst [vmem:[#allocation78_spill] sm:$0xff] %v15365_v11  ;;  %v17611_v32 = vld [vmem:[#allocation82_spill] sm:$0xff] }
 0x44a   :  { %6404 = vmatprep.mubr.bf16.mxu1 %v17608_v47  ;;  %v17612_v47 = vld [vmem:[#allocation84_spill] sm:$0xff] }
 0x44b   :  { %v3884_v41 = vpop.f32.mrb[124].mxu0 }
 0x44c   :  { %v6103_v36 = vpop.f32.mrb[152].mxu1  ;;  %v3886_v17 = vpop.f32.mrb[125].mxu0  ;;  %v936_v41 = vld [vmem:[#allocation3 + $0x19e0] sm:$0xff] }
 0x44d   :  { %v6105_v61 = vpop.f32.mrb[153].mxu1  ;;  %v3888_v13 = vpop.f32.mrb[126].mxu0  ;;  %v943_v36 = vld [vmem:[#allocation3 + $0x1a18] sm:$0xff] }
 0x44e   :  { %v6107_v62 = vpop.f32.mrb[154].mxu1  ;;  %v3890_v4 = vpop.f32.mrb[127].mxu0  ;;  %v951_v17 = vld [vmem:[#allocation3 + $0x1a58] sm:$0xff]  ;;  %v15371_v49 = vpack.c.bf16 %v943_v36, %v936_v41  ;;  %v972_v41 = vld [vmem:[#allocation3 + $0x1b00] sm:$0xff] }
 0x44f   :  { %v6109_v23 = vpop.f32.mrb[155].mxu1  ;;  %v15373_v62 = vpack.c.bf16 %v958_v7, %v951_v17 }
 0x450   :  { %4153 = vmatmul.mubr.bf16.gmra.mrb[232].mxu0 %v15363_v57  ;;  %17613 = vst [vmem:[#allocation79_spill] sm:$0xff] %v15371_v49 }
 0x451   :  { %6405 = vmatmul.mubr.bf16.gmra.mrb[4].mxu1 %v17611_v32  ;;  %4162 = vmatprep.mubr.bf16.mxu0 %v15365_v11  ;;  %17614 = vst [vmem:[#allocation81_spill] sm:$0xff] %v15373_v62  ;;  %v17615_v11 = vld [vmem:[#allocation85_spill] sm:$0xff] }
 0x452   :  { %6414 = vmatprep.mubr.bf16.mxu1 %v17612_v47  ;;  %v17616_v47 = vld [vmem:[#allocation87_spill] sm:$0xff] }
 0x453   :  { %v3894_v60 = vpop.f32.mrb[128].mxu0 }
 0x454   :  { %v6113_v61 = vpop.f32.mrb[156].mxu1  ;;  %v3896_v13 = vpop.f32.mrb[129].mxu0  ;;  %v950_v60 = vld [vmem:[#allocation3 + $0x1a50] sm:$0xff] }
 0x455   :  { %v6115_v55 = vpop.f32.mrb[157].mxu1  ;;  %v3898_v4 = vpop.f32.mrb[130].mxu0  ;;  %v957_v61 = vld [vmem:[#allocation3 + $0x1a88] sm:$0xff] }
 0x456   :  { %v6117_v23 = vpop.f32.mrb[158].mxu1  ;;  %v3900_v57 = vpop.f32.mrb[131].mxu0  ;;  %v965_v13 = vld [vmem:[#allocation3 + $0x1ac8] sm:$0xff]  ;;  %v15379_v17 = vpack.c.bf16 %v957_v61, %v950_v60  ;;  %v986_v60 = vld [vmem:[#allocation3 + $0x1b70] sm:$0xff] }
 0x457   :  { %v6119_v32 = vpop.f32.mrb[159].mxu1  ;;  %v15381_v23 = vpack.c.bf16 %v972_v41, %v965_v13 }
 0x458   :  { %4163 = vmatmul.mubr.bf16.gmra.mrb[236].mxu0 %v15371_v49  ;;  %17617 = vst [vmem:[#allocation82_spill] sm:$0xff] %v15379_v17 }
 0x459   :  { %6415 = vmatmul.mubr.bf16.gmra.mrb[8].mxu1 %v17615_v11  ;;  %4172 = vmatprep.mubr.bf16.mxu0 %v15373_v62  ;;  %17618 = vst [vmem:[#allocation84_spill] sm:$0xff] %v15381_v23  ;;  %v17619_v62 = vld [vmem:[#allocation88_spill] sm:$0xff] }
 0x45a   :  { %6424 = vmatprep.mubr.bf16.mxu1 %v17616_v47  ;;  %v17620_v47 = vld [vmem:[#allocation90_spill] sm:$0xff] }
 0x45b   :  { %v3904_v36 = vpop.f32.mrb[132].mxu0 }
 0x45c   :  { %v6123_v55 = vpop.f32.mrb[160].mxu1  ;;  %v3906_v4 = vpop.f32.mrb[133].mxu0  ;;  %v964_v36 = vld [vmem:[#allocation3 + $0x1ac0] sm:$0xff] }
 0x45d   :  { %v6125_v7 = vpop.f32.mrb[161].mxu1  ;;  %v3908_v57 = vpop.f32.mrb[134].mxu0  ;;  %v971_v55 = vld [vmem:[#allocation3 + $0x1af8] sm:$0xff] }
 0x45e   :  { %v6127_v32 = vpop.f32.mrb[162].mxu1  ;;  %v3910_v49 = vpop.f32.mrb[135].mxu0  ;;  %v979_v4 = vld [vmem:[#allocation3 + $0x1b38] sm:$0xff]  ;;  %v15387_v13 = vpack.c.bf16 %v971_v55, %v964_v36  ;;  %v1000_v36 = vld [vmem:[#allocation3 + $0x1be0] sm:$0xff] }
 0x45f   :  { %v6129_v11 = vpop.f32.mrb[163].mxu1  ;;  %v15389_v32 = vpack.c.bf16 %v986_v60, %v979_v4 }
 0x460   :  { %4173 = vmatmul.mubr.bf16.gmra.mrb[240].mxu0 %v15379_v17  ;;  %17621 = vst [vmem:[#allocation85_spill] sm:$0xff] %v15387_v13 }
 0x461   :  { %6425 = vmatmul.mubr.bf16.gmra.mrb[12].mxu1 %v17619_v62  ;;  %4182 = vmatprep.mubr.bf16.mxu0 %v15381_v23  ;;  %17622 = vst [vmem:[#allocation87_spill] sm:$0xff] %v15389_v32  ;;  %v17623_v23 = vld [vmem:[#allocation91_spill] sm:$0xff] }
 0x462   :  { %6434 = vmatprep.mubr.bf16.mxu1 %v17620_v47  ;;  %v17624_v47 = vld [vmem:[#allocation93_spill] sm:$0xff] }
 0x463   :  { %v3914_v61 = vpop.f32.mrb[136].mxu0 }
 0x464   :  { %v6133_v7 = vpop.f32.mrb[164].mxu1  ;;  %v3916_v57 = vpop.f32.mrb[137].mxu0  ;;  %v978_v61 = vld [vmem:[#allocation3 + $0x1b30] sm:$0xff] }
 0x465   :  { %v6135_v41 = vpop.f32.mrb[165].mxu1  ;;  %v3918_v49 = vpop.f32.mrb[138].mxu0  ;;  %v985_v7 = vld [vmem:[#allocation3 + $0x1b68] sm:$0xff] }
 0x466   :  { %v6137_v11 = vpop.f32.mrb[166].mxu1  ;;  %v3920_v17 = vpop.f32.mrb[139].mxu0  ;;  %v993_v57 = vld [vmem:[#allocation3 + $0x1ba8] sm:$0xff]  ;;  %v15395_v4 = vpack.c.bf16 %v985_v7, %v978_v61  ;;  %v120_v61 = vld [vmem:[#allocation3 + $0x60] sm:$0xff] }
 0x467   :  { %v6139_v62 = vpop.f32.mrb[167].mxu1  ;;  %v15397_v11 = vpack.c.bf16 %v1000_v36, %v993_v57 }
 0x468   :  { %4183 = vmatmul.mubr.bf16.gmra.mrb[244].mxu0 %v15387_v13  ;;  %17625 = vst [vmem:[#allocation88_spill] sm:$0xff] %v15395_v4 }
 0x469   :  { %6435 = vmatmul.mubr.bf16.gmra.mrb[16].mxu1 %v17623_v23  ;;  %4192 = vmatprep.mubr.bf16.mxu0 %v15389_v32  ;;  %17626 = vst [vmem:[#allocation90_spill] sm:$0xff] %v15397_v11  ;;  %v17627_v32 = vld [vmem:[#allocation94_spill] sm:$0xff] }
 0x46a   :  { %6444 = vmatprep.mubr.bf16.mxu1 %v17624_v47  ;;  %v17628_v47 = vld [vmem:[#allocation96_spill] sm:$0xff] }
 0x46b   :  { %v3924_v55 = vpop.f32.mrb[140].mxu0 }
 0x46c   :  { %v6143_v41 = vpop.f32.mrb[168].mxu1  ;;  %v3926_v49 = vpop.f32.mrb[141].mxu0  ;;  %v992_v55 = vld [vmem:[#allocation3 + $0x1ba0] sm:$0xff] }
 0x46d   :  { %v6145_v60 = vpop.f32.mrb[169].mxu1  ;;  %v3928_v17 = vpop.f32.mrb[142].mxu0  ;;  %v999_v41 = vld [vmem:[#allocation3 + $0x1bd8] sm:$0xff]  ;;  %v113_v49 = vld [vmem:[#allocation3 + $0x28] sm:$0xff] }
 0x46e   :  { %v6147_v62 = vpop.f32.mrb[170].mxu1  ;;  %v3930_v13 = vpop.f32.mrb[143].mxu0  ;;  %v15403_v57 = vpack.c.bf16 %v999_v41, %v992_v55  ;;  %v134_v55 = vld [vmem:[#allocation3 + $0xd0] sm:$0xff] }
 0x46f   :  { %v6149_v23 = vpop.f32.mrb[171].mxu1  ;;  %v15405_v62 = vpack.c.bf16 %v120_v61, %v113_v49 }
 0x470   :  { %4193 = vmatmul.mubr.bf16.gmra.mrb[248].mxu0 %v15395_v4  ;;  %17629 = vst [vmem:[#allocation91_spill] sm:$0xff] %v15403_v57 }
 0x471   :  { %6445 = vmatmul.mubr.bf16.gmra.mrb[20].mxu1 %v17627_v32  ;;  %4202 = vmatprep.mubr.bf16.mxu0 %v15397_v11  ;;  %17630 = vst [vmem:[#allocation93_spill] sm:$0xff] %v15405_v62  ;;  %v17631_v11 = vld [vmem:[#allocation97_spill] sm:$0xff] }
 0x472   :  { %6454 = vmatprep.mubr.bf16.mxu1 %v17628_v47  ;;  %v17632_v47 = vld [vmem:[#allocation99_spill] sm:$0xff] }
 0x473   :  { %v3934_v7 = vpop.f32.mrb[144].mxu0 }
 0x474   :  { %v6153_v60 = vpop.f32.mrb[172].mxu1  ;;  %v3936_v17 = vpop.f32.mrb[145].mxu0  ;;  %v112_v7 = vld [vmem:[#allocation3 + $0x20] sm:$0xff] }
 0x475   :  { %v6155_v36 = vpop.f32.mrb[173].mxu1  ;;  %v3938_v13 = vpop.f32.mrb[146].mxu0  ;;  %v119_v60 = vld [vmem:[#allocation3 + $0x58] sm:$0xff] }
 0x476   :  { %v6157_v23 = vpop.f32.mrb[174].mxu1  ;;  %v3940_v4 = vpop.f32.mrb[147].mxu0  ;;  %v127_v17 = vld [vmem:[#allocation3 + $0x98] sm:$0xff]  ;;  %v15411_v49 = vpack.c.bf16 %v119_v60, %v112_v7  ;;  %v148_v7 = vld [vmem:[#allocation3 + $0x140] sm:$0xff] }
 0x477   :  { %v6159_v32 = vpop.f32.mrb[175].mxu1  ;;  %v15413_v23 = vpack.c.bf16 %v134_v55, %v127_v17  ;;  %v13979_v60 = vld [vmem:[#allocation6 + $0x600] ss:$16 sps:$4 sm:$0xff]   ;;  %v13980_v55 = vld [vmem:[#allocation6 + $0x624] ss:$16 sps:$4 sm:$0xff]  }
 0x478   :  { %4203 = vmatmul.mubr.bf16.gmra.mrb[252].mxu0 %v15403_v57  ;;  %17633 = vst [vmem:[#allocation94_spill] sm:$0xff] %v15411_v49 }
 0x479   :  { %6455 = vmatmul.mubr.bf16.gmra.mrb[24].mxu1 %v17631_v11  ;;  %4245 = vmatprep.mubr.bf16.mxu0 %v15405_v62  ;;  %17634 = vst [vmem:[#allocation96_spill] sm:$0xff] %v15413_v23  ;;  %v17635_v62 = vld [vmem:[#allocation100_spill] sm:$0xff] }
 0x47a   :  { %6464 = vmatprep.mubr.bf16.mxu1 %v17632_v47  ;;  %v17636_v47 = vld [vmem:[#allocation102_spill] sm:$0xff] }
 0x47b   :  { %v3944_v41 = vpop.f32.mrb[148].mxu0 }
 0x47c   :  { %v6163_v36 = vpop.f32.mrb[176].mxu1  ;;  %v3946_v13 = vpop.f32.mrb[149].mxu0  ;;  %v126_v41 = vld [vmem:[#allocation3 + $0x90] sm:$0xff] }
 0x47d   :  { %v6165_v61 = vpop.f32.mrb[177].mxu1  ;;  %v3948_v4 = vpop.f32.mrb[150].mxu0  ;;  %v133_v36 = vld [vmem:[#allocation3 + $0xc8] sm:$0xff] }
 0x47e   :  { %v6167_v32 = vpop.f32.mrb[178].mxu1  ;;  %v3950_v57 = vpop.f32.mrb[151].mxu0  ;;  %v141_v13 = vld [vmem:[#allocation3 + $0x108] sm:$0xff]  ;;  %v15419_v4 = vpack.c.bf16 %v133_v36, %v126_v41  ;;  %v140_v41 = vld [vmem:[#allocation3 + $0x100] sm:$0xff]  ;;  %v147_v36 = vld [vmem:[#allocation3 + $0x138] sm:$0xff] }
 0x47f   :  { %v6169_v11 = vpop.f32.mrb[179].mxu1 }
 0x480   :  { %4246 = vmatmul.mubr.bf16.vlgmr.msra.gmra.mrb[0].mxu0 %v15411_v49 }
 0x481   :  { %6465 = vmatmul.mubr.bf16.gmra.mrb[28].mxu1 %v17635_v62  ;;  %4255 = vmatprep.mubr.bf16.mxu0 %v15413_v23  ;;  %v15421_v62 = vpack.c.bf16 %v148_v7, %v141_v13  ;;  %v162_v13 = vld [vmem:[#allocation3 + $0x1b0] sm:$0xff] }
 0x482   :  { %6474 = vmatprep.mubr.bf16.mxu1 %v17636_v47  ;;  %4887 = vmatpush1.bf16.msra.mxu0 %v13979_v60  ;;  %v17638_v60 = vld [vmem:[#allocation103_spill] sm:$0xff] }
 0x483   :  { %v3954_v61 = vpop.f32.mrb[152].mxu0  ;;  %4888 = vmatprep.subr.bf16.mxu0 %v13980_v55  ;;  %v15428_v55 = vpack.c.bf16 %v147_v36, %v140_v41  ;;  %v176_v41 = vld [vmem:[#allocation3 + $0x220] sm:$0xff] }
 0x484   :  { %v6173_v17 = vpop.f32.mrb[180].mxu1  ;;  %v3956_v57 = vpop.f32.mrb[153].mxu0  ;;  %v17639_v61 = vld [vmem:[#allocation105_spill] sm:$0xff] }
 0x485   :  { %v6175_v32 = vpop.f32.mrb[181].mxu1  ;;  %v3958_v11 = vpop.f32.mrb[154].mxu0  ;;  %v155_v17 = vld [vmem:[#allocation3 + $0x178] sm:$0xff] }
 0x486   :  { %v6177_v23 = vpop.f32.mrb[182].mxu1  ;;  %v3960_v49 = vpop.f32.mrb[155].mxu0  ;;  %4889 = vmatpush1.bf16.msra.mxu0 %v13981_v21  ;;  %v15430_v32 = vpack.c.bf16 %v162_v13, %v155_v17 }
 0x487   :  { %v6179_v47 = vpop.f32.mrb[183].mxu1  ;;  %10437 = vmatprep.subr.bf16.mxu0 %v17637_v48 }
 0x488   :  { %4256 = vmatmul.mubr.bf16.gmra.mrb[4].mxu0 %v15419_v4 }
 0x489   :  { %6475 = vmatmul.mubr.bf16.gmra.mrb[32].mxu1 %v17638_v60  ;;  %4265 = vmatprep.mubr.bf16.mxu0 %v15421_v62 }
 0x48a   :  { %6484 = vmatprep.mubr.bf16.mxu1 %v17639_v61  ;;  %v17640_v61 = vld [vmem:[#allocation106_spill] sm:$0xff] }
 0x48b   :  { %v3964_v7 = vpop.f32.mrb[156].mxu0 }
 0x48c   :  { %v6183_v23 = vpop.f32.mrb[184].mxu1  ;;  %v3966_v49 = vpop.f32.mrb[157].mxu0  ;;  %v154_v7 = vld [vmem:[#allocation3 + $0x170] sm:$0xff] }
 0x48d   :  { %v6185_v21 = vpop.f32.mrb[185].mxu1  ;;  %v3968_v57 = vpop.f32.mrb[158].mxu0  ;;  %v161_v23 = vld [vmem:[#allocation3 + $0x1a8] sm:$0xff] }
 0x48e   :  { %v6187_v11 = vpop.f32.mrb[186].mxu1  ;;  %v3970_v47 = vpop.f32.mrb[159].mxu0  ;;  %v169_v49 = vld [vmem:[#allocation3 + $0x1e8] sm:$0xff]  ;;  %v15436_v17 = vpack.c.bf16 %v161_v23, %v154_v7  ;;  %v190_v7 = vld [vmem:[#allocation3 + $0x290] sm:$0xff] }
 0x48f   :  { %v6189_v60 = vpop.f32.mrb[187].mxu1  ;;  %v15438_v47 = vpack.c.bf16 %v176_v41, %v169_v49 }
 0x490   :  { %4266 = vmatmul.mubr.bf16.gmra.mrb[8].mxu0 %v15428_v55 }
 0x491   :  { %6485 = vmatmul.mubr.bf16.gmra.mrb[36].mxu1 %v15075_v54  ;;  %4275 = vmatprep.mubr.bf16.mxu0 %v15430_v32 }
 0x492   :  { %6494 = vmatprep.mubr.bf16.mxu1 %v17640_v61  ;;  %v168_v61 = vld [vmem:[#allocation3 + $0x1e0] sm:$0xff] }
 0x493   :  { %v3974_v36 = vpop.f32.mrb[160].mxu0 }
 0x494   :  { %v6193_v21 = vpop.f32.mrb[188].mxu1  ;;  %v3976_v57 = vpop.f32.mrb[161].mxu0  ;;  %v175_v36 = vld [vmem:[#allocation3 + $0x218] sm:$0xff] }
 0x495   :  { %v6195_v13 = vpop.f32.mrb[189].mxu1  ;;  %v3978_v11 = vpop.f32.mrb[162].mxu0  ;;  %v183_v21 = vld [vmem:[#allocation3 + $0x258] sm:$0xff]  ;;  %v15444_v49 = vpack.c.bf16 %v175_v36, %v168_v61  ;;  %v204_v61 = vld [vmem:[#allocation3 + $0x300] sm:$0xff] }
 0x496   :  { %v6197_v60 = vpop.f32.mrb[190].mxu1  ;;  %v3980_v48 = vpop.f32.mrb[163].mxu0  ;;  %v15446_v11 = vpack.c.bf16 %v190_v7, %v183_v21 }
 0x497   :  { %v6199_v54 = vpop.f32.mrb[191].mxu1 }
 0x498   :  { %4276 = vmatmul.mubr.bf16.gmra.mrb[12].mxu0 %v15436_v17 }
 0x499   :  { %6495 = vmatmul.mubr.bf16.gmra.mrb[40].mxu1 %v15083_v30  ;;  %4285 = vmatprep.mubr.bf16.mxu0 %v15438_v47 }
 0x49a   :  { %6504 = vmatprep.mubr.bf16.mxu1 %v15085_v43  ;;  %v182_v43 = vld [vmem:[#allocation3 + $0x250] sm:$0xff] }
 0x49b   :  { %v3984_v23 = vpop.f32.mrb[164].mxu0 }
 0x49c   :  { %v6203_v57 = vpop.f32.mrb[192].mxu1  ;;  %v3986_v13 = vpop.f32.mrb[165].mxu0  ;;  %v189_v23 = vld [vmem:[#allocation3 + $0x288] sm:$0xff] }
 0x49d   :  { %v6205_v41 = vpop.f32.mrb[193].mxu1  ;;  %v3988_v48 = vpop.f32.mrb[166].mxu0  ;;  %v197_v57 = vld [vmem:[#allocation3 + $0x2c8] sm:$0xff]  ;;  %v15452_v21 = vpack.c.bf16 %v189_v23, %v182_v43  ;;  %v218_v43 = vld [vmem:[#allocation3 + $0x370] sm:$0xff] }
 0x49e   :  { %v6207_v60 = vpop.f32.mrb[194].mxu1  ;;  %v3990_v54 = vpop.f32.mrb[167].mxu0 }
 0x49f   :  { %v6209_v30 = vpop.f32.mrb[195].mxu1  ;;  %v15454_v60 = vpack.c.bf16 %v204_v61, %v197_v57 }
 0x4a0   :  { %4286 = vmatmul.mubr.bf16.gmra.mrb[16].mxu0 %v15444_v49 }
 0x4a1   :  { %6505 = vmatmul.mubr.bf16.gmra.mrb[44].mxu1 %v15091_v52  ;;  %4295 = vmatprep.mubr.bf16.mxu0 %v15446_v11 }
 0x4a2   :  { %6514 = vmatprep.mubr.bf16.mxu1 %v15093_v3  ;;  %v196_v3 = vld [vmem:[#allocation3 + $0x2c0] sm:$0xff] }
 0x4a3   :  { %v3994_v36 = vpop.f32.mrb[168].mxu0 }
 0x4a4   :  { %v6213_v13 = vpop.f32.mrb[196].mxu1  ;;  %v3996_v41 = vpop.f32.mrb[169].mxu0  ;;  %v203_v36 = vld [vmem:[#allocation3 + $0x2f8] sm:$0xff] }
 0x4a5   :  { %v6215_v7 = vpop.f32.mrb[197].mxu1  ;;  %v3998_v48 = vpop.f32.mrb[170].mxu0  ;;  %v211_v13 = vld [vmem:[#allocation3 + $0x338] sm:$0xff]  ;;  %v15460_v57 = vpack.c.bf16 %v203_v36, %v196_v3  ;;  %v232_v3 = vld [vmem:[#allocation3 + $0x3e0] sm:$0xff] }
 0x4a6   :  { %v6217_v54 = vpop.f32.mrb[198].mxu1  ;;  %v4000_v30 = vpop.f32.mrb[171].mxu0 }
 0x4a7   :  { %v6219_v52 = vpop.f32.mrb[199].mxu1  ;;  %v15462_v54 = vpack.c.bf16 %v218_v43, %v211_v13 }
 0x4a8   :  { %4296 = vmatmul.mubr.bf16.gmra.mrb[20].mxu0 %v15452_v21 }
 0x4a9   :  { %6515 = vmatmul.mubr.bf16.gmra.mrb[48].mxu1 %v15099_v46  ;;  %4305 = vmatprep.mubr.bf16.mxu0 %v15454_v60 }
 0x4aa   :  { %6524 = vmatprep.mubr.bf16.mxu1 %v15101_v63  ;;  %v210_v63 = vld [vmem:[#allocation3 + $0x330] sm:$0xff] }
 0x4ab   :  { %v4004_v23 = vpop.f32.mrb[172].mxu0 }
 0x4ac   :  { %v6223_v41 = vpop.f32.mrb[200].mxu1  ;;  %v4006_v7 = vpop.f32.mrb[173].mxu0  ;;  %v217_v23 = vld [vmem:[#allocation3 + $0x368] sm:$0xff] }
 0x4ad   :  { %v6225_v61 = vpop.f32.mrb[201].mxu1  ;;  %v4008_v48 = vpop.f32.mrb[174].mxu0  ;;  %v225_v41 = vld [vmem:[#allocation3 + $0x3a8] sm:$0xff] }
 0x4ae   :  { %v6227_v30 = vpop.f32.mrb[202].mxu1  ;;  %v4010_v52 = vpop.f32.mrb[175].mxu0  ;;  %v15468_v61 = vpack.c.bf16 %v217_v23, %v210_v63  ;;  %v15470_v43 = vpack.c.bf16 %v232_v3, %v225_v41 }
 0x4af   :  { %v6229_v46 = vpop.f32.mrb[203].mxu1  ;;  %v239_v30 = vld [vmem:[#allocation3 + $0x418] sm:$0xff]  ;;  %v246_v52 = vld [vmem:[#allocation3 + $0x450] sm:$0xff] }
 0x4b0   :  { %4306 = vmatmul.mubr.bf16.gmra.mrb[24].mxu0 %v15460_v57 }
 0x4b1   :  { %6525 = vmatmul.mubr.bf16.gmra.mrb[52].mxu1 %v15107_v0  ;;  %4315 = vmatprep.mubr.bf16.mxu0 %v15462_v54  ;;  %v224_v0 = vld [vmem:[#allocation3 + $0x3a0] sm:$0xff] }
 0x4b2   :  { %6534 = vmatprep.mubr.bf16.mxu1 %v15109_v38  ;;  %v231_v38 = vld [vmem:[#allocation3 + $0x3d8] sm:$0xff] }
 0x4b3   :  { %v4014_v36 = vpop.f32.mrb[176].mxu0  ;;  %v15476_v23 = vpack.c.bf16 %v231_v38, %v224_v0  ;;  %v260_v0 = vld [vmem:[#allocation3 + $0x4c0] sm:$0xff] }
 0x4b4   :  { %v4016_v7 = vpop.f32.mrb[177].mxu0 }
 0x4b5   :  { %v4018_v13 = vpop.f32.mrb[178].mxu0  ;;  %v15478_v7 = vpack.c.bf16 %v246_v52, %v239_v30 }
 0x4b6   :  { %v4020_v48 = vpop.f32.mrb[179].mxu0 }
 0x4b8   :  { %4316 = vmatmul.mubr.bf16.gmra.mrb[28].mxu0 %v15468_v61 }
 0x4b9   :  { %6535 = vmatmul.mubr.bf16.gmra.mrb[56].mxu1 %v15115_v34  ;;  %4325 = vmatprep.mubr.bf16.mxu0 %v15470_v43 }
 0x4ba   :  { %6544 = vmatprep.mubr.bf16.mxu1 %v15117_v22  ;;  %v238_v22 = vld [vmem:[#allocation3 + $0x410] sm:$0xff] }
 0x4bb   :  { %v4024_v46 = vpop.f32.mrb[180].mxu0 }
 0x4bc   :  { %v6276_v36 = vpop.f32.mrb[208].mxu1  ;;  %v4026_v63 = vpop.f32.mrb[181].mxu0  ;;  %v245_v46 = vld [vmem:[#allocation3 + $0x448] sm:$0xff] }
 0x4bd   :  { %v6278_v41 = vpop.f32.mrb[209].mxu1  ;;  %v4028_v3 = vpop.f32.mrb[182].mxu0  ;;  %v253_v36 = vld [vmem:[#allocation3 + $0x488] sm:$0xff]  ;;  %v15484_v30 = vpack.c.bf16 %v245_v46, %v238_v22  ;;  %v274_v22 = vld [vmem:[#allocation3 + $0x530] sm:$0xff] }
 0x4be   :  { %v6280_v13 = vpop.f32.mrb[210].mxu1  ;;  %v4030_v48 = vpop.f32.mrb[183].mxu0 }
 0x4bf   :  { %v6282_v34 = vpop.f32.mrb[211].mxu1  ;;  %v15486_v13 = vpack.c.bf16 %v260_v0, %v253_v36 }
 0x4c0   :  { %4326 = vmatmul.mubr.bf16.gmra.mrb[32].mxu0 %v15476_v23 }
 0x4c1   :  { %6545 = vmatmul.mubr.bf16.gmra.mrb[60].mxu1 %v15123_v24  ;;  %4335 = vmatprep.mubr.bf16.mxu0 %v15478_v7 }
 0x4c2   :  { %6554 = vmatprep.mubr.bf16.mxu1 %v15125_v18  ;;  %v252_v18 = vld [vmem:[#allocation3 + $0x480] sm:$0xff] }
 0x4c3   :  { %v4034_v38 = vpop.f32.mrb[184].mxu0 }
 0x4c4   :  { %v6286_v63 = vpop.f32.mrb[212].mxu1  ;;  %v4036_v41 = vpop.f32.mrb[185].mxu0  ;;  %v259_v38 = vld [vmem:[#allocation3 + $0x4b8] sm:$0xff] }
 0x4c5   :  { %v6288_v52 = vpop.f32.mrb[213].mxu1  ;;  %v4038_v3 = vpop.f32.mrb[186].mxu0  ;;  %v267_v63 = vld [vmem:[#allocation3 + $0x4f8] sm:$0xff]  ;;  %v15492_v36 = vpack.c.bf16 %v259_v38, %v252_v18  ;;  %v288_v18 = vld [vmem:[#allocation3 + $0x5a0] sm:$0xff] }
 0x4c6   :  { %v6290_v48 = vpop.f32.mrb[214].mxu1  ;;  %v4040_v34 = vpop.f32.mrb[187].mxu0 }
 0x4c7   :  { %v6292_v24 = vpop.f32.mrb[215].mxu1  ;;  %v15494_v48 = vpack.c.bf16 %v274_v22, %v267_v63 }
 0x4c8   :  { %4336 = vmatmul.mubr.bf16.gmra.mrb[36].mxu0 %v15484_v30 }
 0x4c9   :  { %6555 = vmatmul.mubr.bf16.gmra.mrb[64].mxu1 %v15131_v14  ;;  %4345 = vmatprep.mubr.bf16.mxu0 %v15486_v13 }
 0x4ca   :  { %6564 = vmatprep.mubr.bf16.mxu1 %v15133_v16  ;;  %v266_v16 = vld [vmem:[#allocation3 + $0x4f0] sm:$0xff] }
 0x4cb   :  { %v4044_v46 = vpop.f32.mrb[188].mxu0 }
 0x4cc   :  { %v6296_v41 = vpop.f32.mrb[216].mxu1  ;;  %v4046_v52 = vpop.f32.mrb[189].mxu0  ;;  %v273_v46 = vld [vmem:[#allocation3 + $0x528] sm:$0xff] }
 0x4cd   :  { %v6298_v0 = vpop.f32.mrb[217].mxu1  ;;  %v4048_v3 = vpop.f32.mrb[190].mxu0  ;;  %v281_v41 = vld [vmem:[#allocation3 + $0x568] sm:$0xff]  ;;  %v15500_v63 = vpack.c.bf16 %v273_v46, %v266_v16  ;;  %v302_v16 = vld [vmem:[#allocation3 + $0x610] sm:$0xff] }
 0x4ce   :  { %v6300_v34 = vpop.f32.mrb[218].mxu1  ;;  %v4050_v24 = vpop.f32.mrb[191].mxu0 }
 0x4cf   :  { %v6302_v14 = vpop.f32.mrb[219].mxu1  ;;  %v15502_v34 = vpack.c.bf16 %v288_v18, %v281_v41 }
 0x4d0   :  { %4346 = vmatmul.mubr.bf16.gmra.mrb[40].mxu0 %v15492_v36 }
 0x4d1   :  { %6565 = vmatmul.mubr.bf16.gmra.mrb[68].mxu1 %v15139_v2  ;;  %4355 = vmatprep.mubr.bf16.mxu0 %v15494_v48 }
 0x4d2   :  { %6574 = vmatprep.mubr.bf16.mxu1 %v15141_v12  ;;  %v280_v12 = vld [vmem:[#allocation3 + $0x560] sm:$0xff] }
 0x4d3   :  { %v4054_v38 = vpop.f32.mrb[192].mxu0 }
 0x4d4   :  { %v6306_v52 = vpop.f32.mrb[220].mxu1  ;;  %v4056_v0 = vpop.f32.mrb[193].mxu0  ;;  %v287_v38 = vld [vmem:[#allocation3 + $0x598] sm:$0xff] }
 0x4d5   :  { %v6308_v22 = vpop.f32.mrb[221].mxu1  ;;  %v4058_v3 = vpop.f32.mrb[194].mxu0  ;;  %v295_v52 = vld [vmem:[#allocation3 + $0x5d8] sm:$0xff]  ;;  %v15508_v41 = vpack.c.bf16 %v287_v38, %v280_v12  ;;  %v316_v12 = vld [vmem:[#allocation3 + $0x680] sm:$0xff] }
 0x4d6   :  { %v6310_v24 = vpop.f32.mrb[222].mxu1  ;;  %v4060_v14 = vpop.f32.mrb[195].mxu0 }
 0x4d7   :  { %v6312_v2 = vpop.f32.mrb[223].mxu1  ;;  %v15510_v24 = vpack.c.bf16 %v302_v16, %v295_v52 }
 0x4d8   :  { %4356 = vmatmul.mubr.bf16.gmra.mrb[44].mxu0 %v15500_v63 }
 0x4d9   :  { %6575 = vmatmul.mubr.bf16.gmra.mrb[72].mxu1 %v15147_v19  ;;  %4365 = vmatprep.mubr.bf16.mxu0 %v15502_v34 }
 0x4da   :  { %6584 = vmatprep.mubr.bf16.mxu1 %v15149_v56  ;;  %v294_v56 = vld [vmem:[#allocation3 + $0x5d0] sm:$0xff] }
 0x4db   :  { %v4064_v46 = vpop.f32.mrb[196].mxu0 }
 0x4dc   :  { %v6316_v0 = vpop.f32.mrb[224].mxu1  ;;  %v4066_v22 = vpop.f32.mrb[197].mxu0  ;;  %v301_v46 = vld [vmem:[#allocation3 + $0x608] sm:$0xff] }
 0x4dd   :  { %v6318_v18 = vpop.f32.mrb[225].mxu1  ;;  %v4068_v3 = vpop.f32.mrb[198].mxu0  ;;  %v309_v0 = vld [vmem:[#allocation3 + $0x648] sm:$0xff]  ;;  %v15516_v52 = vpack.c.bf16 %v301_v46, %v294_v56  ;;  %v330_v56 = vld [vmem:[#allocation3 + $0x6f0] sm:$0xff] }
 0x4de   :  { %v6320_v14 = vpop.f32.mrb[226].mxu1  ;;  %v4070_v2 = vpop.f32.mrb[199].mxu0 }
 0x4df   :  { %v6322_v19 = vpop.f32.mrb[227].mxu1  ;;  %v15518_v14 = vpack.c.bf16 %v316_v12, %v309_v0 }
 0x4e0   :  { %4366 = vmatmul.mubr.bf16.gmra.mrb[48].mxu0 %v15508_v41 }
 0x4e1   :  { %6585 = vmatmul.mubr.bf16.gmra.mrb[76].mxu1 %v15155_v1  ;;  %4375 = vmatprep.mubr.bf16.mxu0 %v15510_v24 }
 0x4e2   :  { %6594 = vmatprep.mubr.bf16.mxu1 %v15157_v50  ;;  %v308_v50 = vld [vmem:[#allocation3 + $0x640] sm:$0xff] }
 0x4e3   :  { %v4074_v38 = vpop.f32.mrb[200].mxu0 }
 0x4e4   :  { %v6326_v22 = vpop.f32.mrb[228].mxu1  ;;  %v4076_v18 = vpop.f32.mrb[201].mxu0  ;;  %v315_v38 = vld [vmem:[#allocation3 + $0x678] sm:$0xff] }
 0x4e5   :  { %v6328_v16 = vpop.f32.mrb[229].mxu1  ;;  %v4078_v3 = vpop.f32.mrb[202].mxu0  ;;  %v323_v22 = vld [vmem:[#allocation3 + $0x6b8] sm:$0xff]  ;;  %v15524_v0 = vpack.c.bf16 %v315_v38, %v308_v50  ;;  %v344_v50 = vld [vmem:[#allocation3 + $0x760] sm:$0xff] }
 0x4e6   :  { %v6330_v2 = vpop.f32.mrb[230].mxu1  ;;  %v4080_v19 = vpop.f32.mrb[203].mxu0 }
 0x4e7   :  { %v6332_v1 = vpop.f32.mrb[231].mxu1  ;;  %v15526_v2 = vpack.c.bf16 %v330_v56, %v323_v22 }
 0x4e8   :  { %4376 = vmatmul.mubr.bf16.gmra.mrb[52].mxu0 %v15516_v52 }
 0x4e9   :  { %6595 = vmatmul.mubr.bf16.gmra.mrb[80].mxu1 %v15163_v29  ;;  %4385 = vmatprep.mubr.bf16.mxu0 %v15518_v14 }
 0x4ea   :  { %6604 = vmatprep.mubr.bf16.mxu1 %v15165_v59  ;;  %v322_v59 = vld [vmem:[#allocation3 + $0x6b0] sm:$0xff] }
 0x4eb   :  { %v4084_v46 = vpop.f32.mrb[204].mxu0 }
 0x4ec   :  { %v6336_v18 = vpop.f32.mrb[232].mxu1  ;;  %v4086_v16 = vpop.f32.mrb[205].mxu0  ;;  %v329_v46 = vld [vmem:[#allocation3 + $0x6e8] sm:$0xff] }
 0x4ed   :  { %v6338_v12 = vpop.f32.mrb[233].mxu1  ;;  %v4088_v3 = vpop.f32.mrb[206].mxu0  ;;  %v337_v18 = vld [vmem:[#allocation3 + $0x728] sm:$0xff]  ;;  %v15532_v22 = vpack.c.bf16 %v329_v46, %v322_v59  ;;  %v358_v59 = vld [vmem:[#allocation3 + $0x7d0] sm:$0xff] }
 0x4ee   :  { %v6340_v19 = vpop.f32.mrb[234].mxu1  ;;  %v4090_v1 = vpop.f32.mrb[207].mxu0 }
 0x4ef   :  { %v6342_v29 = vpop.f32.mrb[235].mxu1  ;;  %v15534_v19 = vpack.c.bf16 %v344_v50, %v337_v18 }
 0x4f0   :  { %4386 = vmatmul.mubr.bf16.gmra.mrb[56].mxu0 %v15524_v0 }
 0x4f1   :  { %6605 = vmatmul.mubr.bf16.gmra.mrb[84].mxu1 %v15171_v37  ;;  %4395 = vmatprep.mubr.bf16.mxu0 %v15526_v2 }
 0x4f2   :  { %6614 = vmatprep.mubr.bf16.mxu1 %v15173_v27  ;;  %v336_v27 = vld [vmem:[#allocation3 + $0x720] sm:$0xff] }
 0x4f3   :  { %v4094_v38 = vpop.f32.mrb[208].mxu0 }
 0x4f4   :  { %v6346_v16 = vpop.f32.mrb[236].mxu1  ;;  %v4096_v12 = vpop.f32.mrb[209].mxu0  ;;  %v343_v38 = vld [vmem:[#allocation3 + $0x758] sm:$0xff] }
 0x4f5   :  { %v6348_v56 = vpop.f32.mrb[237].mxu1  ;;  %v4098_v3 = vpop.f32.mrb[210].mxu0  ;;  %v351_v16 = vld [vmem:[#allocation3 + $0x798] sm:$0xff]  ;;  %v15540_v18 = vpack.c.bf16 %v343_v38, %v336_v27  ;;  %v372_v27 = vld [vmem:[#allocation3 + $0x840] sm:$0xff] }
 0x4f6   :  { %v6350_v1 = vpop.f32.mrb[238].mxu1  ;;  %v4100_v29 = vpop.f32.mrb[211].mxu0 }
 0x4f7   :  { %v6352_v37 = vpop.f32.mrb[239].mxu1  ;;  %v15542_v1 = vpack.c.bf16 %v358_v59, %v351_v16 }
 0x4f8   :  { %4396 = vmatmul.mubr.bf16.gmra.mrb[60].mxu0 %v15532_v22 }
 0x4f9   :  { %6615 = vmatmul.mubr.bf16.gmra.mrb[88].mxu1 %v15179_v44  ;;  %4405 = vmatprep.mubr.bf16.mxu0 %v15534_v19 }
 0x4fa   :  { %6624 = vmatprep.mubr.bf16.mxu1 %v15181_v40  ;;  %v350_v40 = vld [vmem:[#allocation3 + $0x790] sm:$0xff] }
 0x4fb   :  { %v4104_v46 = vpop.f32.mrb[212].mxu0 }
 0x4fc   :  { %v6356_v12 = vpop.f32.mrb[240].mxu1  ;;  %v4106_v56 = vpop.f32.mrb[213].mxu0  ;;  %v357_v46 = vld [vmem:[#allocation3 + $0x7c8] sm:$0xff] }
 0x4fd   :  { %v6358_v50 = vpop.f32.mrb[241].mxu1  ;;  %v4108_v3 = vpop.f32.mrb[214].mxu0  ;;  %v365_v12 = vld [vmem:[#allocation3 + $0x808] sm:$0xff]  ;;  %v15548_v16 = vpack.c.bf16 %v357_v46, %v350_v40  ;;  %v386_v40 = vld [vmem:[#allocation3 + $0x8b0] sm:$0xff] }
 0x4fe   :  { %v6360_v29 = vpop.f32.mrb[242].mxu1  ;;  %v4110_v37 = vpop.f32.mrb[215].mxu0 }
 0x4ff   :  { %v6362_v44 = vpop.f32.mrb[243].mxu1  ;;  %v15550_v29 = vpack.c.bf16 %v372_v27, %v365_v12 }
 0x500   :  { %4406 = vmatmul.mubr.bf16.gmra.mrb[64].mxu0 %v15540_v18 }
 0x501   :  { %6625 = vmatmul.mubr.bf16.gmra.mrb[92].mxu1 %v15187_v20  ;;  %4415 = vmatprep.mubr.bf16.mxu0 %v15542_v1 }
 0x502   :  { %6634 = vmatprep.mubr.bf16.mxu1 %v15189_v45  ;;  %v364_v45 = vld [vmem:[#allocation3 + $0x800] sm:$0xff] }
 0x503   :  { %v4114_v38 = vpop.f32.mrb[216].mxu0 }
 0x504   :  { %v6366_v56 = vpop.f32.mrb[244].mxu1  ;;  %v4116_v50 = vpop.f32.mrb[217].mxu0  ;;  %v371_v38 = vld [vmem:[#allocation3 + $0x838] sm:$0xff] }
 0x505   :  { %v6368_v59 = vpop.f32.mrb[245].mxu1  ;;  %v4118_v3 = vpop.f32.mrb[218].mxu0  ;;  %v379_v56 = vld [vmem:[#allocation3 + $0x878] sm:$0xff]  ;;  %v15556_v12 = vpack.c.bf16 %v371_v38, %v364_v45  ;;  %v400_v45 = vld [vmem:[#allocation3 + $0x920] sm:$0xff] }
 0x506   :  { %v6370_v37 = vpop.f32.mrb[246].mxu1  ;;  %v4120_v44 = vpop.f32.mrb[219].mxu0 }
 0x507   :  { %v6372_v20 = vpop.f32.mrb[247].mxu1  ;;  %v15558_v37 = vpack.c.bf16 %v386_v40, %v379_v56 }
 0x508   :  { %4416 = vmatmul.mubr.bf16.gmra.mrb[68].mxu0 %v15548_v16 }
 0x509   :  { %6635 = vmatmul.mubr.bf16.gmra.mrb[96].mxu1 %v15195_v33  ;;  %4425 = vmatprep.mubr.bf16.mxu0 %v15550_v29  ;;  %17641 = vst [vmem:[#allocation97_spill] sm:$0xff] %v15558_v37 }
 0x50a   :  { %6644 = vmatprep.mubr.bf16.mxu1 %v15197_v10  ;;  %v378_v10 = vld [vmem:[#allocation3 + $0x870] sm:$0xff] }
 0x50b   :  { %v4124_v46 = vpop.f32.mrb[220].mxu0 }
 0x50c   :  { %v6376_v50 = vpop.f32.mrb[248].mxu1  ;;  %v4126_v59 = vpop.f32.mrb[221].mxu0  ;;  %v385_v46 = vld [vmem:[#allocation3 + $0x8a8] sm:$0xff] }
 0x50d   :  { %v6378_v27 = vpop.f32.mrb[249].mxu1  ;;  %v4128_v3 = vpop.f32.mrb[222].mxu0  ;;  %v393_v50 = vld [vmem:[#allocation3 + $0x8e8] sm:$0xff]  ;;  %v15564_v56 = vpack.c.bf16 %v385_v46, %v378_v10  ;;  %v414_v10 = vld [vmem:[#allocation3 + $0x990] sm:$0xff] }
 0x50e   :  { %v6380_v44 = vpop.f32.mrb[250].mxu1  ;;  %v4130_v20 = vpop.f32.mrb[223].mxu0 }
 0x50f   :  { %v6382_v33 = vpop.f32.mrb[251].mxu1  ;;  %17642 = vst [vmem:[#allocation99_spill] sm:$0xff] %v15564_v56  ;;  %v15566_v44 = vpack.c.bf16 %v400_v45, %v393_v50 }
 0x510   :  { %4426 = vmatmul.mubr.bf16.gmra.mrb[72].mxu0 %v15556_v12 }
 0x511   :  { %6645 = vmatmul.mubr.bf16.gmra.mrb[100].mxu1 %v15203_v53  ;;  %4435 = vmatprep.mubr.bf16.mxu0 %v15558_v37  ;;  %17643 = vst [vmem:[#allocation100_spill] sm:$0xff] %v15566_v44  ;;  %v13636_v37 = vld [vmem:[#allocation6 + $0x448] ss:$16 sps:$4 sm:$0xff]  }
 0x512   :  { %6654 = vmatprep.mubr.bf16.mxu1 %v15205_v39  ;;  %v392_v39 = vld [vmem:[#allocation3 + $0x8e0] sm:$0xff] }
 0x513   :  { %v4134_v38 = vpop.f32.mrb[224].mxu0 }
 0x514   :  { %v6386_v59 = vpop.f32.mrb[252].mxu1  ;;  %v4136_v27 = vpop.f32.mrb[225].mxu0  ;;  %v399_v38 = vld [vmem:[#allocation3 + $0x918] sm:$0xff] }
 0x515   :  { %v6388_v40 = vpop.f32.mrb[253].mxu1  ;;  %v4138_v3 = vpop.f32.mrb[226].mxu0  ;;  %v407_v59 = vld [vmem:[#allocation3 + $0x958] sm:$0xff]  ;;  %v15572_v50 = vpack.c.bf16 %v399_v38, %v392_v39  ;;  %v413_v39 = vld [vmem:[#allocation3 + $0x988] sm:$0xff] }
 0x516   :  { %v6390_v20 = vpop.f32.mrb[254].mxu1  ;;  %v4140_v33 = vpop.f32.mrb[227].mxu0  ;;  %v421_v38 = vld [vmem:[#allocation3 + $0x9c8] sm:$0xff] }
 0x517   :  { %v6392_v53 = vpop.f32.mrb[255].mxu1  ;;  %17644 = vst [vmem:[#allocation102_spill] sm:$0xff] %v15572_v50  ;;  %v15574_v20 = vpack.c.bf16 %v414_v10, %v407_v59  ;;  %v13635_v59 = vld [vmem:[#allocation6 + $0x42c] ss:$16 sps:$4 sm:$0xff]  }
 0x518   :  { %4436 = vmatmul.mubr.bf16.gmra.mrb[76].mxu0 %v15564_v56 }
 0x519   :  { %6655 = vmatmul.mubr.bf16.gmra.mrb[104].mxu1 %v15211_v42  ;;  %4445 = vmatprep.mubr.bf16.mxu0 %v15566_v44  ;;  %17645 = vst [vmem:[#allocation103_spill] sm:$0xff] %v15574_v20  ;;  %v13632_v42 = vld [vmem:[#allocation6 + $0x40c] ss:$16 sps:$4 sm:$0xff]   ;;  %v13630_v44 = vld [vmem:[#allocation6 + $0x408] ss:$16 sps:$4 sm:$0xff]  }
 0x51a   :  { %6664 = vmatprep.mubr.bf16.mxu1 %v15213_v58  ;;  %v406_v58 = vld [vmem:[#allocation3 + $0x950] sm:$0xff]  ;;  %6905 = vmatprep.subr.bf16.mxu1 %v13632_v42  ;;  %v427_v42 = vld [vmem:[#allocation3 + $0x9f8] sm:$0xff] }
 0x51b   :  { %v4144_v46 = vpop.f32.mrb[228].mxu0  ;;  %6906 = vmatpush1.bf16.msra.mxu1 %v13630_v44  ;;  %v420_v44 = vld [vmem:[#allocation3 + $0x9c0] sm:$0xff] }
 0x51c   :  { %v6396_v27 = vpop.f32.mrb[0].mxu1  ;;  %v4146_v40 = vpop.f32.mrb[229].mxu0  ;;  %v428_v46 = vld [vmem:[#allocation3 + $0xa00] sm:$0xff]  ;;  %6907 = vmatprep.subr.bf16.mxu1 %v13635_v59  ;;  %v13639_v59 = vld [vmem:[#allocation6 + $0x468] ss:$16 sps:$4 sm:$0xff]  }
 0x51d   :  { %v6398_v45 = vpop.f32.mrb[1].mxu1  ;;  %v4148_v3 = vpop.f32.mrb[230].mxu0  ;;  %v13633_v27 = vld [vmem:[#allocation6 + $0x428] ss:$16 sps:$4 sm:$0xff]  }
 0x51e   :  { %v6400_v33 = vpop.f32.mrb[2].mxu1  ;;  %v4150_v53 = vpop.f32.mrb[231].mxu0  ;;  %v15580_v45 = vpack.c.bf16 %v413_v39, %v406_v58  ;;  %v435_v58 = vld [vmem:[#allocation3 + $0xa38] sm:$0xff]  ;;  %v442_v39 = vld [vmem:[#allocation3 + $0xa70] sm:$0xff] }
 0x51f   :  { %v6402_v56 = vpop.f32.mrb[3].mxu1  ;;  %v15582_v33 = vpack.c.bf16 %v428_v46, %v421_v38  ;;  %6908 = vmatpush1.bf16.msra.mxu1 %v13633_v27  ;;  %v13641_v38 = vld [vmem:[#allocation6 + $0x46c] ss:$16 sps:$4 sm:$0xff]   ;;  %v15588_v27 = vpack.c.bf16 %v427_v42, %v420_v44  ;;  %v456_v42 = vld [vmem:[#allocation3 + $0xae0] sm:$0xff] }
 0x520   :  { %4446 = vmatmul.mubr.bf16.gmra.mrb[80].mxu0 %v15572_v50  ;;  %v449_v44 = vld [vmem:[#allocation3 + $0xaa8] sm:$0xff] }
 0x521   :  { %6665 = vmatmul.mubr.bf16.gmra.mrb[108].mxu1 %v15219_v31  ;;  %4455 = vmatprep.mubr.bf16.mxu0 %v15574_v20  ;;  %v13638_v20 = vld [vmem:[#allocation6 + $0x44c] ss:$16 sps:$4 sm:$0xff]  }
 0x522   :  { %6674 = vmatprep.mubr.bf16.mxu1 %v15221_v8  ;;  %6909 = vmatprep.subr.bf16.mxu1 %v13638_v20  ;;  %v441_v20 = vld [vmem:[#allocation3 + $0xa68] sm:$0xff] }
 0x523   :  { %v4154_v10 = vpop.f32.mrb[232].mxu0  ;;  %6910 = vmatpush1.bf16.msra.mxu1 %v13636_v37  ;;  %v434_v37 = vld [vmem:[#allocation3 + $0xa30] sm:$0xff] }
 0x524   :  { %v6406_v40 = vpop.f32.mrb[4].mxu1  ;;  %v4156_v56 = vpop.f32.mrb[233].mxu0  ;;  %6911 = vmatprep.subr.bf16.mxu1 %v13641_v38  ;;  %v13645_v38 = vld [vmem:[#allocation6 + $0x4a8] ss:$16 sps:$4 sm:$0xff]  }
 0x525   :  { %v6408_v3 = vpop.f32.mrb[5].mxu1  ;;  %v4158_v31 = vpop.f32.mrb[234].mxu0  ;;  %v15590_v56 = vpack.c.bf16 %v442_v39, %v435_v58  ;;  %v13647_v58 = vld [vmem:[#allocation6 + $0x4ac] ss:$16 sps:$4 sm:$0xff]  }
 0x526   :  { %v6410_v53 = vpop.f32.mrb[6].mxu1  ;;  %v4160_v8 = vpop.f32.mrb[235].mxu0  ;;  %v13644_v31 = vld [vmem:[#allocation6 + $0x48c] ss:$16 sps:$4 sm:$0xff]  }
 0x527   :  { %v6412_v50 = vpop.f32.mrb[7].mxu1  ;;  %6912 = vmatpush1.bf16.msra.mxu1 %v13639_v59  ;;  %v13642_v8 = vld [vmem:[#allocation6 + $0x488] ss:$16 sps:$4 sm:$0xff]  }
 0x528   :  { %4456 = vmatmul.mubr.bf16.gmra.mrb[84].mxu0 %v15580_v45  ;;  %6913 = vmatprep.subr.bf16.mxu1 %v13644_v31  ;;  %v448_v31 = vld [vmem:[#allocation3 + $0xaa0] sm:$0xff] }
 0x529   :  { %6675 = vmatmul.mubr.bf16.gmra.mrb[112].mxu1 %v15227_v25  ;;  %4465 = vmatprep.mubr.bf16.mxu0 %v15582_v33 }
 0x52a   :  { %6684 = vmatprep.mubr.bf16.mxu1 %v15229_v5 }
 0x52b   :  { %v4164_v46 = vpop.f32.mrb[236].mxu0  ;;  %6914 = vmatpush1.bf16.msra.mxu1 %v13642_v8  ;;  %v455_v8 = vld [vmem:[#allocation3 + $0xad8] sm:$0xff] }
 0x52c   :  { %v6416_v50 = vpop.f32.mrb[8].mxu1  ;;  %v4166_v10 = vpop.f32.mrb[237].mxu0  ;;  %6915 = vmatprep.subr.bf16.mxu1 %v13647_v58  ;;  %v13651_v58 = vld [vmem:[#allocation6 + $0x4e8] ss:$16 sps:$4 sm:$0xff]  }
 0x52d   :  { %v6418_v40 = vpop.f32.mrb[9].mxu1  ;;  %v4168_v25 = vpop.f32.mrb[238].mxu0  ;;  %v15596_v50 = vpack.c.bf16 %v441_v20, %v434_v37  ;;  %v463_v37 = vld [vmem:[#allocation3 + $0xb18] sm:$0xff]  ;;  %v470_v20 = vld [vmem:[#allocation3 + $0xb50] sm:$0xff] }
 0x52e   :  { %v6420_v3 = vpop.f32.mrb[10].mxu1  ;;  %v4170_v5 = vpop.f32.mrb[239].mxu0  ;;  %v15598_v40 = vpack.c.bf16 %v456_v42, %v449_v44  ;;  %v13653_v44 = vld [vmem:[#allocation6 + $0x4ec] ss:$16 sps:$4 sm:$0xff]  }
 0x52f   :  { %v6422_v53 = vpop.f32.mrb[11].mxu1  ;;  %v13650_v3 = vld [vmem:[#allocation6 + $0x4cc] ss:$16 sps:$4 sm:$0xff]   ;;  %6916 = vmatpush1.bf16.msra.mxu1 %v13645_v38 }
 0x530   :  { %4466 = vmatmul.mubr.bf16.gmra.mrb[88].mxu0 %v15588_v27  ;;  %v13648_v53 = vld [vmem:[#allocation6 + $0x4c8] ss:$16 sps:$4 sm:$0xff]   ;;  %6917 = vmatprep.subr.bf16.mxu1 %v13650_v3 }
 0x531   :  { %6685 = vmatmul.mubr.bf16.gmra.mrb[116].mxu1 %v15235_v35  ;;  %4475 = vmatprep.mubr.bf16.mxu0 %v15590_v56  ;;  %v17647_v3 = vld [vmem:[#allocation108_spill] sm:$0xff] }
 0x532   :  { %6694 = vmatprep.mubr.bf16.mxu1 %v15237_v9 }
 0x533   :  { %v4174_v39 = vpop.f32.mrb[240].mxu0  ;;  %6918 = vmatpush1.bf16.msra.mxu1 %v13648_v53  ;;  %v462_v53 = vld [vmem:[#allocation3 + $0xb10] sm:$0xff] }
 0x534   :  { %v6426_v46 = vpop.f32.mrb[12].mxu1  ;;  %v4176_v59 = vpop.f32.mrb[241].mxu0  ;;  %6919 = vmatprep.subr.bf16.mxu1 %v13653_v44  ;;  %v484_v44 = vld [vmem:[#allocation3 + $0xbc0] sm:$0xff] }
 0x535   :  { %v6428_v10 = vpop.f32.mrb[13].mxu1  ;;  %v4178_v35 = vpop.f32.mrb[242].mxu0  ;;  %v15604_v46 = vpack.c.bf16 %v455_v8, %v448_v31  ;;  %v469_v31 = vld [vmem:[#allocation3 + $0xb48] sm:$0xff] }
 0x536   :  { %v6430_v25 = vpop.f32.mrb[14].mxu1  ;;  %v4180_v9 = vpop.f32.mrb[243].mxu0  ;;  %v15606_v10 = vpack.c.bf16 %v470_v20, %v463_v37  ;;  %v477_v8 = vld [vmem:[#allocation3 + $0xb88] sm:$0xff] }
 0x537   :  { %v6432_v5 = vpop.f32.mrb[15].mxu1  ;;  %v13656_v25 = vld [vmem:[#allocation6 + $0x50c] ss:$16 sps:$4 sm:$0xff]   ;;  %6920 = vmatpush1.bf16.msra.mxu1 %v13651_v58 }
 0x538   :  { %4476 = vmatmul.mubr.bf16.gmra.mrb[92].mxu0 %v15596_v50  ;;  %17646 = vst [vmem:[#allocation105_spill] sm:$0xff] %v15606_v10  ;;  %v13654_v5 = vld [vmem:[#allocation6 + $0x508] ss:$16 sps:$4 sm:$0xff]   ;;  %6921 = vmatprep.subr.bf16.mxu1 %v13656_v25  ;;  %v13659_v37 = vld [vmem:[#allocation6 + $0x52c] ss:$16 sps:$4 sm:$0xff]  }
 0x539   :  { %6695 = vmatmul.mubr.bf16.gmra.mrb[120].mxu1 %v15243_v26  ;;  %4485 = vmatprep.mubr.bf16.mxu0 %v15598_v40  ;;  %v17650_v25 = vld [vmem:[#allocation110_spill] sm:$0xff] }
 0x53a   :  { %6704 = vmatprep.mubr.bf16.mxu1 %v15245_v28 }
 0x53b   :  { %v4184_v42 = vpop.f32.mrb[244].mxu0  ;;  %6922 = vmatpush1.bf16.msra.mxu1 %v13654_v5  ;;  %v17651_v5 = vld [vmem:[#allocation112_spill] sm:$0xff] }
 0x53c   :  { %v6436_v39 = vpop.f32.mrb[16].mxu1  ;;  %v4186_v38 = vpop.f32.mrb[245].mxu0  ;;  %v13657_v42 = vld [vmem:[#allocation6 + $0x528] ss:$16 sps:$4 sm:$0xff]   ;;  %6923 = vmatprep.subr.bf16.mxu1 %v13659_v37 }
 0x53d   :  { %v6438_v59 = vpop.f32.mrb[17].mxu1  ;;  %v4188_v26 = vpop.f32.mrb[246].mxu0  ;;  %v15612_v38 = vpack.c.bf16 %v469_v31, %v462_v53  ;;  %v476_v53 = vld [vmem:[#allocation3 + $0xb80] sm:$0xff]  ;;  %v483_v31 = vld [vmem:[#allocation3 + $0xbb8] sm:$0xff] }
 0x53e   :  { %v6440_v35 = vpop.f32.mrb[18].mxu1  ;;  %v4190_v28 = vpop.f32.mrb[247].mxu0  ;;  %v15614_v26 = vpack.c.bf16 %v484_v44, %v477_v8  ;;  %v491_v37 = vld [vmem:[#allocation3 + $0xbf8] sm:$0xff] }
 0x53f   :  { %v6442_v9 = vpop.f32.mrb[19].mxu1  ;;  %17648 = vst [vmem:[#allocation106_spill] sm:$0xff] %v15612_v38  ;;  %6924 = vmatpush1.bf16.msra.mxu1 %v13657_v42  ;;  %v13665_v8 = vld [vmem:[#allocation6 + $0x56c] ss:$16 sps:$4 sm:$0xff]  }
 0x540   :  { %4486 = vmatmul.mubr.bf16.gmra.mrb[96].mxu0 %v15604_v46  ;;  %17649 = vst [vmem:[#allocation108_spill] sm:$0xff] %v15614_v26  ;;  %v13662_v9 = vld [vmem:[#allocation6 + $0x54c] ss:$16 sps:$4 sm:$0xff]  }
 0x541   :  { %6705 = vmatmul.mubr.bf16.gmra.mrb[124].mxu1 %v15251_v6  ;;  %4495 = vmatprep.mubr.bf16.mxu0 %v15606_v10  ;;  %v13660_v10 = vld [vmem:[#allocation6 + $0x548] ss:$16 sps:$4 sm:$0xff]  }
 0x542   :  { %6714 = vmatprep.mubr.bf16.mxu1 %v17647_v3  ;;  %6925 = vmatprep.subr.bf16.mxu1 %v13662_v9  ;;  %v17652_v9 = vld [vmem:[#allocation43_spill] sm:$0xff] }
 0x543   :  { %v4194_v20 = vpop.f32.mrb[248].mxu0  ;;  %6926 = vmatpush1.bf16.msra.mxu1 %v13660_v10  ;;  %v17653_v10 = vld [vmem:[#allocation45_spill] sm:$0xff] }
 0x544   :  { %v6446_v39 = vpop.f32.mrb[20].mxu1  ;;  %v4196_v58 = vpop.f32.mrb[249].mxu0  ;;  %v498_v20 = vld [vmem:[#allocation3 + $0xc30] sm:$0xff]  ;;  %6927 = vmatprep.subr.bf16.mxu1 %v13665_v8  ;;  %v505_v8 = vld [vmem:[#allocation3 + $0xc68] sm:$0xff] }
 0x545   :  { %v6448_v59 = vpop.f32.mrb[21].mxu1  ;;  %v4198_v6 = vpop.f32.mrb[250].mxu0  ;;  %v13663_v39 = vld [vmem:[#allocation6 + $0x568] ss:$16 sps:$4 sm:$0xff]  }
 0x546   :  { %v6450_v35 = vpop.f32.mrb[22].mxu1  ;;  %v4200_v28 = vpop.f32.mrb[251].mxu0  ;;  %v15620_v59 = vpack.c.bf16 %v483_v31, %v476_v53  ;;  %v490_v53 = vld [vmem:[#allocation3 + $0xbf0] sm:$0xff]  ;;  %v497_v31 = vld [vmem:[#allocation3 + $0xc28] sm:$0xff] }
 0x547   :  { %v6452_v3 = vpop.f32.mrb[23].mxu1  ;;  %v15622_v28 = vpack.c.bf16 %v498_v20, %v491_v37  ;;  %6928 = vmatpush1.bf16.msra.mxu1 %v13663_v39  ;;  %v13671_v37 = vld [vmem:[#allocation6 + $0x5ac] ss:$16 sps:$4 sm:$0xff]   ;;  %v13669_v20 = vld [vmem:[#allocation6 + $0x5a8] ss:$16 sps:$4 sm:$0xff]  }
 0x548   :  { %4496 = vmatmul.mubr.bf16.gmra.mrb[100].mxu0 %v15612_v38  ;;  %v13666_v38 = vld [vmem:[#allocation6 + $0x588] ss:$16 sps:$4 sm:$0xff]  }
 0x549   :  { %6715 = vmatmul.mubr.bf16.gmra.mrb[128].mxu1 %v17650_v25  ;;  %4505 = vmatprep.mubr.bf16.mxu0 %v15614_v26 }
 0x54a   :  { %6724 = vmatprep.mubr.bf16.mxu1 %v17651_v5  ;;  %v13668_v5 = vld [vmem:[#allocation6 + $0x58c] ss:$16 sps:$4 sm:$0xff]  }
 0x54b   :  { %v4204_v44 = vpop.f32.mrb[252].mxu0  ;;  %6929 = vmatprep.subr.bf16.mxu1 %v13668_v5  ;;  %v511_v5 = vld [vmem:[#allocation3 + $0xc98] sm:$0xff] }
 0x54c   :  { %v6456_v58 = vpop.f32.mrb[24].mxu1  ;;  %v4206_v42 = vpop.f32.mrb[253].mxu0  ;;  %v512_v44 = vld [vmem:[#allocation3 + $0xca0] sm:$0xff]  ;;  %6930 = vmatpush1.bf16.msra.mxu1 %v13666_v38 }
 0x54d   :  { %v6458_v6 = vpop.f32.mrb[25].mxu1  ;;  %v4208_v35 = vpop.f32.mrb[254].mxu0  ;;  %6931 = vmatprep.subr.bf16.mxu1 %v13671_v37  ;;  %v15630_v42 = vpack.c.bf16 %v512_v44, %v505_v8  ;;  %v504_v38 = vld [vmem:[#allocation3 + $0xc60] sm:$0xff]  ;;  %v13675_v8 = vld [vmem:[#allocation6 + $0x5e8] ss:$16 sps:$4 sm:$0xff]  }
 0x54e   :  { %v6460_v3 = vpop.f32.mrb[26].mxu1  ;;  %v4210_v25 = vpop.f32.mrb[255].mxu0  ;;  %v13674_v35 = vld [vmem:[#allocation6 + $0x5cc] ss:$16 sps:$4 sm:$0xff]  }
 0x54f   :  { %v6462_v26 = vpop.f32.mrb[27].mxu1  ;;  %v13672_v25 = vld [vmem:[#allocation6 + $0x5c8] ss:$16 sps:$4 sm:$0xff]  }
 0x550   :  { %4506 = vmatmul.mubr.bf16.gmra.mrb[104].mxu0 %v15620_v59  ;;  %v15628_v26 = vpack.c.bf16 %v497_v31, %v490_v53  ;;  %6932 = vmatpush1.bf16.msra.mxu1 %v13669_v20  ;;  %v13677_v53 = vld [vmem:[#allocation6 + $0x5ec] ss:$16 sps:$4 sm:$0xff]   ;;  %v15636_v20 = vpack.c.bf16 %v511_v5, %v504_v38 }
 0x551   :  { %6725 = vmatmul.mubr.bf16.gmra.mrb[132].mxu1 %v17652_v9  ;;  %4515 = vmatprep.mubr.bf16.mxu0 %v15622_v28  ;;  %v519_v9 = vld [vmem:[#allocation3 + $0xcd8] sm:$0xff]  ;;  %v525_v38 = vld [vmem:[#allocation3 + $0xd08] sm:$0xff] }
 0x552   :  { %6734 = vmatprep.mubr.bf16.mxu1 %v17653_v10  ;;  %v526_v10 = vld [vmem:[#allocation3 + $0xd10] sm:$0xff]  ;;  %6933 = vmatprep.subr.bf16.mxu1 %v13674_v35  ;;  %v533_v5 = vld [vmem:[#allocation3 + $0xd48] sm:$0xff] }
 0x553   :  { %v17654_v35 = vld [vmem:[#allocation46_spill] sm:$0xff] }
 0x554   :  { %v6466_v58 = vpop.f32.mrb[28].mxu1  ;;  %6934 = vmatpush1.bf16.msra.mxu1 %v13672_v25  ;;  %v17655_v25 = vld [vmem:[#allocation48_spill] sm:$0xff] }
 0x555   :  { %v6468_v39 = vpop.f32.mrb[29].mxu1  ;;  %6935 = vmatprep.subr.bf16.mxu1 %v13677_v53  ;;  %v540_v53 = vld [vmem:[#allocation3 + $0xd80] sm:$0xff] }
 0x556   :  { %v6470_v6 = vpop.f32.mrb[30].mxu1  ;;  %v15638_v39 = vpack.c.bf16 %v526_v10, %v519_v9 }
 0x557   :  { %v6472_v3 = vpop.f32.mrb[31].mxu1 }
 0x558   :  { %4516 = vmatmul.mubr.bf16.gmra.mrb[108].mxu0 %v15628_v26  ;;  %6936 = vmatpush1.bf16.msra.mxu1 %v13675_v8  ;;  %v15646_v8 = vpack.c.bf16 %v540_v53, %v533_v5 }
 0x559   :  { %6735 = vmatmul.mubr.bf16.gmra.mrb[136].mxu1 %v15275_v51  ;;  %4525 = vmatprep.mubr.bf16.mxu0 %v15630_v42 }
 0x55a   :  { %6744 = vmatprep.mubr.bf16.mxu1 %v15277_v15  ;;  %17657 = vst [vmem:[#allocation112_spill] sm:$0xff] %v15646_v8 }
 0x55b   :  { %v4257_v31 = vpop.f32.mrb[4].mxu0 }
 0x55c   :  { %v6476_v44 = vpop.f32.mrb[32].mxu1  ;;  %v4259_v37 = vpop.f32.mrb[5].mxu0  ;;  %v518_v31 = vld [vmem:[#allocation3 + $0xcd0] sm:$0xff] }
 0x55d   :  { %v6478_v58 = vpop.f32.mrb[33].mxu1  ;;  %v4261_v51 = vpop.f32.mrb[6].mxu0  ;;  %v15644_v10 = vpack.c.bf16 %v525_v38, %v518_v31  ;;  %v554_v31 = vld [vmem:[#allocation3 + $0xdf0] sm:$0xff] }
 0x55e   :  { %v6480_v6 = vpop.f32.mrb[34].mxu1  ;;  %v4263_v15 = vpop.f32.mrb[7].mxu0 }
 0x55f   :  { %v6482_v3 = vpop.f32.mrb[35].mxu1  ;;  %17656 = vst [vmem:[#allocation110_spill] sm:$0xff] %v15644_v10 }
 0x560   :  { %4526 = vmatmul.mubr.bf16.gmra.mrb[112].mxu0 %v15636_v20 }
 0x561   :  { %6745 = vmatmul.mubr.bf16.gmra.mrb[140].mxu1 %v17654_v35  ;;  %4535 = vmatprep.mubr.bf16.mxu0 %v15638_v39  ;;  %v17658_v35 = vld [vmem:[#allocation49_spill] sm:$0xff] }
 0x562   :  { %6754 = vmatprep.mubr.bf16.mxu1 %v17655_v25  ;;  %v17659_v25 = vld [vmem:[#allocation51_spill] sm:$0xff] }
 0x563   :  { %v4267_v44 = vpop.f32.mrb[8].mxu0 }
 0x564   :  { %v6486_v37 = vpop.f32.mrb[36].mxu1  ;;  %v4269_v9 = vpop.f32.mrb[9].mxu0  ;;  %v532_v44 = vld [vmem:[#allocation3 + $0xd40] sm:$0xff] }
 0x565   :  { %v6488_v58 = vpop.f32.mrb[37].mxu1  ;;  %v4271_v51 = vpop.f32.mrb[10].mxu0  ;;  %v539_v37 = vld [vmem:[#allocation3 + $0xd78] sm:$0xff] }
 0x566   :  { %v6490_v6 = vpop.f32.mrb[38].mxu1  ;;  %v4273_v15 = vpop.f32.mrb[11].mxu0  ;;  %v547_v9 = vld [vmem:[#allocation3 + $0xdb8] sm:$0xff]  ;;  %v15652_v5 = vpack.c.bf16 %v539_v37, %v532_v44  ;;  %v568_v44 = vld [vmem:[#allocation3 + $0xe60] sm:$0xff] }
 0x567   :  { %v6492_v3 = vpop.f32.mrb[39].mxu1  ;;  %v15654_v15 = vpack.c.bf16 %v554_v31, %v547_v9 }
 0x568   :  { %4536 = vmatmul.mubr.bf16.gmra.mrb[116].mxu0 %v15644_v10  ;;  %17660 = vst [vmem:[#allocation43_spill] sm:$0xff] %v15652_v5 }
 0x569   :  { %6755 = vmatmul.mubr.bf16.gmra.mrb[144].mxu1 %v17658_v35  ;;  %4545 = vmatprep.mubr.bf16.mxu0 %v15646_v8  ;;  %17661 = vst [vmem:[#allocation45_spill] sm:$0xff] %v15654_v15  ;;  %v17662_v8 = vld [vmem:[#allocation52_spill] sm:$0xff] }
 0x56a   :  { %6764 = vmatprep.mubr.bf16.mxu1 %v17659_v25  ;;  %v17663_v25 = vld [vmem:[#allocation54_spill] sm:$0xff] }
 0x56b   :  { %v4277_v38 = vpop.f32.mrb[12].mxu0 }
 0x56c   :  { %v6496_v58 = vpop.f32.mrb[40].mxu1  ;;  %v4279_v51 = vpop.f32.mrb[13].mxu0  ;;  %v546_v38 = vld [vmem:[#allocation3 + $0xdb0] sm:$0xff] }
 0x56d   :  { %v6498_v53 = vpop.f32.mrb[41].mxu1  ;;  %v4281_v6 = vpop.f32.mrb[14].mxu0  ;;  %v553_v58 = vld [vmem:[#allocation3 + $0xde8] sm:$0xff] }
 0x56e   :  { %v6500_v3 = vpop.f32.mrb[42].mxu1  ;;  %v4283_v10 = vpop.f32.mrb[15].mxu0  ;;  %v561_v51 = vld [vmem:[#allocation3 + $0xe28] sm:$0xff]  ;;  %v15660_v9 = vpack.c.bf16 %v553_v58, %v546_v38  ;;  %v582_v38 = vld [vmem:[#allocation3 + $0xed0] sm:$0xff] }
 0x56f   :  { %v6502_v35 = vpop.f32.mrb[43].mxu1  ;;  %v15662_v3 = vpack.c.bf16 %v568_v44, %v561_v51 }
 0x570   :  { %4546 = vmatmul.mubr.bf16.gmra.mrb[120].mxu0 %v15652_v5  ;;  %17664 = vst [vmem:[#allocation46_spill] sm:$0xff] %v15660_v9 }
 0x571   :  { %6765 = vmatmul.mubr.bf16.gmra.mrb[148].mxu1 %v17662_v8  ;;  %4555 = vmatprep.mubr.bf16.mxu0 %v15654_v15  ;;  %17665 = vst [vmem:[#allocation48_spill] sm:$0xff] %v15662_v3  ;;  %v17666_v15 = vld [vmem:[#allocation55_spill] sm:$0xff] }
 0x572   :  { %6774 = vmatprep.mubr.bf16.mxu1 %v17663_v25  ;;  %v17667_v25 = vld [vmem:[#allocation57_spill] sm:$0xff] }
 0x573   :  { %v4287_v37 = vpop.f32.mrb[16].mxu0 }
 0x574   :  { %v6506_v53 = vpop.f32.mrb[44].mxu1  ;;  %v4289_v6 = vpop.f32.mrb[17].mxu0  ;;  %v560_v37 = vld [vmem:[#allocation3 + $0xe20] sm:$0xff] }
 0x575   :  { %v6508_v31 = vpop.f32.mrb[45].mxu1  ;;  %v4291_v10 = vpop.f32.mrb[18].mxu0  ;;  %v567_v53 = vld [vmem:[#allocation3 + $0xe58] sm:$0xff] }
 0x576   :  { %v6510_v35 = vpop.f32.mrb[46].mxu1  ;;  %v4293_v5 = vpop.f32.mrb[19].mxu0  ;;  %v575_v6 = vld [vmem:[#allocation3 + $0xe98] sm:$0xff]  ;;  %v15668_v51 = vpack.c.bf16 %v567_v53, %v560_v37  ;;  %v596_v37 = vld [vmem:[#allocation3 + $0xf40] sm:$0xff] }
 0x577   :  { %v6512_v8 = vpop.f32.mrb[47].mxu1  ;;  %v15670_v35 = vpack.c.bf16 %v582_v38, %v575_v6 }
 0x578   :  { %4556 = vmatmul.mubr.bf16.gmra.mrb[124].mxu0 %v15660_v9  ;;  %17668 = vst [vmem:[#allocation49_spill] sm:$0xff] %v15668_v51 }
 0x579   :  { %6775 = vmatmul.mubr.bf16.gmra.mrb[152].mxu1 %v17666_v15  ;;  %4565 = vmatprep.mubr.bf16.mxu0 %v15662_v3  ;;  %17669 = vst [vmem:[#allocation51_spill] sm:$0xff] %v15670_v35  ;;  %v17670_v3 = vld [vmem:[#allocation58_spill] sm:$0xff] }
 0x57a   :  { %6784 = vmatprep.mubr.bf16.mxu1 %v17667_v25  ;;  %v17671_v25 = vld [vmem:[#allocation60_spill] sm:$0xff] }
 0x57b   :  { %v4297_v58 = vpop.f32.mrb[20].mxu0 }
 0x57c   :  { %v6516_v31 = vpop.f32.mrb[48].mxu1  ;;  %v4299_v10 = vpop.f32.mrb[21].mxu0  ;;  %v574_v58 = vld [vmem:[#allocation3 + $0xe90] sm:$0xff] }
 0x57d   :  { %v6518_v44 = vpop.f32.mrb[49].mxu1  ;;  %v4301_v5 = vpop.f32.mrb[22].mxu0  ;;  %v581_v31 = vld [vmem:[#allocation3 + $0xec8] sm:$0xff] }
 0x57e   :  { %v6520_v8 = vpop.f32.mrb[50].mxu1  ;;  %v4303_v9 = vpop.f32.mrb[23].mxu0  ;;  %v589_v10 = vld [vmem:[#allocation3 + $0xf08] sm:$0xff]  ;;  %v15676_v6 = vpack.c.bf16 %v581_v31, %v574_v58  ;;  %v610_v58 = vld [vmem:[#allocation3 + $0xfb0] sm:$0xff] }
 0x57f   :  { %v6522_v15 = vpop.f32.mrb[51].mxu1  ;;  %v15678_v8 = vpack.c.bf16 %v596_v37, %v589_v10 }
 0x580   :  { %4566 = vmatmul.mubr.bf16.gmra.mrb[128].mxu0 %v15668_v51  ;;  %17672 = vst [vmem:[#allocation52_spill] sm:$0xff] %v15676_v6 }
 0x581   :  { %6785 = vmatmul.mubr.bf16.gmra.mrb[156].mxu1 %v17670_v3  ;;  %4575 = vmatprep.mubr.bf16.mxu0 %v15670_v35  ;;  %17673 = vst [vmem:[#allocation54_spill] sm:$0xff] %v15678_v8  ;;  %v17674_v35 = vld [vmem:[#allocation61_spill] sm:$0xff] }
 0x582   :  { %6794 = vmatprep.mubr.bf16.mxu1 %v17671_v25  ;;  %v17675_v25 = vld [vmem:[#allocation63_spill] sm:$0xff] }
 0x583   :  { %v4307_v53 = vpop.f32.mrb[24].mxu0 }
 0x584   :  { %v6526_v44 = vpop.f32.mrb[52].mxu1  ;;  %v4309_v5 = vpop.f32.mrb[25].mxu0  ;;  %v588_v53 = vld [vmem:[#allocation3 + $0xf00] sm:$0xff] }
 0x585   :  { %v6528_v38 = vpop.f32.mrb[53].mxu1  ;;  %v4311_v9 = vpop.f32.mrb[26].mxu0  ;;  %v595_v44 = vld [vmem:[#allocation3 + $0xf38] sm:$0xff] }
 0x586   :  { %v6530_v15 = vpop.f32.mrb[54].mxu1  ;;  %v4313_v51 = vpop.f32.mrb[27].mxu0  ;;  %v603_v5 = vld [vmem:[#allocation3 + $0xf78] sm:$0xff]  ;;  %v15684_v10 = vpack.c.bf16 %v595_v44, %v588_v53  ;;  %v624_v53 = vld [vmem:[#allocation3 + $0x1020] sm:$0xff] }
 0x587   :  { %v6532_v3 = vpop.f32.mrb[55].mxu1  ;;  %v15686_v15 = vpack.c.bf16 %v610_v58, %v603_v5 }
 0x588   :  { %4576 = vmatmul.mubr.bf16.gmra.mrb[132].mxu0 %v15676_v6  ;;  %17676 = vst [vmem:[#allocation55_spill] sm:$0xff] %v15684_v10 }
 0x589   :  { %6795 = vmatmul.mubr.bf16.gmra.mrb[160].mxu1 %v17674_v35  ;;  %4585 = vmatprep.mubr.bf16.mxu0 %v15678_v8  ;;  %17677 = vst [vmem:[#allocation57_spill] sm:$0xff] %v15686_v15  ;;  %v17678_v8 = vld [vmem:[#allocation64_spill] sm:$0xff] }
 0x58a   :  { %6804 = vmatprep.mubr.bf16.mxu1 %v17675_v25  ;;  %v17679_v25 = vld [vmem:[#allocation66_spill] sm:$0xff] }
 0x58b   :  { %v4317_v31 = vpop.f32.mrb[28].mxu0 }
 0x58c   :  { %v6536_v38 = vpop.f32.mrb[56].mxu1  ;;  %v4319_v9 = vpop.f32.mrb[29].mxu0  ;;  %v602_v31 = vld [vmem:[#allocation3 + $0xf70] sm:$0xff] }
 0x58d   :  { %v6538_v37 = vpop.f32.mrb[57].mxu1  ;;  %v4321_v51 = vpop.f32.mrb[30].mxu0  ;;  %v609_v38 = vld [vmem:[#allocation3 + $0xfa8] sm:$0xff] }
 0x58e   :  { %v6540_v3 = vpop.f32.mrb[58].mxu1  ;;  %v4323_v6 = vpop.f32.mrb[31].mxu0  ;;  %v617_v9 = vld [vmem:[#allocation3 + $0xfe8] sm:$0xff]  ;;  %v15692_v5 = vpack.c.bf16 %v609_v38, %v602_v31  ;;  %v638_v31 = vld [vmem:[#allocation3 + $0x1090] sm:$0xff] }
 0x58f   :  { %v6542_v35 = vpop.f32.mrb[59].mxu1  ;;  %v15694_v3 = vpack.c.bf16 %v624_v53, %v617_v9 }
 0x590   :  { %4586 = vmatmul.mubr.bf16.gmra.mrb[136].mxu0 %v15684_v10  ;;  %17680 = vst [vmem:[#allocation58_spill] sm:$0xff] %v15692_v5 }
 0x591   :  { %6805 = vmatmul.mubr.bf16.gmra.mrb[164].mxu1 %v17678_v8  ;;  %4595 = vmatprep.mubr.bf16.mxu0 %v15686_v15  ;;  %17681 = vst [vmem:[#allocation60_spill] sm:$0xff] %v15694_v3  ;;  %v17682_v15 = vld [vmem:[#allocation67_spill] sm:$0xff] }
 0x592   :  { %6814 = vmatprep.mubr.bf16.mxu1 %v17679_v25  ;;  %v17683_v25 = vld [vmem:[#allocation69_spill] sm:$0xff] }
 0x593   :  { %v4327_v44 = vpop.f32.mrb[32].mxu0 }
 0x594   :  { %v6546_v37 = vpop.f32.mrb[60].mxu1  ;;  %v4329_v51 = vpop.f32.mrb[33].mxu0  ;;  %v616_v44 = vld [vmem:[#allocation3 + $0xfe0] sm:$0xff] }
 0x595   :  { %v6548_v58 = vpop.f32.mrb[61].mxu1  ;;  %v4331_v6 = vpop.f32.mrb[34].mxu0  ;;  %v623_v37 = vld [vmem:[#allocation3 + $0x1018] sm:$0xff] }
 0x596   :  { %v6550_v35 = vpop.f32.mrb[62].mxu1  ;;  %v4333_v10 = vpop.f32.mrb[35].mxu0  ;;  %v631_v51 = vld [vmem:[#allocation3 + $0x1058] sm:$0xff]  ;;  %v15700_v9 = vpack.c.bf16 %v623_v37, %v616_v44  ;;  %v652_v44 = vld [vmem:[#allocation3 + $0x1100] sm:$0xff] }
 0x597   :  { %v6552_v8 = vpop.f32.mrb[63].mxu1  ;;  %v15702_v35 = vpack.c.bf16 %v638_v31, %v631_v51 }
 0x598   :  { %4596 = vmatmul.mubr.bf16.gmra.mrb[140].mxu0 %v15692_v5  ;;  %17684 = vst [vmem:[#allocation61_spill] sm:$0xff] %v15700_v9 }
 0x599   :  { %6815 = vmatmul.mubr.bf16.gmra.mrb[168].mxu1 %v17682_v15  ;;  %4605 = vmatprep.mubr.bf16.mxu0 %v15694_v3  ;;  %17685 = vst [vmem:[#allocation63_spill] sm:$0xff] %v15702_v35  ;;  %v17686_v3 = vld [vmem:[#allocation70_spill] sm:$0xff] }
 0x59a   :  { %6824 = vmatprep.mubr.bf16.mxu1 %v17683_v25  ;;  %v17687_v25 = vld [vmem:[#allocation72_spill] sm:$0xff] }
 0x59b   :  { %v4337_v38 = vpop.f32.mrb[36].mxu0 }
 0x59c   :  { %v6556_v58 = vpop.f32.mrb[64].mxu1  ;;  %v4339_v6 = vpop.f32.mrb[37].mxu0  ;;  %v630_v38 = vld [vmem:[#allocation3 + $0x1050] sm:$0xff] }
 0x59d   :  { %v6558_v53 = vpop.f32.mrb[65].mxu1  ;;  %v4341_v10 = vpop.f32.mrb[38].mxu0  ;;  %v637_v58 = vld [vmem:[#allocation3 + $0x1088] sm:$0xff] }
 0x59e   :  { %v6560_v8 = vpop.f32.mrb[66].mxu1  ;;  %v4343_v5 = vpop.f32.mrb[39].mxu0  ;;  %v645_v6 = vld [vmem:[#allocation3 + $0x10c8] sm:$0xff]  ;;  %v15708_v51 = vpack.c.bf16 %v637_v58, %v630_v38  ;;  %v666_v38 = vld [vmem:[#allocation3 + $0x1170] sm:$0xff] }
 0x59f   :  { %v6562_v15 = vpop.f32.mrb[67].mxu1  ;;  %v15710_v8 = vpack.c.bf16 %v652_v44, %v645_v6 }
 0x5a0   :  { %4606 = vmatmul.mubr.bf16.gmra.mrb[144].mxu0 %v15700_v9  ;;  %17688 = vst [vmem:[#allocation64_spill] sm:$0xff] %v15708_v51 }
 0x5a1   :  { %6825 = vmatmul.mubr.bf16.gmra.mrb[172].mxu1 %v17686_v3  ;;  %4615 = vmatprep.mubr.bf16.mxu0 %v15702_v35  ;;  %17689 = vst [vmem:[#allocation66_spill] sm:$0xff] %v15710_v8  ;;  %v17690_v35 = vld [vmem:[#allocation73_spill] sm:$0xff] }
 0x5a2   :  { %6834 = vmatprep.mubr.bf16.mxu1 %v17687_v25  ;;  %v17691_v25 = vld [vmem:[#allocation75_spill] sm:$0xff] }
 0x5a3   :  { %v4347_v37 = vpop.f32.mrb[40].mxu0 }
 0x5a4   :  { %v6566_v53 = vpop.f32.mrb[68].mxu1  ;;  %v4349_v10 = vpop.f32.mrb[41].mxu0  ;;  %v644_v37 = vld [vmem:[#allocation3 + $0x10c0] sm:$0xff] }
 0x5a5   :  { %v6568_v31 = vpop.f32.mrb[69].mxu1  ;;  %v4351_v5 = vpop.f32.mrb[42].mxu0  ;;  %v651_v53 = vld [vmem:[#allocation3 + $0x10f8] sm:$0xff] }
 0x5a6   :  { %v6570_v15 = vpop.f32.mrb[70].mxu1  ;;  %v4353_v9 = vpop.f32.mrb[43].mxu0  ;;  %v659_v10 = vld [vmem:[#allocation3 + $0x1138] sm:$0xff]  ;;  %v15716_v6 = vpack.c.bf16 %v651_v53, %v644_v37  ;;  %v680_v37 = vld [vmem:[#allocation3 + $0x11e0] sm:$0xff] }
 0x5a7   :  { %v6572_v3 = vpop.f32.mrb[71].mxu1  ;;  %v15718_v15 = vpack.c.bf16 %v666_v38, %v659_v10 }
 0x5a8   :  { %4616 = vmatmul.mubr.bf16.gmra.mrb[148].mxu0 %v15708_v51  ;;  %17692 = vst [vmem:[#allocation67_spill] sm:$0xff] %v15716_v6 }
 0x5a9   :  { %6835 = vmatmul.mubr.bf16.gmra.mrb[176].mxu1 %v17690_v35  ;;  %4625 = vmatprep.mubr.bf16.mxu0 %v15710_v8  ;;  %17693 = vst [vmem:[#allocation69_spill] sm:$0xff] %v15718_v15  ;;  %v17694_v8 = vld [vmem:[#allocation76_spill] sm:$0xff] }
 0x5aa   :  { %6844 = vmatprep.mubr.bf16.mxu1 %v17691_v25  ;;  %v17695_v25 = vld [vmem:[#allocation78_spill] sm:$0xff] }
 0x5ab   :  { %v4357_v58 = vpop.f32.mrb[44].mxu0 }
 0x5ac   :  { %v6576_v31 = vpop.f32.mrb[72].mxu1  ;;  %v4359_v5 = vpop.f32.mrb[45].mxu0  ;;  %v658_v58 = vld [vmem:[#allocation3 + $0x1130] sm:$0xff] }
 0x5ad   :  { %v6578_v44 = vpop.f32.mrb[73].mxu1  ;;  %v4361_v9 = vpop.f32.mrb[46].mxu0  ;;  %v665_v31 = vld [vmem:[#allocation3 + $0x1168] sm:$0xff] }
 0x5ae   :  { %v6580_v3 = vpop.f32.mrb[74].mxu1  ;;  %v4363_v51 = vpop.f32.mrb[47].mxu0  ;;  %v673_v5 = vld [vmem:[#allocation3 + $0x11a8] sm:$0xff]  ;;  %v15724_v10 = vpack.c.bf16 %v665_v31, %v658_v58  ;;  %v694_v58 = vld [vmem:[#allocation3 + $0x1250] sm:$0xff] }
 0x5af   :  { %v6582_v35 = vpop.f32.mrb[75].mxu1  ;;  %v15726_v3 = vpack.c.bf16 %v680_v37, %v673_v5 }
 0x5b0   :  { %4626 = vmatmul.mubr.bf16.gmra.mrb[152].mxu0 %v15716_v6  ;;  %17696 = vst [vmem:[#allocation70_spill] sm:$0xff] %v15724_v10 }
 0x5b1   :  { %6845 = vmatmul.mubr.bf16.gmra.mrb[180].mxu1 %v17694_v8  ;;  %4635 = vmatprep.mubr.bf16.mxu0 %v15718_v15  ;;  %17697 = vst [vmem:[#allocation72_spill] sm:$0xff] %v15726_v3  ;;  %v17698_v15 = vld [vmem:[#allocation79_spill] sm:$0xff] }
 0x5b2   :  { %6854 = vmatprep.mubr.bf16.mxu1 %v17695_v25  ;;  %v17699_v25 = vld [vmem:[#allocation81_spill] sm:$0xff] }
 0x5b3   :  { %v4367_v53 = vpop.f32.mrb[48].mxu0 }
 0x5b4   :  { %v6586_v44 = vpop.f32.mrb[76].mxu1  ;;  %v4369_v9 = vpop.f32.mrb[49].mxu0  ;;  %v672_v53 = vld [vmem:[#allocation3 + $0x11a0] sm:$0xff] }
 0x5b5   :  { %v6588_v38 = vpop.f32.mrb[77].mxu1  ;;  %v4371_v51 = vpop.f32.mrb[50].mxu0  ;;  %v679_v44 = vld [vmem:[#allocation3 + $0x11d8] sm:$0xff] }
 0x5b6   :  { %v6590_v35 = vpop.f32.mrb[78].mxu1  ;;  %v4373_v6 = vpop.f32.mrb[51].mxu0  ;;  %v687_v9 = vld [vmem:[#allocation3 + $0x1218] sm:$0xff]  ;;  %v15732_v5 = vpack.c.bf16 %v679_v44, %v672_v53  ;;  %v708_v53 = vld [vmem:[#allocation3 + $0x12c0] sm:$0xff] }
 0x5b7   :  { %v6592_v8 = vpop.f32.mrb[79].mxu1  ;;  %v15734_v35 = vpack.c.bf16 %v694_v58, %v687_v9 }
 0x5b8   :  { %4636 = vmatmul.mubr.bf16.gmra.mrb[156].mxu0 %v15724_v10  ;;  %17700 = vst [vmem:[#allocation73_spill] sm:$0xff] %v15732_v5 }
 0x5b9   :  { %6855 = vmatmul.mubr.bf16.gmra.mrb[184].mxu1 %v17698_v15  ;;  %4645 = vmatprep.mubr.bf16.mxu0 %v15726_v3  ;;  %17701 = vst [vmem:[#allocation75_spill] sm:$0xff] %v15734_v35  ;;  %v17702_v3 = vld [vmem:[#allocation82_spill] sm:$0xff] }
 0x5ba   :  { %6864 = vmatprep.mubr.bf16.mxu1 %v17699_v25  ;;  %v17703_v25 = vld [vmem:[#allocation84_spill] sm:$0xff] }
 0x5bb   :  { %v4377_v31 = vpop.f32.mrb[52].mxu0 }
 0x5bc   :  { %v6596_v38 = vpop.f32.mrb[80].mxu1  ;;  %v4379_v51 = vpop.f32.mrb[53].mxu0  ;;  %v686_v31 = vld [vmem:[#allocation3 + $0x1210] sm:$0xff] }
 0x5bd   :  { %v6598_v37 = vpop.f32.mrb[81].mxu1  ;;  %v4381_v6 = vpop.f32.mrb[54].mxu0  ;;  %v693_v38 = vld [vmem:[#allocation3 + $0x1248] sm:$0xff] }
 0x5be   :  { %v6600_v8 = vpop.f32.mrb[82].mxu1  ;;  %v4383_v10 = vpop.f32.mrb[55].mxu0  ;;  %v701_v51 = vld [vmem:[#allocation3 + $0x1288] sm:$0xff]  ;;  %v15740_v9 = vpack.c.bf16 %v693_v38, %v686_v31  ;;  %v722_v31 = vld [vmem:[#allocation3 + $0x1330] sm:$0xff] }
 0x5bf   :  { %v6602_v15 = vpop.f32.mrb[83].mxu1  ;;  %v15742_v8 = vpack.c.bf16 %v708_v53, %v701_v51 }
 0x5c0   :  { %4646 = vmatmul.mubr.bf16.gmra.mrb[160].mxu0 %v15732_v5  ;;  %17704 = vst [vmem:[#allocation76_spill] sm:$0xff] %v15740_v9 }
 0x5c1   :  { %6865 = vmatmul.mubr.bf16.gmra.mrb[188].mxu1 %v17702_v3  ;;  %4655 = vmatprep.mubr.bf16.mxu0 %v15734_v35  ;;  %17705 = vst [vmem:[#allocation78_spill] sm:$0xff] %v15742_v8  ;;  %v17706_v35 = vld [vmem:[#allocation85_spill] sm:$0xff] }
 0x5c2   :  { %6874 = vmatprep.mubr.bf16.mxu1 %v17703_v25  ;;  %v17707_v25 = vld [vmem:[#allocation87_spill] sm:$0xff] }
 0x5c3   :  { %v4387_v44 = vpop.f32.mrb[56].mxu0 }
 0x5c4   :  { %v6606_v37 = vpop.f32.mrb[84].mxu1  ;;  %v4389_v6 = vpop.f32.mrb[57].mxu0  ;;  %v700_v44 = vld [vmem:[#allocation3 + $0x1280] sm:$0xff] }
 0x5c5   :  { %v6608_v58 = vpop.f32.mrb[85].mxu1  ;;  %v4391_v10 = vpop.f32.mrb[58].mxu0  ;;  %v707_v37 = vld [vmem:[#allocation3 + $0x12b8] sm:$0xff] }
 0x5c6   :  { %v6610_v15 = vpop.f32.mrb[86].mxu1  ;;  %v4393_v5 = vpop.f32.mrb[59].mxu0  ;;  %v715_v6 = vld [vmem:[#allocation3 + $0x12f8] sm:$0xff]  ;;  %v15748_v51 = vpack.c.bf16 %v707_v37, %v700_v44  ;;  %v736_v44 = vld [vmem:[#allocation3 + $0x13a0] sm:$0xff] }
 0x5c7   :  { %v6612_v3 = vpop.f32.mrb[87].mxu1  ;;  %v15750_v15 = vpack.c.bf16 %v722_v31, %v715_v6 }
 0x5c8   :  { %4656 = vmatmul.mubr.bf16.gmra.mrb[164].mxu0 %v15740_v9  ;;  %17708 = vst [vmem:[#allocation79_spill] sm:$0xff] %v15748_v51 }
 0x5c9   :  { %6875 = vmatmul.mubr.bf16.gmra.mrb[192].mxu1 %v17706_v35  ;;  %4665 = vmatprep.mubr.bf16.mxu0 %v15742_v8  ;;  %17709 = vst [vmem:[#allocation81_spill] sm:$0xff] %v15750_v15  ;;  %v17710_v8 = vld [vmem:[#allocation88_spill] sm:$0xff] }
 0x5ca   :  { %6884 = vmatprep.mubr.bf16.mxu1 %v17707_v25  ;;  %v17711_v25 = vld [vmem:[#allocation90_spill] sm:$0xff] }
 0x5cb   :  { %v4397_v38 = vpop.f32.mrb[60].mxu0 }
 0x5cc   :  { %v6616_v58 = vpop.f32.mrb[88].mxu1  ;;  %v4399_v10 = vpop.f32.mrb[61].mxu0  ;;  %v714_v38 = vld [vmem:[#allocation3 + $0x12f0] sm:$0xff] }
 0x5cd   :  { %v6618_v53 = vpop.f32.mrb[89].mxu1  ;;  %v4401_v5 = vpop.f32.mrb[62].mxu0  ;;  %v721_v58 = vld [vmem:[#allocation3 + $0x1328] sm:$0xff] }
 0x5ce   :  { %v6620_v3 = vpop.f32.mrb[90].mxu1  ;;  %v4403_v9 = vpop.f32.mrb[63].mxu0  ;;  %v729_v10 = vld [vmem:[#allocation3 + $0x1368] sm:$0xff]  ;;  %v15756_v6 = vpack.c.bf16 %v721_v58, %v714_v38  ;;  %v750_v38 = vld [vmem:[#allocation3 + $0x1410] sm:$0xff] }
 0x5cf   :  { %v6622_v35 = vpop.f32.mrb[91].mxu1  ;;  %v15758_v3 = vpack.c.bf16 %v736_v44, %v729_v10 }
 0x5d0   :  { %4666 = vmatmul.mubr.bf16.gmra.mrb[168].mxu0 %v15748_v51  ;;  %17712 = vst [vmem:[#allocation82_spill] sm:$0xff] %v15756_v6 }
 0x5d1   :  { %6885 = vmatmul.mubr.bf16.gmra.mrb[196].mxu1 %v17710_v8  ;;  %4675 = vmatprep.mubr.bf16.mxu0 %v15750_v15  ;;  %17713 = vst [vmem:[#allocation84_spill] sm:$0xff] %v15758_v3  ;;  %v17714_v15 = vld [vmem:[#allocation91_spill] sm:$0xff] }
 0x5d2   :  { %6894 = vmatprep.mubr.bf16.mxu1 %v17711_v25  ;;  %v17715_v25 = vld [vmem:[#allocation93_spill] sm:$0xff] }
 0x5d3   :  { %v4407_v37 = vpop.f32.mrb[64].mxu0 }
 0x5d4   :  { %v6626_v53 = vpop.f32.mrb[92].mxu1  ;;  %v4409_v5 = vpop.f32.mrb[65].mxu0  ;;  %v728_v37 = vld [vmem:[#allocation3 + $0x1360] sm:$0xff] }
 0x5d5   :  { %v6628_v31 = vpop.f32.mrb[93].mxu1  ;;  %v4411_v9 = vpop.f32.mrb[66].mxu0  ;;  %v735_v53 = vld [vmem:[#allocation3 + $0x1398] sm:$0xff] }
 0x5d6   :  { %v6630_v35 = vpop.f32.mrb[94].mxu1  ;;  %v4413_v51 = vpop.f32.mrb[67].mxu0  ;;  %v743_v5 = vld [vmem:[#allocation3 + $0x13d8] sm:$0xff]  ;;  %v15764_v10 = vpack.c.bf16 %v735_v53, %v728_v37  ;;  %v764_v37 = vld [vmem:[#allocation3 + $0x1480] sm:$0xff] }
 0x5d7   :  { %v6632_v8 = vpop.f32.mrb[95].mxu1  ;;  %v15766_v35 = vpack.c.bf16 %v750_v38, %v743_v5 }
 0x5d8   :  { %4676 = vmatmul.mubr.bf16.gmra.mrb[172].mxu0 %v15756_v6  ;;  %17716 = vst [vmem:[#allocation85_spill] sm:$0xff] %v15764_v10 }
 0x5d9   :  { %6895 = vmatmul.mubr.bf16.gmra.mrb[200].mxu1 %v17714_v15  ;;  %4685 = vmatprep.mubr.bf16.mxu0 %v15758_v3  ;;  %v17717_v3 = vld [vmem:[#allocation94_spill] sm:$0xff] }
 0x5da   :  { %6937 = vmatprep.mubr.bf16.mxu1 %v17715_v25  ;;  %v17718_v25 = vld [vmem:[#allocation96_spill] sm:$0xff] }
 0x5db   :  { %v4417_v58 = vpop.f32.mrb[68].mxu0 }
 0x5dc   :  { %v6636_v31 = vpop.f32.mrb[96].mxu1  ;;  %v4419_v9 = vpop.f32.mrb[69].mxu0  ;;  %v742_v58 = vld [vmem:[#allocation3 + $0x13d0] sm:$0xff] }
 0x5dd   :  { %v6638_v44 = vpop.f32.mrb[97].mxu1  ;;  %v4421_v51 = vpop.f32.mrb[70].mxu0  ;;  %v749_v31 = vld [vmem:[#allocation3 + $0x1408] sm:$0xff] }
 0x5de   :  { %v6640_v8 = vpop.f32.mrb[98].mxu1  ;;  %v4423_v6 = vpop.f32.mrb[71].mxu0  ;;  %v757_v9 = vld [vmem:[#allocation3 + $0x1448] sm:$0xff]  ;;  %v15772_v5 = vpack.c.bf16 %v749_v31, %v742_v58  ;;  %v778_v58 = vld [vmem:[#allocation3 + $0x14f0] sm:$0xff] }
 0x5df   :  { %v6642_v15 = vpop.f32.mrb[99].mxu1  ;;  %v15774_v8 = vpack.c.bf16 %v764_v37, %v757_v9 }
 0x5e0   :  { %4686 = vmatmul.mubr.bf16.gmra.mrb[176].mxu0 %v15764_v10 }
 0x5e1   :  { %6938 = vmatmul.mubr.bf16.vlgmr.msra.gmra.mrb[204].mxu1 %v17717_v3  ;;  %4695 = vmatprep.mubr.bf16.mxu0 %v15766_v35 }
 0x5e2   :  { %6947 = vmatprep.mubr.bf16.mxu1 %v17718_v25  ;;  %v756_v25 = vld [vmem:[#allocation3 + $0x1440] sm:$0xff] }
 0x5e3   :  { %v4427_v53 = vpop.f32.mrb[72].mxu0 }
 0x5e4   :  { %v6646_v44 = vpop.f32.mrb[100].mxu1  ;;  %v4429_v51 = vpop.f32.mrb[73].mxu0  ;;  %v763_v53 = vld [vmem:[#allocation3 + $0x1478] sm:$0xff] }
 0x5e5   :  { %v6648_v38 = vpop.f32.mrb[101].mxu1  ;;  %v4431_v6 = vpop.f32.mrb[74].mxu0  ;;  %v771_v44 = vld [vmem:[#allocation3 + $0x14b8] sm:$0xff]  ;;  %v15780_v9 = vpack.c.bf16 %v763_v53, %v756_v25  ;;  %v792_v25 = vld [vmem:[#allocation3 + $0x1560] sm:$0xff] }
 0x5e6   :  { %v6650_v15 = vpop.f32.mrb[102].mxu1  ;;  %v4433_v10 = vpop.f32.mrb[75].mxu0  ;;  %v15782_v6 = vpack.c.bf16 %v778_v58, %v771_v44 }
 0x5e7   :  { %v6652_v3 = vpop.f32.mrb[103].mxu1 }
 0x5e8   :  { %4696 = vmatmul.mubr.bf16.gmra.mrb[180].mxu0 %v15772_v5 }
 0x5e9   :  { %6948 = vmatmul.mubr.bf16.gmra.mrb[208].mxu1 %v15419_v4  ;;  %4705 = vmatprep.mubr.bf16.mxu0 %v15774_v8 }
 0x5ea   :  { %6957 = vmatprep.mubr.bf16.mxu1 %v15421_v62  ;;  %v770_v62 = vld [vmem:[#allocation3 + $0x14b0] sm:$0xff] }
 0x5eb   :  { %v4437_v31 = vpop.f32.mrb[76].mxu0 }
 0x5ec   :  { %v6656_v51 = vpop.f32.mrb[104].mxu1  ;;  %v4439_v38 = vpop.f32.mrb[77].mxu0  ;;  %v777_v31 = vld [vmem:[#allocation3 + $0x14e8] sm:$0xff] }
 0x5ed   :  { %v6658_v37 = vpop.f32.mrb[105].mxu1  ;;  %v4441_v10 = vpop.f32.mrb[78].mxu0  ;;  %v785_v51 = vld [vmem:[#allocation3 + $0x1528] sm:$0xff]  ;;  %v15788_v44 = vpack.c.bf16 %v777_v31, %v770_v62  ;;  %v806_v62 = vld [vmem:[#allocation3 + $0x15d0] sm:$0xff] }
 0x5ee   :  { %v6660_v15 = vpop.f32.mrb[106].mxu1  ;;  %v4443_v3 = vpop.f32.mrb[79].mxu0 }
 0x5ef   :  { %v6662_v4 = vpop.f32.mrb[107].mxu1  ;;  %v15790_v15 = vpack.c.bf16 %v792_v25, %v785_v51 }
 0x5f0   :  { %4706 = vmatmul.mubr.bf16.gmra.mrb[184].mxu0 %v15780_v9 }
 0x5f1   :  { %6958 = vmatmul.mubr.bf16.gmra.mrb[212].mxu1 %v15428_v55  ;;  %4715 = vmatprep.mubr.bf16.mxu0 %v15782_v6 }
 0x5f2   :  { %6967 = vmatprep.mubr.bf16.mxu1 %v15430_v32  ;;  %v784_v32 = vld [vmem:[#allocation3 + $0x1520] sm:$0xff] }
 0x5f3   :  { %v4447_v53 = vpop.f32.mrb[80].mxu0 }
 0x5f4   :  { %v6666_v38 = vpop.f32.mrb[108].mxu1  ;;  %v4449_v37 = vpop.f32.mrb[81].mxu0  ;;  %v791_v53 = vld [vmem:[#allocation3 + $0x1558] sm:$0xff] }
 0x5f5   :  { %v6668_v58 = vpop.f32.mrb[109].mxu1  ;;  %v4451_v10 = vpop.f32.mrb[82].mxu0  ;;  %v799_v38 = vld [vmem:[#allocation3 + $0x1598] sm:$0xff]  ;;  %v15796_v51 = vpack.c.bf16 %v791_v53, %v784_v32  ;;  %v820_v32 = vld [vmem:[#allocation3 + $0x1640] sm:$0xff] }
 0x5f6   :  { %v6670_v3 = vpop.f32.mrb[110].mxu1  ;;  %v4453_v4 = vpop.f32.mrb[83].mxu0 }
 0x5f7   :  { %v6672_v55 = vpop.f32.mrb[111].mxu1  ;;  %v15798_v3 = vpack.c.bf16 %v806_v62, %v799_v38 }
 0x5f8   :  { %4716 = vmatmul.mubr.bf16.gmra.mrb[188].mxu0 %v15788_v44 }
 0x5f9   :  { %6968 = vmatmul.mubr.bf16.gmra.mrb[216].mxu1 %v15436_v17  ;;  %4725 = vmatprep.mubr.bf16.mxu0 %v15790_v15 }
 0x5fa   :  { %6977 = vmatprep.mubr.bf16.mxu1 %v15438_v47  ;;  %v798_v47 = vld [vmem:[#allocation3 + $0x1590] sm:$0xff] }
 0x5fb   :  { %v4457_v31 = vpop.f32.mrb[84].mxu0 }
 0x5fc   :  { %v6676_v37 = vpop.f32.mrb[112].mxu1  ;;  %v4459_v58 = vpop.f32.mrb[85].mxu0  ;;  %v805_v31 = vld [vmem:[#allocation3 + $0x15c8] sm:$0xff] }
 0x5fd   :  { %v6678_v25 = vpop.f32.mrb[113].mxu1  ;;  %v4461_v10 = vpop.f32.mrb[86].mxu0  ;;  %v813_v37 = vld [vmem:[#allocation3 + $0x1608] sm:$0xff]  ;;  %v15804_v38 = vpack.c.bf16 %v805_v31, %v798_v47  ;;  %v834_v47 = vld [vmem:[#allocation3 + $0x16b0] sm:$0xff] }
 0x5fe   :  { %v6680_v4 = vpop.f32.mrb[114].mxu1  ;;  %v4463_v55 = vpop.f32.mrb[87].mxu0 }
 0x5ff   :  { %v6682_v17 = vpop.f32.mrb[115].mxu1  ;;  %v15806_v4 = vpack.c.bf16 %v820_v32, %v813_v37 }
 0x600   :  { %4726 = vmatmul.mubr.bf16.gmra.mrb[192].mxu0 %v15796_v51 }
 0x601   :  { %6978 = vmatmul.mubr.bf16.gmra.mrb[220].mxu1 %v15444_v49  ;;  %4735 = vmatprep.mubr.bf16.mxu0 %v15798_v3 }
 0x602   :  { %6987 = vmatprep.mubr.bf16.mxu1 %v15446_v11  ;;  %v812_v11 = vld [vmem:[#allocation3 + $0x1600] sm:$0xff] }
 0x603   :  { %v4467_v53 = vpop.f32.mrb[88].mxu0 }
 0x604   :  { %v6686_v58 = vpop.f32.mrb[116].mxu1  ;;  %v4469_v25 = vpop.f32.mrb[89].mxu0  ;;  %v819_v53 = vld [vmem:[#allocation3 + $0x1638] sm:$0xff] }
 0x605   :  { %v6688_v62 = vpop.f32.mrb[117].mxu1  ;;  %v4471_v10 = vpop.f32.mrb[90].mxu0  ;;  %v827_v58 = vld [vmem:[#allocation3 + $0x1678] sm:$0xff]  ;;  %v15812_v37 = vpack.c.bf16 %v819_v53, %v812_v11  ;;  %v848_v11 = vld [vmem:[#allocation3 + $0x1720] sm:$0xff] }
 0x606   :  { %v6690_v55 = vpop.f32.mrb[118].mxu1  ;;  %v4473_v17 = vpop.f32.mrb[91].mxu0 }
 0x607   :  { %v6692_v49 = vpop.f32.mrb[119].mxu1  ;;  %v15814_v55 = vpack.c.bf16 %v834_v47, %v827_v58 }
 0x608   :  { %4736 = vmatmul.mubr.bf16.gmra.mrb[196].mxu0 %v15804_v38 }
 0x609   :  { %6988 = vmatmul.mubr.bf16.gmra.mrb[224].mxu1 %v15452_v21  ;;  %4745 = vmatprep.mubr.bf16.mxu0 %v15806_v4 }
 0x60a   :  { %6997 = vmatprep.mubr.bf16.mxu1 %v15454_v60  ;;  %v826_v60 = vld [vmem:[#allocation3 + $0x1670] sm:$0xff] }
 0x60b   :  { %v4477_v31 = vpop.f32.mrb[92].mxu0 }
 0x60c   :  { %v6696_v25 = vpop.f32.mrb[120].mxu1  ;;  %v4479_v62 = vpop.f32.mrb[93].mxu0  ;;  %v833_v31 = vld [vmem:[#allocation3 + $0x16a8] sm:$0xff] }
 0x60d   :  { %v6698_v32 = vpop.f32.mrb[121].mxu1  ;;  %v4481_v10 = vpop.f32.mrb[94].mxu0  ;;  %v841_v25 = vld [vmem:[#allocation3 + $0x16e8] sm:$0xff]  ;;  %v15820_v58 = vpack.c.bf16 %v833_v31, %v826_v60  ;;  %v862_v60 = vld [vmem:[#allocation3 + $0x1790] sm:$0xff] }
 0x60e   :  { %v6700_v17 = vpop.f32.mrb[122].mxu1  ;;  %v4483_v49 = vpop.f32.mrb[95].mxu0 }
 0x60f   :  { %v6702_v21 = vpop.f32.mrb[123].mxu1  ;;  %v15822_v17 = vpack.c.bf16 %v848_v11, %v841_v25 }
 0x610   :  { %4746 = vmatmul.mubr.bf16.gmra.mrb[200].mxu0 %v15812_v37 }
 0x611   :  { %6998 = vmatmul.mubr.bf16.gmra.mrb[228].mxu1 %v15460_v57  ;;  %4755 = vmatprep.mubr.bf16.mxu0 %v15814_v55 }
 0x612   :  { %7007 = vmatprep.mubr.bf16.mxu1 %v15462_v54  ;;  %v840_v54 = vld [vmem:[#allocation3 + $0x16e0] sm:$0xff] }
 0x613   :  { %v4487_v53 = vpop.f32.mrb[96].mxu0 }
 0x614   :  { %v6706_v62 = vpop.f32.mrb[124].mxu1  ;;  %v4489_v32 = vpop.f32.mrb[97].mxu0  ;;  %v847_v53 = vld [vmem:[#allocation3 + $0x1718] sm:$0xff] }
 0x615   :  { %v6708_v47 = vpop.f32.mrb[125].mxu1  ;;  %v4491_v10 = vpop.f32.mrb[98].mxu0  ;;  %v855_v62 = vld [vmem:[#allocation3 + $0x1758] sm:$0xff]  ;;  %v15828_v25 = vpack.c.bf16 %v847_v53, %v840_v54  ;;  %v876_v54 = vld [vmem:[#allocation3 + $0x1800] sm:$0xff] }
 0x616   :  { %v6710_v49 = vpop.f32.mrb[126].mxu1  ;;  %v4493_v21 = vpop.f32.mrb[99].mxu0 }
 0x617   :  { %v6712_v57 = vpop.f32.mrb[127].mxu1  ;;  %v15830_v49 = vpack.c.bf16 %v862_v60, %v855_v62 }
 0x618   :  { %4756 = vmatmul.mubr.bf16.gmra.mrb[204].mxu0 %v15820_v58 }
 0x619   :  { %7008 = vmatmul.mubr.bf16.gmra.mrb[232].mxu1 %v15468_v61  ;;  %4765 = vmatprep.mubr.bf16.mxu0 %v15822_v17 }
 0x61a   :  { %7017 = vmatprep.mubr.bf16.mxu1 %v15470_v43  ;;  %v854_v43 = vld [vmem:[#allocation3 + $0x1750] sm:$0xff] }
 0x61b   :  { %v4497_v31 = vpop.f32.mrb[100].mxu0 }
 0x61c   :  { %v6716_v32 = vpop.f32.mrb[128].mxu1  ;;  %v4499_v47 = vpop.f32.mrb[101].mxu0  ;;  %v861_v31 = vld [vmem:[#allocation3 + $0x1788] sm:$0xff] }
 0x61d   :  { %v6718_v11 = vpop.f32.mrb[129].mxu1  ;;  %v4501_v10 = vpop.f32.mrb[102].mxu0  ;;  %v869_v32 = vld [vmem:[#allocation3 + $0x17c8] sm:$0xff]  ;;  %v15836_v62 = vpack.c.bf16 %v861_v31, %v854_v43  ;;  %v890_v43 = vld [vmem:[#allocation3 + $0x1870] sm:$0xff] }
 0x61e   :  { %v6720_v21 = vpop.f32.mrb[130].mxu1  ;;  %v4503_v57 = vpop.f32.mrb[103].mxu0 }
 0x61f   :  { %v6722_v61 = vpop.f32.mrb[131].mxu1  ;;  %v15838_v21 = vpack.c.bf16 %v876_v54, %v869_v32 }
 0x620   :  { %4766 = vmatmul.mubr.bf16.gmra.mrb[208].mxu0 %v15828_v25 }
 0x621   :  { %7018 = vmatmul.mubr.bf16.gmra.mrb[236].mxu1 %v15476_v23  ;;  %4775 = vmatprep.mubr.bf16.mxu0 %v15830_v49 }
 0x622   :  { %7027 = vmatprep.mubr.bf16.mxu1 %v15478_v7  ;;  %v868_v7 = vld [vmem:[#allocation3 + $0x17c0] sm:$0xff] }
 0x623   :  { %v4507_v53 = vpop.f32.mrb[104].mxu0 }
 0x624   :  { %v6726_v47 = vpop.f32.mrb[132].mxu1  ;;  %v4509_v11 = vpop.f32.mrb[105].mxu0  ;;  %v875_v53 = vld [vmem:[#allocation3 + $0x17f8] sm:$0xff] }
 0x625   :  { %v6728_v60 = vpop.f32.mrb[133].mxu1  ;;  %v4511_v10 = vpop.f32.mrb[106].mxu0  ;;  %v883_v47 = vld [vmem:[#allocation3 + $0x1838] sm:$0xff]  ;;  %v15844_v32 = vpack.c.bf16 %v875_v53, %v868_v7  ;;  %v904_v7 = vld [vmem:[#allocation3 + $0x18e0] sm:$0xff] }
 0x626   :  { %v6730_v57 = vpop.f32.mrb[134].mxu1  ;;  %v4513_v61 = vpop.f32.mrb[107].mxu0 }
 0x627   :  { %v6732_v23 = vpop.f32.mrb[135].mxu1  ;;  %v15846_v57 = vpack.c.bf16 %v890_v43, %v883_v47 }
 0x628   :  { %4776 = vmatmul.mubr.bf16.gmra.mrb[212].mxu0 %v15836_v62 }
 0x629   :  { %7028 = vmatmul.mubr.bf16.gmra.mrb[240].mxu1 %v15484_v30  ;;  %4785 = vmatprep.mubr.bf16.mxu0 %v15838_v21 }
 0x62a   :  { %7037 = vmatprep.mubr.bf16.mxu1 %v15486_v13  ;;  %v882_v13 = vld [vmem:[#allocation3 + $0x1830] sm:$0xff] }
 0x62b   :  { %v4517_v31 = vpop.f32.mrb[108].mxu0 }
 0x62c   :  { %v6736_v11 = vpop.f32.mrb[136].mxu1  ;;  %v4519_v60 = vpop.f32.mrb[109].mxu0  ;;  %v889_v31 = vld [vmem:[#allocation3 + $0x1868] sm:$0xff] }
 0x62d   :  { %v6738_v54 = vpop.f32.mrb[137].mxu1  ;;  %v4521_v10 = vpop.f32.mrb[110].mxu0  ;;  %v897_v11 = vld [vmem:[#allocation3 + $0x18a8] sm:$0xff]  ;;  %v15852_v47 = vpack.c.bf16 %v889_v31, %v882_v13  ;;  %v918_v13 = vld [vmem:[#allocation3 + $0x1950] sm:$0xff] }
 0x62e   :  { %v6740_v61 = vpop.f32.mrb[138].mxu1  ;;  %v4523_v23 = vpop.f32.mrb[111].mxu0 }
 0x62f   :  { %v6742_v30 = vpop.f32.mrb[139].mxu1  ;;  %v15854_v61 = vpack.c.bf16 %v904_v7, %v897_v11 }
 0x630   :  { %4786 = vmatmul.mubr.bf16.gmra.mrb[216].mxu0 %v15844_v32 }
 0x631   :  { %7038 = vmatmul.mubr.bf16.gmra.mrb[244].mxu1 %v15492_v36  ;;  %4795 = vmatprep.mubr.bf16.mxu0 %v15846_v57 }
 0x632   :  { %7047 = vmatprep.mubr.bf16.mxu1 %v15494_v48  ;;  %v896_v48 = vld [vmem:[#allocation3 + $0x18a0] sm:$0xff] }
 0x633   :  { %v4527_v53 = vpop.f32.mrb[112].mxu0 }
 0x634   :  { %v6746_v60 = vpop.f32.mrb[140].mxu1  ;;  %v4529_v54 = vpop.f32.mrb[113].mxu0  ;;  %v903_v53 = vld [vmem:[#allocation3 + $0x18d8] sm:$0xff] }
 0x635   :  { %v6748_v43 = vpop.f32.mrb[141].mxu1  ;;  %v4531_v10 = vpop.f32.mrb[114].mxu0  ;;  %v911_v60 = vld [vmem:[#allocation3 + $0x1918] sm:$0xff]  ;;  %v15860_v11 = vpack.c.bf16 %v903_v53, %v896_v48  ;;  %v932_v48 = vld [vmem:[#allocation3 + $0x19c0] sm:$0xff] }
 0x636   :  { %v6750_v23 = vpop.f32.mrb[142].mxu1  ;;  %v4533_v30 = vpop.f32.mrb[115].mxu0 }
 0x637   :  { %v6752_v36 = vpop.f32.mrb[143].mxu1  ;;  %v15862_v23 = vpack.c.bf16 %v918_v13, %v911_v60 }
 0x638   :  { %4796 = vmatmul.mubr.bf16.gmra.mrb[220].mxu0 %v15852_v47 }
 0x639   :  { %7048 = vmatmul.mubr.bf16.gmra.mrb[248].mxu1 %v15500_v63  ;;  %4805 = vmatprep.mubr.bf16.mxu0 %v15854_v61 }
 0x63a   :  { %7057 = vmatprep.mubr.bf16.mxu1 %v15502_v34  ;;  %v910_v34 = vld [vmem:[#allocation3 + $0x1910] sm:$0xff] }
 0x63b   :  { %v4537_v31 = vpop.f32.mrb[116].mxu0 }
 0x63c   :  { %v6756_v54 = vpop.f32.mrb[144].mxu1  ;;  %v4539_v43 = vpop.f32.mrb[117].mxu0  ;;  %v917_v31 = vld [vmem:[#allocation3 + $0x1948] sm:$0xff] }
 0x63d   :  { %v6758_v7 = vpop.f32.mrb[145].mxu1  ;;  %v4541_v10 = vpop.f32.mrb[118].mxu0  ;;  %v925_v54 = vld [vmem:[#allocation3 + $0x1988] sm:$0xff]  ;;  %v15868_v60 = vpack.c.bf16 %v917_v31, %v910_v34  ;;  %v946_v34 = vld [vmem:[#allocation3 + $0x1a30] sm:$0xff] }
 0x63e   :  { %v6760_v30 = vpop.f32.mrb[146].mxu1  ;;  %v4543_v36 = vpop.f32.mrb[119].mxu0 }
 0x63f   :  { %v6762_v63 = vpop.f32.mrb[147].mxu1  ;;  %v15870_v30 = vpack.c.bf16 %v932_v48, %v925_v54 }
 0x640   :  { %4806 = vmatmul.mubr.bf16.gmra.mrb[224].mxu0 %v15860_v11 }
 0x641   :  { %7058 = vmatmul.mubr.bf16.gmra.mrb[252].mxu1 %v15508_v41  ;;  %4815 = vmatprep.mubr.bf16.mxu0 %v15862_v23 }
 0x642   :  { %7067 = vmatprep.mubr.bf16.mxu1 %v15510_v24  ;;  %v924_v24 = vld [vmem:[#allocation3 + $0x1980] sm:$0xff] }
 0x643   :  { %v4547_v53 = vpop.f32.mrb[120].mxu0 }
 0x644   :  { %v6766_v43 = vpop.f32.mrb[148].mxu1  ;;  %v4549_v7 = vpop.f32.mrb[121].mxu0  ;;  %v931_v53 = vld [vmem:[#allocation3 + $0x19b8] sm:$0xff] }
 0x645   :  { %v6768_v13 = vpop.f32.mrb[149].mxu1  ;;  %v4551_v10 = vpop.f32.mrb[122].mxu0  ;;  %v939_v43 = vld [vmem:[#allocation3 + $0x19f8] sm:$0xff]  ;;  %v15876_v54 = vpack.c.bf16 %v931_v53, %v924_v24  ;;  %v960_v24 = vld [vmem:[#allocation3 + $0x1aa0] sm:$0xff] }
 0x646   :  { %v6770_v36 = vpop.f32.mrb[150].mxu1  ;;  %v4553_v63 = vpop.f32.mrb[123].mxu0 }
 0x647   :  { %v6772_v41 = vpop.f32.mrb[151].mxu1  ;;  %v15878_v36 = vpack.c.bf16 %v946_v34, %v939_v43 }
 0x648   :  { %4816 = vmatmul.mubr.bf16.gmra.mrb[228].mxu0 %v15868_v60 }
 0x649   :  { %7068 = vmatmul.mubr.bf16.gmra.mrb[0].mxu1 %v15516_v52  ;;  %4825 = vmatprep.mubr.bf16.mxu0 %v15870_v30 }
 0x64a   :  { %7077 = vmatprep.mubr.bf16.mxu1 %v15518_v14  ;;  %v938_v14 = vld [vmem:[#allocation3 + $0x19f0] sm:$0xff] }
 0x64b   :  { %v4557_v31 = vpop.f32.mrb[124].mxu0 }
 0x64c   :  { %v6776_v7 = vpop.f32.mrb[152].mxu1  ;;  %v4559_v13 = vpop.f32.mrb[125].mxu0  ;;  %v945_v31 = vld [vmem:[#allocation3 + $0x1a28] sm:$0xff] }
 0x64d   :  { %v6778_v48 = vpop.f32.mrb[153].mxu1  ;;  %v4561_v10 = vpop.f32.mrb[126].mxu0  ;;  %v953_v7 = vld [vmem:[#allocation3 + $0x1a68] sm:$0xff]  ;;  %v15884_v43 = vpack.c.bf16 %v945_v31, %v938_v14  ;;  %v974_v14 = vld [vmem:[#allocation3 + $0x1b10] sm:$0xff] }
 0x64e   :  { %v6780_v63 = vpop.f32.mrb[154].mxu1  ;;  %v4563_v41 = vpop.f32.mrb[127].mxu0 }
 0x64f   :  { %v6782_v52 = vpop.f32.mrb[155].mxu1  ;;  %v15886_v63 = vpack.c.bf16 %v960_v24, %v953_v7 }
 0x650   :  { %4826 = vmatmul.mubr.bf16.gmra.mrb[232].mxu0 %v15876_v54 }
 0x651   :  { %7078 = vmatmul.mubr.bf16.gmra.mrb[4].mxu1 %v15524_v0  ;;  %4835 = vmatprep.mubr.bf16.mxu0 %v15878_v36 }
 0x652   :  { %7087 = vmatprep.mubr.bf16.mxu1 %v15526_v2  ;;  %v952_v2 = vld [vmem:[#allocation3 + $0x1a60] sm:$0xff] }
 0x653   :  { %v4567_v53 = vpop.f32.mrb[128].mxu0 }
 0x654   :  { %v6786_v13 = vpop.f32.mrb[156].mxu1  ;;  %v4569_v48 = vpop.f32.mrb[129].mxu0  ;;  %v959_v53 = vld [vmem:[#allocation3 + $0x1a98] sm:$0xff] }
 0x655   :  { %v6788_v34 = vpop.f32.mrb[157].mxu1  ;;  %v4571_v10 = vpop.f32.mrb[130].mxu0  ;;  %v967_v13 = vld [vmem:[#allocation3 + $0x1ad8] sm:$0xff]  ;;  %v15892_v7 = vpack.c.bf16 %v959_v53, %v952_v2  ;;  %v988_v2 = vld [vmem:[#allocation3 + $0x1b80] sm:$0xff] }
 0x656   :  { %v6790_v41 = vpop.f32.mrb[158].mxu1  ;;  %v4573_v52 = vpop.f32.mrb[131].mxu0 }
 0x657   :  { %v6792_v0 = vpop.f32.mrb[159].mxu1  ;;  %v15894_v41 = vpack.c.bf16 %v974_v14, %v967_v13 }
 0x658   :  { %4836 = vmatmul.mubr.bf16.gmra.mrb[236].mxu0 %v15884_v43 }
 0x659   :  { %7088 = vmatmul.mubr.bf16.gmra.mrb[8].mxu1 %v15532_v22  ;;  %4845 = vmatprep.mubr.bf16.mxu0 %v15886_v63 }
 0x65a   :  { %7097 = vmatprep.mubr.bf16.mxu1 %v15534_v19  ;;  %v966_v19 = vld [vmem:[#allocation3 + $0x1ad0] sm:$0xff] }
 0x65b   :  { %v4577_v31 = vpop.f32.mrb[132].mxu0 }
 0x65c   :  { %v6796_v48 = vpop.f32.mrb[160].mxu1  ;;  %v4579_v34 = vpop.f32.mrb[133].mxu0  ;;  %v973_v31 = vld [vmem:[#allocation3 + $0x1b08] sm:$0xff] }
 0x65d   :  { %v6798_v24 = vpop.f32.mrb[161].mxu1  ;;  %v4581_v10 = vpop.f32.mrb[134].mxu0  ;;  %v981_v48 = vld [vmem:[#allocation3 + $0x1b48] sm:$0xff]  ;;  %v15900_v13 = vpack.c.bf16 %v973_v31, %v966_v19  ;;  %v1002_v19 = vld [vmem:[#allocation3 + $0x1bf0] sm:$0xff] }
 0x65e   :  { %v6800_v52 = vpop.f32.mrb[162].mxu1  ;;  %v4583_v0 = vpop.f32.mrb[135].mxu0 }
 0x65f   :  { %v6802_v22 = vpop.f32.mrb[163].mxu1  ;;  %v15902_v52 = vpack.c.bf16 %v988_v2, %v981_v48 }
 0x660   :  { %4846 = vmatmul.mubr.bf16.gmra.mrb[240].mxu0 %v15892_v7 }
 0x661   :  { %7098 = vmatmul.mubr.bf16.gmra.mrb[12].mxu1 %v15540_v18  ;;  %4855 = vmatprep.mubr.bf16.mxu0 %v15894_v41 }
 0x662   :  { %7107 = vmatprep.mubr.bf16.mxu1 %v15542_v1  ;;  %v980_v1 = vld [vmem:[#allocation3 + $0x1b40] sm:$0xff] }
 0x663   :  { %v4587_v53 = vpop.f32.mrb[136].mxu0 }
 0x664   :  { %v6806_v34 = vpop.f32.mrb[164].mxu1  ;;  %v4589_v24 = vpop.f32.mrb[137].mxu0  ;;  %v987_v53 = vld [vmem:[#allocation3 + $0x1b78] sm:$0xff] }
 0x665   :  { %v6808_v14 = vpop.f32.mrb[165].mxu1  ;;  %v4591_v10 = vpop.f32.mrb[138].mxu0  ;;  %v995_v34 = vld [vmem:[#allocation3 + $0x1bb8] sm:$0xff]  ;;  %v15908_v48 = vpack.c.bf16 %v987_v53, %v980_v1 }
 0x666   :  { %v6810_v0 = vpop.f32.mrb[166].mxu1  ;;  %v4593_v22 = vpop.f32.mrb[139].mxu0 }
 0x667   :  { %v6812_v18 = vpop.f32.mrb[167].mxu1  ;;  %17719 = vst [vmem:[#allocation87_spill] sm:$0xff] %v15908_v48  ;;  %v15910_v0 = vpack.c.bf16 %v1002_v19, %v995_v34 }
 0x668   :  { %4856 = vmatmul.mubr.bf16.gmra.mrb[244].mxu0 %v15900_v13 }
 0x669   :  { %7108 = vmatmul.mubr.bf16.gmra.mrb[16].mxu1 %v15548_v16  ;;  %4865 = vmatprep.mubr.bf16.mxu0 %v15902_v52  ;;  %17720 = vst [vmem:[#allocation88_spill] sm:$0xff] %v15910_v0 }
 0x66a   :  { %7117 = vmatprep.mubr.bf16.mxu1 %v15550_v29  ;;  %v17721_v29 = vld [vmem:[#allocation97_spill] sm:$0xff] }
 0x66b   :  { %v4597_v31 = vpop.f32.mrb[140].mxu0 }
 0x66c   :  { %v6816_v24 = vpop.f32.mrb[168].mxu1  ;;  %v4599_v14 = vpop.f32.mrb[141].mxu0  ;;  %v994_v31 = vld [vmem:[#allocation3 + $0x1bb0] sm:$0xff] }
 0x66d   :  { %v6818_v2 = vpop.f32.mrb[169].mxu1  ;;  %v4601_v10 = vpop.f32.mrb[142].mxu0  ;;  %v1001_v24 = vld [vmem:[#allocation3 + $0x1be8] sm:$0xff] }
 0x66e   :  { %v6820_v22 = vpop.f32.mrb[170].mxu1  ;;  %v4603_v18 = vpop.f32.mrb[143].mxu0  ;;  %v15916_v2 = vpack.c.bf16 %v1001_v24, %v994_v31 }
 0x66f   :  { %v6822_v16 = vpop.f32.mrb[171].mxu1 }
 0x670   :  { %4866 = vmatmul.mubr.bf16.gmra.mrb[248].mxu0 %v15908_v48  ;;  %v17722_v16 = vld [vmem:[#allocation99_spill] sm:$0xff]  ;;  %v121_v48 = vld [vmem:[#allocation3 + $0x68] sm:$0xff] }
 0x671   :  { %7118 = vmatmul.mubr.bf16.gmra.mrb[20].mxu1 %v15556_v12  ;;  %4875 = vmatprep.mubr.bf16.mxu0 %v15910_v0  ;;  %v17723_v12 = vmov 0   ;;  %v17724_v0 = vld [vmem:[#allocation100_spill] sm:$0xff] }
 0x672   :  { %7127 = vmatprep.mubr.bf16.mxu1 %v17721_v29  ;;  %v114_v29 = vld [vmem:[#allocation3 + $0x30] sm:$0xff] }
 0x673   :  { %v4607_v14 = vpop.f32.mrb[144].mxu0  ;;  %v15922_v31 = vpack.c.bf16 %v121_v48, %v114_v29 }
 0x674   :  { %v6826_v1 = vpop.f32.mrb[172].mxu1  ;;  %v4609_v53 = vpop.f32.mrb[145].mxu0 }
 0x675   :  { %v6828_v34 = vpop.f32.mrb[173].mxu1  ;;  %v4611_v19 = vpop.f32.mrb[146].mxu0 }
 0x676   :  { %v6830_v10 = vpop.f32.mrb[174].mxu1  ;;  %v4613_v22 = vpop.f32.mrb[147].mxu0 }
 0x677   :  { %v6832_v18 = vpop.f32.mrb[175].mxu1 }
 0x678   :  { %4876 = vmatmul.mubr.bf16.gmra.mrb[252].mxu0 %v15916_v2  ;;  %v17725_v18 = vld [vmem:[#allocation102_spill] sm:$0xff] }
 0x679   :  { %7128 = vmatmul.mubr.bf16.gmra.mrb[24].mxu1 %v17722_v16  ;;  %4918 = vmatprep.mubr.bf16.mxu0 %v17723_v12  ;;  %v17726_v16 = vld [vmem:[#allocation103_spill] sm:$0xff] }
 0x67a   :  { %7137 = vmatprep.mubr.bf16.mxu1 %v17724_v0  ;;  %v128_v0 = vld [vmem:[#allocation3 + $0xa0] sm:$0xff] }
 0x67b   :  { %v4617_v14 = vpop.f32.mrb[148].mxu0 }
 0x67c   :  { %v6836_v1 = vpop.f32.mrb[176].mxu1  ;;  %v4619_v53 = vpop.f32.mrb[149].mxu0  ;;  %v135_v14 = vld [vmem:[#allocation3 + $0xd8] sm:$0xff] }
 0x67d   :  { %v6838_v24 = vpop.f32.mrb[177].mxu1  ;;  %v4621_v34 = vpop.f32.mrb[150].mxu0  ;;  %v15929_v29 = vpack.c.bf16 %v135_v14, %v128_v0 }
 0x67e   :  { %v6840_v19 = vpop.f32.mrb[178].mxu1  ;;  %v4623_v10 = vpop.f32.mrb[151].mxu0 }
 0x67f   :  { %v6842_v22 = vpop.f32.mrb[179].mxu1 }
 0x680   :  { %12692 = vmatmul.mubr.msk.bf16.vlgmr.msra.gmra.mrb[0].mxu0 %vm2674_vm0, %v15922_v31 }
 0x681   :  { %7138 = vmatmul.mubr.bf16.gmra.mrb[28].mxu1 %v17725_v18  ;;  %4928 = vmatprep.mubr.bf16.mxu0 %v17723_v12  ;;  %v142_v18 = vld [vmem:[#allocation3 + $0x110] sm:$0xff] }
 0x682   :  { %7147 = vmatprep.mubr.bf16.mxu1 %v17726_v16  ;;  %v149_v16 = vld [vmem:[#allocation3 + $0x148] sm:$0xff] }
 0x683   :  { %v4627_v1 = vpop.f32.mrb[152].mxu0  ;;  %v15936_v14 = vpack.c.bf16 %v149_v16, %v142_v18 }
 0x684   :  { %v6846_v53 = vpop.f32.mrb[180].mxu1  ;;  %v4629_v48 = vpop.f32.mrb[153].mxu0 }
 0x685   :  { %v6848_v24 = vpop.f32.mrb[181].mxu1  ;;  %v4631_v34 = vpop.f32.mrb[154].mxu0 }
 0x686   :  { %v6850_v19 = vpop.f32.mrb[182].mxu1  ;;  %v4633_v10 = vpop.f32.mrb[155].mxu0 }
 0x687   :  { %v6852_v22 = vpop.f32.mrb[183].mxu1 }
 0x688   :  { %12693 = vmatmul.mubr.msk.bf16.gmra.mrb[4].mxu0 %vm2674_vm0, %v15929_v29 }
 0x689   :  { %7148 = vmatmul.mubr.bf16.gmra.mrb[32].mxu1 %v15580_v45  ;;  %4938 = vmatprep.mubr.bf16.mxu0 %v17723_v12  ;;  %v156_v45 = vld [vmem:[#allocation3 + $0x180] sm:$0xff] }
 0x68a   :  { %7157 = vmatprep.mubr.bf16.mxu1 %v15582_v33  ;;  %v163_v33 = vld [vmem:[#allocation3 + $0x1b8] sm:$0xff] }
 0x68b   :  { %v4637_v1 = vpop.f32.mrb[156].mxu0  ;;  %v15943_v16 = vpack.c.bf16 %v163_v33, %v156_v45 }
 0x68c   :  { %v6856_v53 = vpop.f32.mrb[184].mxu1  ;;  %v4639_v0 = vpop.f32.mrb[157].mxu0 }
 0x68d   :  { %v6858_v48 = vpop.f32.mrb[185].mxu1  ;;  %v4641_v24 = vpop.f32.mrb[158].mxu0 }
 0x68e   :  { %v6860_v34 = vpop.f32.mrb[186].mxu1  ;;  %v4643_v19 = vpop.f32.mrb[159].mxu0 }
 0x68f   :  { %v6862_v10 = vpop.f32.mrb[187].mxu1 }
 0x690   :  { %12694 = vmatmul.mubr.msk.bf16.gmra.mrb[8].mxu0 %vm2674_vm0, %v15936_v14  ;;  %v13678_v10 = vld [vmem:[#allocation8] sm:$0xff]  }
 0x691   :  { %7158 = vmatmul.mubr.bf16.gmra.mrb[36].mxu1 %v15588_v27  ;;  %4948 = vmatprep.mubr.bf16.mxu0 %v17723_v12  ;;  %v170_v27 = vld [vmem:[#allocation3 + $0x1f0] sm:$0xff] }
 0x692   :  { %7167 = vmatprep.mubr.bf16.mxu1 %v15590_v56  ;;  %v177_v56 = vld [vmem:[#allocation3 + $0x228] sm:$0xff]  ;;  %10438 = vmatpush1.bf16.msra.mxu0 %v13678_v10 }
 0x693   :  { %v4647_v22 = vpop.f32.mrb[160].mxu0  ;;  %10439 = vmatprep.subr.bf16.mxu0 %v17723_v12 }
 0x694   :  { %v6866_v1 = vpop.f32.mrb[188].mxu1  ;;  %v4649_v18 = vpop.f32.mrb[161].mxu0  ;;  %v15950_v22 = vpack.c.bf16 %v177_v56, %v170_v27  ;;  %v13680_v56 = vld [vmem:[#allocation8 + $0x10] sm:$0xff]  }
 0x695   :  { %v6868_v53 = vpop.f32.mrb[189].mxu1  ;;  %v4651_v0 = vpop.f32.mrb[162].mxu0 }
 0x696   :  { %v6870_v48 = vpop.f32.mrb[190].mxu1  ;;  %v4653_v24 = vpop.f32.mrb[163].mxu0 }
 0x697   :  { %v6872_v34 = vpop.f32.mrb[191].mxu1  ;;  %v13679_v48 = vld [vmem:[#allocation8 + $0x8] sm:$0xff]   ;;  %v184_v24 = vld [vmem:[#allocation3 + $0x260] sm:$0xff] }
 0x698   :  { %12695 = vmatmul.mubr.msk.bf16.gmra.mrb[12].mxu0 %vm2674_vm0, %v15943_v16  ;;  %v191_v34 = vld [vmem:[#allocation3 + $0x298] sm:$0xff] }
 0x699   :  { %7168 = vmatmul.mubr.bf16.gmra.mrb[40].mxu1 %v15596_v50  ;;  %4958 = vmatprep.mubr.bf16.mxu0 %v17723_v12 }
 0x69a   :  { %7177 = vmatprep.mubr.bf16.mxu1 %v15598_v40  ;;  %v17727_v40 = vld [vmem:[#allocation105_spill] sm:$0xff]  ;;  %10440 = vmatpush1.bf16.msra.mxu0 %v13679_v48  ;;  %v17729_v48 = vld [vmem:[#allocation108_spill] sm:$0xff] }
 0x69b   :  { %v4657_v19 = vpop.f32.mrb[164].mxu0  ;;  %10441 = vmatprep.subr.bf16.mxu0 %v17723_v12 }
 0x69c   :  { %v6876_v45 = vpop.f32.mrb[192].mxu1  ;;  %v4659_v33 = vpop.f32.mrb[165].mxu0 }
 0x69d   :  { %v6878_v1 = vpop.f32.mrb[193].mxu1  ;;  %v4661_v18 = vpop.f32.mrb[166].mxu0  ;;  %v15959_v45 = vpack.c.bf16 %v191_v34, %v184_v24  ;;  %v205_v24 = vld [vmem:[#allocation3 + $0x308] sm:$0xff] }
 0x69e   :  { %v6880_v53 = vpop.f32.mrb[194].mxu1  ;;  %v4663_v50 = vpop.f32.mrb[167].mxu0  ;;  %10442 = vmatpush1.bf16.msra.mxu0 %v13680_v56 }
 0x69f   :  { %v6882_v0 = vpop.f32.mrb[195].mxu1  ;;  %10443 = vmatprep.subr.bf16.mxu0 %v17723_v12  ;;  %v13681_v50 = vld [vmem:[#allocation8 + $0x18] sm:$0xff]  }
 0x6a0   :  { %12696 = vmatmul.mubr.msk.bf16.gmra.mrb[16].mxu0 %vm2674_vm0, %v15950_v22  ;;  %v17728_v0 = vld [vmem:[#allocation106_spill] sm:$0xff] }
 0x6a1   :  { %7178 = vmatmul.mubr.bf16.gmra.mrb[44].mxu1 %v15604_v46  ;;  %4968 = vmatprep.mubr.bf16.mxu0 %v17723_v12 }
 0x6a2   :  { %7187 = vmatprep.mubr.bf16.mxu1 %v17727_v40  ;;  %v198_v40 = vld [vmem:[#allocation3 + $0x2d0] sm:$0xff]  ;;  %10444 = vmatpush1.bf16.msra.mxu0 %v13681_v50  ;;  %v212_v50 = vld [vmem:[#allocation3 + $0x340] sm:$0xff] }
 0x6a3   :  { %v4667_v27 = vpop.f32.mrb[168].mxu0  ;;  %10445 = vmatprep.subr.bf16.mxu0 %v17723_v12 }
 0x6a4   :  { %v6886_v19 = vpop.f32.mrb[196].mxu1  ;;  %v4669_v10 = vpop.f32.mrb[169].mxu0  ;;  %v13682_v27 = vld [vmem:[#allocation8 + $0x20] sm:$0xff]  }
 0x6a5   :  { %v6888_v33 = vpop.f32.mrb[197].mxu1  ;;  %v4671_v46 = vpop.f32.mrb[170].mxu0  ;;  %v15968_v10 = vpack.c.bf16 %v205_v24, %v198_v40  ;;  %v13684_v24 = vld [vmem:[#allocation8 + $0x30] sm:$0xff]  }
 0x6a6   :  { %v6890_v1 = vpop.f32.mrb[198].mxu1  ;;  %v4673_v18 = vpop.f32.mrb[171].mxu0  ;;  %10446 = vmatpush1.bf16.msra.mxu0 %v13682_v27 }
 0x6a7   :  { %v6892_v53 = vpop.f32.mrb[199].mxu1  ;;  %10447 = vmatprep.subr.bf16.mxu0 %v17723_v12 }
 0x6a8   :  { %12697 = vmatmul.mubr.msk.bf16.gmra.mrb[20].mxu0 %vm2674_vm0, %v15959_v45 }
 0x6a9   :  { %7188 = vmatmul.mubr.bf16.gmra.mrb[48].mxu1 %v17728_v0  ;;  %4978 = vmatprep.mubr.bf16.mxu0 %v17723_v12  ;;  %v13683_v0 = vld [vmem:[#allocation8 + $0x28] sm:$0xff]  }
 0x6aa   :  { %7197 = vmatprep.mubr.bf16.mxu1 %v17729_v48  ;;  %v219_v48 = vld [vmem:[#allocation3 + $0x378] sm:$0xff]  ;;  %10448 = vmatpush1.bf16.msra.mxu0 %v13683_v0 }
 0x6ab   :  { %v4677_v34 = vpop.f32.mrb[172].mxu0  ;;  %10449 = vmatprep.subr.bf16.mxu0 %v17723_v12  ;;  %v15977_v27 = vpack.c.bf16 %v219_v48, %v212_v50 }
 0x6ac   :  { %v6896_v56 = vpop.f32.mrb[200].mxu1  ;;  %v4679_v19 = vpop.f32.mrb[173].mxu0 }
 0x6ad   :  { %v6898_v33 = vpop.f32.mrb[201].mxu1  ;;  %v4681_v46 = vpop.f32.mrb[174].mxu0 }
 0x6ae   :  { %v6900_v1 = vpop.f32.mrb[202].mxu1  ;;  %v4683_v18 = vpop.f32.mrb[175].mxu0  ;;  %10450 = vmatpush1.bf16.msra.mxu0 %v13684_v24  ;;  %v233_v33 = vld [vmem:[#allocation3 + $0x3e8] sm:$0xff] }
 0x6af   :  { %v6902_v53 = vpop.f32.mrb[203].mxu1  ;;  %10451 = vmatprep.subr.bf16.mxu0 %v17723_v12  ;;  %v13686_v1 = vld [vmem:[#allocation8 + $0x40] sm:$0xff]  }
 0x6b0   :  { %12698 = vmatmul.mubr.msk.bf16.gmra.mrb[24].mxu0 %vm2674_vm0, %v15968_v10 }
 0x6b1   :  { %7198 = vmatmul.mubr.bf16.gmra.mrb[52].mxu1 %v15620_v59  ;;  %4988 = vmatprep.mubr.bf16.mxu0 %v17723_v12  ;;  %v13685_v59 = vld [vmem:[#allocation8 + $0x38] sm:$0xff]  }
 0x6b2   :  { %7207 = vmatprep.mubr.bf16.mxu1 %v15622_v28  ;;  %v226_v28 = vld [vmem:[#allocation3 + $0x3b0] sm:$0xff]  ;;  %10452 = vmatpush1.bf16.msra.mxu0 %v13685_v59 }
 0x6b3   :  { %v4687_v40 = vpop.f32.mrb[176].mxu0  ;;  %10453 = vmatprep.subr.bf16.mxu0 %v17723_v12  ;;  %v15986_v0 = vpack.c.bf16 %v233_v33, %v226_v28  ;;  %v13688_v59 = vld [vmem:[#allocation8 + $0x50] sm:$0xff]  }
 0x6b4   :  { %v4689_v34 = vpop.f32.mrb[177].mxu0 }
 0x6b5   :  { %v4691_v56 = vpop.f32.mrb[178].mxu0  ;;  %v240_v34 = vld [vmem:[#allocation3 + $0x420] sm:$0xff] }
 0x6b6   :  { %v4693_v19 = vpop.f32.mrb[179].mxu0  ;;  %10454 = vmatpush1.bf16.msra.mxu0 %v13686_v1  ;;  %v247_v56 = vld [vmem:[#allocation3 + $0x458] sm:$0xff] }
 0x6b7   :  { %10455 = vmatprep.subr.bf16.mxu0 %v17723_v12 }
 0x6b8   :  { %12699 = vmatmul.mubr.msk.bf16.gmra.mrb[28].mxu0 %vm2674_vm0, %v15977_v27 }
 0x6b9   :  { %7208 = vmatmul.mubr.bf16.gmra.mrb[56].mxu1 %v15628_v26  ;;  %4998 = vmatprep.mubr.bf16.mxu0 %v17723_v12 }
 0x6ba   :  { %7217 = vmatprep.mubr.bf16.mxu1 %v15630_v42  ;;  %v13687_v42 = vld [vmem:[#allocation8 + $0x48] sm:$0xff]  }
 0x6bb   :  { %v4697_v46 = vpop.f32.mrb[180].mxu0  ;;  %10456 = vmatpush1.bf16.msra.mxu0 %v13687_v42 }
 0x6bc   :  { %v6949_v18 = vpop.f32.mrb[208].mxu1  ;;  %v4699_v53 = vpop.f32.mrb[181].mxu0  ;;  %10457 = vmatprep.subr.bf16.mxu0 %v17723_v12  ;;  %v15995_v46 = vpack.c.bf16 %v247_v56, %v240_v34  ;;  %v13690_v34 = vld [vmem:[#allocation8 + $0x60] sm:$0xff]  }
 0x6bd   :  { %v6951_v50 = vpop.f32.mrb[209].mxu1  ;;  %v4701_v26 = vpop.f32.mrb[182].mxu0 }
 0x6be   :  { %v6953_v48 = vpop.f32.mrb[210].mxu1  ;;  %v4703_v40 = vpop.f32.mrb[183].mxu0  ;;  %17730 = vst [vmem:[#allocation90_spill] sm:$0xff] %v15995_v46  ;;  %v17731_v26 = vld [vmem:[#allocation110_spill] sm:$0xff] }
 0x6bf   :  { %v6955_v24 = vpop.f32.mrb[211].mxu1  ;;  %10458 = vmatpush1.bf16.msra.mxu0 %v13688_v59  ;;  %v17732_v48 = vld [vmem:[#allocation112_spill] sm:$0xff]  ;;  %v254_v40 = vld [vmem:[#allocation3 + $0x490] sm:$0xff] }
 0x6c0   :  { %12700 = vmatmul.mubr.msk.bf16.gmra.mrb[32].mxu0 %vm2674_vm0, %v15986_v0  ;;  %10459 = vmatprep.subr.bf16.mxu0 %v17723_v12  ;;  %v261_v24 = vld [vmem:[#allocation3 + $0x4c8] sm:$0xff] }
 0x6c1   :  { %7218 = vmatmul.mubr.bf16.gmra.mrb[60].mxu1 %v15636_v20  ;;  %5008 = vmatprep.mubr.bf16.mxu0 %v17723_v12  ;;  %v16004_v59 = vpack.c.bf16 %v261_v24, %v254_v40  ;;  %v268_v40 = vld [vmem:[#allocation3 + $0x500] sm:$0xff]  ;;  %v275_v24 = vld [vmem:[#allocation3 + $0x538] sm:$0xff] }
 0x6c2   :  { %7227 = vmatprep.mubr.bf16.mxu1 %v15638_v39  ;;  %v13689_v39 = vld [vmem:[#allocation8 + $0x58] sm:$0xff]  }
 0x6c3   :  { %v4707_v19 = vpop.f32.mrb[184].mxu0  ;;  %10460 = vmatpush1.bf16.msra.mxu0 %v13689_v39  ;;  %17733 = vst [vmem:[#allocation91_spill] sm:$0xff] %v16004_v59  ;;  %v17735_v39 = vmov 0 }
 0x6c4   :  { %v6959_v28 = vpop.f32.mrb[212].mxu1  ;;  %v4709_v33 = vpop.f32.mrb[185].mxu0  ;;  %10461 = vmatprep.subr.bf16.mxu0 %v17723_v12 }
 0x6c5   :  { %v6961_v1 = vpop.f32.mrb[213].mxu1  ;;  %v4711_v20 = vpop.f32.mrb[186].mxu0 }
 0x6c6   :  { %v6963_v18 = vpop.f32.mrb[214].mxu1  ;;  %v4713_v53 = vpop.f32.mrb[187].mxu0 }
 0x6c7   :  { %v6965_v50 = vpop.f32.mrb[215].mxu1  ;;  %10462 = vmatpush1.bf16.msra.mxu0 %v13690_v34  ;;  %v17362_v18 = vlaneseq }
 0x6c8   :  { %12701 = vmatmul.mubr.msk.bf16.gmra.mrb[36].mxu0 %vm2674_vm0, %v15995_v46  ;;  %10463 = vmatprep.subr.bf16.mxu0 %v17723_v12  ;;  %v13691_v50 = vld [vmem:[#allocation8 + $0x68] sm:$0xff]  }
 0x6c9   :  { %7228 = vmatmul.mubr.bf16.gmra.mrb[64].mxu1 %v17731_v26  ;;  %5018 = vmatprep.mubr.bf16.mxu0 %v17723_v12  ;;  %v17734_v26 = vld [vmem:[#allocation43_spill] sm:$0xff]  ;;  %vm16011_vm1 = vcmp.lt.s32.totalorder %v17362_v18, 512 }
 0x6ca   :  { %7237 = vmatprep.mubr.bf16.mxu1 %v17732_v48  ;;  %v17736_v39 = vsel %vm16011_vm1, 4294967295, %v17735_v39  ;;  %v17738_v48 = vld [vmem:[#allocation45_spill] sm:$0xff]  ;;  %v13693_v18 = vld [vmem:[#allocation8 + $0x78] sm:$0xff]  }
 0x6cb   :  { %v4717_v42 = vpop.f32.mrb[188].mxu0  ;;  %17737 = vst [vmem:[#allocation93_spill] sm:$0xff] %v17736_v39  ;;  %10464 = vmatpush1.bf16.msra.mxu0 %v13691_v50  ;;  %v17740_v39 = vld [vmem:[#allocation46_spill] sm:$0xff]  ;;  %v17741_v50 = vld [vmem:[#allocation48_spill] sm:$0xff] }
 0x6cc   :  { %v6969_v56 = vpop.f32.mrb[216].mxu1  ;;  %v4719_v19 = vpop.f32.mrb[189].mxu0  ;;  %v17365_v42 = vmov 0.0   ;;  %10465 = vmatprep.subr.bf16.mxu0 %v17723_v12 }
 0x6cd   :  { %v6971_v28 = vpop.f32.mrb[217].mxu1  ;;  %v4721_v33 = vpop.f32.mrb[190].mxu0  ;;  %107 = vst.msk [vmem:[%s17138_s10] sm:$0xf] %vm16011_vm1, %v17365_v42  ;;  %v13692_v56 = vld [vmem:[#allocation8 + $0x70] sm:$0xff]  }
 0x6ce   :  { %v6973_v1 = vpop.f32.mrb[218].mxu1  ;;  %v4723_v20 = vpop.f32.mrb[191].mxu0  ;;  %v16024_v33 = vpack.c.bf16 %v275_v24, %v268_v40  ;;  %v282_v40 = vld [vmem:[#allocation3 + $0x570] sm:$0xff]  ;;  %v289_v24 = vld [vmem:[#allocation3 + $0x5a8] sm:$0xff] }
 0x6cf   :  { %v6975_v53 = vpop.f32.mrb[219].mxu1  ;;  %10466 = vmatpush1.bf16.msra.mxu0 %v13692_v56 }
 0x6d0   :  { %12702 = vmatmul.mubr.msk.bf16.gmra.mrb[40].mxu0 %vm2674_vm0, %v16004_v59  ;;  %17739 = vst [vmem:[#allocation94_spill] sm:$0xff] %v16024_v33  ;;  %10467 = vmatprep.subr.bf16.mxu0 %v17723_v12 }
 0x6d1   :  { %7238 = vmatmul.mubr.bf16.gmra.mrb[68].mxu1 %v17734_v26  ;;  %5028 = vmatprep.mubr.bf16.mxu0 %v17723_v12 }
 0x6d2   :  { %7247 = vmatprep.mubr.bf16.mxu1 %v17738_v48 }
 0x6d3   :  { %v4727_v34 = vpop.f32.mrb[192].mxu0  ;;  %10468 = vmatpush1.bf16.msra.mxu0 %v13693_v18 }
 0x6d4   :  { %v6979_v19 = vpop.f32.mrb[220].mxu1  ;;  %v4729_v28 = vpop.f32.mrb[193].mxu0  ;;  %10982 = vmatprep.subr.bf16.mxu0 %v17723_v12 }
 0x6d5   :  { %v6981_v1 = vpop.f32.mrb[221].mxu1  ;;  %v4731_v20 = vpop.f32.mrb[194].mxu0  ;;  %v16033_v28 = vpack.c.bf16 %v289_v24, %v282_v40 }
 0x6d6   :  { %v6983_v53 = vpop.f32.mrb[222].mxu1  ;;  %v4733_v26 = vpop.f32.mrb[195].mxu0 }
 0x6d7   :  { %v6985_v48 = vpop.f32.mrb[223].mxu1  ;;  %17742 = vst [vmem:[#allocation96_spill] sm:$0xff] %v16033_v28 }
 0x6d8   :  { %12703 = vmatmul.mubr.msk.bf16.gmra.mrb[44].mxu0 %vm2674_vm0, %v16024_v33  ;;  %v17743_v48 = vld [vmem:[#allocation49_spill] sm:$0xff] }
 0x6d9   :  { %7248 = vmatmul.mubr.bf16.gmra.mrb[72].mxu1 %v17740_v39  ;;  %5038 = vmatprep.mubr.bf16.mxu0 %v17723_v12 }
 0x6da   :  { %7257 = vmatprep.mubr.bf16.mxu1 %v17741_v50  ;;  %v17744_v50 = vld [vmem:[#allocation51_spill] sm:$0xff] }
 0x6db   :  { %v4737_v34 = vpop.f32.mrb[196].mxu0 }
 0x6dc   :  { %v6989_v19 = vpop.f32.mrb[224].mxu1  ;;  %v4739_v56 = vpop.f32.mrb[197].mxu0 }
 0x6dd   :  { %v6991_v1 = vpop.f32.mrb[225].mxu1  ;;  %v4741_v20 = vpop.f32.mrb[198].mxu0 }
 0x6de   :  { %v6993_v39 = vpop.f32.mrb[226].mxu1  ;;  %v4743_v53 = vpop.f32.mrb[199].mxu0  ;;  %v17745_v1 = vld [vmem:[#allocation52_spill] sm:$0xff]  ;;  %v17746_v20 = vld [vmem:[#allocation54_spill] sm:$0xff] }
 0x6df   :  { %v6995_v26 = vpop.f32.mrb[227].mxu1 }
 0x6e0   :  { %12704 = vmatmul.mubr.msk.bf16.gmra.mrb[48].mxu0 %vm2674_vm0, %v16033_v28 }
 0x6e1   :  { %7258 = vmatmul.mubr.bf16.gmra.mrb[76].mxu1 %v17743_v48 }
 0x6e2   :  { %7267 = vmatprep.mubr.bf16.mxu1 %v17744_v50 }
 0x6e3   :  { %v4747_v18 = vpop.f32.mrb[200].mxu0 }
 0x6e4   :  { %v6999_v34 = vpop.f32.mrb[228].mxu1  ;;  %v4749_v19 = vpop.f32.mrb[201].mxu0  ;;  %v17747_v18 = vld [vmem:[#allocation55_spill] sm:$0xff] }
 0x6e5   :  { %v7001_v42 = vpop.f32.mrb[229].mxu1  ;;  %v4751_v33 = vpop.f32.mrb[202].mxu0  ;;  %v17748_v34 = vld [vmem:[#allocation57_spill] sm:$0xff] }
 0x6e6   :  { %v7003_v56 = vpop.f32.mrb[230].mxu1  ;;  %v4753_v40 = vpop.f32.mrb[203].mxu0 }
 0x6e7   :  { %v7005_v24 = vpop.f32.mrb[231].mxu1 }
 0x6e9   :  { %7268 = vmatmul.mubr.bf16.gmra.mrb[80].mxu1 %v17745_v1 }
 0x6ea   :  { %7277 = vmatprep.mubr.bf16.mxu1 %v17746_v20 }
 0x6eb   :  { %v4757_v39 = vpop.f32.mrb[204].mxu0 }
 0x6ec   :  { %v7009_v53 = vpop.f32.mrb[232].mxu1  ;;  %v4759_v26 = vpop.f32.mrb[205].mxu0  ;;  %v17749_v39 = vld [vmem:[#allocation58_spill] sm:$0xff] }
 0x6ed   :  { %v7011_v48 = vpop.f32.mrb[233].mxu1  ;;  %v4761_v59 = vpop.f32.mrb[206].mxu0  ;;  %v17750_v53 = vld [vmem:[#allocation60_spill] sm:$0xff] }
 0x6ee   :  { %v7013_v28 = vpop.f32.mrb[234].mxu1  ;;  %v4763_v46 = vpop.f32.mrb[207].mxu0 }
 0x6ef   :  { %v7015_v50 = vpop.f32.mrb[235].mxu1 }
 0x6f1   :  { %7278 = vmatmul.mubr.bf16.gmra.mrb[84].mxu1 %v17747_v18 }
 0x6f2   :  { %7287 = vmatprep.mubr.bf16.mxu1 %v17748_v34 }
 0x6f3   :  { %v4767_v42 = vpop.f32.mrb[208].mxu0 }
 0x6f4   :  { %v7019_v33 = vpop.f32.mrb[236].mxu1  ;;  %v4769_v19 = vpop.f32.mrb[209].mxu0  ;;  %v17751_v42 = vld [vmem:[#allocation61_spill] sm:$0xff] }
 0x6f5   :  { %v7021_v56 = vpop.f32.mrb[237].mxu1  ;;  %v4771_v40 = vpop.f32.mrb[210].mxu0  ;;  %v17752_v33 = vld [vmem:[#allocation63_spill] sm:$0xff] }
 0x6f6   :  { %v7023_v24 = vpop.f32.mrb[238].mxu1  ;;  %v4773_v1 = vpop.f32.mrb[211].mxu0 }
 0x6f7   :  { %v7025_v20 = vpop.f32.mrb[239].mxu1 }
 0x6f9   :  { %7288 = vmatmul.mubr.bf16.gmra.mrb[88].mxu1 %v17749_v39 }
 0x6fa   :  { %7297 = vmatprep.mubr.bf16.mxu1 %v17750_v53 }
 0x6fb   :  { %v4777_v59 = vpop.f32.mrb[212].mxu0 }
 0x6fc   :  { %v7029_v28 = vpop.f32.mrb[240].mxu1  ;;  %v4779_v46 = vpop.f32.mrb[213].mxu0  ;;  %v17753_v59 = vld [vmem:[#allocation64_spill] sm:$0xff] }
 0x6fd   :  { %v7031_v26 = vpop.f32.mrb[241].mxu1  ;;  %v4781_v48 = vpop.f32.mrb[214].mxu0  ;;  %v17754_v28 = vld [vmem:[#allocation66_spill] sm:$0xff] }
 0x6fe   :  { %v7033_v50 = vpop.f32.mrb[242].mxu1  ;;  %v4783_v18 = vpop.f32.mrb[215].mxu0 }
 0x6ff   :  { %v7035_v34 = vpop.f32.mrb[243].mxu1 }
 0x701   :  { %7298 = vmatmul.mubr.bf16.gmra.mrb[92].mxu1 %v17751_v42 }
 0x702   :  { %7307 = vmatprep.mubr.bf16.mxu1 %v17752_v33 }
 0x703   :  { %v4787_v19 = vpop.f32.mrb[216].mxu0 }
 0x704   :  { %v7039_v56 = vpop.f32.mrb[244].mxu1  ;;  %v4789_v40 = vpop.f32.mrb[217].mxu0  ;;  %v17755_v19 = vld [vmem:[#allocation67_spill] sm:$0xff] }
 0x705   :  { %v7041_v24 = vpop.f32.mrb[245].mxu1  ;;  %v4791_v1 = vpop.f32.mrb[218].mxu0  ;;  %v17756_v56 = vld [vmem:[#allocation69_spill] sm:$0xff] }
 0x706   :  { %v7043_v20 = vpop.f32.mrb[246].mxu1  ;;  %v4793_v39 = vpop.f32.mrb[219].mxu0 }
 0x707   :  { %v7045_v53 = vpop.f32.mrb[247].mxu1 }
 0x709   :  { %7308 = vmatmul.mubr.bf16.gmra.mrb[96].mxu1 %v17753_v59 }
 0x70a   :  { %7317 = vmatprep.mubr.bf16.mxu1 %v17754_v28 }
 0x70b   :  { %v4797_v46 = vpop.f32.mrb[220].mxu0 }
 0x70c   :  { %v7049_v26 = vpop.f32.mrb[248].mxu1  ;;  %v4799_v48 = vpop.f32.mrb[221].mxu0  ;;  %v17757_v46 = vld [vmem:[#allocation70_spill] sm:$0xff] }
 0x70d   :  { %v7051_v50 = vpop.f32.mrb[249].mxu1  ;;  %v4801_v18 = vpop.f32.mrb[222].mxu0  ;;  %v17758_v26 = vld [vmem:[#allocation72_spill] sm:$0xff] }
 0x70e   :  { %v7053_v34 = vpop.f32.mrb[250].mxu1  ;;  %v4803_v42 = vpop.f32.mrb[223].mxu0 }
 0x70f   :  { %v7055_v33 = vpop.f32.mrb[251].mxu1 }
 0x711   :  { %7318 = vmatmul.mubr.bf16.gmra.mrb[100].mxu1 %v17755_v19 }
 0x712   :  { %7327 = vmatprep.mubr.bf16.mxu1 %v17756_v56 }
 0x713   :  { %v4807_v40 = vpop.f32.mrb[224].mxu0 }
 0x714   :  { %v7059_v24 = vpop.f32.mrb[252].mxu1  ;;  %v4809_v1 = vpop.f32.mrb[225].mxu0  ;;  %v17759_v40 = vld [vmem:[#allocation73_spill] sm:$0xff] }
 0x715   :  { %v7061_v20 = vpop.f32.mrb[253].mxu1  ;;  %v4811_v39 = vpop.f32.mrb[226].mxu0  ;;  %v17760_v24 = vld [vmem:[#allocation75_spill] sm:$0xff] }
 0x716   :  { %v7063_v53 = vpop.f32.mrb[254].mxu1  ;;  %v4813_v59 = vpop.f32.mrb[227].mxu0 }
 0x717   :  { %v7065_v28 = vpop.f32.mrb[255].mxu1 }
 0x719   :  { %7328 = vmatmul.mubr.bf16.gmra.mrb[104].mxu1 %v17757_v46 }
 0x71a   :  { %7337 = vmatprep.mubr.bf16.mxu1 %v17758_v26 }
 0x71b   :  { %v4817_v48 = vpop.f32.mrb[228].mxu0 }
 0x71c   :  { %v7069_v50 = vpop.f32.mrb[0].mxu1  ;;  %v4819_v18 = vpop.f32.mrb[229].mxu0  ;;  %v17761_v48 = vld [vmem:[#allocation76_spill] sm:$0xff] }
 0x71d   :  { %v7071_v34 = vpop.f32.mrb[1].mxu1  ;;  %v4821_v42 = vpop.f32.mrb[230].mxu0  ;;  %v17762_v50 = vld [vmem:[#allocation78_spill] sm:$0xff] }
 0x71e   :  { %v7073_v33 = vpop.f32.mrb[2].mxu1  ;;  %v4823_v19 = vpop.f32.mrb[231].mxu0 }
 0x71f   :  { %v7075_v56 = vpop.f32.mrb[3].mxu1 }
 0x721   :  { %7338 = vmatmul.mubr.bf16.gmra.mrb[108].mxu1 %v17759_v40 }
 0x722   :  { %7347 = vmatprep.mubr.bf16.mxu1 %v17760_v24 }
 0x723   :  { %v4827_v1 = vpop.f32.mrb[232].mxu0 }
 0x724   :  { %v7079_v20 = vpop.f32.mrb[4].mxu1  ;;  %v4829_v39 = vpop.f32.mrb[233].mxu0  ;;  %v17763_v1 = vld [vmem:[#allocation79_spill] sm:$0xff] }
 0x725   :  { %v7081_v53 = vpop.f32.mrb[5].mxu1  ;;  %v4831_v59 = vpop.f32.mrb[234].mxu0  ;;  %v17764_v20 = vld [vmem:[#allocation81_spill] sm:$0xff] }
 0x726   :  { %v7083_v28 = vpop.f32.mrb[6].mxu1  ;;  %v4833_v46 = vpop.f32.mrb[235].mxu0 }
 0x727   :  { %v7085_v26 = vpop.f32.mrb[7].mxu1 }
 0x729   :  { %7348 = vmatmul.mubr.bf16.gmra.mrb[112].mxu1 %v17761_v48 }
 0x72a   :  { %7357 = vmatprep.mubr.bf16.mxu1 %v17762_v50 }
 0x72b   :  { %v4837_v18 = vpop.f32.mrb[236].mxu0 }
 0x72c   :  { %v7089_v34 = vpop.f32.mrb[8].mxu1  ;;  %v4839_v42 = vpop.f32.mrb[237].mxu0  ;;  %v17765_v18 = vld [vmem:[#allocation82_spill] sm:$0xff] }
 0x72d   :  { %v7091_v33 = vpop.f32.mrb[9].mxu1  ;;  %v4841_v19 = vpop.f32.mrb[238].mxu0  ;;  %v17766_v34 = vld [vmem:[#allocation84_spill] sm:$0xff] }
 0x72e   :  { %v7093_v56 = vpop.f32.mrb[10].mxu1  ;;  %v4843_v40 = vpop.f32.mrb[239].mxu0 }
 0x72f   :  { %v7095_v24 = vpop.f32.mrb[11].mxu1 }
 0x731   :  { %7358 = vmatmul.mubr.bf16.gmra.mrb[116].mxu1 %v17763_v1 }
 0x732   :  { %7367 = vmatprep.mubr.bf16.mxu1 %v17764_v20 }
 0x733   :  { %v4847_v39 = vpop.f32.mrb[240].mxu0 }
 0x734   :  { %v7099_v53 = vpop.f32.mrb[12].mxu1  ;;  %v4849_v59 = vpop.f32.mrb[241].mxu0  ;;  %v17767_v39 = vld [vmem:[#allocation85_spill] sm:$0xff] }
 0x735   :  { %v7101_v28 = vpop.f32.mrb[13].mxu1  ;;  %v4851_v46 = vpop.f32.mrb[242].mxu0 }
 0x736   :  { %v7103_v26 = vpop.f32.mrb[14].mxu1  ;;  %v4853_v48 = vpop.f32.mrb[243].mxu0 }
 0x737   :  { %v7105_v50 = vpop.f32.mrb[15].mxu1 }
 0x739   :  { %7368 = vmatmul.mubr.bf16.gmra.mrb[120].mxu1 %v17765_v18 }
 0x73a   :  { %7377 = vmatprep.mubr.bf16.mxu1 %v17766_v34  ;;  %v17768_v34 = vlaneseq }
 0x73b   :  { %v4857_v42 = vpop.f32.mrb[244].mxu0 }
 0x73c   :  { %v7109_v33 = vpop.f32.mrb[16].mxu1  ;;  %v4859_v19 = vpop.f32.mrb[245].mxu0  ;;  %v16065_v42 = vshrl.u32 %v17768_v34, 7 }
 0x73d   :  { %v7111_v56 = vpop.f32.mrb[17].mxu1  ;;  %v4861_v40 = vpop.f32.mrb[246].mxu0 }
 0x73e   :  { %v7113_v24 = vpop.f32.mrb[18].mxu1  ;;  %v4863_v1 = vpop.f32.mrb[247].mxu0 }
 0x73f   :  { %v7115_v20 = vpop.f32.mrb[19].mxu1  ;;  %v1652_v1 = vld [vmem:[%s17130_s2] sm:$0xf] }
 0x740   :  { %v1660_v20 = vsub.s32 1, %v16065_v42 }
 0x741   :  { %7378 = vmatmul.mubr.bf16.gmra.mrb[124].mxu1 %v17767_v39 }
 0x742   :  { %7387 = vmatprep.mubr.bf16.mxu1 %v15766_v35  ;;  %v16069_v35 = vsub.s32 0, %v16065_v42 }
 0x743   :  { %v4867_v53 = vpop.f32.mrb[248].mxu0 }
 0x744   :  { %v7119_v59 = vpop.f32.mrb[20].mxu1  ;;  %v4869_v28 = vpop.f32.mrb[249].mxu0 }
 0x745   :  { %v7121_v46 = vpop.f32.mrb[21].mxu1  ;;  %v4871_v26 = vpop.f32.mrb[250].mxu0  ;;  %v1661_v59 = vrot.slane %v1652_v1, %v1660_v20  ;;  %v13697_v20 = vld [vmem:[#allocation6 + $0x628] ss:$16 sps:$4 sm:$0xff]  }
 0x746   :  { %v7123_v48 = vpop.f32.mrb[22].mxu1  ;;  %v4873_v50 = vpop.f32.mrb[251].mxu0 }
 0x747   :  { %v7125_v18 = vpop.f32.mrb[23].mxu1 }
 0x749   :  { %7388 = vmatmul.mubr.bf16.gmra.mrb[128].mxu1 %v15772_v5 }
 0x74a   :  { %7397 = vmatprep.mubr.bf16.mxu1 %v15774_v8  ;;  %v1657_v8 = vrot.slane %v1652_v1, %v16069_v35  ;;  %v17769_v1 = vmov 0.0  }
 0x74b   :  { %v4877_v33 = vpop.f32.mrb[252].mxu0  ;;  %102 = vst.msk [vmem:[#allocation10] sm:$0x1] %vm100_vm2, %v17769_v1 }
 0x74c   :  { %v7129_v19 = vpop.f32.mrb[24].mxu1  ;;  %v4879_v56 = vpop.f32.mrb[253].mxu0 }
 0x74d   :  { %v7131_v40 = vpop.f32.mrb[25].mxu1  ;;  %v4881_v24 = vpop.f32.mrb[254].mxu0 }
 0x74e   :  { %v7133_v5 = vpop.f32.mrb[26].mxu1  ;;  %v4883_v39 = vpop.f32.mrb[255].mxu0  ;;  %v13696_v24 = vld [vmem:[#allocation6 + $0x60c] ss:$16 sps:$4 sm:$0xff]  }
 0x74f   :  { %v7135_v53 = vpop.f32.mrb[27].mxu1  ;;  %7578 = vmatprep.subr.bf16.mxu1 %v13696_v24 }
 0x750   :  { %v13694_v53 = vld [vmem:[#allocation6 + $0x608] ss:$16 sps:$4 sm:$0xff]  }
 0x751   :  { %7398 = vmatmul.mubr.bf16.gmra.mrb[132].mxu1 %v15780_v9  ;;  %v13699_v9 = vld [vmem:[#allocation6 + $0x62c] ss:$16 sps:$4 sm:$0xff]  }
 0x752   :  { %7407 = vmatprep.mubr.bf16.mxu1 %v15782_v6  ;;  %7579 = vmatpush1.bf16.msra.mxu1 %v13694_v53 }
 0x753   :  { %v4920_v28 = vpop.f32.mrb[0].mxu0  ;;  %7580 = vmatprep.subr.bf16.mxu1 %v13699_v9 }
 0x754   :  { %v7139_v46 = vpop.f32.mrb[28].mxu1  ;;  %v12929_v26 = vadd.f32 %v4920_v28, %v1657_v8  ;;  %v4922_v48 = vpop.f32.mrb[1].mxu0 }
 0x755   :  { %v7141_v50 = vpop.f32.mrb[29].mxu1  ;;  %v12930_v18 = vadd.f32 %v4922_v48, %v1661_v59  ;;  %v4924_v33 = vpop.f32.mrb[2].mxu0 }
 0x756   :  { %v7143_v19 = vpop.f32.mrb[30].mxu1  ;;  %v8251_v56 = vmax.f32 %v12929_v26, 0.0  ;;  %v4926_v40 = vpop.f32.mrb[3].mxu0  ;;  %v14114_v26 = vmov 0.0|0.0   ;;  %7581 = vmatpush1.bf16.msra.mxu1 %v13697_v20 }
 0x757   :  { %v7145_v5 = vpop.f32.mrb[31].mxu1  ;;  %v8252_v39 = vmax.f32 %v12930_v18, 0.0 }
 0x758   :  { %v16084_v8 = vpack.c.bf16 %v17769_v1, %v8251_v56 }
 0x759   :  { %7408 = vmatmul.mubr.bf16.gmra.mrb[136].mxu1 %v15788_v44  ;;  %v16080_v6 = vpack.c.bf16 %v17769_v1, %v8252_v39 }
 0x75a   :  { %7417 = vmatprep.mubr.bf16.mxu1 %v15790_v15 }
 0x75b   :  { %10469 = vmatprep.mubr.bf16.mxu0 %v16080_v6  ;;  %v4930_v59 = vpop.f32.mrb[4].mxu0 }
 0x75c   :  { %v7149_v28 = vpop.f32.mrb[32].mxu1  ;;  %10470 = vmatmul.mubr.bf16.vlgmr.msra.gmra.mrb[52].mxu0 %v16084_v8  ;;  %v4932_v44 = vpop.f32.mrb[5].mxu0 }
 0x75d   :  { %v7151_v46 = vpop.f32.mrb[33].mxu1  ;;  %10477 = vmatprep.mubr.bf16.mxu0 %v14114_v26  ;;  %v4934_v48 = vpop.f32.mrb[6].mxu0 }
 0x75e   :  { %v7153_v15 = vpop.f32.mrb[34].mxu1  ;;  %v4936_v50 = vpop.f32.mrb[7].mxu0 }
 0x75f   :  { %v7155_v18 = vpop.f32.mrb[35].mxu1 }
 0x761   :  { %7418 = vmatmul.mubr.bf16.gmra.mrb[140].mxu1 %v15796_v51 }
 0x762   :  { %7427 = vmatprep.mubr.bf16.mxu1 %v15798_v3 }
 0x763   :  { %v4940_v33 = vpop.f32.mrb[8].mxu0 }
 0x764   :  { %v7159_v19 = vpop.f32.mrb[36].mxu1  ;;  %10478 = vmatmul.mubr.bf16.gmra.mrb[56].mxu0 %v14114_v26  ;;  %v4942_v56 = vpop.f32.mrb[9].mxu0 }
 0x765   :  { %v7161_v40 = vpop.f32.mrb[37].mxu1  ;;  %10485 = vmatprep.mubr.bf16.mxu0 %v14114_v26  ;;  %v4944_v24 = vpop.f32.mrb[10].mxu0 }
 0x766   :  { %v7163_v5 = vpop.f32.mrb[38].mxu1  ;;  %v4946_v39 = vpop.f32.mrb[11].mxu0 }
 0x767   :  { %v7165_v53 = vpop.f32.mrb[39].mxu1 }
 0x769   :  { %7428 = vmatmul.mubr.bf16.gmra.mrb[144].mxu1 %v15804_v38 }
 0x76a   :  { %7437 = vmatprep.mubr.bf16.mxu1 %v15806_v4 }
 0x76b   :  { %v4950_v9 = vpop.f32.mrb[12].mxu0 }
 0x76c   :  { %v7169_v51 = vpop.f32.mrb[40].mxu1  ;;  %10486 = vmatmul.mubr.bf16.gmra.mrb[60].mxu0 %v14114_v26  ;;  %v4952_v3 = vpop.f32.mrb[13].mxu0 }
 0x76d   :  { %v7171_v20 = vpop.f32.mrb[41].mxu1  ;;  %10493 = vmatprep.mubr.bf16.mxu0 %v14114_v26  ;;  %v4954_v59 = vpop.f32.mrb[14].mxu0 }
 0x76e   :  { %v7173_v28 = vpop.f32.mrb[42].mxu1  ;;  %v4956_v44 = vpop.f32.mrb[15].mxu0 }
 0x76f   :  { %v7175_v46 = vpop.f32.mrb[43].mxu1 }
 0x771   :  { %7438 = vmatmul.mubr.bf16.gmra.mrb[148].mxu1 %v15812_v37 }
 0x772   :  { %7447 = vmatprep.mubr.bf16.mxu1 %v15814_v55 }
 0x773   :  { %v4960_v48 = vpop.f32.mrb[16].mxu0 }
 0x774   :  { %v7179_v38 = vpop.f32.mrb[44].mxu1  ;;  %10494 = vmatmul.mubr.bf16.gmra.mrb[64].mxu0 %v14114_v26  ;;  %v4962_v4 = vpop.f32.mrb[17].mxu0 }
 0x775   :  { %v7181_v15 = vpop.f32.mrb[45].mxu1  ;;  %10501 = vmatprep.mubr.bf16.mxu0 %v14114_v26  ;;  %v4964_v50 = vpop.f32.mrb[18].mxu0 }
 0x776   :  { %v7183_v18 = vpop.f32.mrb[46].mxu1  ;;  %v4966_v33 = vpop.f32.mrb[19].mxu0 }
 0x777   :  { %v7185_v19 = vpop.f32.mrb[47].mxu1 }
 0x779   :  { %7448 = vmatmul.mubr.bf16.gmra.mrb[152].mxu1 %v15820_v58 }
 0x77a   :  { %7457 = vmatprep.mubr.bf16.mxu1 %v15822_v17 }
 0x77b   :  { %v4970_v56 = vpop.f32.mrb[20].mxu0 }
 0x77c   :  { %v7189_v37 = vpop.f32.mrb[48].mxu1  ;;  %10502 = vmatmul.mubr.bf16.gmra.mrb[68].mxu0 %v14114_v26  ;;  %v4972_v55 = vpop.f32.mrb[21].mxu0 }
 0x77d   :  { %v7191_v40 = vpop.f32.mrb[49].mxu1  ;;  %10509 = vmatprep.mubr.bf16.mxu0 %v14114_v26  ;;  %v4974_v24 = vpop.f32.mrb[22].mxu0 }
 0x77e   :  { %v7193_v5 = vpop.f32.mrb[50].mxu1  ;;  %v4976_v39 = vpop.f32.mrb[23].mxu0 }
 0x77f   :  { %v7195_v53 = vpop.f32.mrb[51].mxu1 }
 0x781   :  { %7458 = vmatmul.mubr.bf16.gmra.mrb[156].mxu1 %v15828_v25 }
 0x782   :  { %7467 = vmatprep.mubr.bf16.mxu1 %v15830_v49 }
 0x783   :  { %v4980_v9 = vpop.f32.mrb[24].mxu0 }
 0x784   :  { %v7199_v58 = vpop.f32.mrb[52].mxu1  ;;  %10510 = vmatmul.mubr.bf16.gmra.mrb[72].mxu0 %v14114_v26  ;;  %v4982_v17 = vpop.f32.mrb[25].mxu0 }
 0x785   :  { %v7201_v51 = vpop.f32.mrb[53].mxu1  ;;  %10517 = vmatprep.mubr.bf16.mxu0 %v14114_v26  ;;  %v4984_v3 = vpop.f32.mrb[26].mxu0 }
 0x786   :  { %v7203_v20 = vpop.f32.mrb[54].mxu1  ;;  %v4986_v59 = vpop.f32.mrb[27].mxu0 }
 0x787   :  { %v7205_v28 = vpop.f32.mrb[55].mxu1 }
 0x789   :  { %7468 = vmatmul.mubr.bf16.gmra.mrb[160].mxu1 %v15836_v62 }
 0x78a   :  { %7477 = vmatprep.mubr.bf16.mxu1 %v15838_v21 }
 0x78b   :  { %v4990_v44 = vpop.f32.mrb[28].mxu0 }
 0x78c   :  { %v7209_v25 = vpop.f32.mrb[56].mxu1  ;;  %10518 = vmatmul.mubr.bf16.gmra.mrb[76].mxu0 %v14114_v26  ;;  %v4992_v49 = vpop.f32.mrb[29].mxu0 }
 0x78d   :  { %v7211_v46 = vpop.f32.mrb[57].mxu1  ;;  %10525 = vmatprep.mubr.bf16.mxu0 %v14114_v26  ;;  %v4994_v48 = vpop.f32.mrb[30].mxu0 }
 0x78e   :  { %v7213_v38 = vpop.f32.mrb[58].mxu1  ;;  %v4996_v4 = vpop.f32.mrb[31].mxu0 }
 0x78f   :  { %v7215_v15 = vpop.f32.mrb[59].mxu1 }
 0x791   :  { %7478 = vmatmul.mubr.bf16.gmra.mrb[164].mxu1 %v15844_v32 }
 0x792   :  { %7487 = vmatprep.mubr.bf16.mxu1 %v15846_v57 }
 0x793   :  { %v5000_v50 = vpop.f32.mrb[32].mxu0 }
 0x794   :  { %v7219_v62 = vpop.f32.mrb[60].mxu1  ;;  %10526 = vmatmul.mubr.bf16.gmra.mrb[80].mxu0 %v14114_v26  ;;  %v5002_v21 = vpop.f32.mrb[33].mxu0 }
 0x795   :  { %v7221_v18 = vpop.f32.mrb[61].mxu1  ;;  %10533 = vmatprep.mubr.bf16.mxu0 %v14114_v26  ;;  %v5004_v33 = vpop.f32.mrb[34].mxu0 }
 0x796   :  { %v7223_v19 = vpop.f32.mrb[62].mxu1  ;;  %v5006_v56 = vpop.f32.mrb[35].mxu0 }
 0x797   :  { %v7225_v37 = vpop.f32.mrb[63].mxu1 }
 0x799   :  { %7488 = vmatmul.mubr.bf16.gmra.mrb[168].mxu1 %v15852_v47 }
 0x79a   :  { %7497 = vmatprep.mubr.bf16.mxu1 %v15854_v61 }
 0x79b   :  { %v5010_v55 = vpop.f32.mrb[36].mxu0 }
 0x79c   :  { %v7229_v32 = vpop.f32.mrb[64].mxu1  ;;  %10534 = vmatmul.mubr.bf16.gmra.mrb[84].mxu0 %v14114_v26  ;;  %v5012_v57 = vpop.f32.mrb[37].mxu0  ;;  %v17770_v55 = vld [vmem:[#allocation87_spill] sm:$0xff] }
 0x79d   :  { %v7231_v40 = vpop.f32.mrb[65].mxu1  ;;  %10541 = vmatprep.mubr.bf16.mxu0 %v14114_v26  ;;  %v5014_v24 = vpop.f32.mrb[38].mxu0  ;;  %v17771_v32 = vld [vmem:[#allocation88_spill] sm:$0xff] }
 0x79e   :  { %v7233_v5 = vpop.f32.mrb[66].mxu1  ;;  %v5016_v39 = vpop.f32.mrb[39].mxu0 }
 0x79f   :  { %v7235_v53 = vpop.f32.mrb[67].mxu1 }
 0x7a1   :  { %7498 = vmatmul.mubr.bf16.gmra.mrb[172].mxu1 %v15860_v11 }
 0x7a2   :  { %7507 = vmatprep.mubr.bf16.mxu1 %v15862_v23 }
 0x7a3   :  { %v5020_v9 = vpop.f32.mrb[40].mxu0 }
 0x7a4   :  { %v7239_v47 = vpop.f32.mrb[68].mxu1  ;;  %10542 = vmatmul.mubr.bf16.gmra.mrb[88].mxu0 %v14114_v26  ;;  %v5022_v61 = vpop.f32.mrb[41].mxu0 }
 0x7a5   :  { %v7241_v58 = vpop.f32.mrb[69].mxu1  ;;  %10549 = vmatprep.mubr.bf16.mxu0 %v14114_v26  ;;  %v5024_v17 = vpop.f32.mrb[42].mxu0 }
 0x7a6   :  { %v7243_v51 = vpop.f32.mrb[70].mxu1  ;;  %v5026_v3 = vpop.f32.mrb[43].mxu0 }
 0x7a7   :  { %v7245_v20 = vpop.f32.mrb[71].mxu1 }
 0x7a9   :  { %7508 = vmatmul.mubr.bf16.gmra.mrb[176].mxu1 %v15868_v60 }
 0x7aa   :  { %7517 = vmatprep.mubr.bf16.mxu1 %v15870_v30 }
 0x7ab   :  { %v5030_v59 = vpop.f32.mrb[44].mxu0 }
 0x7ac   :  { %v7249_v11 = vpop.f32.mrb[72].mxu1  ;;  %10550 = vmatmul.mubr.bf16.gmra.mrb[92].mxu0 %v14114_v26  ;;  %v5032_v23 = vpop.f32.mrb[45].mxu0 }
 0x7ad   :  { %v7251_v28 = vpop.f32.mrb[73].mxu1  ;;  %10557 = vmatprep.mubr.bf16.mxu0 %v14114_v26  ;;  %v5034_v44 = vpop.f32.mrb[46].mxu0 }
 0x7ae   :  { %v7253_v25 = vpop.f32.mrb[74].mxu1  ;;  %v5036_v49 = vpop.f32.mrb[47].mxu0 }
 0x7af   :  { %v7255_v46 = vpop.f32.mrb[75].mxu1 }
 0x7b1   :  { %7518 = vmatmul.mubr.bf16.gmra.mrb[180].mxu1 %v15876_v54 }
 0x7b2   :  { %7527 = vmatprep.mubr.bf16.mxu1 %v15878_v36 }
 0x7b3   :  { %v5040_v48 = vpop.f32.mrb[48].mxu0 }
 0x7b4   :  { %v7259_v60 = vpop.f32.mrb[76].mxu1  ;;  %10558 = vmatmul.mubr.bf16.gmra.mrb[96].mxu0 %v14114_v26  ;;  %v5042_v30 = vpop.f32.mrb[49].mxu0 }
 0x7b5   :  { %v7261_v38 = vpop.f32.mrb[77].mxu1  ;;  %10565 = vmatprep.mubr.bf16.mxu0 %v14114_v26  ;;  %v5044_v4 = vpop.f32.mrb[50].mxu0 }
 0x7b6   :  { %v7263_v15 = vpop.f32.mrb[78].mxu1  ;;  %v5046_v50 = vpop.f32.mrb[51].mxu0 }
 0x7b7   :  { %v7265_v62 = vpop.f32.mrb[79].mxu1 }
 0x7b9   :  { %7528 = vmatmul.mubr.bf16.gmra.mrb[184].mxu1 %v15884_v43 }
 0x7ba   :  { %7537 = vmatprep.mubr.bf16.mxu1 %v15886_v63 }
 0x7bc   :  { %v7269_v21 = vpop.f32.mrb[80].mxu1  ;;  %10566 = vmatmul.mubr.bf16.gmra.mrb[100].mxu0 %v14114_v26 }
 0x7bd   :  { %v7271_v54 = vpop.f32.mrb[81].mxu1  ;;  %10573 = vmatprep.mubr.bf16.mxu0 %v14114_v26 }
 0x7be   :  { %v7273_v36 = vpop.f32.mrb[82].mxu1 }
 0x7bf   :  { %v7275_v18 = vpop.f32.mrb[83].mxu1 }
 0x7c0   :  { %v17772_v18 = vld [vmem:[#allocation90_spill] sm:$0xff] }
 0x7c1   :  { %7538 = vmatmul.mubr.bf16.gmra.mrb[188].mxu1 %v15892_v7 }
 0x7c2   :  { %7547 = vmatprep.mubr.bf16.mxu1 %v15894_v41 }
 0x7c4   :  { %v7279_v33 = vpop.f32.mrb[84].mxu1  ;;  %10574 = vmatmul.mubr.bf16.gmra.mrb[104].mxu0 %v14114_v26 }
 0x7c5   :  { %v7281_v19 = vpop.f32.mrb[85].mxu1  ;;  %10581 = vmatprep.mubr.bf16.mxu0 %v14114_v26 }
 0x7c6   :  { %v7283_v43 = vpop.f32.mrb[86].mxu1 }
 0x7c7   :  { %v7285_v63 = vpop.f32.mrb[87].mxu1 }
 0x7c8   :  { %v17773_v63 = vld [vmem:[#allocation91_spill] sm:$0xff] }
 0x7c9   :  { %7548 = vmatmul.mubr.bf16.gmra.mrb[192].mxu1 %v15900_v13 }
 0x7ca   :  { %7557 = vmatprep.mubr.bf16.mxu1 %v15902_v52 }
 0x7cc   :  { %v7289_v56 = vpop.f32.mrb[88].mxu1  ;;  %10582 = vmatmul.mubr.bf16.gmra.mrb[108].mxu0 %v14114_v26 }
 0x7cd   :  { %v7291_v37 = vpop.f32.mrb[89].mxu1  ;;  %10589 = vmatprep.mubr.bf16.mxu0 %v14114_v26 }
 0x7ce   :  { %v7293_v7 = vpop.f32.mrb[90].mxu1 }
 0x7cf   :  { %v7295_v41 = vpop.f32.mrb[91].mxu1 }
 0x7d1   :  { %7558 = vmatmul.mubr.bf16.gmra.mrb[196].mxu1 %v17770_v55  ;;  %v17774_v55 = vld [vmem:[#allocation94_spill] sm:$0xff] }
 0x7d2   :  { %7567 = vmatprep.mubr.bf16.mxu1 %v17771_v32 }
 0x7d4   :  { %v7299_v57 = vpop.f32.mrb[92].mxu1  ;;  %10590 = vmatmul.mubr.bf16.gmra.mrb[112].mxu0 %v14114_v26 }
 0x7d5   :  { %v7301_v40 = vpop.f32.mrb[93].mxu1  ;;  %10597 = vmatprep.mubr.bf16.mxu0 %v14114_v26 }
 0x7d6   :  { %v7303_v13 = vpop.f32.mrb[94].mxu1 }
 0x7d7   :  { %v7305_v52 = vpop.f32.mrb[95].mxu1 }
 0x7d8   :  { %v17775_v52 = vld [vmem:[#allocation96_spill] sm:$0xff] }
 0x7d9   :  { %7568 = vmatmul.mubr.bf16.gmra.mrb[200].mxu1 %v15916_v2 }
 0x7da   :  { %7610 = vmatprep.mubr.bf16.mxu1 %v17723_v12 }
 0x7dc   :  { %v7309_v24 = vpop.f32.mrb[96].mxu1  ;;  %10598 = vmatmul.mubr.bf16.gmra.mrb[116].mxu0 %v14114_v26 }
 0x7dd   :  { %v7311_v5 = vpop.f32.mrb[97].mxu1  ;;  %10605 = vmatprep.mubr.bf16.mxu0 %v14114_v26 }
 0x7de   :  { %v7313_v39 = vpop.f32.mrb[98].mxu1 }
 0x7df   :  { %v7315_v53 = vpop.f32.mrb[99].mxu1 }
 0x7e1   :  { %12756 = vmatmul.mubr.msk.bf16.vlgmr.msra.gmra.mrb[204].mxu1 %vm2674_vm0, %v15922_v31 }
 0x7e2   :  { %7620 = vmatprep.mubr.bf16.mxu1 %v17723_v12 }
 0x7e4   :  { %v7319_v9 = vpop.f32.mrb[100].mxu1  ;;  %10606 = vmatmul.mubr.bf16.gmra.mrb[120].mxu0 %v14114_v26 }
 0x7e5   :  { %v7321_v47 = vpop.f32.mrb[101].mxu1  ;;  %10613 = vmatprep.mubr.bf16.mxu0 %v14114_v26  ;;  %v17776_v9 = vld [vmem:[#allocation16_spill] sm:$0xff] }
 0x7e6   :  { %v7323_v2 = vpop.f32.mrb[102].mxu1 }
 0x7e7   :  { %v7325_v61 = vpop.f32.mrb[103].mxu1 }
 0x7e9   :  { %12757 = vmatmul.mubr.msk.bf16.gmra.mrb[208].mxu1 %vm2674_vm0, %v15929_v29 }
 0x7ea   :  { %7630 = vmatprep.mubr.bf16.mxu1 %v17723_v12 }
 0x7ec   :  { %v7329_v58 = vpop.f32.mrb[104].mxu1  ;;  %10614 = vmatmul.mubr.bf16.gmra.mrb[124].mxu0 %v14114_v26 }
 0x7ed   :  { %v7331_v17 = vpop.f32.mrb[105].mxu1  ;;  %10621 = vmatprep.mubr.bf16.mxu0 %v14114_v26 }
 0x7ee   :  { %v7333_v31 = vpop.f32.mrb[106].mxu1  ;;  %v17777_v17 = vld [vmem:[#allocation17_spill] sm:$0xff] }
 0x7ef   :  { %v7335_v51 = vpop.f32.mrb[107].mxu1 }
 0x7f1   :  { %12758 = vmatmul.mubr.msk.bf16.gmra.mrb[212].mxu1 %vm2674_vm0, %v15936_v14 }
 0x7f2   :  { %7640 = vmatprep.mubr.bf16.mxu1 %v17723_v12 }
 0x7f4   :  { %v7339_v3 = vpop.f32.mrb[108].mxu1  ;;  %10622 = vmatmul.mubr.bf16.gmra.mrb[128].mxu0 %v14114_v26 }
 0x7f5   :  { %v7341_v20 = vpop.f32.mrb[109].mxu1  ;;  %10629 = vmatprep.mubr.bf16.mxu0 %v14114_v26 }
 0x7f6   :  { %v7343_v29 = vpop.f32.mrb[110].mxu1 }
 0x7f7   :  { %v7345_v59 = vpop.f32.mrb[111].mxu1  ;;  %v17778_v29 = vld [vmem:[#allocation18_spill] sm:$0xff] }
 0x7f9   :  { %12759 = vmatmul.mubr.msk.bf16.gmra.mrb[216].mxu1 %vm2674_vm0, %v15943_v16 }
 0x7fa   :  { %7650 = vmatprep.mubr.bf16.mxu1 %v17723_v12 }
 0x7fc   :  { %v7349_v11 = vpop.f32.mrb[112].mxu1  ;;  %10630 = vmatmul.mubr.bf16.gmra.mrb[132].mxu0 %v14114_v26 }
 0x7fd   :  { %v7351_v23 = vpop.f32.mrb[113].mxu1  ;;  %10637 = vmatprep.mubr.bf16.mxu0 %v14114_v26 }
 0x7fe   :  { %v7353_v14 = vpop.f32.mrb[114].mxu1 }
 0x7ff   :  { %v7355_v28 = vpop.f32.mrb[115].mxu1 }
 0x800   :  { %v17779_v28 = vld [vmem:[#allocation19_spill] sm:$0xff] }
 0x801   :  { %12760 = vmatmul.mubr.msk.bf16.gmra.mrb[220].mxu1 %vm2674_vm0, %v15950_v22 }
 0x802   :  { %7660 = vmatprep.mubr.bf16.mxu1 %v17723_v12 }
 0x804   :  { %v7359_v44 = vpop.f32.mrb[116].mxu1  ;;  %10638 = vmatmul.mubr.bf16.gmra.mrb[136].mxu0 %v14114_v26 }
 0x805   :  { %v7361_v25 = vpop.f32.mrb[117].mxu1  ;;  %10645 = vmatprep.mubr.bf16.mxu0 %v14114_v26 }
 0x806   :  { %v7363_v16 = vpop.f32.mrb[118].mxu1 }
 0x807   :  { %v7365_v49 = vpop.f32.mrb[119].mxu1 }
 0x809   :  { %12761 = vmatmul.mubr.msk.bf16.gmra.mrb[224].mxu1 %vm2674_vm0, %v15959_v45 }
 0x80a   :  { %7670 = vmatprep.mubr.bf16.mxu1 %v17723_v12 }
 0x80c   :  { %v7369_v46 = vpop.f32.mrb[120].mxu1  ;;  %10646 = vmatmul.mubr.bf16.gmra.mrb[140].mxu0 %v14114_v26 }
 0x80d   :  { %v7371_v48 = vpop.f32.mrb[121].mxu1  ;;  %10653 = vmatprep.mubr.bf16.mxu0 %v14114_v26  ;;  %v17780_v46 = vld [vmem:[#allocation20_spill] sm:$0xff] }
 0x80e   :  { %v7373_v22 = vpop.f32.mrb[122].mxu1 }
 0x80f   :  { %v7375_v60 = vpop.f32.mrb[123].mxu1 }
 0x811   :  { %12762 = vmatmul.mubr.msk.bf16.gmra.mrb[228].mxu1 %vm2674_vm0, %v15968_v10 }
 0x812   :  { %7680 = vmatprep.mubr.bf16.mxu1 %v17723_v12 }
 0x814   :  { %v7379_v30 = vpop.f32.mrb[124].mxu1  ;;  %10654 = vmatmul.mubr.bf16.gmra.mrb[144].mxu0 %v14114_v26 }
 0x815   :  { %v7381_v38 = vpop.f32.mrb[125].mxu1  ;;  %10661 = vmatprep.mubr.bf16.mxu0 %v14114_v26 }
 0x816   :  { %v7383_v45 = vpop.f32.mrb[126].mxu1  ;;  %v17781_v38 = vld [vmem:[#allocation21_spill] sm:$0xff] }
 0x817   :  { %v7385_v4 = vpop.f32.mrb[127].mxu1 }
 0x819   :  { %12763 = vmatmul.mubr.msk.bf16.gmra.mrb[232].mxu1 %vm2674_vm0, %v15977_v27 }
 0x81a   :  { %7690 = vmatprep.mubr.bf16.mxu1 %v17723_v12 }
 0x81c   :  { %v7389_v15 = vpop.f32.mrb[128].mxu1  ;;  %10662 = vmatmul.mubr.bf16.gmra.mrb[148].mxu0 %v14114_v26 }
 0x81d   :  { %v7391_v50 = vpop.f32.mrb[129].mxu1  ;;  %10669 = vmatprep.mubr.bf16.mxu0 %v14114_v26 }
 0x81e   :  { %v7393_v10 = vpop.f32.mrb[130].mxu1 }
 0x81f   :  { %v7395_v62 = vpop.f32.mrb[131].mxu1  ;;  %v17782_v10 = vld [vmem:[#allocation22_spill] sm:$0xff] }
 0x821   :  { %12764 = vmatmul.mubr.msk.bf16.gmra.mrb[236].mxu1 %vm2674_vm0, %v15986_v0 }
 0x822   :  { %7700 = vmatprep.mubr.bf16.mxu1 %v17723_v12 }
 0x824   :  { %v7399_v21 = vpop.f32.mrb[132].mxu1  ;;  %10670 = vmatmul.mubr.bf16.gmra.mrb[152].mxu0 %v14114_v26 }
 0x825   :  { %v7401_v54 = vpop.f32.mrb[133].mxu1  ;;  %10677 = vmatprep.mubr.bf16.mxu0 %v14114_v26 }
 0x826   :  { %v7403_v27 = vpop.f32.mrb[134].mxu1 }
 0x827   :  { %v7405_v36 = vpop.f32.mrb[135].mxu1 }
 0x828   :  { %v17783_v36 = vld [vmem:[#allocation23_spill] sm:$0xff] }
 0x829   :  { %12765 = vmatmul.mubr.msk.bf16.gmra.mrb[240].mxu1 %vm2674_vm0, %v17772_v18 }
 0x82a   :  { %7710 = vmatprep.mubr.bf16.mxu1 %v17723_v12 }
 0x82c   :  { %v7409_v33 = vpop.f32.mrb[136].mxu1  ;;  %10678 = vmatmul.mubr.bf16.gmra.mrb[156].mxu0 %v14114_v26 }
 0x82d   :  { %v7411_v19 = vpop.f32.mrb[137].mxu1  ;;  %10685 = vmatprep.mubr.bf16.mxu0 %v14114_v26 }
 0x82e   :  { %v7413_v0 = vpop.f32.mrb[138].mxu1 }
 0x82f   :  { %v7415_v43 = vpop.f32.mrb[139].mxu1 }
 0x830   :  { %v17784_v43 = vld [vmem:[#allocation24_spill] sm:$0xff] }
 0x831   :  { %12766 = vmatmul.mubr.msk.bf16.gmra.mrb[244].mxu1 %vm2674_vm0, %v17773_v63 }
 0x832   :  { %7720 = vmatprep.mubr.bf16.mxu1 %v17723_v12 }
 0x834   :  { %v7419_v56 = vpop.f32.mrb[140].mxu1  ;;  %10686 = vmatmul.mubr.bf16.gmra.mrb[160].mxu0 %v14114_v26 }
 0x835   :  { %v7421_v37 = vpop.f32.mrb[141].mxu1  ;;  %10693 = vmatprep.mubr.bf16.mxu0 %v14114_v26 }
 0x836   :  { %v7423_v7 = vpop.f32.mrb[142].mxu1 }
 0x837   :  { %v7425_v41 = vpop.f32.mrb[143].mxu1 }
 0x838   :  { %v17785_v41 = vld [vmem:[#allocation25_spill] sm:$0xff] }
 0x839   :  { %12767 = vmatmul.mubr.msk.bf16.gmra.mrb[248].mxu1 %vm2674_vm0, %v17774_v55 }
 0x83a   :  { %7730 = vmatprep.mubr.bf16.mxu1 %v17723_v12 }
 0x83c   :  { %v7429_v32 = vpop.f32.mrb[144].mxu1  ;;  %10694 = vmatmul.mubr.bf16.gmra.mrb[164].mxu0 %v14114_v26 }
 0x83d   :  { %v7431_v57 = vpop.f32.mrb[145].mxu1  ;;  %10701 = vmatprep.mubr.bf16.mxu0 %v14114_v26 }
 0x83e   :  { %v7433_v40 = vpop.f32.mrb[146].mxu1 }
 0x83f   :  { %v7435_v13 = vpop.f32.mrb[147].mxu1 }
 0x840   :  { %v17786_v13 = vld [vmem:[#allocation26_spill] sm:$0xff] }
 0x841   :  { %12768 = vmatmul.mubr.msk.bf16.gmra.mrb[252].mxu1 %vm2674_vm0, %v17775_v52 }
 0x842   :  { %7740 = vmatprep.mubr.bf16.mxu1 %v17723_v12 }
 0x844   :  { %v7439_v24 = vpop.f32.mrb[148].mxu1  ;;  %10702 = vmatmul.mubr.bf16.gmra.mrb[168].mxu0 %v14114_v26 }
 0x845   :  { %v7441_v5 = vpop.f32.mrb[149].mxu1  ;;  %10709 = vmatprep.mubr.bf16.mxu0 %v14114_v26  ;;  %v13700_v24 = vld [vmem:[#allocation8 + $0x80] sm:$0xff]  }
 0x846   :  { %v7443_v39 = vpop.f32.mrb[150].mxu1  ;;  %10983 = vmatpush1.bf16.msra.mxu0 %v13700_v24 }
 0x847   :  { %v7445_v53 = vpop.f32.mrb[151].mxu1  ;;  %10984 = vmatprep.subr.bf16.mxu0 %v17723_v12 }
 0x848   :  { %v13701_v53 = vld [vmem:[#allocation8 + $0x88] sm:$0xff]  }
 0x849   :  { %12769 = vmatmul.mubr.msk.bf16.gmra.mrb[0].mxu1 %vm2674_vm0, %v17776_v9 }
 0x84a   :  { %7750 = vmatprep.mubr.bf16.mxu1 %v17723_v12  ;;  %10985 = vmatpush1.bf16.msra.mxu0 %v13701_v53  ;;  %v17795_v53 = vld [vmem:[#allocation35_spill] sm:$0xff] }
 0x84b   :  { %10986 = vmatprep.subr.bf16.mxu0 %v17723_v12 }
 0x84c   :  { %v7449_v47 = vpop.f32.mrb[152].mxu1  ;;  %10710 = vmatmul.mubr.bf16.gmra.mrb[172].mxu0 %v14114_v26 }
 0x84d   :  { %v7451_v2 = vpop.f32.mrb[153].mxu1  ;;  %10717 = vmatprep.mubr.bf16.mxu0 %v14114_v26  ;;  %v17787_v47 = vld [vmem:[#allocation27_spill] sm:$0xff] }
 0x84e   :  { %v7453_v61 = vpop.f32.mrb[154].mxu1 }
 0x84f   :  { %v7455_v58 = vpop.f32.mrb[155].mxu1  ;;  %v13702_v61 = vld [vmem:[#allocation8 + $0x90] sm:$0xff]  }
 0x850   :  { %10987 = vmatpush1.bf16.msra.mxu0 %v13702_v61 }
 0x851   :  { %12770 = vmatmul.mubr.msk.bf16.gmra.mrb[4].mxu1 %vm2674_vm0, %v17777_v17  ;;  %10988 = vmatprep.subr.bf16.mxu0 %v17723_v12 }
 0x852   :  { %7760 = vmatprep.mubr.bf16.mxu1 %v17723_v12 }
 0x854   :  { %v7459_v31 = vpop.f32.mrb[156].mxu1  ;;  %10718 = vmatmul.mubr.bf16.gmra.mrb[176].mxu0 %v14114_v26 }
 0x855   :  { %v7461_v51 = vpop.f32.mrb[157].mxu1  ;;  %10725 = vmatprep.mubr.bf16.mxu0 %v14114_v26  ;;  %v13703_v31 = vld [vmem:[#allocation8 + $0x98] sm:$0xff]  }
 0x856   :  { %v7463_v3 = vpop.f32.mrb[158].mxu1  ;;  %10989 = vmatpush1.bf16.msra.mxu0 %v13703_v31 }
 0x857   :  { %v7465_v20 = vpop.f32.mrb[159].mxu1  ;;  %v17788_v3 = vld [vmem:[#allocation28_spill] sm:$0xff]  ;;  %10990 = vmatprep.subr.bf16.mxu0 %v17723_v12 }
 0x859   :  { %12771 = vmatmul.mubr.msk.bf16.gmra.mrb[8].mxu1 %vm2674_vm0, %v17778_v29  ;;  %v13704_v29 = vld [vmem:[#allocation8 + $0xa0] sm:$0xff]  }
 0x85a   :  { %7770 = vmatprep.mubr.bf16.mxu1 %v17723_v12  ;;  %10991 = vmatpush1.bf16.msra.mxu0 %v13704_v29 }
 0x85b   :  { %10992 = vmatprep.subr.bf16.mxu0 %v17723_v12 }
 0x85c   :  { %v7469_v59 = vpop.f32.mrb[160].mxu1  ;;  %10726 = vmatmul.mubr.bf16.gmra.mrb[180].mxu0 %v14114_v26 }
 0x85d   :  { %v7471_v11 = vpop.f32.mrb[161].mxu1  ;;  %10733 = vmatprep.mubr.bf16.mxu0 %v14114_v26 }
 0x85e   :  { %v7473_v23 = vpop.f32.mrb[162].mxu1 }
 0x85f   :  { %v7475_v14 = vpop.f32.mrb[163].mxu1  ;;  %v13705_v23 = vld [vmem:[#allocation8 + $0xa8] sm:$0xff]  }
 0x860   :  { %10993 = vmatpush1.bf16.msra.mxu0 %v13705_v23 }
 0x861   :  { %12772 = vmatmul.mubr.msk.bf16.gmra.mrb[12].mxu1 %vm2674_vm0, %v17779_v28  ;;  %v17789_v28 = vld [vmem:[#allocation29_spill] sm:$0xff]  ;;  %10994 = vmatprep.subr.bf16.mxu0 %v17723_v12 }
 0x862   :  { %7780 = vmatprep.mubr.bf16.mxu1 %v17723_v12 }
 0x864   :  { %v7479_v44 = vpop.f32.mrb[164].mxu1  ;;  %10734 = vmatmul.mubr.bf16.gmra.mrb[184].mxu0 %v14114_v26 }
 0x865   :  { %v7481_v25 = vpop.f32.mrb[165].mxu1  ;;  %10741 = vmatprep.mubr.bf16.mxu0 %v14114_v26 }
 0x866   :  { %v7483_v16 = vpop.f32.mrb[166].mxu1  ;;  %v13706_v25 = vld [vmem:[#allocation8 + $0xb0] sm:$0xff]  }
 0x867   :  { %v7485_v49 = vpop.f32.mrb[167].mxu1  ;;  %10995 = vmatpush1.bf16.msra.mxu0 %v13706_v25 }
 0x868   :  { %10996 = vmatprep.subr.bf16.mxu0 %v17723_v12 }
 0x869   :  { %12773 = vmatmul.mubr.msk.bf16.gmra.mrb[16].mxu1 %vm2674_vm0, %v17780_v46  ;;  %v13707_v46 = vld [vmem:[#allocation8 + $0xb8] sm:$0xff]  }
 0x86a   :  { %7790 = vmatprep.mubr.bf16.mxu1 %v17723_v12 }
 0x86b   :  { %10997 = vmatpush1.bf16.msra.mxu0 %v13707_v46 }
 0x86c   :  { %v7489_v48 = vpop.f32.mrb[168].mxu1  ;;  %10742 = vmatmul.mubr.bf16.gmra.mrb[188].mxu0 %v14114_v26  ;;  %10998 = vmatprep.subr.bf16.mxu0 %v17723_v12 }
 0x86d   :  { %v7491_v22 = vpop.f32.mrb[169].mxu1  ;;  %10749 = vmatprep.mubr.bf16.mxu0 %v14114_v26 }
 0x86e   :  { %v7493_v60 = vpop.f32.mrb[170].mxu1  ;;  %v17790_v22 = vld [vmem:[#allocation30_spill] sm:$0xff] }
 0x86f   :  { %v7495_v30 = vpop.f32.mrb[171].mxu1  ;;  %v13708_v60 = vld [vmem:[#allocation8 + $0xc0] sm:$0xff]  }
 0x870   :  { %10999 = vmatpush1.bf16.msra.mxu0 %v13708_v60 }
 0x871   :  { %12774 = vmatmul.mubr.msk.bf16.gmra.mrb[20].mxu1 %vm2674_vm0, %v17781_v38  ;;  %11000 = vmatprep.subr.bf16.mxu0 %v17723_v12 }
 0x872   :  { %7800 = vmatprep.mubr.bf16.mxu1 %v17723_v12 }
 0x874   :  { %v7499_v45 = vpop.f32.mrb[172].mxu1  ;;  %10750 = vmatmul.mubr.bf16.gmra.mrb[192].mxu0 %v14114_v26 }
 0x875   :  { %v7501_v4 = vpop.f32.mrb[173].mxu1  ;;  %10757 = vmatprep.mubr.bf16.mxu0 %v14114_v26  ;;  %v13709_v45 = vld [vmem:[#allocation8 + $0xc8] sm:$0xff]  }
 0x876   :  { %v7503_v15 = vpop.f32.mrb[174].mxu1  ;;  %11001 = vmatpush1.bf16.msra.mxu0 %v13709_v45  ;;  %v17800_v45 = vld [vmem:[#allocation40_spill] sm:$0xff] }
 0x877   :  { %v7505_v50 = vpop.f32.mrb[175].mxu1  ;;  %11002 = vmatprep.subr.bf16.mxu0 %v17723_v12 }
 0x878   :  { %v17791_v50 = vld [vmem:[#allocation31_spill] sm:$0xff] }
 0x879   :  { %12775 = vmatmul.mubr.msk.bf16.gmra.mrb[24].mxu1 %vm2674_vm0, %v17782_v10  ;;  %v13710_v10 = vld [vmem:[#allocation8 + $0xd0] sm:$0xff]  }
 0x87a   :  { %7810 = vmatprep.mubr.bf16.mxu1 %v17723_v12  ;;  %11003 = vmatpush1.bf16.msra.mxu0 %v13710_v10 }
 0x87b   :  { %11004 = vmatprep.subr.bf16.mxu0 %v17723_v12 }
 0x87c   :  { %v7509_v62 = vpop.f32.mrb[176].mxu1  ;;  %10758 = vmatmul.mubr.bf16.gmra.mrb[196].mxu0 %v14114_v26 }
 0x87d   :  { %v7511_v21 = vpop.f32.mrb[177].mxu1  ;;  %10765 = vmatprep.mubr.bf16.mxu0 %v14114_v26 }
 0x87e   :  { %v7513_v54 = vpop.f32.mrb[178].mxu1 }
 0x87f   :  { %v7515_v27 = vpop.f32.mrb[179].mxu1  ;;  %v13711_v54 = vld [vmem:[#allocation8 + $0xd8] sm:$0xff]  }
 0x880   :  { %11005 = vmatpush1.bf16.msra.mxu0 %v13711_v54 }
 0x881   :  { %12776 = vmatmul.mubr.msk.bf16.gmra.mrb[28].mxu1 %vm2674_vm0, %v17783_v36  ;;  %11006 = vmatprep.subr.bf16.mxu0 %v17723_v12 }
 0x882   :  { %7820 = vmatprep.mubr.bf16.mxu1 %v17723_v12 }
 0x884   :  { %v7519_v18 = vpop.f32.mrb[180].mxu1  ;;  %10766 = vmatmul.mubr.bf16.gmra.mrb[200].mxu0 %v14114_v26 }
 0x885   :  { %v7521_v33 = vpop.f32.mrb[181].mxu1  ;;  %10773 = vmatprep.mubr.bf16.mxu0 %v14114_v26  ;;  %v17792_v18 = vld [vmem:[#allocation32_spill] sm:$0xff] }
 0x886   :  { %v7523_v19 = vpop.f32.mrb[182].mxu1  ;;  %v13712_v33 = vld [vmem:[#allocation8 + $0xe0] sm:$0xff]  }
 0x887   :  { %v7525_v0 = vpop.f32.mrb[183].mxu1  ;;  %11007 = vmatpush1.bf16.msra.mxu0 %v13712_v33 }
 0x888   :  { %11008 = vmatprep.subr.bf16.mxu0 %v17723_v12 }
 0x889   :  { %12777 = vmatmul.mubr.msk.bf16.gmra.mrb[32].mxu1 %vm2674_vm0, %v17784_v43  ;;  %v13713_v43 = vld [vmem:[#allocation8 + $0xe8] sm:$0xff]  }
 0x88a   :  { %7830 = vmatprep.mubr.bf16.mxu1 %v17723_v12 }
 0x88b   :  { %11009 = vmatpush1.bf16.msra.mxu0 %v13713_v43 }
 0x88c   :  { %v7529_v63 = vpop.f32.mrb[184].mxu1  ;;  %10774 = vmatmul.mubr.bf16.gmra.mrb[204].mxu0 %v14114_v26  ;;  %11010 = vmatprep.subr.bf16.mxu0 %v17723_v12 }
 0x88d   :  { %v7531_v56 = vpop.f32.mrb[185].mxu1  ;;  %10781 = vmatprep.mubr.bf16.mxu0 %v14114_v26 }
 0x88e   :  { %v7533_v37 = vpop.f32.mrb[186].mxu1 }
 0x88f   :  { %v7535_v7 = vpop.f32.mrb[187].mxu1  ;;  %v17793_v37 = vld [vmem:[#allocation33_spill] sm:$0xff] }
 0x890   :  { %v13714_v7 = vld [vmem:[#allocation8 + $0xf0] sm:$0xff]  }
 0x891   :  { %12778 = vmatmul.mubr.msk.bf16.gmra.mrb[36].mxu1 %vm2674_vm0, %v17785_v41  ;;  %11011 = vmatpush1.bf16.msra.mxu0 %v13714_v7 }
 0x892   :  { %7840 = vmatprep.mubr.bf16.mxu1 %v17723_v12  ;;  %11012 = vmatprep.subr.bf16.mxu0 %v17723_v12 }
 0x894   :  { %v7539_v55 = vpop.f32.mrb[188].mxu1  ;;  %10782 = vmatmul.mubr.bf16.gmra.mrb[208].mxu0 %v14114_v26 }
 0x895   :  { %v7541_v32 = vpop.f32.mrb[189].mxu1  ;;  %10789 = vmatprep.mubr.bf16.mxu0 %v14114_v26 }
 0x896   :  { %v7543_v57 = vpop.f32.mrb[190].mxu1  ;;  %v13715_v32 = vld [vmem:[#allocation8 + $0xf8] sm:$0xff]  }
 0x897   :  { %v7545_v40 = vpop.f32.mrb[191].mxu1  ;;  %11013 = vmatpush1.bf16.msra.mxu0 %v13715_v32 }
 0x899   :  { %12779 = vmatmul.mubr.msk.bf16.gmra.mrb[40].mxu1 %vm2674_vm0, %v17786_v13  ;;  %v17794_v13 = vld [vmem:[#allocation34_spill] sm:$0xff] }
 0x89a   :  { %7850 = vmatprep.mubr.bf16.mxu1 %v17723_v12 }
 0x89c   :  { %v7549_v52 = vpop.f32.mrb[192].mxu1  ;;  %10790 = vmatmul.mubr.bf16.gmra.mrb[212].mxu0 %v14114_v26 }
 0x89d   :  { %v7551_v5 = vpop.f32.mrb[193].mxu1  ;;  %10797 = vmatprep.mubr.bf16.mxu0 %v14114_v26 }
 0x89e   :  { %v7553_v39 = vpop.f32.mrb[194].mxu1 }
 0x89f   :  { %v7555_v9 = vpop.f32.mrb[195].mxu1 }
 0x8a1   :  { %12780 = vmatmul.mubr.msk.bf16.gmra.mrb[44].mxu1 %vm2674_vm0, %v17787_v47 }
 0x8a2   :  { %7860 = vmatprep.mubr.bf16.mxu1 %v17723_v12 }
 0x8a4   :  { %v7559_v2 = vpop.f32.mrb[196].mxu1  ;;  %10798 = vmatmul.mubr.bf16.gmra.mrb[216].mxu0 %v14114_v26 }
 0x8a5   :  { %v7561_v58 = vpop.f32.mrb[197].mxu1  ;;  %10805 = vmatprep.mubr.bf16.mxu0 %v14114_v26 }
 0x8a6   :  { %v7563_v17 = vpop.f32.mrb[198].mxu1  ;;  %v17796_v58 = vld [vmem:[#allocation36_spill] sm:$0xff] }
 0x8a7   :  { %v7565_v51 = vpop.f32.mrb[199].mxu1 }
 0x8a9   :  { %12781 = vmatmul.mubr.msk.bf16.gmra.mrb[48].mxu1 %vm2674_vm0, %v17788_v3 }
 0x8aa   :  { %7870 = vmatprep.mubr.bf16.mxu1 %v17723_v12 }
 0x8ac   :  { %v7569_v20 = vpop.f32.mrb[200].mxu1  ;;  %10806 = vmatmul.mubr.bf16.gmra.mrb[220].mxu0 %v14114_v26 }
 0x8ad   :  { %v7571_v59 = vpop.f32.mrb[201].mxu1  ;;  %10813 = vmatprep.mubr.bf16.mxu0 %v14114_v26  ;;  %v17797_v20 = vld [vmem:[#allocation37_spill] sm:$0xff] }
 0x8ae   :  { %v7573_v11 = vpop.f32.mrb[202].mxu1 }
 0x8af   :  { %v7575_v14 = vpop.f32.mrb[203].mxu1 }
 0x8b0   :  { %v17798_v14 = vld [vmem:[#allocation38_spill] sm:$0xff] }
 0x8b1   :  { %12782 = vmatmul.mubr.msk.bf16.gmra.mrb[52].mxu1 %vm2674_vm0, %v17789_v28 }
 0x8b2   :  { %7880 = vmatprep.mubr.bf16.mxu1 %v17723_v12 }
 0x8b4   :  { %v16292_v44 = vpop.f32.mrb[204].mxu1  ;;  %10814 = vmatmul.mubr.bf16.gmra.mrb[224].mxu0 %v14114_v26 }
 0x8b5   :  { %v16294_v16 = vpop.f32.mrb[205].mxu1  ;;  %10821 = vmatprep.mubr.bf16.mxu0 %v14114_v26 }
 0x8b6   :  { %v7616_v49 = vpop.f32.mrb[206].mxu1 }
 0x8b7   :  { %v7618_v48 = vpop.f32.mrb[207].mxu1 }
 0x8b8   :  { %v17799_v48 = vld [vmem:[#allocation39_spill] sm:$0xff] }
 0x8b9   :  { %12783 = vmatmul.mubr.msk.bf16.gmra.mrb[56].mxu1 %vm2674_vm0, %v17790_v22 }
 0x8ba   :  { %7890 = vmatprep.mubr.bf16.mxu1 %v17723_v12 }
 0x8bc   :  { %v7622_v30 = vpop.f32.mrb[208].mxu1  ;;  %10822 = vmatmul.mubr.bf16.gmra.mrb[228].mxu0 %v14114_v26 }
 0x8bd   :  { %v7624_v38 = vpop.f32.mrb[209].mxu1  ;;  %10829 = vmatprep.mubr.bf16.mxu0 %v14114_v26 }
 0x8be   :  { %v7626_v4 = vpop.f32.mrb[210].mxu1 }
 0x8bf   :  { %v7628_v15 = vpop.f32.mrb[211].mxu1 }
 0x8c1   :  { %12784 = vmatmul.mubr.msk.bf16.gmra.mrb[60].mxu1 %vm2674_vm0, %v17791_v50 }
 0x8c2   :  { %7900 = vmatprep.mubr.bf16.mxu1 %v17723_v12 }
 0x8c4   :  { %v7632_v62 = vpop.f32.mrb[212].mxu1  ;;  %10830 = vmatmul.mubr.bf16.gmra.mrb[232].mxu0 %v14114_v26 }
 0x8c5   :  { %v7634_v21 = vpop.f32.mrb[213].mxu1  ;;  %10837 = vmatprep.mubr.bf16.mxu0 %v14114_v26  ;;  %v17801_v62 = vld [vmem:[#allocation41_spill] sm:$0xff] }
 0x8c6   :  { %v7636_v27 = vpop.f32.mrb[214].mxu1 }
 0x8c7   :  { %v7638_v36 = vpop.f32.mrb[215].mxu1 }
 0x8c9   :  { %12785 = vmatmul.mubr.msk.bf16.gmra.mrb[64].mxu1 %vm2674_vm0, %v17792_v18  ;;  %v17802_v18 = vld [vmem:[#allocation42_spill] sm:$0xff] }
 0x8ca   :  { %7910 = vmatprep.mubr.bf16.mxu1 %v17723_v12 }
 0x8cc   :  { %v7642_v19 = vpop.f32.mrb[216].mxu1  ;;  %10838 = vmatmul.mubr.bf16.gmra.mrb[236].mxu0 %v14114_v26 }
 0x8cd   :  { %v7644_v0 = vpop.f32.mrb[217].mxu1  ;;  %10845 = vmatprep.mubr.bf16.mxu0 %v14114_v26 }
 0x8ce   :  { %v7646_v63 = vpop.f32.mrb[218].mxu1 }
 0x8cf   :  { %v7648_v56 = vpop.f32.mrb[219].mxu1  ;;  %v17803_v63 = vld [vmem:[#allocation44_spill] sm:$0xff] }
 0x8d1   :  { %12786 = vmatmul.mubr.msk.bf16.gmra.mrb[68].mxu1 %vm2674_vm0, %v17793_v37 }
 0x8d2   :  { %7920 = vmatprep.mubr.bf16.mxu1 %v17723_v12 }
 0x8d4   :  { %v7652_v41 = vpop.f32.mrb[220].mxu1  ;;  %10846 = vmatmul.mubr.bf16.gmra.mrb[240].mxu0 %v14114_v26 }
 0x8d5   :  { %v7654_v55 = vpop.f32.mrb[221].mxu1  ;;  %10853 = vmatprep.mubr.bf16.mxu0 %v14114_v26 }
 0x8d6   :  { %v7656_v57 = vpop.f32.mrb[222].mxu1  ;;  %v17804_v55 = vld [vmem:[#allocation47_spill] sm:$0xff] }
 0x8d7   :  { %v7658_v40 = vpop.f32.mrb[223].mxu1 }
 0x8d9   :  { %12787 = vmatmul.mubr.msk.bf16.gmra.mrb[72].mxu1 %vm2674_vm0, %v17794_v13 }
 0x8da   :  { %7930 = vmatprep.mubr.bf16.mxu1 %v17723_v12 }
 0x8dc   :  { %v7662_v52 = vpop.f32.mrb[224].mxu1  ;;  %10854 = vmatmul.mubr.bf16.gmra.mrb[244].mxu0 %v14114_v26 }
 0x8dd   :  { %v7664_v24 = vpop.f32.mrb[225].mxu1  ;;  %10861 = vmatprep.mubr.bf16.mxu0 %v14114_v26  ;;  %v17805_v52 = vld [vmem:[#allocation50_spill] sm:$0xff] }
 0x8de   :  { %v7666_v5 = vpop.f32.mrb[226].mxu1 }
 0x8df   :  { %v7668_v39 = vpop.f32.mrb[227].mxu1 }
 0x8e1   :  { %12788 = vmatmul.mubr.msk.bf16.gmra.mrb[76].mxu1 %vm2674_vm0, %v17795_v53 }
 0x8e2   :  { %7940 = vmatprep.mubr.bf16.mxu1 %v17723_v12 }
 0x8e4   :  { %v7672_v9 = vpop.f32.mrb[228].mxu1  ;;  %10862 = vmatmul.mubr.bf16.gmra.mrb[248].mxu0 %v14114_v26 }
 0x8e5   :  { %v7674_v47 = vpop.f32.mrb[229].mxu1  ;;  %10869 = vmatprep.mubr.bf16.mxu0 %v14114_v26  ;;  %v17806_v9 = vld [vmem:[#allocation53_spill] sm:$0xff] }
 0x8e6   :  { %v7676_v2 = vpop.f32.mrb[230].mxu1 }
 0x8e7   :  { %v7678_v61 = vpop.f32.mrb[231].mxu1 }
 0x8e9   :  { %12789 = vmatmul.mubr.msk.bf16.gmra.mrb[80].mxu1 %vm2674_vm0, %v17796_v58 }
 0x8ea   :  { %7950 = vmatprep.mubr.bf16.mxu1 %v17723_v12 }
 0x8ec   :  { %v7682_v17 = vpop.f32.mrb[232].mxu1  ;;  %10870 = vmatmul.mubr.bf16.gmra.mrb[252].mxu0 %v14114_v26 }
 0x8ed   :  { %v7684_v31 = vpop.f32.mrb[233].mxu1  ;;  %10877 = vmatprep.mubr.bf16.mxu0 %v14114_v26  ;;  %v17807_v17 = vld [vmem:[#allocation56_spill] sm:$0xff] }
 0x8ee   :  { %v7686_v51 = vpop.f32.mrb[234].mxu1  ;;  %v1668_v31 = vsub.s32 3, %v16065_v42 }
 0x8ef   :  { %v7688_v3 = vpop.f32.mrb[235].mxu1 }
 0x8f1   :  { %12790 = vmatmul.mubr.msk.bf16.gmra.mrb[84].mxu1 %vm2674_vm0, %v17797_v20 }
 0x8f2   :  { %7960 = vmatprep.mubr.bf16.mxu1 %v17723_v12 }
 0x8f4   :  { %v7692_v29 = vpop.f32.mrb[236].mxu1  ;;  %10878 = vmatmul.mubr.bf16.gmra.mrb[0].mxu0 %v14114_v26 }
 0x8f5   :  { %v7694_v59 = vpop.f32.mrb[237].mxu1  ;;  %10885 = vmatprep.mubr.bf16.mxu0 %v14114_v26 }
 0x8f6   :  { %v7696_v11 = vpop.f32.mrb[238].mxu1  ;;  %v13982_v59 = vld [vmem:[%s17130_s2] sm:$0xf] }
 0x8f7   :  { %v7698_v23 = vpop.f32.mrb[239].mxu1  ;;  %v1669_v11 = vrot.slane %v13982_v59, %v1668_v31 }
 0x8f8   :  { %v17808_v23 = vld [vmem:[#allocation59_spill] sm:$0xff] }
 0x8f9   :  { %12791 = vmatmul.mubr.msk.bf16.gmra.mrb[88].mxu1 %vm2674_vm0, %v17798_v14  ;;  %v1664_v14 = vsub.s32 2, %v16065_v42 }
 0x8fa   :  { %7970 = vmatprep.mubr.bf16.mxu1 %v17723_v12 }
 0x8fc   :  { %v7702_v28 = vpop.f32.mrb[240].mxu1  ;;  %10886 = vmatmul.mubr.bf16.gmra.mrb[4].mxu0 %v14114_v26 }
 0x8fd   :  { %v7704_v25 = vpop.f32.mrb[241].mxu1  ;;  %10893 = vmatprep.mubr.bf16.mxu0 %v14114_v26  ;;  %v12932_v28 = vadd.f32 %v16294_v16, %v1669_v11 }
 0x8fe   :  { %v7706_v49 = vpop.f32.mrb[242].mxu1 }
 0x8ff   :  { %v7708_v46 = vpop.f32.mrb[243].mxu1 }
 0x901   :  { %12792 = vmatmul.mubr.msk.bf16.gmra.mrb[92].mxu1 %vm2674_vm0, %v17799_v48  ;;  %v1665_v48 = vrot.slane %v13982_v59, %v1664_v14 }
 0x902   :  { %7980 = vmatprep.mubr.bf16.mxu1 %v17723_v12 }
 0x904   :  { %v7712_v22 = vpop.f32.mrb[244].mxu1  ;;  %10894 = vmatmul.mubr.bf16.gmra.mrb[8].mxu0 %v14114_v26 }
 0x905   :  { %v7714_v60 = vpop.f32.mrb[245].mxu1  ;;  %10901 = vmatprep.mubr.bf16.mxu0 %v14114_v26 }
 0x906   :  { %v7716_v30 = vpop.f32.mrb[246].mxu1  ;;  %v8254_v60 = vmax.f32 %v12932_v28, 0.0  ;;  %v17818_v28 = vld [vmem:[#allocation89_spill] sm:$0xff] }
 0x907   :  { %v7718_v38 = vpop.f32.mrb[247].mxu1  ;;  %v17809_v30 = vld [vmem:[#allocation62_spill] sm:$0xff] }
 0x908   :  { %v12931_v38 = vadd.f32 %v16292_v44, %v1665_v48 }
 0x909   :  { %12793 = vmatmul.mubr.msk.bf16.gmra.mrb[96].mxu1 %vm2674_vm0, %v17800_v45  ;;  %v16413_v45 = vpack.c.bf16 %v17769_v1, %v8254_v60 }
 0x90a   :  { %7990 = vmatprep.mubr.bf16.mxu1 %v17723_v12 }
 0x90c   :  { %v7722_v4 = vpop.f32.mrb[248].mxu1  ;;  %10902 = vmatmul.mubr.bf16.gmra.mrb[12].mxu0 %v14114_v26 }
 0x90d   :  { %v7724_v15 = vpop.f32.mrb[249].mxu1  ;;  %10909 = vmatprep.mubr.bf16.mxu0 %v14114_v26 }
 0x90e   :  { %v7726_v50 = vpop.f32.mrb[250].mxu1 }
 0x90f   :  { %v7728_v10 = vpop.f32.mrb[251].mxu1  ;;  %v8253_v50 = vmax.f32 %v12931_v38, 0.0 }
 0x911   :  { %12794 = vmatmul.mubr.msk.bf16.gmra.mrb[100].mxu1 %vm2674_vm0, %v17801_v62  ;;  %v17810_v62 = vld [vmem:[#allocation65_spill] sm:$0xff] }
 0x912   :  { %8000 = vmatprep.mubr.bf16.mxu1 %v17723_v12 }
 0x914   :  { %v7732_v21 = vpop.f32.mrb[252].mxu1  ;;  %10910 = vmatmul.mubr.bf16.gmra.mrb[16].mxu0 %v14114_v26 }
 0x915   :  { %v7734_v54 = vpop.f32.mrb[253].mxu1  ;;  %10917 = vmatprep.mubr.bf16.mxu0 %v14114_v26  ;;  %v16421_v21 = vpack.c.bf16 %v17769_v1, %v8253_v50 }
 0x916   :  { %v7736_v27 = vpop.f32.mrb[254].mxu1 }
 0x917   :  { %v7738_v36 = vpop.f32.mrb[255].mxu1 }
 0x919   :  { %12795 = vmatmul.mubr.msk.bf16.gmra.mrb[104].mxu1 %vm2674_vm0, %v17802_v18  ;;  %v17811_v18 = vld [vmem:[#allocation68_spill] sm:$0xff] }
 0x91a   :  { %8010 = vmatprep.mubr.bf16.mxu1 %v17723_v12 }
 0x91c   :  { %v7742_v33 = vpop.f32.mrb[0].mxu1  ;;  %10918 = vmatmul.mubr.bf16.gmra.mrb[20].mxu0 %v14114_v26 }
 0x91d   :  { %v7744_v19 = vpop.f32.mrb[1].mxu1  ;;  %10925 = vmatprep.mubr.bf16.mxu0 %v14114_v26 }
 0x91e   :  { %v7746_v0 = vpop.f32.mrb[2].mxu1 }
 0x91f   :  { %v7748_v43 = vpop.f32.mrb[3].mxu1 }
 0x921   :  { %12796 = vmatmul.mubr.msk.bf16.gmra.mrb[108].mxu1 %vm2674_vm0, %v17803_v63  ;;  %v17812_v63 = vld [vmem:[#allocation71_spill] sm:$0xff] }
 0x922   :  { %8020 = vmatprep.mubr.bf16.mxu1 %v17723_v12 }
 0x924   :  { %v7752_v56 = vpop.f32.mrb[4].mxu1  ;;  %10926 = vmatmul.mubr.bf16.gmra.mrb[24].mxu0 %v14114_v26 }
 0x925   :  { %v7754_v37 = vpop.f32.mrb[5].mxu1  ;;  %10933 = vmatprep.mubr.bf16.mxu0 %v14114_v26 }
 0x926   :  { %v7756_v7 = vpop.f32.mrb[6].mxu1 }
 0x927   :  { %v7758_v41 = vpop.f32.mrb[7].mxu1 }
 0x929   :  { %12797 = vmatmul.mubr.msk.bf16.gmra.mrb[112].mxu1 %vm2674_vm0, %v17804_v55  ;;  %v17813_v55 = vld [vmem:[#allocation74_spill] sm:$0xff] }
 0x92a   :  { %8030 = vmatprep.mubr.bf16.mxu1 %v17723_v12 }
 0x92c   :  { %v7762_v32 = vpop.f32.mrb[8].mxu1  ;;  %10934 = vmatmul.mubr.bf16.gmra.mrb[28].mxu0 %v14114_v26 }
 0x92d   :  { %v7764_v57 = vpop.f32.mrb[9].mxu1  ;;  %10941 = vmatprep.mubr.bf16.mxu0 %v14114_v26 }
 0x92e   :  { %v7766_v40 = vpop.f32.mrb[10].mxu1 }
 0x92f   :  { %v7768_v13 = vpop.f32.mrb[11].mxu1 }
 0x931   :  { %12798 = vmatmul.mubr.msk.bf16.gmra.mrb[116].mxu1 %vm2674_vm0, %v17805_v52  ;;  %v17814_v52 = vld [vmem:[#allocation77_spill] sm:$0xff] }
 0x932   :  { %8040 = vmatprep.mubr.bf16.mxu1 %v17723_v12 }
 0x934   :  { %v7772_v24 = vpop.f32.mrb[12].mxu1  ;;  %10942 = vmatmul.mubr.bf16.gmra.mrb[32].mxu0 %v14114_v26 }
 0x935   :  { %v7774_v5 = vpop.f32.mrb[13].mxu1  ;;  %10949 = vmatprep.mubr.bf16.mxu0 %v14114_v26 }
 0x936   :  { %v7776_v39 = vpop.f32.mrb[14].mxu1 }
 0x937   :  { %v7778_v53 = vpop.f32.mrb[15].mxu1 }
 0x939   :  { %12799 = vmatmul.mubr.msk.bf16.gmra.mrb[120].mxu1 %vm2674_vm0, %v17806_v9  ;;  %v17815_v9 = vld [vmem:[#allocation80_spill] sm:$0xff] }
 0x93a   :  { %8050 = vmatprep.mubr.bf16.mxu1 %v17723_v12 }
 0x93c   :  { %v7782_v47 = vpop.f32.mrb[16].mxu1  ;;  %10950 = vmatmul.mubr.bf16.gmra.mrb[36].mxu0 %v14114_v26 }
 0x93d   :  { %v7784_v2 = vpop.f32.mrb[17].mxu1  ;;  %10957 = vmatprep.mubr.bf16.mxu0 %v14114_v26 }
 0x93e   :  { %v7786_v61 = vpop.f32.mrb[18].mxu1 }
 0x93f   :  { %v7788_v58 = vpop.f32.mrb[19].mxu1 }
 0x941   :  { %12800 = vmatmul.mubr.msk.bf16.gmra.mrb[124].mxu1 %vm2674_vm0, %v17807_v17  ;;  %v17816_v17 = vld [vmem:[#allocation83_spill] sm:$0xff] }
 0x942   :  { %8060 = vmatprep.mubr.bf16.mxu1 %v17723_v12 }
 0x944   :  { %v7792_v51 = vpop.f32.mrb[20].mxu1  ;;  %10958 = vmatmul.mubr.bf16.gmra.mrb[40].mxu0 %v14114_v26 }
 0x945   :  { %v7794_v3 = vpop.f32.mrb[21].mxu1  ;;  %10965 = vmatprep.mubr.bf16.mxu0 %v14114_v26 }
 0x946   :  { %v7796_v20 = vpop.f32.mrb[22].mxu1 }
 0x947   :  { %v7798_v29 = vpop.f32.mrb[23].mxu1 }
 0x948   :  { %v17817_v29 = vld [vmem:[#allocation86_spill] sm:$0xff] }
 0x949   :  { %12801 = vmatmul.mubr.msk.bf16.gmra.mrb[128].mxu1 %vm2674_vm0, %v17808_v23 }
 0x94a   :  { %8070 = vmatprep.mubr.bf16.mxu1 %v17723_v12 }
 0x94c   :  { %v7802_v25 = vpop.f32.mrb[24].mxu1  ;;  %10966 = vmatmul.mubr.bf16.gmra.mrb[44].mxu0 %v14114_v26 }
 0x94d   :  { %v7804_v49 = vpop.f32.mrb[25].mxu1  ;;  %10973 = vmatprep.mubr.bf16.mxu0 %v14114_v26 }
 0x94e   :  { %v7806_v46 = vpop.f32.mrb[26].mxu1 }
 0x94f   :  { %v7808_v22 = vpop.f32.mrb[27].mxu1 }
 0x950   :  { %v17819_v22 = vld [vmem:[#allocation92_spill] sm:$0xff] }
 0x951   :  { %12802 = vmatmul.mubr.msk.bf16.gmra.mrb[132].mxu1 %vm2674_vm0, %v17809_v30 }
 0x952   :  { %8080 = vmatprep.mubr.bf16.mxu1 %v17723_v12 }
 0x954   :  { %v7812_v16 = vpop.f32.mrb[28].mxu1  ;;  %10974 = vmatmul.mubr.bf16.gmra.mrb[48].mxu0 %v14114_v26 }
 0x955   :  { %v7814_v4 = vpop.f32.mrb[29].mxu1  ;;  %11014 = vmatprep.mubr.bf16.mxu0 %v16413_v45 }
 0x956   :  { %v7816_v15 = vpop.f32.mrb[30].mxu1  ;;  %v17820_v4 = vld [vmem:[#allocation95_spill] sm:$0xff] }
 0x957   :  { %v7818_v10 = vpop.f32.mrb[31].mxu1 }
 0x959   :  { %12803 = vmatmul.mubr.msk.bf16.gmra.mrb[136].mxu1 %vm2674_vm0, %v17810_v62 }
 0x95a   :  { %8090 = vmatprep.mubr.bf16.mxu1 %v17723_v12 }
 0x95c   :  { %v7822_v44 = vpop.f32.mrb[32].mxu1  ;;  %11015 = vmatmul.mubr.bf16.vlgmr.msra.gmra.mrb[52].mxu0 %v16421_v21 }
 0x95d   :  { %v7824_v54 = vpop.f32.mrb[33].mxu1  ;;  %11022 = vmatprep.mubr.bf16.mxu0 %v14114_v26  ;;  %v17821_v44 = vld [vmem:[#allocation98_spill] sm:$0xff] }
 0x95e   :  { %v7826_v27 = vpop.f32.mrb[34].mxu1 }
 0x95f   :  { %v7828_v36 = vpop.f32.mrb[35].mxu1 }
 0x961   :  { %12804 = vmatmul.mubr.msk.bf16.gmra.mrb[140].mxu1 %vm2674_vm0, %v17811_v18 }
 0x962   :  { %8100 = vmatprep.mubr.bf16.mxu1 %v17723_v12 }
 0x964   :  { %v7832_v33 = vpop.f32.mrb[36].mxu1  ;;  %11023 = vmatmul.mubr.bf16.gmra.mrb[56].mxu0 %v14114_v26 }
 0x965   :  { %v7834_v19 = vpop.f32.mrb[37].mxu1  ;;  %11030 = vmatprep.mubr.bf16.mxu0 %v14114_v26  ;;  %v17822_v33 = vld [vmem:[#allocation101_spill] sm:$0xff] }
 0x966   :  { %v7836_v0 = vpop.f32.mrb[38].mxu1 }
 0x967   :  { %v7838_v43 = vpop.f32.mrb[39].mxu1 }
 0x969   :  { %12805 = vmatmul.mubr.msk.bf16.gmra.mrb[144].mxu1 %vm2674_vm0, %v17812_v63 }
 0x96a   :  { %8110 = vmatprep.mubr.bf16.mxu1 %v17723_v12 }
 0x96c   :  { %v7842_v56 = vpop.f32.mrb[40].mxu1  ;;  %11031 = vmatmul.mubr.bf16.gmra.mrb[60].mxu0 %v14114_v26 }
 0x96d   :  { %v7844_v37 = vpop.f32.mrb[41].mxu1  ;;  %11038 = vmatprep.mubr.bf16.mxu0 %v14114_v26  ;;  %v17823_v56 = vld [vmem:[#allocation104_spill] sm:$0xff] }
 0x96e   :  { %v7846_v7 = vpop.f32.mrb[42].mxu1 }
 0x96f   :  { %v7848_v41 = vpop.f32.mrb[43].mxu1 }
 0x971   :  { %12806 = vmatmul.mubr.msk.bf16.gmra.mrb[148].mxu1 %vm2674_vm0, %v17813_v55 }
 0x972   :  { %8120 = vmatprep.mubr.bf16.mxu1 %v17723_v12 }
 0x974   :  { %v7852_v32 = vpop.f32.mrb[44].mxu1  ;;  %11039 = vmatmul.mubr.bf16.gmra.mrb[64].mxu0 %v14114_v26 }
 0x975   :  { %v7854_v57 = vpop.f32.mrb[45].mxu1  ;;  %11046 = vmatprep.mubr.bf16.mxu0 %v14114_v26  ;;  %v17824_v32 = vld [vmem:[#allocation107_spill] sm:$0xff] }
 0x976   :  { %v7856_v40 = vpop.f32.mrb[46].mxu1 }
 0x977   :  { %v7858_v13 = vpop.f32.mrb[47].mxu1 }
 0x979   :  { %12807 = vmatmul.mubr.msk.bf16.gmra.mrb[152].mxu1 %vm2674_vm0, %v17814_v52 }
 0x97a   :  { %8130 = vmatprep.mubr.bf16.mxu1 %v17723_v12 }
 0x97c   :  { %v7862_v24 = vpop.f32.mrb[48].mxu1  ;;  %11047 = vmatmul.mubr.bf16.gmra.mrb[68].mxu0 %v14114_v26 }
 0x97d   :  { %v7864_v5 = vpop.f32.mrb[49].mxu1  ;;  %11054 = vmatprep.mubr.bf16.mxu0 %v14114_v26  ;;  %v17825_v24 = vld [vmem:[#allocation109_spill] sm:$0xff] }
 0x97e   :  { %v7866_v39 = vpop.f32.mrb[50].mxu1 }
 0x97f   :  { %v7868_v53 = vpop.f32.mrb[51].mxu1 }
 0x981   :  { %12808 = vmatmul.mubr.msk.bf16.gmra.mrb[156].mxu1 %vm2674_vm0, %v17815_v9 }
 0x982   :  { %8140 = vmatprep.mubr.bf16.mxu1 %v17723_v12 }
 0x984   :  { %v7872_v47 = vpop.f32.mrb[52].mxu1  ;;  %11055 = vmatmul.mubr.bf16.gmra.mrb[72].mxu0 %v14114_v26 }
 0x985   :  { %v7874_v2 = vpop.f32.mrb[53].mxu1  ;;  %11062 = vmatprep.mubr.bf16.mxu0 %v14114_v26  ;;  %v17826_v47 = vld [vmem:[#allocation111_spill] sm:$0xff] }
 0x986   :  { %v7876_v61 = vpop.f32.mrb[54].mxu1 }
 0x987   :  { %v7878_v58 = vpop.f32.mrb[55].mxu1 }
 0x989   :  { %12809 = vmatmul.mubr.msk.bf16.gmra.mrb[160].mxu1 %vm2674_vm0, %v17816_v17 }
 0x98a   :  { %8150 = vmatprep.mubr.bf16.mxu1 %v17723_v12 }
 0x98c   :  { %v7882_v31 = vpop.f32.mrb[56].mxu1  ;;  %11063 = vmatmul.mubr.bf16.gmra.mrb[76].mxu0 %v14114_v26 }
 0x98d   :  { %v7884_v51 = vpop.f32.mrb[57].mxu1  ;;  %11070 = vmatprep.mubr.bf16.mxu0 %v14114_v26 }
 0x98e   :  { %v7886_v3 = vpop.f32.mrb[58].mxu1 }
 0x98f   :  { %v7888_v20 = vpop.f32.mrb[59].mxu1 }
 0x991   :  { %12810 = vmatmul.mubr.msk.bf16.gmra.mrb[164].mxu1 %vm2674_vm0, %v17817_v29 }
 0x992   :  { %8160 = vmatprep.mubr.bf16.mxu1 %v17723_v12 }
 0x994   :  { %v7892_v59 = vpop.f32.mrb[60].mxu1  ;;  %11071 = vmatmul.mubr.bf16.gmra.mrb[80].mxu0 %v14114_v26 }
 0x995   :  { %v7894_v11 = vpop.f32.mrb[61].mxu1  ;;  %11078 = vmatprep.mubr.bf16.mxu0 %v14114_v26 }
 0x996   :  { %v7896_v23 = vpop.f32.mrb[62].mxu1 }
 0x997   :  { %v7898_v14 = vpop.f32.mrb[63].mxu1 }
 0x999   :  { %12811 = vmatmul.mubr.msk.bf16.gmra.mrb[168].mxu1 %vm2674_vm0, %v17818_v28 }
 0x99a   :  { %8170 = vmatprep.mubr.bf16.mxu1 %v17723_v12 }
 0x99c   :  { %v7902_v25 = vpop.f32.mrb[64].mxu1  ;;  %11079 = vmatmul.mubr.bf16.gmra.mrb[84].mxu0 %v14114_v26 }
 0x99d   :  { %v7904_v49 = vpop.f32.mrb[65].mxu1  ;;  %11086 = vmatprep.mubr.bf16.mxu0 %v14114_v26 }
 0x99e   :  { %v7906_v46 = vpop.f32.mrb[66].mxu1 }
 0x99f   :  { %v7908_v48 = vpop.f32.mrb[67].mxu1 }
 0x9a1   :  { %12812 = vmatmul.mubr.msk.bf16.gmra.mrb[172].mxu1 %vm2674_vm0, %v17819_v22 }
 0x9a2   :  { %8180 = vmatprep.mubr.bf16.mxu1 %v17723_v12 }
 0x9a4   :  { %v7912_v60 = vpop.f32.mrb[68].mxu1  ;;  %11087 = vmatmul.mubr.bf16.gmra.mrb[88].mxu0 %v14114_v26 }
 0x9a5   :  { %v7914_v30 = vpop.f32.mrb[69].mxu1  ;;  %11094 = vmatprep.mubr.bf16.mxu0 %v14114_v26 }
 0x9a6   :  { %v7916_v38 = vpop.f32.mrb[70].mxu1 }
 0x9a7   :  { %v7918_v16 = vpop.f32.mrb[71].mxu1 }
 0x9a9   :  { %12813 = vmatmul.mubr.msk.bf16.gmra.mrb[176].mxu1 %vm2674_vm0, %v17820_v4 }
 0x9aa   :  { %8190 = vmatprep.mubr.bf16.mxu1 %v17723_v12 }
 0x9ac   :  { %v7922_v15 = vpop.f32.mrb[72].mxu1  ;;  %11095 = vmatmul.mubr.bf16.gmra.mrb[92].mxu0 %v14114_v26 }
 0x9ad   :  { %v7924_v50 = vpop.f32.mrb[73].mxu1  ;;  %11102 = vmatprep.mubr.bf16.mxu0 %v14114_v26 }
 0x9ae   :  { %v7926_v10 = vpop.f32.mrb[74].mxu1 }
 0x9af   :  { %v7928_v62 = vpop.f32.mrb[75].mxu1 }
 0x9b1   :  { %12814 = vmatmul.mubr.msk.bf16.gmra.mrb[180].mxu1 %vm2674_vm0, %v17821_v44 }
 0x9b2   :  { %8200 = vmatprep.mubr.bf16.mxu1 %v17723_v12 }
 0x9b4   :  { %v7932_v54 = vpop.f32.mrb[76].mxu1  ;;  %11103 = vmatmul.mubr.bf16.gmra.mrb[96].mxu0 %v14114_v26 }
 0x9b5   :  { %v7934_v27 = vpop.f32.mrb[77].mxu1  ;;  %11110 = vmatprep.mubr.bf16.mxu0 %v14114_v26 }
 0x9b6   :  { %v7936_v36 = vpop.f32.mrb[78].mxu1 }
 0x9b7   :  { %v7938_v18 = vpop.f32.mrb[79].mxu1 }
 0x9b9   :  { %12815 = vmatmul.mubr.msk.bf16.gmra.mrb[184].mxu1 %vm2674_vm0, %v17822_v33 }
 0x9ba   :  { %8210 = vmatprep.mubr.bf16.mxu1 %v17723_v12 }
 0x9bc   :  { %v7942_v19 = vpop.f32.mrb[80].mxu1  ;;  %11111 = vmatmul.mubr.bf16.gmra.mrb[100].mxu0 %v14114_v26 }
 0x9bd   :  { %v7944_v0 = vpop.f32.mrb[81].mxu1  ;;  %11118 = vmatprep.mubr.bf16.mxu0 %v14114_v26 }
 0x9be   :  { %v7946_v43 = vpop.f32.mrb[82].mxu1 }
 0x9bf   :  { %v7948_v63 = vpop.f32.mrb[83].mxu1 }
 0x9c1   :  { %12816 = vmatmul.mubr.msk.bf16.gmra.mrb[188].mxu1 %vm2674_vm0, %v17823_v56 }
 0x9c2   :  { %8220 = vmatprep.mubr.bf16.mxu1 %v17723_v12 }
 0x9c4   :  { %v7952_v37 = vpop.f32.mrb[84].mxu1  ;;  %11119 = vmatmul.mubr.bf16.gmra.mrb[104].mxu0 %v14114_v26 }
 0x9c5   :  { %v7954_v7 = vpop.f32.mrb[85].mxu1  ;;  %11126 = vmatprep.mubr.bf16.mxu0 %v14114_v26 }
 0x9c6   :  { %v7956_v41 = vpop.f32.mrb[86].mxu1 }
 0x9c7   :  { %v7958_v55 = vpop.f32.mrb[87].mxu1  ;;  %v16526_v41 = vld [vmem:[%s17132_s4] ss:$0 sm:$0xff] }
 0x9c9   :  { %12817 = vmatmul.mubr.msk.bf16.gmra.mrb[192].mxu1 %vm2674_vm0, %v17824_v32 }
 0x9ca   :  { %8230 = vmatprep.mubr.bf16.mxu1 %v17723_v12 }
 0x9cc   :  { %v7962_v57 = vpop.f32.mrb[88].mxu1  ;;  %11127 = vmatmul.mubr.bf16.gmra.mrb[108].mxu0 %v14114_v26 }
 0x9cd   :  { %v7964_v40 = vpop.f32.mrb[89].mxu1  ;;  %11134 = vmatprep.mubr.bf16.mxu0 %v14114_v26 }
 0x9ce   :  { %v7966_v13 = vpop.f32.mrb[90].mxu1 }
 0x9cf   :  { %v7968_v52 = vpop.f32.mrb[91].mxu1 }
 0x9d1   :  { %12818 = vmatmul.mubr.msk.bf16.gmra.mrb[196].mxu1 %vm2674_vm0, %v17825_v24 }
 0x9d2   :  { %8240 = vmatprep.mubr.bf16.mxu1 %v17723_v12 }
 0x9d4   :  { %v7972_v5 = vpop.f32.mrb[92].mxu1  ;;  %11135 = vmatmul.mubr.bf16.gmra.mrb[112].mxu0 %v14114_v26 }
 0x9d5   :  { %v7974_v39 = vpop.f32.mrb[93].mxu1  ;;  %11142 = vmatprep.mubr.bf16.mxu0 %v14114_v26 }
 0x9d6   :  { %v7976_v53 = vpop.f32.mrb[94].mxu1 }
 0x9d7   :  { %v7978_v9 = vpop.f32.mrb[95].mxu1 }
 0x9d9   :  { %12819 = vmatmul.mubr.msk.bf16.gmra.mrb[200].mxu1 %vm2674_vm0, %v17826_v47 }
 0x9dc   :  { %v7982_v2 = vpop.f32.mrb[96].mxu1  ;;  %11143 = vmatmul.mubr.bf16.gmra.mrb[116].mxu0 %v14114_v26 }
 0x9dd   :  { %v7984_v61 = vpop.f32.mrb[97].mxu1  ;;  %11150 = vmatprep.mubr.bf16.mxu0 %v14114_v26 }
 0x9de   :  { %v7986_v58 = vpop.f32.mrb[98].mxu1 }
 0x9df   :  { %v7988_v17 = vpop.f32.mrb[99].mxu1 }
 0x9e4   :  { %v7992_v12 = vpop.f32.mrb[100].mxu1  ;;  %11151 = vmatmul.mubr.bf16.gmra.mrb[120].mxu0 %v14114_v26 }
 0x9e5   :  { %v7994_v31 = vpop.f32.mrb[101].mxu1  ;;  %11158 = vmatprep.mubr.bf16.mxu0 %v14114_v26 }
 0x9e6   :  { %v7996_v51 = vpop.f32.mrb[102].mxu1 }
 0x9e7   :  { %v7998_v3 = vpop.f32.mrb[103].mxu1 }
 0x9ec   :  { %v8002_v20 = vpop.f32.mrb[104].mxu1  ;;  %11159 = vmatmul.mubr.bf16.gmra.mrb[124].mxu0 %v14114_v26 }
 0x9ed   :  { %v8004_v29 = vpop.f32.mrb[105].mxu1  ;;  %11166 = vmatprep.mubr.bf16.mxu0 %v14114_v26 }
 0x9ee   :  { %v8006_v59 = vpop.f32.mrb[106].mxu1 }
 0x9ef   :  { %v8008_v11 = vpop.f32.mrb[107].mxu1 }
 0x9f4   :  { %v8012_v23 = vpop.f32.mrb[108].mxu1  ;;  %11167 = vmatmul.mubr.bf16.gmra.mrb[128].mxu0 %v14114_v26 }
 0x9f5   :  { %v8014_v14 = vpop.f32.mrb[109].mxu1  ;;  %11174 = vmatprep.mubr.bf16.mxu0 %v14114_v26 }
 0x9f6   :  { %v8016_v28 = vpop.f32.mrb[110].mxu1 }
 0x9f7   :  { %v8018_v25 = vpop.f32.mrb[111].mxu1  ;;  %v16546_v28 = vld [vmem:[%s17133_s5] sm:$0x1] }
 0x9f8   :  { %12869 = vmatprep.mubr.bf16.mxu1 %v16546_v28 }
 0x9fc   :  { %v8022_v49 = vpop.f32.mrb[112].mxu1  ;;  %11175 = vmatmul.mubr.bf16.gmra.mrb[132].mxu0 %v14114_v26 }
 0x9fd   :  { %v8024_v46 = vpop.f32.mrb[113].mxu1  ;;  %11182 = vmatprep.mubr.bf16.mxu0 %v14114_v26 }
 0x9fe   :  { %v8026_v48 = vpop.f32.mrb[114].mxu1 }
 0x9ff   :  { %v8028_v22 = vpop.f32.mrb[115].mxu1 }
 0xa04   :  { %v8032_v60 = vpop.f32.mrb[116].mxu1  ;;  %11183 = vmatmul.mubr.bf16.gmra.mrb[136].mxu0 %v14114_v26 }
 0xa05   :  { %v8034_v30 = vpop.f32.mrb[117].mxu1  ;;  %11190 = vmatprep.mubr.bf16.mxu0 %v14114_v26 }
 0xa06   :  { %v8036_v38 = vpop.f32.mrb[118].mxu1 }
 0xa07   :  { %v8038_v16 = vpop.f32.mrb[119].mxu1 }
 0xa0c   :  { %v8042_v4 = vpop.f32.mrb[120].mxu1  ;;  %11191 = vmatmul.mubr.bf16.gmra.mrb[140].mxu0 %v14114_v26 }
 0xa0d   :  { %v8044_v15 = vpop.f32.mrb[121].mxu1  ;;  %11198 = vmatprep.mubr.bf16.mxu0 %v14114_v26 }
 0xa0e   :  { %v8046_v50 = vpop.f32.mrb[122].mxu1 }
 0xa0f   :  { %v8048_v10 = vpop.f32.mrb[123].mxu1 }
 0xa14   :  { %v8052_v62 = vpop.f32.mrb[124].mxu1  ;;  %11199 = vmatmul.mubr.bf16.gmra.mrb[144].mxu0 %v14114_v26 }
 0xa15   :  { %v8054_v44 = vpop.f32.mrb[125].mxu1  ;;  %11206 = vmatprep.mubr.bf16.mxu0 %v14114_v26 }
 0xa16   :  { %v8056_v54 = vpop.f32.mrb[126].mxu1 }
 0xa17   :  { %v8058_v27 = vpop.f32.mrb[127].mxu1 }
 0xa1c   :  { %v8062_v36 = vpop.f32.mrb[128].mxu1  ;;  %11207 = vmatmul.mubr.bf16.gmra.mrb[148].mxu0 %v14114_v26 }
 0xa1d   :  { %v8064_v18 = vpop.f32.mrb[129].mxu1  ;;  %11214 = vmatprep.mubr.bf16.mxu0 %v14114_v26 }
 0xa1e   :  { %v8066_v33 = vpop.f32.mrb[130].mxu1 }
 0xa1f   :  { %v8068_v19 = vpop.f32.mrb[131].mxu1 }
 0xa24   :  { %v8072_v0 = vpop.f32.mrb[132].mxu1  ;;  %11215 = vmatmul.mubr.bf16.gmra.mrb[152].mxu0 %v14114_v26 }
 0xa25   :  { %v8074_v43 = vpop.f32.mrb[133].mxu1  ;;  %11222 = vmatprep.mubr.bf16.mxu0 %v14114_v26 }
 0xa26   :  { %v8076_v63 = vpop.f32.mrb[134].mxu1 }
 0xa27   :  { %v8078_v56 = vpop.f32.mrb[135].mxu1 }
 0xa2c   :  { %v8082_v37 = vpop.f32.mrb[136].mxu1  ;;  %11223 = vmatmul.mubr.bf16.gmra.mrb[156].mxu0 %v14114_v26 }
 0xa2d   :  { %v8084_v7 = vpop.f32.mrb[137].mxu1  ;;  %11230 = vmatprep.mubr.bf16.mxu0 %v14114_v26 }
 0xa2e   :  { %v8086_v55 = vpop.f32.mrb[138].mxu1 }
 0xa2f   :  { %v8088_v32 = vpop.f32.mrb[139].mxu1  ;;  %v11016_v57 = vpop.f32.mrb[52].mxu0 }
 0xa30   :  { %v12933_v40 = vadd.f32 %v16526_v41, %v11016_v57  ;;  %v11018_v13 = vpop.f32.mrb[53].mxu0 }
 0xa31   :  { %v11019_v52 = vpop.f32.mrb[54].mxu0 }
 0xa32   :  { %v12934_v24 = vadd.f32 %v16526_v41, %v11019_v52  ;;  %v11021_v5 = vpop.f32.mrb[55].mxu0  ;;  %13716 = vtanh.f32 %v12933_v40 }
 0xa34   :  { %v8092_v39 = vpop.f32.mrb[140].mxu1  ;;  %13718 = vtanh.f32 %v12934_v24  ;;  %11231 = vmatmul.mubr.bf16.gmra.mrb[160].mxu0 %v14114_v26 }
 0xa35   :  { %v8094_v53 = vpop.f32.mrb[141].mxu1  ;;  %11238 = vmatprep.mubr.bf16.mxu0 %v14114_v26 }
 0xa36   :  { %v8096_v9 = vpop.f32.mrb[142].mxu1 }
 0xa37   :  { %v8098_v47 = vpop.f32.mrb[143].mxu1  ;;  %v11024_v2 = vpop.f32.mrb[56].mxu0 }
 0xa38   :  { %v12935_v61 = vadd.f32 %v16526_v41, %v11024_v2  ;;  %v11026_v58 = vpop.f32.mrb[57].mxu0 }
 0xa39   :  { %v11027_v17 = vpop.f32.mrb[58].mxu0 }
 0xa3a   :  { %v12936_v12 = vadd.f32 %v16526_v41, %v11027_v17  ;;  %v11029_v31 = vpop.f32.mrb[59].mxu0  ;;  %13720 = vtanh.f32 %v12935_v61 }
 0xa3c   :  { %v8102_v51 = vpop.f32.mrb[144].mxu1  ;;  %13722 = vtanh.f32 %v12936_v12  ;;  %11239 = vmatmul.mubr.bf16.gmra.mrb[164].mxu0 %v14114_v26  ;;  %v16536_v20 = vpop.eup %13716 }
 0xa3d   :  { %v8104_v3 = vpop.f32.mrb[145].mxu1  ;;  %11246 = vmatprep.mubr.bf16.mxu0 %v14114_v26 }
 0xa3e   :  { %v8106_v29 = vpop.f32.mrb[146].mxu1  ;;  %v16539_v59 = vpop.eup %13718 }
 0xa3f   :  { %v8108_v11 = vpop.f32.mrb[147].mxu1  ;;  %v11032_v23 = vpop.f32.mrb[60].mxu0  ;;  %v11656_v14 = vpack.c.bf16 %v16539_v59, %v16536_v20 }
 0xa40   :  { %v12937_v25 = vadd.f32 %v16526_v41, %v11032_v23  ;;  %v11034_v49 = vpop.f32.mrb[61].mxu0 }
 0xa41   :  { %v11035_v46 = vpop.f32.mrb[62].mxu0 }
 0xa42   :  { %v12938_v48 = vadd.f32 %v16526_v41, %v11035_v46  ;;  %v11037_v22 = vpop.f32.mrb[63].mxu0  ;;  %13724 = vtanh.f32 %v12937_v25 }
 0xa44   :  { %v8112_v60 = vpop.f32.mrb[148].mxu1  ;;  %13726 = vtanh.f32 %v12938_v48  ;;  %11247 = vmatmul.mubr.bf16.gmra.mrb[168].mxu0 %v14114_v26  ;;  %v16552_v38 = vpop.eup %13720 }
 0xa45   :  { %v8114_v30 = vpop.f32.mrb[149].mxu1  ;;  %11254 = vmatprep.mubr.bf16.mxu0 %v14114_v26 }
 0xa46   :  { %v8116_v16 = vpop.f32.mrb[150].mxu1  ;;  %v16555_v4 = vpop.eup %13722 }
 0xa47   :  { %v8118_v15 = vpop.f32.mrb[151].mxu1  ;;  %v11040_v50 = vpop.f32.mrb[64].mxu0  ;;  %v11657_v10 = vpack.c.bf16 %v16555_v4, %v16552_v38 }
 0xa48   :  { %v12939_v62 = vadd.f32 %v16526_v41, %v11040_v50  ;;  %v11042_v44 = vpop.f32.mrb[65].mxu0 }
 0xa49   :  { %v11043_v54 = vpop.f32.mrb[66].mxu0 }
 0xa4a   :  { %v12940_v27 = vadd.f32 %v16526_v41, %v11043_v54  ;;  %v11045_v36 = vpop.f32.mrb[67].mxu0  ;;  %13728 = vtanh.f32 %v12939_v62 }
 0xa4c   :  { %v8122_v18 = vpop.f32.mrb[152].mxu1  ;;  %13730 = vtanh.f32 %v12940_v27  ;;  %11255 = vmatmul.mubr.bf16.gmra.mrb[172].mxu0 %v14114_v26  ;;  %v16562_v19 = vpop.eup %13724 }
 0xa4d   :  { %v8124_v33 = vpop.f32.mrb[153].mxu1  ;;  %11262 = vmatprep.mubr.bf16.mxu0 %v14114_v26 }
 0xa4e   :  { %v8126_v0 = vpop.f32.mrb[154].mxu1  ;;  %v16565_v43 = vpop.eup %13726 }
 0xa4f   :  { %v8128_v63 = vpop.f32.mrb[155].mxu1  ;;  %v11048_v56 = vpop.f32.mrb[68].mxu0  ;;  %v11658_v37 = vpack.c.bf16 %v16565_v43, %v16562_v19 }
 0xa50   :  { %v12941_v7 = vadd.f32 %v16526_v41, %v11048_v56  ;;  %v11050_v55 = vpop.f32.mrb[69].mxu0 }
 0xa51   :  { %v11051_v32 = vpop.f32.mrb[70].mxu0 }
 0xa52   :  { %v12942_v57 = vadd.f32 %v16526_v41, %v11051_v32  ;;  %v11053_v40 = vpop.f32.mrb[71].mxu0  ;;  %13732 = vtanh.f32 %v12941_v7 }
 0xa54   :  { %v8132_v13 = vpop.f32.mrb[156].mxu1  ;;  %13734 = vtanh.f32 %v12942_v57  ;;  %11263 = vmatmul.mubr.bf16.gmra.mrb[176].mxu0 %v14114_v26  ;;  %v16572_v24 = vpop.eup %13728 }
 0xa55   :  { %v8134_v52 = vpop.f32.mrb[157].mxu1  ;;  %11270 = vmatprep.mubr.bf16.mxu0 %v14114_v26 }
 0xa56   :  { %v8136_v5 = vpop.f32.mrb[158].mxu1  ;;  %v16575_v39 = vpop.eup %13730 }
 0xa57   :  { %v8138_v53 = vpop.f32.mrb[159].mxu1  ;;  %v11056_v9 = vpop.f32.mrb[72].mxu0  ;;  %v11659_v47 = vpack.c.bf16 %v16575_v39, %v16572_v24 }
 0xa58   :  { %v12943_v2 = vadd.f32 %v16526_v41, %v11056_v9  ;;  %v11058_v61 = vpop.f32.mrb[73].mxu0 }
 0xa59   :  { %v11059_v58 = vpop.f32.mrb[74].mxu0 }
 0xa5a   :  { %v12944_v17 = vadd.f32 %v16526_v41, %v11059_v58  ;;  %v11061_v12 = vpop.f32.mrb[75].mxu0  ;;  %13736 = vtanh.f32 %v12943_v2 }
 0xa5c   :  { %v8142_v31 = vpop.f32.mrb[160].mxu1  ;;  %13738 = vtanh.f32 %v12944_v17  ;;  %11271 = vmatmul.mubr.bf16.gmra.mrb[180].mxu0 %v14114_v26  ;;  %v16582_v3 = vpop.eup %13732 }
 0xa5d   :  { %v8144_v51 = vpop.f32.mrb[161].mxu1  ;;  %11278 = vmatprep.mubr.bf16.mxu0 %v14114_v26 }
 0xa5e   :  { %v8146_v29 = vpop.f32.mrb[162].mxu1  ;;  %v16585_v11 = vpop.eup %13734 }
 0xa5f   :  { %v8148_v23 = vpop.f32.mrb[163].mxu1  ;;  %v11064_v25 = vpop.f32.mrb[76].mxu0  ;;  %v11660_v49 = vpack.c.bf16 %v16585_v11, %v16582_v3 }
 0xa60   :  { %v12945_v46 = vadd.f32 %v16526_v41, %v11064_v25  ;;  %v11066_v48 = vpop.f32.mrb[77].mxu0 }
 0xa61   :  { %v11067_v22 = vpop.f32.mrb[78].mxu0 }
 0xa62   :  { %v12946_v60 = vadd.f32 %v16526_v41, %v11067_v22  ;;  %v11069_v30 = vpop.f32.mrb[79].mxu0  ;;  %13740 = vtanh.f32 %v12945_v46 }
 0xa64   :  { %v8152_v16 = vpop.f32.mrb[164].mxu1  ;;  %13742 = vtanh.f32 %v12946_v60  ;;  %11279 = vmatmul.mubr.bf16.gmra.mrb[184].mxu0 %v14114_v26  ;;  %v16592_v50 = vpop.eup %13736 }
 0xa65   :  { %v8154_v15 = vpop.f32.mrb[165].mxu1  ;;  %11286 = vmatprep.mubr.bf16.mxu0 %v14114_v26 }
 0xa66   :  { %v8156_v62 = vpop.f32.mrb[166].mxu1  ;;  %v16595_v44 = vpop.eup %13738 }
 0xa67   :  { %v8158_v54 = vpop.f32.mrb[167].mxu1  ;;  %v11072_v27 = vpop.f32.mrb[80].mxu0  ;;  %v11661_v36 = vpack.c.bf16 %v16595_v44, %v16592_v50 }
 0xa68   :  { %v12947_v18 = vadd.f32 %v16526_v41, %v11072_v27  ;;  %v11074_v33 = vpop.f32.mrb[81].mxu0 }
 0xa69   :  { %v11075_v0 = vpop.f32.mrb[82].mxu0 }
 0xa6a   :  { %v12948_v63 = vadd.f32 %v16526_v41, %v11075_v0  ;;  %v11077_v56 = vpop.f32.mrb[83].mxu0  ;;  %13744 = vtanh.f32 %v12947_v18 }
 0xa6c   :  { %v8162_v7 = vpop.f32.mrb[168].mxu1  ;;  %13746 = vtanh.f32 %v12948_v63  ;;  %11287 = vmatmul.mubr.bf16.gmra.mrb[188].mxu0 %v14114_v26  ;;  %v16602_v32 = vpop.eup %13740 }
 0xa6d   :  { %v8164_v55 = vpop.f32.mrb[169].mxu1  ;;  %11294 = vmatprep.mubr.bf16.mxu0 %v14114_v26 }
 0xa6e   :  { %v8166_v57 = vpop.f32.mrb[170].mxu1  ;;  %v16605_v40 = vpop.eup %13742 }
 0xa6f   :  { %v8168_v13 = vpop.f32.mrb[171].mxu1  ;;  %v11080_v52 = vpop.f32.mrb[84].mxu0  ;;  %v11662_v5 = vpack.c.bf16 %v16605_v40, %v16602_v32 }
 0xa70   :  { %v12949_v53 = vadd.f32 %v16526_v41, %v11080_v52  ;;  %v11082_v9 = vpop.f32.mrb[85].mxu0 }
 0xa71   :  { %v11083_v2 = vpop.f32.mrb[86].mxu0 }
 0xa72   :  { %v12950_v61 = vadd.f32 %v16526_v41, %v11083_v2  ;;  %v11085_v58 = vpop.f32.mrb[87].mxu0  ;;  %13748 = vtanh.f32 %v12949_v53 }
 0xa74   :  { %v8172_v17 = vpop.f32.mrb[172].mxu1  ;;  %13750 = vtanh.f32 %v12950_v61  ;;  %11295 = vmatmul.mubr.bf16.gmra.mrb[192].mxu0 %v14114_v26  ;;  %v16612_v31 = vpop.eup %13744 }
 0xa75   :  { %v8174_v12 = vpop.f32.mrb[173].mxu1  ;;  %11302 = vmatprep.mubr.bf16.mxu0 %v14114_v26 }
 0xa76   :  { %v8176_v51 = vpop.f32.mrb[174].mxu1  ;;  %v16615_v29 = vpop.eup %13746 }
 0xa77   :  { %v8178_v23 = vpop.f32.mrb[175].mxu1  ;;  %v11088_v25 = vpop.f32.mrb[88].mxu0  ;;  %v11663_v46 = vpack.c.bf16 %v16615_v29, %v16612_v31 }
 0xa78   :  { %v12951_v48 = vadd.f32 %v16526_v41, %v11088_v25  ;;  %v11090_v22 = vpop.f32.mrb[89].mxu0 }
 0xa79   :  { %v11091_v60 = vpop.f32.mrb[90].mxu0 }
 0xa7a   :  { %v12952_v30 = vadd.f32 %v16526_v41, %v11091_v60  ;;  %v11093_v16 = vpop.f32.mrb[91].mxu0  ;;  %13752 = vtanh.f32 %v12951_v48 }
 0xa7c   :  { %v8182_v15 = vpop.f32.mrb[176].mxu1  ;;  %13754 = vtanh.f32 %v12952_v30  ;;  %11303 = vmatmul.mubr.bf16.gmra.mrb[196].mxu0 %v14114_v26  ;;  %v13749_v54 = vpop.eup %13748 }
 0xa7d   :  { %v8184_v62 = vpop.f32.mrb[177].mxu1  ;;  %11310 = vmatprep.mubr.bf16.mxu0 %v14114_v26 }
 0xa7e   :  { %v8186_v27 = vpop.f32.mrb[178].mxu1  ;;  %v13751_v18 = vpop.eup %13750 }
 0xa7f   :  { %v8188_v33 = vpop.f32.mrb[179].mxu1  ;;  %v11096_v0 = vpop.f32.mrb[92].mxu0  ;;  %v11664_v63 = vpack.c.bf16 %v13751_v18, %v13749_v54 }
 0xa80   :  { %v12953_v56 = vadd.f32 %v16526_v41, %v11096_v0  ;;  %v11098_v7 = vpop.f32.mrb[93].mxu0 }
 0xa81   :  { %v11099_v55 = vpop.f32.mrb[94].mxu0  ;;  %12853 = vmatprep.subr.bf16.mxu1 %v11664_v63 }
 0xa82   :  { %v12954_v57 = vadd.f32 %v16526_v41, %v11099_v55  ;;  %v11101_v13 = vpop.f32.mrb[95].mxu0  ;;  %12854 = vmatpush3.bf16.xpose.msra.mxu1 %v11656_v14  ;;  %13756 = vtanh.f32 %v12953_v56 }
 0xa84   :  { %v8192_v52 = vpop.f32.mrb[180].mxu1  ;;  %13758 = vtanh.f32 %v12954_v57  ;;  %11311 = vmatmul.mubr.bf16.gmra.mrb[200].mxu0 %v14114_v26  ;;  %v13753_v9 = vpop.eup %13752 }
 0xa85   :  { %v8194_v53 = vpop.f32.mrb[181].mxu1  ;;  %11318 = vmatprep.mubr.bf16.mxu0 %v14114_v26 }
 0xa86   :  { %v8196_v2 = vpop.f32.mrb[182].mxu1  ;;  %v13755_v61 = vpop.eup %13754 }
 0xa87   :  { %v8198_v58 = vpop.f32.mrb[183].mxu1  ;;  %v11104_v17 = vpop.f32.mrb[96].mxu0  ;;  %v11665_v12 = vpack.c.bf16 %v13755_v61, %v13753_v9 }
 0xa88   :  { %v12955_v51 = vadd.f32 %v16526_v41, %v11104_v17  ;;  %v11106_v23 = vpop.f32.mrb[97].mxu0 }
 0xa89   :  { %v11107_v25 = vpop.f32.mrb[98].mxu0  ;;  %12855 = vmatprep.subr.bf16.mxu1 %v11665_v12 }
 0xa8a   :  { %v12956_v20 = vadd.f32 %v16526_v41, %v11107_v25  ;;  %v11109_v59 = vpop.f32.mrb[99].mxu0  ;;  %12856 = vmatpush3.bf16.xpose.msra.mxu1 %v11657_v10  ;;  %13760 = vtanh.f32 %v12955_v51  ;;  %v11745_v10 = vld [vmem:[#allocation2] sm:$0x1] }
 0xa8b   :  { %11748 = vperm.xlu0 %13382, %v11745_v10  }
 0xa8c   :  { %v8202_v14 = vpop.f32.mrb[184].mxu1  ;;  %13762 = vtanh.f32 %v12956_v20  ;;  %11319 = vmatmul.mubr.bf16.gmra.mrb[204].mxu0 %v14114_v26  ;;  %v13757_v22 = vpop.eup %13756 }
 0xa8d   :  { %v8204_v48 = vpop.f32.mrb[185].mxu1  ;;  %11326 = vmatprep.mubr.bf16.mxu0 %v14114_v26 }
 0xa8e   :  { %v8206_v60 = vpop.f32.mrb[186].mxu1  ;;  %v13759_v30 = vpop.eup %13758 }
 0xa8f   :  { %v8208_v16 = vpop.f32.mrb[187].mxu1  ;;  %v11112_v15 = vpop.f32.mrb[100].mxu0  ;;  %v11666_v62 = vpack.c.bf16 %v13759_v30, %v13757_v22 }
 0xa90   :  { %v12957_v54 = vadd.f32 %v16526_v41, %v11112_v15  ;;  %v11114_v27 = vpop.f32.mrb[101].mxu0 }
 0xa91   :  { %v11115_v18 = vpop.f32.mrb[102].mxu0  ;;  %12857 = vmatprep.subr.bf16.mxu1 %v11666_v62 }
 0xa92   :  { %v12958_v38 = vadd.f32 %v16526_v41, %v11115_v18  ;;  %v11117_v4 = vpop.f32.mrb[103].mxu0  ;;  %12858 = vmatpush3.bf16.xpose.msra.mxu1 %v11658_v37  ;;  %13764 = vtanh.f32 %v12957_v54 }
 0xa94   :  { %v8212_v33 = vpop.f32.mrb[188].mxu1  ;;  %13766 = vtanh.f32 %v12958_v38  ;;  %11327 = vmatmul.mubr.bf16.gmra.mrb[208].mxu0 %v14114_v26  ;;  %v13761_v63 = vpop.eup %13760 }
 0xa95   :  { %v8214_v0 = vpop.f32.mrb[189].mxu1  ;;  %11334 = vmatprep.mubr.bf16.mxu0 %v14114_v26 }
 0xa96   :  { %v8216_v56 = vpop.f32.mrb[190].mxu1  ;;  %v13763_v7 = vpop.eup %13762 }
 0xa97   :  { %v8218_v55 = vpop.f32.mrb[191].mxu1  ;;  %v11120_v57 = vpop.f32.mrb[104].mxu0  ;;  %v11667_v13 = vpack.c.bf16 %v13763_v7, %v13761_v63 }
 0xa98   :  { %v12959_v52 = vadd.f32 %v16526_v41, %v11120_v57  ;;  %v11122_v19 = vpop.f32.mrb[105].mxu0 }
 0xa99   :  { %v11123_v43 = vpop.f32.mrb[106].mxu0  ;;  %12859 = vmatprep.subr.bf16.mxu1 %v11667_v13 }
 0xa9a   :  { %v12960_v37 = vadd.f32 %v16526_v41, %v11123_v43  ;;  %v11125_v53 = vpop.f32.mrb[107].mxu0  ;;  %12860 = vmatpush3.bf16.xpose.msra.mxu1 %v11659_v47  ;;  %13768 = vtanh.f32 %v12959_v52 }
 0xa9c   :  { %v8222_v9 = vpop.f32.mrb[192].mxu1  ;;  %13770 = vtanh.f32 %v12960_v37  ;;  %11335 = vmatmul.mubr.bf16.gmra.mrb[212].mxu0 %v14114_v26  ;;  %v13765_v61 = vpop.eup %13764 }
 0xa9d   :  { %v8224_v2 = vpop.f32.mrb[193].mxu1  ;;  %11342 = vmatprep.mubr.bf16.mxu0 %v14114_v26 }
 0xa9e   :  { %v8226_v58 = vpop.f32.mrb[194].mxu1  ;;  %v13767_v17 = vpop.eup %13766 }
 0xa9f   :  { %v8228_v12 = vpop.f32.mrb[195].mxu1  ;;  %v11128_v51 = vpop.f32.mrb[108].mxu0  ;;  %v11668_v23 = vpack.c.bf16 %v13767_v17, %v13765_v61 }
 0xaa0   :  { %v12961_v25 = vadd.f32 %v16526_v41, %v11128_v51  ;;  %v11130_v20 = vpop.f32.mrb[109].mxu0 }
 0xaa1   :  { %v11131_v59 = vpop.f32.mrb[110].mxu0  ;;  %12861 = vmatprep.subr.bf16.mxu1 %v11668_v23 }
 0xaa2   :  { %v12962_v24 = vadd.f32 %v16526_v41, %v11131_v59  ;;  %v11133_v39 = vpop.f32.mrb[111].mxu0  ;;  %12862 = vmatpush3.bf16.xpose.msra.mxu1 %v11660_v49  ;;  %13772 = vtanh.f32 %v12961_v25 }
 0xaa4   :  { %v8232_v47 = vpop.f32.mrb[196].mxu1  ;;  %13774 = vtanh.f32 %v12962_v24  ;;  %11343 = vmatmul.mubr.bf16.gmra.mrb[216].mxu0 %v14114_v26  ;;  %v13769_v48 = vpop.eup %13768 }
 0xaa5   :  { %v8234_v14 = vpop.f32.mrb[197].mxu1  ;;  %11350 = vmatprep.mubr.bf16.mxu0 %v14114_v26 }
 0xaa6   :  { %v8236_v22 = vpop.f32.mrb[198].mxu1  ;;  %v13771_v60 = vpop.eup %13770 }
 0xaa7   :  { %v8238_v30 = vpop.f32.mrb[199].mxu1  ;;  %v11136_v16 = vpop.f32.mrb[112].mxu0  ;;  %v11669_v15 = vpack.c.bf16 %v13771_v60, %v13769_v48 }
 0xaa8   :  { %v12963_v62 = vadd.f32 %v16526_v41, %v11136_v16  ;;  %v11138_v54 = vpop.f32.mrb[113].mxu0 }
 0xaa9   :  { %v11139_v27 = vpop.f32.mrb[114].mxu0  ;;  %12863 = vmatprep.subr.bf16.mxu1 %v11669_v15 }
 0xaaa   :  { %v12964_v3 = vadd.f32 %v16526_v41, %v11139_v27  ;;  %v11141_v11 = vpop.f32.mrb[115].mxu0  ;;  %12864 = vmatpush3.bf16.xpose.msra.mxu1 %v11661_v36  ;;  %13776 = vtanh.f32 %v12963_v62 }
 0xaac   :  { %v8242_v49 = vpop.f32.mrb[200].mxu1  ;;  %13778 = vtanh.f32 %v12964_v3  ;;  %11351 = vmatmul.mubr.bf16.gmra.mrb[220].mxu0 %v14114_v26  ;;  %v13773_v38 = vpop.eup %13772 }
 0xaad   :  { %v8244_v18 = vpop.f32.mrb[201].mxu1  ;;  %11358 = vmatprep.mubr.bf16.mxu0 %v14114_v26 }
 0xaae   :  { %v8246_v4 = vpop.f32.mrb[202].mxu1  ;;  %v13775_v10 = vpop.eup %13774 }
 0xaaf   :  { %v8248_v33 = vpop.f32.mrb[203].mxu1  ;;  %v11144_v0 = vpop.f32.mrb[116].mxu0  ;;  %v11670_v63 = vpack.c.bf16 %v13775_v10, %v13773_v38 }
 0xab0   :  { %v12965_v56 = vadd.f32 %v16526_v41, %v11144_v0  ;;  %v11146_v7 = vpop.f32.mrb[117].mxu0 }
 0xab1   :  { %v11147_v55 = vpop.f32.mrb[118].mxu0  ;;  %12865 = vmatprep.subr.bf16.mxu1 %v11670_v63 }
 0xab2   :  { %v12966_v50 = vadd.f32 %v16526_v41, %v11147_v55  ;;  %v11149_v44 = vpop.f32.mrb[119].mxu0  ;;  %12866 = vmatpush3.bf16.xpose.msra.mxu1 %v11662_v5  ;;  %13780 = vtanh.f32 %v12965_v56 }
 0xab4   :  { %13782 = vtanh.f32 %v12966_v50  ;;  %11359 = vmatmul.mubr.bf16.gmra.mrb[224].mxu0 %v14114_v26  ;;  %v13777_v36 = vpop.eup %13776 }
 0xab5   :  { %11366 = vmatprep.mubr.bf16.mxu0 %v14114_v26 }
 0xab6   :  { %v13779_v57 = vpop.eup %13778 }
 0xab7   :  { %v11152_v13 = vpop.f32.mrb[120].mxu0  ;;  %v11671_v52 = vpack.c.bf16 %v13779_v57, %v13777_v36 }
 0xab8   :  { %v12967_v19 = vadd.f32 %v16526_v41, %v11152_v13  ;;  %v11154_v43 = vpop.f32.mrb[121].mxu0 }
 0xab9   :  { %v11155_v37 = vpop.f32.mrb[122].mxu0  ;;  %12867 = vmatprep.subr.bf16.mxu1 %v11671_v52 }
 0xaba   :  { %v12968_v53 = vadd.f32 %v16526_v41, %v11155_v37  ;;  %v11157_v9 = vpop.f32.mrb[123].mxu0  ;;  %12868 = vmatpush3.bf16.xpose.msra.mxu1 %v11663_v46  ;;  %13784 = vtanh.f32 %v12967_v19 }
 0xabc   :  { %13786 = vtanh.f32 %v12968_v53  ;;  %11367 = vmatmul.mubr.bf16.gmra.mrb[228].mxu0 %v14114_v26  ;;  %v16678_v32 = vpop.eup %13780 }
 0xabd   :  { %11374 = vmatprep.mubr.bf16.mxu0 %v14114_v26 }
 0xabe   :  { %v16681_v40 = vpop.eup %13782 }
 0xabf   :  { %v11160_v5 = vpop.f32.mrb[124].mxu0  ;;  %v11672_v2 = vpack.c.bf16 %v16681_v40, %v16678_v32 }
 0xac0   :  { %v12969_v61 = vadd.f32 %v16526_v41, %v11160_v5  ;;  %v11162_v58 = vpop.f32.mrb[125].mxu0 }
 0xac1   :  { %v11163_v17 = vpop.f32.mrb[126].mxu0  ;;  %12870 = vmatmul.mubr.bf16.vlgmr.msra.gmra.mrb[204].mxu1 %v16546_v28 }
 0xac2   :  { %v12970_v31 = vadd.f32 %v16526_v41, %v11163_v17  ;;  %v11165_v29 = vpop.f32.mrb[127].mxu0  ;;  %12887 = vmatprep.mubr.bf16.mxu1 %v16546_v28  ;;  %13788 = vtanh.f32 %v12969_v61 }
 0xac4   :  { %13790 = vtanh.f32 %v12970_v31  ;;  %11375 = vmatmul.mubr.bf16.gmra.mrb[232].mxu0 %v14114_v26  ;;  %v16690_v46 = vpop.eup %13784 }
 0xac5   :  { %11382 = vmatprep.mubr.bf16.mxu0 %v14114_v26 }
 0xac6   :  { %v16693_v12 = vpop.eup %13786 }
 0xac7   :  { %v11168_v51 = vpop.f32.mrb[128].mxu0  ;;  %v11673_v23 = vpack.c.bf16 %v16693_v12, %v16690_v46  ;;  %v14115_v12 = vmov -1e+30  }
 0xac8   :  { %v12971_v25 = vadd.f32 %v16526_v41, %v11168_v51  ;;  %v11170_v20 = vpop.f32.mrb[129].mxu0  ;;  %101 = vst.msk [vmem:[#allocation9] sm:$0x1] %vm100_vm2, %v14115_v12 }
 0xac9   :  { %v11171_v59 = vpop.f32.mrb[130].mxu0 }
 0xaca   :  { %v12972_v28 = vadd.f32 %v16526_v41, %v11171_v59  ;;  %v11173_v24 = vpop.f32.mrb[131].mxu0  ;;  %13792 = vtanh.f32 %v12971_v25 }
 0xacc   :  { %13794 = vtanh.f32 %v12972_v28  ;;  %11383 = vmatmul.mubr.bf16.gmra.mrb[236].mxu0 %v14114_v26  ;;  %v16700_v39 = vpop.eup %13788 }
 0xacd   :  { %11390 = vmatprep.mubr.bf16.mxu0 %v14114_v26 }
 0xace   :  { %v16703_v47 = vpop.eup %13790 }
 0xacf   :  { %v11176_v14 = vpop.f32.mrb[132].mxu0  ;;  %v11674_v48 = vpack.c.bf16 %v16703_v47, %v16700_v39 }
 0xad0   :  { %v12973_v22 = vadd.f32 %v16526_v41, %v11176_v14  ;;  %v11178_v60 = vpop.f32.mrb[133].mxu0 }
 0xad1   :  { %v11179_v30 = vpop.f32.mrb[134].mxu0 }
 0xad2   :  { %v12974_v16 = vadd.f32 %v16526_v41, %v11179_v30  ;;  %v11181_v15 = vpop.f32.mrb[135].mxu0  ;;  %13796 = vtanh.f32 %v12973_v22 }
 0xad4   :  { %13798 = vtanh.f32 %v12974_v16  ;;  %11391 = vmatmul.mubr.bf16.gmra.mrb[240].mxu0 %v14114_v26  ;;  %v16710_v62 = vpop.eup %13792 }
 0xad5   :  { %11398 = vmatprep.mubr.bf16.mxu0 %v14114_v26 }
 0xad6   :  { %v16713_v54 = vpop.eup %13794 }
 0xad7   :  { %v11184_v27 = vpop.f32.mrb[136].mxu0  ;;  %v11675_v3 = vpack.c.bf16 %v16713_v54, %v16710_v62 }
 0xad8   :  { %v12975_v11 = vadd.f32 %v16526_v41, %v11184_v27  ;;  %v11186_v49 = vpop.f32.mrb[137].mxu0 }
 0xad9   :  { %v11187_v18 = vpop.f32.mrb[138].mxu0 }
 0xada   :  { %v12976_v38 = vadd.f32 %v16526_v41, %v11187_v18  ;;  %v11189_v4 = vpop.f32.mrb[139].mxu0  ;;  %13800 = vtanh.f32 %v12975_v11 }
 0xadc   :  { %13802 = vtanh.f32 %v12976_v38  ;;  %11399 = vmatmul.mubr.bf16.gmra.mrb[244].mxu0 %v14114_v26  ;;  %v16720_v10 = vpop.eup %13796 }
 0xadd   :  { %11406 = vmatprep.mubr.bf16.mxu0 %v14114_v26 }
 0xade   :  { %v16723_v33 = vpop.eup %13798 }
 0xadf   :  { %v11192_v0 = vpop.f32.mrb[140].mxu0  ;;  %v11676_v63 = vpack.c.bf16 %v16723_v33, %v16720_v10 }
 0xae0   :  { %v12977_v56 = vadd.f32 %v16526_v41, %v11192_v0  ;;  %v11194_v7 = vpop.f32.mrb[141].mxu0 }
 0xae1   :  { %v11195_v55 = vpop.f32.mrb[142].mxu0 }
 0xae2   :  { %v12978_v50 = vadd.f32 %v16526_v41, %v11195_v55  ;;  %v11197_v44 = vpop.f32.mrb[143].mxu0  ;;  %13804 = vtanh.f32 %v12977_v56 }
 0xae4   :  { %13806 = vtanh.f32 %v12978_v50  ;;  %11407 = vmatmul.mubr.bf16.gmra.mrb[248].mxu0 %v14114_v26  ;;  %v16730_v36 = vpop.eup %13800 }
 0xae5   :  { %11414 = vmatprep.mubr.bf16.mxu0 %v14114_v26 }
 0xae6   :  { %v16733_v57 = vpop.eup %13802 }
 0xae7   :  { %v11200_v13 = vpop.f32.mrb[144].mxu0  ;;  %v11677_v52 = vpack.c.bf16 %v16733_v57, %v16730_v36 }
 0xae8   :  { %v12979_v19 = vadd.f32 %v16526_v41, %v11200_v13  ;;  %v11202_v43 = vpop.f32.mrb[145].mxu0 }
 0xae9   :  { %v11203_v37 = vpop.f32.mrb[146].mxu0 }
 0xaea   :  { %v12980_v53 = vadd.f32 %v16526_v41, %v11203_v37  ;;  %v11205_v9 = vpop.f32.mrb[147].mxu0  ;;  %13808 = vtanh.f32 %v12979_v19 }
 0xaec   :  { %13810 = vtanh.f32 %v12980_v53  ;;  %11415 = vmatmul.mubr.bf16.gmra.mrb[252].mxu0 %v14114_v26  ;;  %v16740_v5 = vpop.eup %13804 }
 0xaed   :  { %11422 = vmatprep.mubr.bf16.mxu0 %v14114_v26 }
 0xaee   :  { %v16743_v61 = vpop.eup %13806 }
 0xaef   :  { %v11208_v58 = vpop.f32.mrb[148].mxu0  ;;  %v11678_v17 = vpack.c.bf16 %v16743_v61, %v16740_v5 }
 0xaf0   :  { %v12981_v31 = vadd.f32 %v16526_v41, %v11208_v58  ;;  %v11210_v29 = vpop.f32.mrb[149].mxu0 }
 0xaf1   :  { %v11211_v51 = vpop.f32.mrb[150].mxu0 }
 0xaf2   :  { %v12982_v25 = vadd.f32 %v16526_v41, %v11211_v51  ;;  %v11213_v20 = vpop.f32.mrb[151].mxu0  ;;  %13812 = vtanh.f32 %v12981_v31 }
 0xaf4   :  { %13814 = vtanh.f32 %v12982_v25  ;;  %11423 = vmatmul.mubr.bf16.gmra.mrb[0].mxu0 %v14114_v26  ;;  %v16750_v59 = vpop.eup %13808 }
 0xaf5   :  { %11430 = vmatprep.mubr.bf16.mxu0 %v14114_v26 }
 0xaf6   :  { %v16753_v28 = vpop.eup %13810 }
 0xaf7   :  { %v11216_v24 = vpop.f32.mrb[152].mxu0  ;;  %v11679_v14 = vpack.c.bf16 %v16753_v28, %v16750_v59  ;;  %v16836_v59 = vld [vmem:[%s17133_s5] sm:$0x1] }
 0xaf8   :  { %v12983_v22 = vadd.f32 %v16526_v41, %v11216_v24  ;;  %v11218_v60 = vpop.f32.mrb[153].mxu0 }
 0xaf9   :  { %v11219_v30 = vpop.f32.mrb[154].mxu0 }
 0xafa   :  { %v12984_v16 = vadd.f32 %v16526_v41, %v11219_v30  ;;  %v11221_v15 = vpop.f32.mrb[155].mxu0  ;;  %13816 = vtanh.f32 %v12983_v22 }
 0xafc   :  { %13818 = vtanh.f32 %v12984_v16  ;;  %11431 = vmatmul.mubr.bf16.gmra.mrb[4].mxu0 %v14114_v26  ;;  %v13813_v27 = vpop.eup %13812 }
 0xafd   :  { %11438 = vmatprep.mubr.bf16.mxu0 %v14114_v26 }
 0xafe   :  { %v13815_v11 = vpop.eup %13814 }
 0xaff   :  { %v11224_v49 = vpop.f32.mrb[156].mxu0  ;;  %v11680_v18 = vpack.c.bf16 %v13815_v11, %v13813_v27 }
 0xb00   :  { %v12985_v38 = vadd.f32 %v16526_v41, %v11224_v49  ;;  %v11226_v4 = vpop.f32.mrb[157].mxu0 }
 0xb01   :  { %v11227_v0 = vpop.f32.mrb[158].mxu0  ;;  %12871 = vmatprep.subr.bf16.mxu1 %v11680_v18 }
 0xb02   :  { %v12986_v56 = vadd.f32 %v16526_v41, %v11227_v0  ;;  %v11229_v7 = vpop.f32.mrb[159].mxu0  ;;  %12872 = vmatpush3.bf16.xpose.msra.mxu1 %v11672_v2  ;;  %13820 = vtanh.f32 %v12985_v38 }
 0xb04   :  { %13822 = vtanh.f32 %v12986_v56  ;;  %11439 = vmatmul.mubr.bf16.gmra.mrb[8].mxu0 %v14114_v26  ;;  %v13817_v55 = vpop.eup %13816 }
 0xb05   :  { %11446 = vmatprep.mubr.bf16.mxu0 %v14114_v26 }
 0xb06   :  { %v13819_v50 = vpop.eup %13818 }
 0xb07   :  { %v11232_v44 = vpop.f32.mrb[160].mxu0  ;;  %v11681_v13 = vpack.c.bf16 %v13819_v50, %v13817_v55 }
 0xb08   :  { %v12987_v19 = vadd.f32 %v16526_v41, %v11232_v44  ;;  %v11234_v43 = vpop.f32.mrb[161].mxu0 }
 0xb09   :  { %v11235_v37 = vpop.f32.mrb[162].mxu0  ;;  %12873 = vmatprep.subr.bf16.mxu1 %v11681_v13 }
 0xb0a   :  { %v12988_v53 = vadd.f32 %v16526_v41, %v11235_v37  ;;  %v11237_v9 = vpop.f32.mrb[163].mxu0  ;;  %12874 = vmatpush3.bf16.xpose.msra.mxu1 %v11673_v23  ;;  %13824 = vtanh.f32 %v12987_v19  ;;  %v16810_v19 = vld [vmem:[%s17132_s4] ss:$0 sm:$0xff] }
 0xb0c   :  { %13826 = vtanh.f32 %v12988_v53  ;;  %11447 = vmatmul.mubr.bf16.gmra.mrb[12].mxu0 %v14114_v26  ;;  %v13821_v32 = vpop.eup %13820 }
 0xb0d   :  { %11454 = vmatprep.mubr.bf16.mxu0 %v14114_v26 }
 0xb0e   :  { %v13823_v40 = vpop.eup %13822 }
 0xb0f   :  { %v11240_v2 = vpop.f32.mrb[164].mxu0  ;;  %v11682_v58 = vpack.c.bf16 %v13823_v40, %v13821_v32 }
 0xb10   :  { %v12989_v31 = vadd.f32 %v16526_v41, %v11240_v2  ;;  %v11242_v29 = vpop.f32.mrb[165].mxu0 }
 0xb11   :  { %v11243_v51 = vpop.f32.mrb[166].mxu0  ;;  %12875 = vmatprep.subr.bf16.mxu1 %v11682_v58 }
 0xb12   :  { %v12990_v25 = vadd.f32 %v16526_v41, %v11243_v51  ;;  %v11245_v20 = vpop.f32.mrb[167].mxu0  ;;  %12876 = vmatpush3.bf16.xpose.msra.mxu1 %v11674_v48  ;;  %13828 = vtanh.f32 %v12989_v31 }
 0xb14   :  { %13830 = vtanh.f32 %v12990_v25  ;;  %11455 = vmatmul.mubr.bf16.gmra.mrb[16].mxu0 %v14114_v26  ;;  %v13825_v46 = vpop.eup %13824 }
 0xb15   :  { %11462 = vmatprep.mubr.bf16.mxu0 %v14114_v26 }
 0xb16   :  { %v13827_v23 = vpop.eup %13826 }
 0xb17   :  { %v11248_v24 = vpop.f32.mrb[168].mxu0  ;;  %v11683_v22 = vpack.c.bf16 %v13827_v23, %v13825_v46 }
 0xb18   :  { %v12991_v39 = vadd.f32 %v16526_v41, %v11248_v24  ;;  %v11250_v47 = vpop.f32.mrb[169].mxu0 }
 0xb19   :  { %v11251_v48 = vpop.f32.mrb[170].mxu0  ;;  %12877 = vmatprep.subr.bf16.mxu1 %v11683_v22 }
 0xb1a   :  { %v12992_v60 = vadd.f32 %v16526_v41, %v11251_v48  ;;  %v11253_v30 = vpop.f32.mrb[171].mxu0  ;;  %12878 = vmatpush3.bf16.xpose.msra.mxu1 %v11675_v3  ;;  %13832 = vtanh.f32 %v12991_v39 }
 0xb1c   :  { %13834 = vtanh.f32 %v12992_v60  ;;  %11463 = vmatmul.mubr.bf16.gmra.mrb[20].mxu0 %v14114_v26  ;;  %v13829_v1 = vpop.eup %13828 }
 0xb1d   :  { %11470 = vmatprep.mubr.bf16.mxu0 %v14114_v26 }
 0xb1e   :  { %v13831_v16 = vpop.eup %13830 }
 0xb1f   :  { %v11256_v15 = vpop.f32.mrb[172].mxu0  ;;  %v11684_v27 = vpack.c.bf16 %v13831_v16, %v13829_v1 }
 0xb20   :  { %v12993_v11 = vadd.f32 %v16526_v41, %v11256_v15  ;;  %v11258_v49 = vpop.f32.mrb[173].mxu0 }
 0xb21   :  { %v11259_v18 = vpop.f32.mrb[174].mxu0  ;;  %12879 = vmatprep.subr.bf16.mxu1 %v11684_v27 }
 0xb22   :  { %v12994_v38 = vadd.f32 %v16526_v41, %v11259_v18  ;;  %v11261_v4 = vpop.f32.mrb[175].mxu0  ;;  %12880 = vmatpush3.bf16.xpose.msra.mxu1 %v11676_v63  ;;  %13836 = vtanh.f32 %v12993_v11 }
 0xb24   :  { %13838 = vtanh.f32 %v12994_v38  ;;  %11471 = vmatmul.mubr.bf16.gmra.mrb[24].mxu0 %v14114_v26  ;;  %v13833_v62 = vpop.eup %13832 }
 0xb25   :  { %11478 = vmatprep.mubr.bf16.mxu0 %v14114_v26 }
 0xb26   :  { %v13835_v54 = vpop.eup %13834 }
 0xb27   :  { %v11264_v3 = vpop.f32.mrb[176].mxu0  ;;  %v11685_v0 = vpack.c.bf16 %v13835_v54, %v13833_v62 }
 0xb28   :  { %v12995_v56 = vadd.f32 %v16526_v41, %v11264_v3  ;;  %v11266_v7 = vpop.f32.mrb[177].mxu0 }
 0xb29   :  { %v11267_v55 = vpop.f32.mrb[178].mxu0  ;;  %12881 = vmatprep.subr.bf16.mxu1 %v11685_v0 }
 0xb2a   :  { %v12996_v50 = vadd.f32 %v16526_v41, %v11267_v55  ;;  %v11269_v44 = vpop.f32.mrb[179].mxu0  ;;  %12882 = vmatpush3.bf16.xpose.msra.mxu1 %v11677_v52  ;;  %13840 = vtanh.f32 %v12995_v56 }
 0xb2c   :  { %13842 = vtanh.f32 %v12996_v50  ;;  %11479 = vmatmul.mubr.bf16.gmra.mrb[28].mxu0 %v14114_v26  ;;  %v13837_v10 = vpop.eup %13836 }
 0xb2d   :  { %11486 = vmatprep.mubr.bf16.mxu0 %v14114_v26 }
 0xb2e   :  { %v13839_v33 = vpop.eup %13838 }
 0xb2f   :  { %v11272_v63 = vpop.f32.mrb[180].mxu0  ;;  %v11686_v13 = vpack.c.bf16 %v13839_v33, %v13837_v10 }
 0xb30   :  { %v12997_v41 = vadd.f32 %v16810_v19, %v11272_v63  ;;  %v11274_v43 = vpop.f32.mrb[181].mxu0 }
 0xb31   :  { %v11275_v36 = vpop.f32.mrb[182].mxu0  ;;  %12883 = vmatprep.subr.bf16.mxu1 %v11686_v13 }
 0xb32   :  { %v12998_v57 = vadd.f32 %v16810_v19, %v11275_v36  ;;  %v11277_v52 = vpop.f32.mrb[183].mxu0  ;;  %12884 = vmatpush3.bf16.xpose.msra.mxu1 %v11678_v17  ;;  %13844 = vtanh.f32 %v12997_v41 }
 0xb34   :  { %13846 = vtanh.f32 %v12998_v57  ;;  %11487 = vmatmul.mubr.bf16.gmra.mrb[32].mxu0 %v14114_v26  ;;  %v13841_v37 = vpop.eup %13840 }
 0xb35   :  { %11494 = vmatprep.mubr.bf16.mxu0 %v14114_v26 }
 0xb36   :  { %v13843_v53 = vpop.eup %13842 }
 0xb37   :  { %v11280_v9 = vpop.f32.mrb[184].mxu0  ;;  %v11687_v32 = vpack.c.bf16 %v13843_v53, %v13841_v37 }
 0xb38   :  { %v12999_v40 = vadd.f32 %v16810_v19, %v11280_v9  ;;  %v11282_v2 = vpop.f32.mrb[185].mxu0 }
 0xb39   :  { %v11283_v58 = vpop.f32.mrb[186].mxu0  ;;  %12885 = vmatprep.subr.bf16.mxu1 %v11687_v32 }
 0xb3a   :  { %v13000_v31 = vadd.f32 %v16810_v19, %v11283_v58  ;;  %v11285_v29 = vpop.f32.mrb[187].mxu0  ;;  %12886 = vmatpush3.bf16.xpose.msra.mxu1 %v11679_v14  ;;  %13848 = vtanh.f32 %v12999_v40 }
 0xb3c   :  { %13850 = vtanh.f32 %v13000_v31  ;;  %11495 = vmatmul.mubr.bf16.gmra.mrb[36].mxu0 %v14114_v26  ;;  %v16825_v5 = vpop.eup %13844 }
 0xb3d   :  { %11502 = vmatprep.mubr.bf16.mxu0 %v14114_v26 }
 0xb3e   :  { %v16828_v61 = vpop.eup %13846 }
 0xb3f   :  { %v11288_v17 = vpop.f32.mrb[188].mxu0  ;;  %v11688_v51 = vpack.c.bf16 %v16828_v61, %v16825_v5 }
 0xb40   :  { %v13001_v25 = vadd.f32 %v16810_v19, %v11288_v17  ;;  %v11290_v20 = vpop.f32.mrb[189].mxu0 }
 0xb41   :  { %v11291_v46 = vpop.f32.mrb[190].mxu0  ;;  %12888 = vmatmul.mubr.bf16.vlgmr.msra.gmra.mrb[208].mxu1 %v16836_v59 }
 0xb42   :  { %v13002_v28 = vadd.f32 %v16810_v19, %v11291_v46  ;;  %v11293_v14 = vpop.f32.mrb[191].mxu0  ;;  %12905 = vmatprep.mubr.bf16.mxu1 %v16836_v59  ;;  %13852 = vtanh.f32 %v13001_v25 }
 0xb44   :  { %13854 = vtanh.f32 %v13002_v28  ;;  %11503 = vmatmul.mubr.bf16.gmra.mrb[40].mxu0 %v14114_v26  ;;  %v16842_v23 = vpop.eup %13848 }
 0xb45   :  { %11510 = vmatprep.mubr.bf16.mxu0 %v14114_v26 }
 0xb46   :  { %v16845_v24 = vpop.eup %13850 }
 0xb47   :  { %v11296_v22 = vpop.f32.mrb[192].mxu0  ;;  %v11689_v39 = vpack.c.bf16 %v16845_v24, %v16842_v23 }
 0xb48   :  { %v13003_v47 = vadd.f32 %v16810_v19, %v11296_v22  ;;  %v11298_v48 = vpop.f32.mrb[193].mxu0 }
 0xb49   :  { %v11299_v60 = vpop.f32.mrb[194].mxu0 }
 0xb4a   :  { %v13004_v30 = vadd.f32 %v16810_v19, %v11299_v60  ;;  %v11301_v1 = vpop.f32.mrb[195].mxu0  ;;  %13856 = vtanh.f32 %v13003_v47 }
 0xb4c   :  { %13858 = vtanh.f32 %v13004_v30  ;;  %11511 = vmatmul.mubr.bf16.gmra.mrb[44].mxu0 %v14114_v26  ;;  %v16852_v16 = vpop.eup %13852 }
 0xb4d   :  { %11518 = vmatprep.mubr.bf16.mxu0 %v14114_v26 }
 0xb4e   :  { %v16855_v15 = vpop.eup %13854 }
 0xb4f   :  { %v11304_v27 = vpop.f32.mrb[196].mxu0  ;;  %v11690_v11 = vpack.c.bf16 %v16855_v15, %v16852_v16 }
 0xb50   :  { %v13005_v49 = vadd.f32 %v16810_v19, %v11304_v27  ;;  %v11306_v18 = vpop.f32.mrb[197].mxu0 }
 0xb51   :  { %v11307_v38 = vpop.f32.mrb[198].mxu0 }
 0xb52   :  { %v13006_v4 = vadd.f32 %v16810_v19, %v11307_v38  ;;  %v11309_v62 = vpop.f32.mrb[199].mxu0  ;;  %13860 = vtanh.f32 %v13005_v49 }
 0xb54   :  { %13862 = vtanh.f32 %v13006_v4  ;;  %11519 = vmatmul.mubr.bf16.gmra.mrb[48].mxu0 %v14114_v26  ;;  %v16862_v54 = vpop.eup %13856 }
 0xb56   :  { %v16864_v3 = vpop.eup %13858 }
 0xb57   :  { %v11312_v0 = vpop.f32.mrb[200].mxu0  ;;  %v11691_v56 = vpack.c.bf16 %v16864_v3, %v16862_v54 }
 0xb58   :  { %v13007_v7 = vadd.f32 %v16810_v19, %v11312_v0  ;;  %v11314_v55 = vpop.f32.mrb[201].mxu0 }
 0xb59   :  { %v11315_v50 = vpop.f32.mrb[202].mxu0 }
 0xb5a   :  { %v13008_v44 = vadd.f32 %v16810_v19, %v11315_v50  ;;  %v11317_v10 = vpop.f32.mrb[203].mxu0  ;;  %13864 = vtanh.f32 %v13007_v7 }
 0xb5c   :  { %13866 = vtanh.f32 %v13008_v44  ;;  %v16870_v33 = vpop.eup %13860 }
 0xb5e   :  { %v16872_v63 = vpop.eup %13862 }
 0xb5f   :  { %v11320_v13 = vpop.f32.mrb[204].mxu0  ;;  %v11692_v41 = vpack.c.bf16 %v16872_v63, %v16870_v33 }
 0xb60   :  { %v13009_v43 = vadd.f32 %v16810_v19, %v11320_v13  ;;  %v11322_v36 = vpop.f32.mrb[205].mxu0 }
 0xb61   :  { %v11323_v57 = vpop.f32.mrb[206].mxu0 }
 0xb62   :  { %v13010_v52 = vadd.f32 %v16810_v19, %v11323_v57  ;;  %v11325_v37 = vpop.f32.mrb[207].mxu0  ;;  %13868 = vtanh.f32 %v13009_v43 }
 0xb64   :  { %13870 = vtanh.f32 %v13010_v52  ;;  %v16878_v53 = vpop.eup %13864 }
 0xb66   :  { %v16880_v9 = vpop.eup %13866 }
 0xb67   :  { %v11328_v32 = vpop.f32.mrb[208].mxu0  ;;  %v11693_v40 = vpack.c.bf16 %v16880_v9, %v16878_v53 }
 0xb68   :  { %v13011_v2 = vadd.f32 %v16810_v19, %v11328_v32  ;;  %v11330_v58 = vpop.f32.mrb[209].mxu0 }
 0xb69   :  { %v11331_v31 = vpop.f32.mrb[210].mxu0 }
 0xb6a   :  { %v13012_v29 = vadd.f32 %v16810_v19, %v11331_v31  ;;  %v11333_v17 = vpop.f32.mrb[211].mxu0  ;;  %13872 = vtanh.f32 %v13011_v2 }
 0xb6c   :  { %13874 = vtanh.f32 %v13012_v29  ;;  %v16886_v25 = vpop.eup %13868  ;;  %v14116_v29 = vmov 1966171168  }
 0xb6d   :  { %v11941_v17 = vunpack.c.l.s4 %v14116_v29 }
 0xb6e   :  { %v16888_v20 = vpop.eup %13870 }
 0xb6f   :  { %v11336_v46 = vpop.f32.mrb[212].mxu0  ;;  %v11694_v28 = vpack.c.bf16 %v16888_v20, %v16886_v25  ;;  %v11942_v5 = vunpack.c.0.s8 %v11941_v17 }
 0xb70   :  { %v13013_v14 = vadd.f32 %v16810_v19, %v11336_v46  ;;  %v11338_v22 = vpop.f32.mrb[213].mxu0 }
 0xb71   :  { %v11339_v47 = vpop.f32.mrb[214].mxu0 }
 0xb72   :  { %v13014_v48 = vadd.f32 %v16810_v19, %v11339_v47  ;;  %v11341_v60 = vpop.f32.mrb[215].mxu0  ;;  %13876 = vtanh.f32 %v13013_v14  ;;  %v11749_v47 = vpop.permute.xlu0 %11748 }
 0xb73   :  { %v11754_v24 = vrot.slane %v11749_v47, %v16069_v35 }
 0xb74   :  { %13878 = vtanh.f32 %v13014_v48  ;;  %v16894_v30 = vpop.eup %13872 }
 0xb76   :  { %v16896_v1 = vpop.eup %13874 }
 0xb77   :  { %v11344_v27 = vpop.f32.mrb[216].mxu0  ;;  %v11695_v49 = vpack.c.bf16 %v16896_v1, %v16894_v30 }
 0xb78   :  { %v13015_v18 = vadd.f32 %v16810_v19, %v11344_v27  ;;  %v11346_v38 = vpop.f32.mrb[217].mxu0 }
 0xb79   :  { %v11347_v4 = vpop.f32.mrb[218].mxu0  ;;  %v11721_v38 = vand.u32 127, %v17768_v34 }
 0xb7a   :  { %v13016_v62 = vadd.f32 %v16810_v19, %v11347_v4  ;;  %v11349_v0 = vpop.f32.mrb[219].mxu0  ;;  %13880 = vtanh.f32 %v13015_v18  ;;  %v11937_v4 = vcombine.low %v14115_v12, %v14115_v12 }
 0xb7b   :  { %vm11737_vm4 = vcmp.lt.s32.totalorder %v11721_v38, 8 }
 0xb7c   :  { %13882 = vtanh.f32 %v13016_v62  ;;  %v13877_v7 = vpop.eup %13876  ;;  %v16917_v62 = vsub.s32 %v11942_v5, %v16065_v42 }
 0xb7e   :  { %v13879_v55 = vpop.eup %13878 }
 0xb7f   :  { %v11352_v50 = vpop.f32.mrb[220].mxu0  ;;  %v11696_v44 = vpack.c.bf16 %v13879_v55, %v13877_v7  ;;  %v11953_v7 = vrot.slane %v11937_v4, %v16917_v62 }
 0xb80   :  { %v13017_v10 = vadd.f32 %v16810_v19, %v11352_v50  ;;  %v11354_v13 = vpop.f32.mrb[221].mxu0 }
 0xb81   :  { %v11355_v43 = vpop.f32.mrb[222].mxu0  ;;  %12889 = vmatprep.subr.bf16.mxu1 %v11696_v44 }
 0xb82   :  { %v13018_v36 = vadd.f32 %v16810_v19, %v11355_v43  ;;  %v11357_v57 = vpop.f32.mrb[223].mxu0  ;;  %12890 = vmatpush3.bf16.xpose.msra.mxu1 %v11688_v51  ;;  %13884 = vtanh.f32 %v13017_v10  ;;  %v14117_v10 = vmov -inf  }
 0xb83   :  { %v11993_v13 = vsel %vm11991_vm3, -1e+30, %v14117_v10 }
 0xb84   :  { %13886 = vtanh.f32 %v13018_v36  ;;  %v13881_v52 = vpop.eup %13880 }
 0xb86   :  { %v13883_v37 = vpop.eup %13882 }
 0xb87   :  { %v11360_v32 = vpop.f32.mrb[224].mxu0  ;;  %v11697_v2 = vpack.c.bf16 %v13883_v37, %v13881_v52  ;;  %v11969_v52 = vcombine.low %v11953_v7, %v11953_v7 }
 0xb88   :  { %v13019_v58 = vadd.f32 %v16810_v19, %v11360_v32  ;;  %v11362_v31 = vpop.f32.mrb[225].mxu0 }
 0xb89   :  { %v11363_v46 = vpop.f32.mrb[226].mxu0  ;;  %12891 = vmatprep.subr.bf16.mxu1 %v11697_v2 }
 0xb8a   :  { %v13020_v14 = vadd.f32 %v16810_v19, %v11363_v46  ;;  %v11365_v22 = vpop.f32.mrb[227].mxu0  ;;  %12892 = vmatpush3.bf16.xpose.msra.mxu1 %v11689_v39  ;;  %13888 = vtanh.f32 %v13019_v58 }
 0xb8b   :  { %v11983_v22 = vrot.slane %v11969_v52, %v16917_v62 }
 0xb8c   :  { %13890 = vtanh.f32 %v13020_v14  ;;  %v13885_v61 = vpop.eup %13884 }
 0xb8e   :  { %v13887_v51 = vpop.eup %13886 }
 0xb8f   :  { %v11368_v48 = vpop.f32.mrb[228].mxu0  ;;  %v11698_v60 = vpack.c.bf16 %v13887_v51, %v13885_v61 }
 0xb90   :  { %v13021_v27 = vadd.f32 %v16810_v19, %v11368_v48  ;;  %v11370_v18 = vpop.f32.mrb[229].mxu0 }
 0xb91   :  { %v11371_v23 = vpop.f32.mrb[230].mxu0  ;;  %12893 = vmatprep.subr.bf16.mxu1 %v11698_v60 }
 0xb92   :  { %v13022_v39 = vadd.f32 %v16810_v19, %v11371_v23  ;;  %v11373_v0 = vpop.f32.mrb[231].mxu0  ;;  %12894 = vmatpush3.bf16.xpose.msra.mxu1 %v11690_v11  ;;  %13892 = vtanh.f32 %v13021_v27 }
 0xb94   :  { %13894 = vtanh.f32 %v13022_v39  ;;  %v11789_v34 = vpop.f32.mrb[204].mxu1  ;;  %v13889_v42 = vpop.eup %13888 }
 0xb95   :  { %v11790_v55 = vadd.f32 %v11789_v34, %v11754_v24  ;;  %v11791_v50 = vpop.f32.mrb[205].mxu1 }
 0xb96   :  { %v13891_v44 = vpop.eup %13890  ;;  %v11793_v43 = vpop.f32.mrb[206].mxu1 }
 0xb97   :  { %v16926_v36 = vsel %vm11737_vm4, %v11790_v55, -1e+30  ;;  %v11376_v57 = vpop.f32.mrb[232].mxu0  ;;  %v11699_v16 = vpack.c.bf16 %v13891_v44, %v13889_v42  ;;  %v11794_v15 = vpop.f32.mrb[207].mxu1 }
 0xb98   :  { %v11936_v11 = vcombine.low %v16926_v36, %v14115_v12  ;;  %v11992_v37 = vsel %vm11991_vm3, %v16926_v36, -inf  ;;  %v13023_v32 = vadd.f32 %v16810_v19, %v11376_v57  ;;  %v11378_v2 = vpop.f32.mrb[233].mxu0 }
 0xb99   :  { %v11379_v58 = vpop.f32.mrb[234].mxu0  ;;  %12895 = vmatprep.subr.bf16.mxu1 %v11699_v16  ;;  %v11997_v31 = vmax.f32 %v11992_v37, %v11993_v13 }
 0xb9a   :  { %v11946_v29 = vrot.slane %v11936_v11, %v16917_v62  ;;  %v13024_v17 = vadd.f32 %v16810_v19, %v11379_v58  ;;  %v11381_v46 = vpop.f32.mrb[235].mxu0  ;;  %12896 = vmatpush3.bf16.xpose.msra.mxu1 %v11691_v56  ;;  %13896 = vtanh.f32 %v13023_v32 }
 0xb9b   :  { %v12004_v12 = vmax.f32 %v11997_v31, %v11993_v13 }
 0xb9c   :  { %v11968_v14 = vcombine.low %v11946_v29, %v11953_v7  ;;  %13898 = vtanh.f32 %v13024_v17  ;;  %v13893_v5 = vpop.eup %13892 }
 0xb9d   :  { %v12006_v61 = vmax.f32 %v12004_v12, %v11993_v13 }
 0xb9e   :  { %v13895_v51 = vpop.eup %13894  ;;  %v11976_v47 = vrot.slane %v11968_v14, %v16917_v62 }
 0xb9f   :  { %v11384_v48 = vpop.f32.mrb[236].mxu0  ;;  %12007 = vmax.xlane.f32.xlu0 %v12006_v61  ;;  %v11700_v60 = vpack.c.bf16 %v13895_v51, %v13893_v5 }
 0xba0   :  { %v11984_v27 = vcombine.low %v11976_v47, %v11983_v22  ;;  %v13025_v18 = vadd.f32 %v16810_v19, %v11384_v48  ;;  %v11386_v38 = vpop.f32.mrb[237].mxu0 }
 0xba1   :  { %v11387_v54 = vpop.f32.mrb[238].mxu0  ;;  %12897 = vmatprep.subr.bf16.mxu1 %v11700_v60 }
 0xba2   :  { %11989 = vst [vmem:[%s17135_s7] sm:$0xff] %v11984_v27  ;;  %v13026_v3 = vadd.f32 %v16810_v19, %v11387_v54  ;;  %v11389_v56 = vpop.f32.mrb[239].mxu0  ;;  %12898 = vmatpush3.bf16.xpose.msra.mxu1 %v11692_v41  ;;  %13900 = vtanh.f32 %v13025_v18  ;;  %s14118_s7 = smov [#allocation9]  }
 0xba3   :  { %s12459_s24 = sshll.u32 %s14118_s7, 4  ;;  %s12460_s24 = int_to_ptr.vmem [resolvable:$true] %s12459_s24 }
 0xba4   :  { %13902 = vtanh.f32 %v13026_v3  ;;  %v13897_v4 = vpop.eup %13896  ;;  %s14051_s27 = scalar_lea.vmem %s12460_s24, 16  ;;  %s14055_s28 = scalar_lea.vmem %s12460_s24, 32 }
 0xba5   :  { %p14052_p10 = scmp.ne.s32.totalorder %s12460_s24, %s14051_s27  ;;  %p14056_p11 = scmp.lt.s32.totalorder %s12460_s24, %s12460_s24 }
 0xba6   :  { %v13899_v23 = vpop.eup %13898  ;;  %p14057_p12 = scmp.lt.s32.totalorder %s14055_s28, %s14051_s27 }
 0xba7   :  { %v11392_v24 = vpop.f32.mrb[240].mxu0  ;;  %v11701_v39 = vpack.c.bf16 %v13899_v23, %v13897_v4 }
 0xba8   :  { %v13027_v0 = vadd.f32 %v16810_v19, %v11392_v24  ;;  %v11394_v34 = vpop.f32.mrb[241].mxu0  ;;  %p14058_p13 = por %p14057_p12, %p14056_p11 }
 0xba9   :  { %v11395_v7 = vpop.f32.mrb[242].mxu0  ;;  %12899 = vmatprep.subr.bf16.mxu1 %v11701_v39 }
 0xbaa   :  { %v13028_v42 = vadd.f32 %v16810_v19, %v11395_v7  ;;  %v11397_v55 = vpop.f32.mrb[243].mxu0  ;;  %12900 = vmatpush3.bf16.xpose.msra.mxu1 %v11693_v40  ;;  %13904 = vtanh.f32 %v13027_v0  ;;  %p14059_p0 = pnand %p14058_p13, %p14052_p10 }
 0xbac   :  { %13906 = vtanh.f32 %v13028_v42  ;;  %v13901_v33 = vpop.eup %13900 }
 0xbae   :  { %v13903_v63 = vpop.eup %13902 }
 0xbaf   :  { %v11400_v41 = vpop.f32.mrb[244].mxu0  ;;  %v11702_v50 = vpack.c.bf16 %v13903_v63, %v13901_v33 }
 0xbb0   :  { %v13029_v44 = vadd.f32 %v16810_v19, %v11400_v41  ;;  %v11402_v10 = vpop.f32.mrb[245].mxu0 }
 0xbb1   :  { %v11403_v13 = vpop.f32.mrb[246].mxu0  ;;  %12901 = vmatprep.subr.bf16.mxu1 %v11702_v50 }
 0xbb2   :  { %v13030_v43 = vadd.f32 %v16810_v19, %v11403_v13  ;;  %v11405_v57 = vpop.f32.mrb[247].mxu0  ;;  %12902 = vmatpush3.bf16.xpose.msra.mxu1 %v11694_v28  ;;  %13908 = vtanh.f32 %v13029_v44 }
 0xbb4   :  { %13910 = vtanh.f32 %v13030_v43  ;;  %v13905_v53 = vpop.eup %13904 }
 0xbb6   :  { %v13907_v9 = vpop.eup %13906 }
 0xbb7   :  { %v11408_v40 = vpop.f32.mrb[248].mxu0  ;;  %v11703_v16 = vpack.c.bf16 %v13907_v9, %v13905_v53 }
 0xbb8   :  { %v13031_v15 = vadd.f32 %v16810_v19, %v11408_v40  ;;  %v11410_v11 = vpop.f32.mrb[249].mxu0 }
 0xbb9   :  { %v11411_v52 = vpop.f32.mrb[250].mxu0  ;;  %12903 = vmatprep.subr.bf16.mxu1 %v11703_v16 }
 0xbba   :  { %v13032_v37 = vadd.f32 %v16810_v19, %v11411_v52  ;;  %v11413_v32 = vpop.f32.mrb[251].mxu0  ;;  %12904 = vmatpush3.bf16.xpose.msra.mxu1 %v11695_v49  ;;  %13912 = vtanh.f32 %v13031_v15 }
 0xbbc   :  { %13914 = vtanh.f32 %v13032_v37  ;;  %v16963_v25 = vpop.eup %13908 }
 0xbbe   :  { %v16965_v20 = vpop.eup %13910 }
 0xbbf   :  { %v11416_v28 = vpop.f32.mrb[252].mxu0  ;;  %v11704_v2 = vpack.c.bf16 %v16965_v20, %v16963_v25 }
 0xbc0   :  { %v13033_v58 = vadd.f32 %v16810_v19, %v11416_v28  ;;  %v11418_v31 = vpop.f32.mrb[253].mxu0 }
 0xbc1   :  { %v11419_v29 = vpop.f32.mrb[254].mxu0  ;;  %12906 = vmatmul.mubr.bf16.vlgmr.msra.gmra.mrb[212].mxu1 %v16836_v59 }
 0xbc2   :  { %v13034_v17 = vadd.f32 %v16810_v19, %v11419_v29  ;;  %v11421_v30 = vpop.f32.mrb[255].mxu0  ;;  %12923 = vmatprep.mubr.bf16.mxu1 %v16836_v59  ;;  %13916 = vtanh.f32 %v13033_v58 }
 0xbc4   :  { %13918 = vtanh.f32 %v13034_v17  ;;  %v16973_v1 = vpop.eup %13912 }
 0xbc6   :  { %v16975_v49 = vpop.eup %13914 }
 0xbc7   :  { %v11424_v46 = vpop.f32.mrb[0].mxu0  ;;  %v11705_v12 = vpack.c.bf16 %v16975_v49, %v16973_v1 }
 0xbc8   :  { %v13035_v14 = vadd.f32 %v16810_v19, %v11424_v46  ;;  %v11426_v22 = vpop.f32.mrb[1].mxu0 }
 0xbc9   :  { %v11427_v5 = vpop.f32.mrb[2].mxu0 }
 0xbca   :  { %v13036_v61 = vadd.f32 %v16810_v19, %v11427_v5  ;;  %v11429_v51 = vpop.f32.mrb[3].mxu0  ;;  %13920 = vtanh.f32 %v13035_v14 }
 0xbcc   :  { %13922 = vtanh.f32 %v13036_v61  ;;  %v16981_v47 = vpop.eup %13916 }
 0xbce   :  { %v16983_v48 = vpop.eup %13918 }
 0xbcf   :  { %v11432_v60 = vpop.f32.mrb[4].mxu0  ;;  %v11706_v27 = vpack.c.bf16 %v16983_v48, %v16981_v47 }
 0xbd0   :  { %v13037_v18 = vadd.f32 %v16810_v19, %v11432_v60  ;;  %v11434_v38 = vpop.f32.mrb[5].mxu0 }
 0xbd1   :  { %v11435_v54 = vpop.f32.mrb[6].mxu0 }
 0xbd2   :  { %v13038_v3 = vadd.f32 %v16810_v19, %v11435_v54  ;;  %v11437_v56 = vpop.f32.mrb[7].mxu0  ;;  %13924 = vtanh.f32 %v13037_v18 }
 0xbd4   :  { %13926 = vtanh.f32 %v13038_v3  ;;  %v16989_v4 = vpop.eup %13920 }
 0xbd6   :  { %v16991_v23 = vpop.eup %13922 }
 0xbd7   :  { %v11440_v24 = vpop.f32.mrb[8].mxu0  ;;  %v11707_v39 = vpack.c.bf16 %v16991_v23, %v16989_v4 }
 0xbd8   :  { %v13039_v0 = vadd.f32 %v16810_v19, %v11440_v24  ;;  %v11442_v34 = vpop.f32.mrb[9].mxu0 }
 0xbd9   :  { %v11443_v7 = vpop.f32.mrb[10].mxu0 }
 0xbda   :  { %v13040_v42 = vadd.f32 %v16810_v19, %v11443_v7  ;;  %v11445_v55 = vpop.f32.mrb[11].mxu0  ;;  %13928 = vtanh.f32 %v13039_v0 }
 0xbdc   :  { %13930 = vtanh.f32 %v13040_v42  ;;  %v16997_v33 = vpop.eup %13924 }
 0xbde   :  { %v16999_v63 = vpop.eup %13926 }
 0xbdf   :  { %v11448_v41 = vpop.f32.mrb[12].mxu0  ;;  %v11708_v50 = vpack.c.bf16 %v16999_v63, %v16997_v33  ;;  %v11990_v33 = vld [vmem:[#allocation9] sm:$0x1] }
 0xbe0   :  { %v13041_v44 = vadd.f32 %v16810_v19, %v11448_v41  ;;  %v11450_v10 = vpop.f32.mrb[13].mxu0 }
 0xbe1   :  { %v11451_v13 = vpop.f32.mrb[14].mxu0 }
 0xbe2   :  { %v13042_v43 = vadd.f32 %v16810_v19, %v11451_v13  ;;  %v11453_v57 = vpop.f32.mrb[15].mxu0  ;;  %13932 = vtanh.f32 %v13041_v44 }
 0xbe4   :  { %13934 = vtanh.f32 %v13042_v43  ;;  %v17005_v53 = vpop.eup %13928 }
 0xbe6   :  { %v17007_v9 = vpop.eup %13930 }
 0xbe7   :  { %v11456_v40 = vpop.f32.mrb[16].mxu0  ;;  %v11709_v16 = vpack.c.bf16 %v17007_v9, %v17005_v53 }
 0xbe8   :  { %v13043_v15 = vadd.f32 %v16810_v19, %v11456_v40  ;;  %v11458_v11 = vpop.f32.mrb[17].mxu0 }
 0xbe9   :  { %v11459_v52 = vpop.f32.mrb[18].mxu0 }
 0xbea   :  { %v13044_v37 = vadd.f32 %v16810_v19, %v11459_v52  ;;  %v11461_v32 = vpop.f32.mrb[19].mxu0  ;;  %13936 = vtanh.f32 %v13043_v15 }
 0xbec   :  { %13938 = vtanh.f32 %v13044_v37  ;;  %v17013_v28 = vpop.eup %13932 }
 0xbee   :  { %v17015_v58 = vpop.eup %13934 }
 0xbef   :  { %v11464_v31 = vpop.f32.mrb[20].mxu0  ;;  %v11710_v29 = vpack.c.bf16 %v17015_v58, %v17013_v28 }
 0xbf0   :  { %v13045_v17 = vadd.f32 %v16810_v19, %v11464_v31  ;;  %v11466_v30 = vpop.f32.mrb[21].mxu0 }
 0xbf1   :  { %v11467_v46 = vpop.f32.mrb[22].mxu0 }
 0xbf2   :  { %v13046_v14 = vadd.f32 %v16810_v19, %v11467_v46  ;;  %v11469_v22 = vpop.f32.mrb[23].mxu0  ;;  %13940 = vtanh.f32 %v13045_v17 }
 0xbf4   :  { %13942 = vtanh.f32 %v13046_v14  ;;  %v17021_v5 = vpop.eup %13936 }
 0xbf6   :  { %v17023_v61 = vpop.eup %13938 }
 0xbf7   :  { %v11472_v51 = vpop.f32.mrb[24].mxu0  ;;  %v11711_v60 = vpack.c.bf16 %v17023_v61, %v17021_v5 }
 0xbf8   :  { %v13047_v18 = vadd.f32 %v16810_v19, %v11472_v51  ;;  %v11474_v38 = vpop.f32.mrb[25].mxu0 }
 0xbf9   :  { %v11475_v54 = vpop.f32.mrb[26].mxu0 }
 0xbfa   :  { %v13048_v3 = vadd.f32 %v16810_v19, %v11475_v54  ;;  %v11477_v56 = vpop.f32.mrb[27].mxu0  ;;  %13944 = vtanh.f32 %v13047_v18 }
 0xbfc   :  { %13946 = vtanh.f32 %v13048_v3  ;;  %v13941_v24 = vpop.eup %13940 }
 0xbfe   :  { %v13943_v0 = vpop.eup %13942 }
 0xbff   :  { %v11480_v34 = vpop.f32.mrb[28].mxu0  ;;  %v11712_v7 = vpack.c.bf16 %v13943_v0, %v13941_v24 }
 0xc00   :  { %v13049_v42 = vadd.f32 %v16810_v19, %v11480_v34  ;;  %v11482_v55 = vpop.f32.mrb[29].mxu0 }
 0xc01   :  { %v11483_v41 = vpop.f32.mrb[30].mxu0  ;;  %12907 = vmatprep.subr.bf16.mxu1 %v11712_v7 }
 0xc02   :  { %v13050_v44 = vadd.f32 %v16810_v19, %v11483_v41  ;;  %v11485_v10 = vpop.f32.mrb[31].mxu0  ;;  %12908 = vmatpush3.bf16.xpose.msra.mxu1 %v11704_v2  ;;  %13948 = vtanh.f32 %v13049_v42 }
 0xc04   :  { %13950 = vtanh.f32 %v13050_v44  ;;  %v13945_v13 = vpop.eup %13944 }
 0xc06   :  { %v13947_v43 = vpop.eup %13946 }
 0xc07   :  { %v11488_v57 = vpop.f32.mrb[32].mxu0  ;;  %v11713_v40 = vpack.c.bf16 %v13947_v43, %v13945_v13 }
 0xc08   :  { %v13051_v15 = vadd.f32 %v16810_v19, %v11488_v57  ;;  %v11490_v11 = vpop.f32.mrb[33].mxu0 }
 0xc09   :  { %v11491_v52 = vpop.f32.mrb[34].mxu0  ;;  %12909 = vmatprep.subr.bf16.mxu1 %v11713_v40 }
 0xc0a   :  { %v13052_v37 = vadd.f32 %v16810_v19, %v11491_v52  ;;  %v11493_v32 = vpop.f32.mrb[35].mxu0  ;;  %12910 = vmatpush3.bf16.xpose.msra.mxu1 %v11705_v12  ;;  %13952 = vtanh.f32 %v13051_v15 }
 0xc0c   :  { %13954 = vtanh.f32 %v13052_v37  ;;  %v13949_v25 = vpop.eup %13948 }
 0xc0e   :  { %v13951_v20 = vpop.eup %13950 }
 0xc0f   :  { %v11496_v2 = vpop.f32.mrb[36].mxu0  ;;  %v11714_v31 = vpack.c.bf16 %v13951_v20, %v13949_v25 }
 0xc10   :  { %v13053_v17 = vadd.f32 %v16810_v19, %v11496_v2  ;;  %v11498_v30 = vpop.f32.mrb[37].mxu0 }
 0xc11   :  { %v11499_v46 = vpop.f32.mrb[38].mxu0  ;;  %12911 = vmatprep.subr.bf16.mxu1 %v11714_v31 }
 0xc12   :  { %v13054_v14 = vadd.f32 %v16810_v19, %v11499_v46  ;;  %v11501_v22 = vpop.f32.mrb[39].mxu0  ;;  %12912 = vmatpush3.bf16.xpose.msra.mxu1 %v11706_v27  ;;  %13956 = vtanh.f32 %v13053_v17 }
 0xc14   :  { %13958 = vtanh.f32 %v13054_v14  ;;  %v11830_v1 = vpop.f32.mrb[208].mxu1  ;;  %v13953_v49 = vpop.eup %13952 }
 0xc15   :  { %v11832_v12 = vpop.f32.mrb[209].mxu1 }
 0xc16   :  { %v13955_v51 = vpop.eup %13954  ;;  %v11834_v18 = vpop.f32.mrb[210].mxu1 }
 0xc17   :  { %v11504_v38 = vpop.f32.mrb[40].mxu0  ;;  %v11715_v54 = vpack.c.bf16 %v13955_v51, %v13953_v49  ;;  %v11835_v3 = vpop.f32.mrb[211].mxu1 }
 0xc18   :  { %v13055_v56 = vadd.f32 %v16810_v19, %v11504_v38  ;;  %v11506_v24 = vpop.f32.mrb[41].mxu0 }
 0xc19   :  { %v11507_v0 = vpop.f32.mrb[42].mxu0  ;;  %12913 = vmatprep.subr.bf16.mxu1 %v11715_v54  ;;  %v12046_v24 = vld [vmem:[#allocation10] sm:$0x1] }
 0xc1a   :  { %v13056_v34 = vadd.f32 %v16810_v19, %v11507_v0  ;;  %v11509_v7 = vpop.f32.mrb[43].mxu0  ;;  %12914 = vmatpush3.bf16.xpose.msra.mxu1 %v11707_v39  ;;  %13960 = vtanh.f32 %v13055_v56 }
 0xc1c   :  { %13962 = vtanh.f32 %v13056_v34  ;;  %v13957_v47 = vpop.eup %13956 }
 0xc1e   :  { %v13959_v48 = vpop.eup %13958 }
 0xc1f   :  { %v11512_v27 = vpop.f32.mrb[44].mxu0  ;;  %v11716_v42 = vpack.c.bf16 %v13959_v48, %v13957_v47 }
 0xc20   :  { %v13057_v55 = vadd.f32 %v16810_v19, %v11512_v27  ;;  %v11514_v41 = vpop.f32.mrb[45].mxu0 }
 0xc21   :  { %v11515_v44 = vpop.f32.mrb[46].mxu0  ;;  %12915 = vmatprep.subr.bf16.mxu1 %v11716_v42 }
 0xc22   :  { %v13058_v10 = vadd.f32 %v16810_v19, %v11515_v44  ;;  %v11517_v13 = vpop.f32.mrb[47].mxu0  ;;  %12916 = vmatpush3.bf16.xpose.msra.mxu1 %v11708_v50  ;;  %13964 = vtanh.f32 %v13057_v55 }
 0xc24   :  { %13966 = vtanh.f32 %v13058_v10  ;;  %v13961_v4 = vpop.eup %13960 }
 0xc26   :  { %v13963_v23 = vpop.eup %13962 }
 0xc27   :  { %v11520_v39 = vpop.f32.mrb[48].mxu0  ;;  %v11717_v43 = vpack.c.bf16 %v13963_v23, %v13961_v4 }
 0xc28   :  { %v13059_v57 = vadd.f32 %v16810_v19, %v11520_v39  ;;  %v11522_v40 = vpop.f32.mrb[49].mxu0 }
 0xc29   :  { %v11523_v15 = vpop.f32.mrb[50].mxu0  ;;  %12917 = vmatprep.subr.bf16.mxu1 %v11717_v43 }
 0xc2a   :  { %v13060_v11 = vadd.f32 %v16810_v19, %v11523_v15  ;;  %v11525_v52 = vpop.f32.mrb[51].mxu0  ;;  %12918 = vmatpush3.bf16.xpose.msra.mxu1 %v11709_v16  ;;  %13968 = vtanh.f32 %v13059_v57 }
 0xc2c   :  { %13970 = vtanh.f32 %v13060_v11  ;;  %v12008_v63 = vpop.xlane.xlu0 %12007  ;;  %v13965_v50 = vpop.eup %13964 }
 0xc2d   :  { %v12009_v37 = vmax.f32 %v11990_v33, %v12008_v63 }
 0xc2e   :  { %v13967_v32 = vpop.eup %13966 }
 0xc2f   :  { %v12010_v25 = vsub.f32 %v11990_v33, %v12009_v37  ;;  %12450 = vst.msk [vmem:[#allocation9] sm:$0x1] %vm100_vm2, %v12009_v37  ;;  %12015 = vperm.xlu1 %13383, %v12009_v37   ;;  %v11718_v20 = vpack.c.bf16 %v13967_v32, %v13965_v50 }
 0xc31   :  { %v12011_v2 = vmul.f32 1.442695, %v12010_v25  ;;  %12919 = vmatprep.subr.bf16.mxu1 %v11718_v20 }
 0xc32   :  { %12920 = vmatpush3.bf16.xpose.msra.mxu1 %v11710_v29 }
 0xc33   :  { %13972 = vpow2.f32 %v12011_v2 }
 0xc34   :  { %v13969_v19 = vpop.eup %13968 }
 0xc36   :  { %v13971_v53 = vpop.eup %13970 }
 0xc37   :  { %v11719_v9 = vpack.c.bf16 %v13971_v53, %v13969_v19 }
 0xc39   :  { %12921 = vmatprep.subr.bf16.mxu1 %v11719_v9 }
 0xc3a   :  { %12922 = vmatpush3.bf16.xpose.msra.mxu1 %v11711_v60 }
 0xc3b   :  { %12087 = vmatprep.subr.bf16.mxu1 %v16080_v6 }
 0xc3d   :  { %v17067_v16 = vpop.eup %13972 }
 0xc3e   :  { %12071 = vperm.xlu0 %13382, %v17067_v16   ;;  %v12047_v0 = vmul.f32 %v17067_v16, %v12046_v24 }
 0xc41   :  { %12924 = vmatmul.mubr.bf16.vlgmr.msra.gmra.mrb[216].mxu1 %v16836_v59 }
 0xc42   :  { %12088 = vmatpush1.bf16.msra.mxu1 %v16084_v8 }
 0xc43   :  { %12128 = vmatprep.subr.bf16.mxu1 %v14114_v26 }
 0xc94   :  { %v11871_v28 = vpop.f32.mrb[212].mxu1 }
 0xc95   :  { %v11873_v58 = vpop.f32.mrb[213].mxu1 }
 0xc96   :  { %v11875_v29 = vpop.f32.mrb[214].mxu1 }
 0xc97   :  { %v11876_v31 = vpop.f32.mrb[215].mxu1 }
 0xcae   :  { %v12016_v17 = vpop.permute.xlu1 %12015 }
 0xcaf   :  { %v12021_v5 = vrot.slane %v12016_v17, %v16069_v35 }
 0xcb1   :  { %v12022_v61 = vsub.f32 %v16926_v36, %v12021_v5  ;;  %v12023_v6 = vsub.f32 -1e+30, %v12021_v5 }
 0xcb3   :  { %v12030_v60 = vmul.f32 1.442695, %v12022_v61  ;;  %v12032_v30 = vmul.f32 1.442695, %v12023_v6 }
 0xcb5   :  { %13974 = vpow2.f32 %v12030_v60 }
 0xcb6   :  { %13976 = vpow2.f32 %v12032_v30 }
 0xcbf   :  { %v13975_v46 = vpop.eup %13974 }
 0xcc0   :  { %v13977_v59 = vpop.eup %13976  ;;  %v12079_v14 = vpack.c.bf16 %v13975_v46, %v13975_v46  ;;  %v12048_v8 = vsel %vm11991_vm3, %v13975_v46, 0.0 }
 0xcc1   :  { %v12080_v22 = vpack.c.bf16 %v13977_v59, %v13977_v59  ;;  %v12049_v1 = vsel %vm11991_vm3, %v13977_v59, 0.0 }
 0xcc2   :  { %v12050_v49 = vadd.f32 %v12049_v1, %v12048_v8 }
 0xcc3   :  { %12119 = vmatprep.mubr.bf16.mxu1 %v12080_v22 }
 0xcc4   :  { %12120 = vmatmul.mubr.bf16.vlgmr.msra.gmra.mrb[220].mxu1 %v12079_v14  ;;  %v12052_v12 = vadd.f32 %v12050_v49, %v12049_v1 }
 0xcc5   :  { %12129 = vmatpush1.bf16.msra.mxu1 %v14114_v26  ;;  %12160 = vmatprep.mubr.bf16.mxu1 %v12080_v22 }
 0xcc6   :  { %12169 = vmatprep.subr.bf16.mxu1 %v14114_v26  ;;  %v12054_v36 = vadd.f32 %v12052_v12, %v12049_v1 }
 0xcc8   :  { %v12056_v51 = vadd.f32 %v12054_v36, %v12049_v1 }
 0xcca   :  { %v12058_v18 = vadd.f32 %v12056_v51, %v12049_v1 }
 0xccc   :  { %v12060_v38 = vadd.f32 %v12058_v18, %v12049_v1 }
 0xcce   :  { %v12062_v54 = vadd.f32 %v12060_v38, %v12049_v1 }
 0xcd0   :  { %12161 = vmatmul.mubr.bf16.vlgmr.msra.gmra.mrb[220].mxu1 %v12080_v22  ;;  %12063 = vadd.xlane.f32.xlu1 %v12062_v54 }
 0xcd1   :  { %12170 = vmatpush1.bf16.msra.mxu1 %v14114_v26  ;;  %12201 = vmatprep.mubr.bf16.mxu1 %v12080_v22 }
 0xcd2   :  { %12210 = vmatprep.subr.bf16.mxu1 %v14114_v26 }
 0xcdc   :  { %12202 = vmatmul.mubr.bf16.vlgmr.msra.gmra.mrb[220].mxu1 %v12080_v22 }
 0xcdd   :  { %12211 = vmatpush1.bf16.msra.mxu1 %v14114_v26  ;;  %12242 = vmatprep.mubr.bf16.mxu1 %v12080_v22 }
 0xcde   :  { %12251 = vmatprep.subr.bf16.mxu1 %v16413_v45 }
 0xce8   :  { %12243 = vmatmul.mubr.bf16.vlgmr.msra.gmra.mrb[220].mxu1 %v12080_v22 }
 0xce9   :  { %12252 = vmatpush1.bf16.msra.mxu1 %v16421_v21  ;;  %12283 = vmatprep.mubr.bf16.mxu1 %v12080_v22 }
 0xcea   :  { %12292 = vmatprep.subr.bf16.mxu1 %v14114_v26 }
 0xcf0   :  { %12284 = vmatmul.mubr.bf16.vlgmr.msra.gmra.mrb[224].mxu1 %v12079_v14 }
 0xcf1   :  { %12293 = vmatpush1.bf16.msra.mxu1 %v14114_v26  ;;  %12324 = vmatprep.mubr.bf16.mxu1 %v12080_v22 }
 0xcf2   :  { %12333 = vmatprep.subr.bf16.mxu1 %v14114_v26 }
 0xcfc   :  { %12325 = vmatmul.mubr.bf16.vlgmr.msra.gmra.mrb[224].mxu1 %v12080_v22 }
 0xcfd   :  { %12334 = vmatpush1.bf16.msra.mxu1 %v14114_v26  ;;  %12365 = vmatprep.mubr.bf16.mxu1 %v12080_v22 }
 0xcfe   :  { %12374 = vmatprep.subr.bf16.mxu1 %v14114_v26 }
 0xd08   :  { %12366 = vmatmul.mubr.bf16.vlgmr.msra.gmra.mrb[224].mxu1 %v12080_v22 }
 0xd09   :  { %12375 = vmatpush1.bf16.msra.mxu1 %v14114_v26  ;;  %12406 = vmatprep.mubr.bf16.mxu1 %v12080_v22 }
 0xd14   :  { %12407 = vmatmul.mubr.bf16.vlgmr.msra.gmra.mrb[224].mxu1 %v12080_v22  ;;  %v11912_v45 = vpop.f32.mrb[216].mxu1 }
 0xd15   :  { %v11914_v21 = vpop.f32.mrb[217].mxu1 }
 0xd16   :  { %v11916_v3 = vpop.f32.mrb[218].mxu1 }
 0xd17   :  { %v11917_v56 = vpop.f32.mrb[219].mxu1 }
 0xd5d   :  { %v12064_v34 = vpop.xlane.xlu1 %12063 }
 0xd5e   :  { %v12065_v7 = vadd.f32 %v12064_v34, %v12047_v0 }
 0xd60   :  { %12067 = vst.msk [vmem:[#allocation10] sm:$0x1] %vm100_vm2, %v12065_v7 }
 0xd61   :  { %14062 = shalt.err (!%p14059_p0)
}
 0xd62   :  { %s14063_s0 = scalar_lea.hbm %s17136_s8, 16 }
 0xd63   :  { %p14064_p1 = scmp.ne.s32.totalorder %s17136_s8, %s14063_s0  ;;  %p14067_p2 = scmp.lt.u32.totalorder %s14063_s0, %s17136_s8 }
 0xd65   :  { %p14069_p3 = pnand %p14067_p2, %p14064_p1 }
 0xd67   :  { %14072 = shalt.err (!%p14069_p3)
}
 0xd68   :  { %12462 = dma.vmem_to_hbm [thread:$0]  %s12460_s24, 16, %s17136_s8, [#allocation5]  }
 0xd69   :  { %s14073_s17 = scalar_lea.vmem %s12470_s26, 16  ;;  %s14077_s18 = scalar_lea.vmem %s12470_s26, 32 }
 0xd6a   :  { %p14074_p4 = scmp.ne.s32.totalorder %s12470_s26, %s14073_s17  ;;  %p14078_p5 = scmp.lt.s32.totalorder %s12470_s26, %s12470_s26 }
 0xd6b   :  { %p14079_p6 = scmp.lt.s32.totalorder %s14077_s18, %s14073_s17 }
 0xd6d   :  { %p14080_p7 = por %p14079_p6, %p14078_p5 }
 0xd6f   :  { %p14081_p8 = pnand %p14080_p7, %p14074_p4 }
 0xd71   :  { %14084 = shalt.err (!%p14081_p8)
}
 0xd72   :  { %s14085_s16 = scalar_lea.hbm %s17137_s9, 16 }
 0xd73   :  { %p14086_p9 = scmp.ne.s32.totalorder %s17137_s9, %s14085_s16  ;;  %p14089_p10 = scmp.lt.u32.totalorder %s14085_s16, %s17137_s9 }
 0xd75   :  { %p14091_p11 = pnand %p14089_p10, %p14086_p9 }
 0xd77   :  { %14094 = shalt.err (!%p14091_p11)
}
 0xd78   :  { %12472 = dma.vmem_to_hbm [thread:$0]  %s12470_s26, 16, %s17137_s9, [#allocation11]   ;;  %v12072_v41 = vpop.permute.xlu0 %12071  ;;  %v12068_v57 = vld [vmem:[%s17138_s10] sm:$0xf] }
 0xd79   :  { %v12077_v23 = vrot.slane %v12072_v41, %v16069_v35 }
 0xd7b   :  { %v12078_v15 = vmul.f32 %v12077_v23, %v12068_v57 }
 0xdbb   :  { %v12244_v26 = vpop.f32.mrb[220].mxu1 }
 0xdbc   :  { %v12246_v47 = vpop.f32.mrb[221].mxu1 }
 0xdbd   :  { %v12419_v48 = vcombine.low %v12244_v26, %v12246_v47  ;;  %v12248_v27 = vpop.f32.mrb[222].mxu1 }
 0xdbe   :  { %v12249_v42 = vpop.f32.mrb[223].mxu1 }
 0xdbf   :  { %v12427_v39 = vrot.slane %v12419_v48, %v16917_v62 }
 0xde7   :  { %v12408_v55 = vpop.f32.mrb[224].mxu1 }
 0xde8   :  { %v12410_v44 = vpop.f32.mrb[225].mxu1 }
 0xde9   :  { %v12420_v10 = vcombine.low %v12408_v55, %v12410_v44  ;;  %v12412_v13 = vpop.f32.mrb[226].mxu1 }
 0xdea   :  { %v12413_v4 = vpop.f32.mrb[227].mxu1 }
 0xdeb   :  { %v12434_v43 = vrot.slane %v12420_v10, %v16917_v62 }
 0xded   :  { %v12435_v40 = vcombine.low %v12427_v39, %v12434_v43 }
 0xdef   :  { %v12442_v11 = vrot.slane %v12435_v40, %v16917_v62 }
 0xdf1   :  { %v12444_v52 = vadd.f32 %v12442_v11, %v12078_v15 }
 0xdf3   :  { %12449 = vst.msk [vmem:[%s17138_s10] sm:$0xf] %vm16011_vm1, %v12444_v52 }
 0xdf4   :  { %14099 = dma.done.wait [#allocation5], 16  }
 0xdf5   :  { %14100 = vsyncadd [#allocation5], 4294967280 }
 0xdf6   :  { %14101 = dma.done.wait [#allocation11], 16  }
 0xdf7   :  { %14102 = vsyncadd [#allocation11], 4294967280 }
 0xdf8   :  { %12485 = vsyncpa [#allocation4], 1 }
 0xdf9   :  { %12486 = vsyncpa [#allocation7], 1 }
 0xdfa   :  { %12487 = vsyncpa [#allocation5], 1 }
 0xdfb   :  { %12488 = vsyncpa [#allocation11], 1 }

</bundles_post_ra>
